<compile_context>
chip_gen: v7x
topology: tpu7x:2x2x1
jax: 0.10.0
libtpu: 0.0.40
codegen_flags: <defaults>
</compile_context>

<pallas_src>
import jax
import jax.numpy as jnp
from jax import lax
from jax.experimental import pallas as pl
from jax.experimental.pallas import tpu as pltpu

EPS = 1e-5
KSZ = 5      # Conv1d kernel size
PAD = 2      # Conv1d padding (same)

# lane-aligned (padded) channel widths
CINP = 1024  # conv1 in  1000 -> 1024
C1P = 512    # conv1 out 500  -> 512
C2P = 256    # conv2 out 200  -> 256
C3P = 128    # conv3 out 30   -> 128
F1P = 128    # fc1  out 10    -> 128
F2P = 128    # fc2  out 3     -> 128


# ----------------------------- fused kernel ---------------------------------

def _fused_forward_kernel(xpad_ref, w1_ref, b1_ref, w2_ref, b2_ref,
                          w3_ref, b3_ref, fw1_ref, fb1_ref, fw2_ref, fb2_ref,
                          o_ref, h1pad, h2pad):
    # One grid step == one batch element (blocks are squeezed to 2-D).
    Lp = xpad_ref.shape[0]          # L + 2*PAD (zero halo already in the input)
    L = Lp - 2 * PAD

    # ---- conv1 + bn1 (folded) + relu : single K = 5*1024 bf16 MXU matmul ----
    im1 = jnp.concatenate([xpad_ref[pl.ds(k, L), :] for k in range(KSZ)], axis=-1)
    h1 = jnp.dot(im1, w1_ref[...], preferred_element_type=jnp.float32)
    h1 = jnp.maximum(h1 + b1_ref[...], 0.0)

    # zero only the halo rows; store the data rows once (f32 -> bf16 cast on store)
    h1pad[pl.ds(0, PAD), :] = jnp.zeros((PAD, C1P), h1pad.dtype)
    h1pad[pl.ds(PAD + L, PAD), :] = jnp.zeros((PAD, C1P), h1pad.dtype)
    h1pad[pl.ds(PAD, L), :] = h1.astype(h1pad.dtype)

    # ---- conv2 + bn2 + relu : single K = 5*512 bf16 MXU matmul ----
    im2 = jnp.concatenate([h1pad[pl.ds(k, L), :] for k in range(KSZ)], axis=-1)
    h2 = jnp.dot(im2, w2_ref[...], preferred_element_type=jnp.float32)
    h2 = jnp.maximum(h2 + b2_ref[...], 0.0)

    h2pad[pl.ds(0, PAD), :] = jnp.zeros((PAD, C2P), h2pad.dtype)
    h2pad[pl.ds(PAD + L, PAD), :] = jnp.zeros((PAD, C2P), h2pad.dtype)
    h2pad[pl.ds(PAD, L), :] = h2

    # ---- conv3 + bn3 + relu (tiny; keep f32) ----
    im3 = jnp.concatenate([h2pad[pl.ds(k, L), :] for k in range(KSZ)], axis=-1)
    h3 = jnp.dot(im3, w3_ref[...], preferred_element_type=jnp.float32)
    h3 = jnp.maximum(h3 + b3_ref[...], 0.0)

    # ---- fc1 -> dropout (eval identity) -> relu -> fc2 ----
    # TODO(synk): nn.Dropout(p=0.5) is a no-op in eval mode; training-mode
    # stochastic masking (pltpu.prng_*) is not implemented here.
    z = jnp.dot(h3, fw1_ref[...], preferred_element_type=jnp.float32) + fb1_ref[...]
    z = jnp.maximum(z, 0.0)
    o_ref[...] = jnp.dot(z, fw2_ref[...], preferred_element_type=jnp.float32) + fb2_ref[...]


# ----------------------------- trace-time prep -------------------------------

def _fold_conv_bn(conv_w, conv_b, gamma, beta, mean, var, cin_pad, cout_pad, dtype):
    """(Cout, Cin, K) conv + eval-BN -> packed (K*Cin_pad, Cout_pad) weight, (1, Cout_pad) bias."""
    s = gamma / jnp.sqrt(var + EPS)                              # (Cout,)
    w = jnp.transpose(conv_w, (2, 1, 0)) * s[None, None, :]      # (K, Cin, Cout)
    b = (conv_b - mean) * s + beta                               # (Cout,)
    k, cin, cout = w.shape
    w = jnp.pad(w, ((0, 0), (0, cin_pad - cin), (0, cout_pad - cout)))
    w = w.reshape(k * cin_pad, cout_pad)                         # tap-major rows
    b = jnp.pad(b, (0, cout_pad - cout))
    return w.astype(dtype), b[None, :].astype(jnp.float32)


def _pad_fc(w, b, cin_pad, cout_pad):
    """(Cout, Cin) PyTorch linear -> (Cin_pad, Cout_pad) weight, (1, Cout_pad) bias."""
    wt = jnp.transpose(w)
    cin, cout = wt.shape
    wt = jnp.pad(wt, ((0, cin_pad - cin), (0, cout_pad - cout)))
    bp = jnp.pad(b, (0, cout_pad - cout))
    return wt.astype(jnp.float32), bp[None, :].astype(jnp.float32)


@jax.jit
def model_forward(X, p):
    B, L, Cin = X.shape
    Lp = L + 2 * PAD

    w1, b1 = _fold_conv_bn(p["conv1_w"], p["conv1_b"], p["bn1_gamma"], p["bn1_beta"],
                           p["bn1_mean"], p["bn1_var"], CINP, C1P, jnp.bfloat16)
    w2, b2 = _fold_conv_bn(p["conv2_w"], p["conv2_b"], p["bn2_gamma"], p["bn2_beta"],
                           p["bn2_mean"], p["bn2_var"], C1P, C2P, jnp.bfloat16)
    w3, b3 = _fold_conv_bn(p["conv3_w"], p["conv3_b"], p["bn3_gamma"], p["bn3_beta"],
                           p["bn3_mean"], p["bn3_var"], C2P, C3P, jnp.float32)
    fw1, fb1 = _pad_fc(p["fc1_w"], p["fc1_b"], C3P, F1P)
    fw2, fb2 = _pad_fc(p["fc2_w"], p["fc2_b"], F1P, F2P)

    # bf16 input, zero halo along L, channels 1000 -> 1024 (lane-dense conv1 loads)
    xpad = jnp.pad(X.astype(jnp.bfloat16), ((0, 0), (PAD, PAD), (0, CINP - Cin)))

    def full_spec(shape):
        return pl.BlockSpec(shape, lambda b: (0,) * len(shape))

    out = pl.pallas_call(
        _fused_forward_kernel,
        out_shape=jax.ShapeDtypeStruct((B, L, F2P), jnp.float32),
        grid=(B,),
        in_specs=[
            pl.BlockSpec((None, Lp, CINP), lambda b: (b, 0, 0)),   # per-batch X block
            full_spec(w1.shape), full_spec(b1.shape),
            full_spec(w2.shape), full_spec(b2.shape),
            full_spec(w3.shape), full_spec(b3.shape),
            full_spec(fw1.shape), full_spec(fb1.shape),
            full_spec(fw2.shape), full_spec(fb2.shape),
        ],
        out_specs=pl.BlockSpec((None, L, F2P), lambda b: (b, 0, 0)),
        scratch_shapes=[pltpu.VMEM((Lp, C1P), jnp.bfloat16),
                        pltpu.VMEM((Lp, C2P), jnp.float32)],
        compiler_params=pltpu.CompilerParams(
            dimension_semantics=("parallel",),
            vmem_limit_bytes=48 * 1024 * 1024),
    )(xpad, w1, b1, w2, b2, w3, b3, fw1, fb1, fw2, fb2)

    return out[..., :3]


# ----------------------------- params & reference ----------------------------

def init_params(key):
    ks = jax.random.split(key, 16)

    def u(k, shape, fan_in):
        bound = 1.0 / float(fan_in) ** 0.5
        return jax.random.uniform(k, shape, jnp.float32, -bound, bound)

    p = {}
    p["conv1_w"] = u(ks[0], (500, 1000, KSZ), 1000 * KSZ)
    p["conv1_b"] = u(ks[1], (500,), 1000 * KSZ)
    p["conv2_w"] = u(ks[2], (200, 500, KSZ), 500 * KSZ)
    p["conv2_b"] = u(ks[3], (200,), 500 * KSZ)
    p["conv3_w"] = u(ks[4], (30, 200, KSZ), 200 * KSZ)
    p["conv3_b"] = u(ks[5], (30,), 200 * KSZ)
    for i, c in ((1, 500), (2, 200), (3, 30)):
        kg, kb, km, kv = jax.random.split(ks[5 + i], 4)
        p[f"bn{i}_gamma"] = 1.0 + 0.1 * jax.random.normal(kg, (c,), jnp.float32)
        p[f"bn{i}_beta"] = 0.1 * jax.random.normal(kb, (c,), jnp.float32)
        p[f"bn{i}_mean"] = 0.1 * jax.random.normal(km, (c,), jnp.float32)
        p[f"bn{i}_var"] = jax.random.uniform(kv, (c,), jnp.float32, 0.5, 1.5)
    p["fc1_w"] = u(ks[9], (10, 30), 30)
    p["fc1_b"] = u(ks[10], (10,), 30)
    p["fc2_w"] = u(ks[11], (3, 10), 10)
    p["fc2_b"] = u(ks[12], (3,), 10)
    return p


def ref_forward(X, p):
    # Pure-JAX reference mirroring the PyTorch forward (eval mode).
    x = jnp.transpose(X, (0, 2, 1))    # (B, C, L)

    def block(x, w, b, gamma, beta, mean, var):
        y = lax.conv_general_dilated(
            x, w, window_strides=(1,), padding=[(PAD, PAD)],
            dimension_numbers=("NCH", "OIH", "NCH"),
            precision=lax.Precision.HIGHEST)
        y = y + b[None, :, None]
        y = (y - mean[None, :, None]) * (
            gamma[None, :, None] / jnp.sqrt(var[None, :, None] + EPS)) + beta[None, :, None]
        return jnp.maximum(y, 0.0)

    h = block(x, p["conv1_w"], p["conv1_b"], p["bn1_gamma"], p["bn1_beta"],
              p["bn1_mean"], p["bn1_var"])
    h = block(h, p["conv2_w"], p["conv2_b"], p["bn2_gamma"], p["bn2_beta"],
              p["bn2_mean"], p["bn2_var"])
    h = block(h, p["conv3_w"], p["conv3_b"], p["bn3_gamma"], p["bn3_beta"],
              p["bn3_mean"], p["bn3_var"])
    h = jnp.transpose(h, (0, 2, 1))    # (B, L, 30)
    z = jnp.maximum(h @ p["fc1_w"].T + p["fc1_b"], 0.0)   # dropout == identity (eval)
    return z @ p["fc2_w"].T + p["fc2_b"]


if __name__ == "__main__":
    B, L, Cin = 2, 16, 1000
    key = jax.random.PRNGKey(0)
    kx, kp = jax.random.split(key)
    X = jax.random.normal(kx, (B, L, Cin), jnp.float32)
    params = init_params(kp)

    out = model_forward(X, params)
    out = jax.block_until_ready(out)

    assert out.shape == (B, L, 3), out.shape
    assert bool(jnp.all(jnp.isfinite(out)))

    ref = ref_forward(X, params)
    max_err = float(jnp.max(jnp.abs(out - ref)))
    assert max_err < 5e-2, f"mismatch vs reference: {max_err}"

    print("KERNEL_OK")
</pallas_src>

<mosaic_0001>
module attributes {stable_mosaic.version = 11 : i64} {
  func.func @_fused_forward_kernel(%arg0: i32, %arg1: memref<1x20x1024xbf16, #tpu.memory_space<vmem>>, %arg2: memref<5120x512xbf16, #tpu.memory_space<vmem>>, %arg3: memref<1x512xf32, #tpu.memory_space<vmem>>, %arg4: memref<2560x256xbf16, #tpu.memory_space<vmem>>, %arg5: memref<1x256xf32, #tpu.memory_space<vmem>>, %arg6: memref<1280x128xf32, #tpu.memory_space<vmem>>, %arg7: memref<1x128xf32, #tpu.memory_space<vmem>>, %arg8: memref<128x128xf32, #tpu.memory_space<vmem>>, %arg9: memref<1x128xf32, #tpu.memory_space<vmem>>, %arg10: memref<128x128xf32, #tpu.memory_space<vmem>>, %arg11: memref<1x128xf32, #tpu.memory_space<vmem>>, %arg12: memref<1x16x128xf32, #tpu.memory_space<vmem>>, %arg13: memref<20x512xbf16, #tpu.memory_space<vmem>>, %arg14: memref<20x256xf32, #tpu.memory_space<vmem>>) attributes {dimension_semantics = [#tpu.dimension_semantics<parallel>], iteration_bounds = array<i64: 2>, scalar_prefetch = 0 : i64, scratch_operands = 2 : i64, tpu.core_type = #tpu.core_type<tc>, window_params = [{transform_indices = @transform_0, window_bounds = array<i64: 1, 20, 1024>}, {pipeline_mode = #tpu.pipeline_mode<synchronous>, transform_indices = @transform_1, window_bounds = array<i64: 5120, 512>}, {pipeline_mode = #tpu.pipeline_mode<synchronous>, transform_indices = @transform_2, window_bounds = array<i64: 1, 512>}, {pipeline_mode = #tpu.pipeline_mode<synchronous>, transform_indices = @transform_3, window_bounds = array<i64: 2560, 256>}, {pipeline_mode = #tpu.pipeline_mode<synchronous>, transform_indices = @transform_4, window_bounds = array<i64: 1, 256>}, {pipeline_mode = #tpu.pipeline_mode<synchronous>, transform_indices = @transform_5, window_bounds = array<i64: 1280, 128>}, {pipeline_mode = #tpu.pipeline_mode<synchronous>, transform_indices = @transform_6, window_bounds = array<i64: 1, 128>}, {pipeline_mode = #tpu.pipeline_mode<synchronous>, transform_indices = @transform_7, window_bounds = array<i64: 128, 128>}, {pipeline_mode = #tpu.pipeline_mode<synchronous>, transform_indices = @transform_8, window_bounds = array<i64: 1, 128>}, {pipeline_mode = #tpu.pipeline_mode<synchronous>, transform_indices = @transform_9, window_bounds = array<i64: 128, 128>}, {pipeline_mode = #tpu.pipeline_mode<synchronous>, transform_indices = @transform_10, window_bounds = array<i64: 1, 128>}, {transform_indices = @transform_11, window_bounds = array<i64: 1, 16, 128>}]} {
    %c0 = arith.constant 0 : index
    %c0_0 = arith.constant 0 : index
    %c0_1 = arith.constant 0 : index
    %0 = vector.load %arg1[%c0, %c0_0, %c0_1] : memref<1x20x1024xbf16, #tpu.memory_space<vmem>>, vector<1x16x1024xbf16>
    %1 = vector.shape_cast %0 : vector<1x16x1024xbf16> to vector<16x1024xbf16>
    %c0_2 = arith.constant 0 : index
    %c1 = arith.constant 1 : index
    %c0_3 = arith.constant 0 : index
    %2 = vector.load %arg1[%c0_2, %c1, %c0_3] : memref<1x20x1024xbf16, #tpu.memory_space<vmem>>, vector<1x16x1024xbf16>
    %3 = vector.shape_cast %2 : vector<1x16x1024xbf16> to vector<16x1024xbf16>
    %c0_4 = arith.constant 0 : index
    %c2 = arith.constant 2 : index
    %c0_5 = arith.constant 0 : index
    %4 = vector.load %arg1[%c0_4, %c2, %c0_5] : memref<1x20x1024xbf16, #tpu.memory_space<vmem>>, vector<1x16x1024xbf16>
    %5 = vector.shape_cast %4 : vector<1x16x1024xbf16> to vector<16x1024xbf16>
    %c0_6 = arith.constant 0 : index
    %c3 = arith.constant 3 : index
    %c0_7 = arith.constant 0 : index
    %6 = vector.load %arg1[%c0_6, %c3, %c0_7] : memref<1x20x1024xbf16, #tpu.memory_space<vmem>>, vector<1x16x1024xbf16>
    %7 = vector.shape_cast %6 : vector<1x16x1024xbf16> to vector<16x1024xbf16>
    %c0_8 = arith.constant 0 : index
    %c4 = arith.constant 4 : index
    %c0_9 = arith.constant 0 : index
    %8 = vector.load %arg1[%c0_8, %c4, %c0_9] : memref<1x20x1024xbf16, #tpu.memory_space<vmem>>, vector<1x16x1024xbf16>
    %9 = vector.shape_cast %8 : vector<1x16x1024xbf16> to vector<16x1024xbf16>
    %10 = tpu.concatenate %1, %3, %5, %7, %9 in 1 : vector<16x1024xbf16>, vector<16x1024xbf16>, vector<16x1024xbf16>, vector<16x1024xbf16>, vector<16x1024xbf16> -> vector<16x5120xbf16>
    %c0_10 = arith.constant 0 : index
    %c0_11 = arith.constant 0 : index
    %11 = vector.load %arg2[%c0_10, %c0_11] : memref<5120x512xbf16, #tpu.memory_space<vmem>>, vector<5120x512xbf16>
    %cst = arith.constant dense<0.000000e+00> : vector<16x512xf32>
    %12 = tpu.matmul %10, %11, %cst {dimension_numbers = #tpu.dot_dimension_numbers<[1], [0], [0], [1], [0, 0, 1, 1], [], []>} : vector<16x5120xbf16>, vector<5120x512xbf16>, vector<16x512xf32> -> vector<16x512xf32>
    %c0_12 = arith.constant 0 : index
    %c0_13 = arith.constant 0 : index
    %13 = vector.load %arg3[%c0_12, %c0_13] : memref<1x512xf32, #tpu.memory_space<vmem>>, vector<1x512xf32>
    %14 = vector.broadcast %13 : vector<1x512xf32> to vector<16x512xf32>
    %15 = arith.addf %12, %14 : vector<16x512xf32>
    %cst_14 = arith.constant 0.000000e+00 : f32
    %16 = vector.broadcast %cst_14 : f32 to vector<16x512xf32>
    %17 = arith.maximumf %15, %16 : vector<16x512xf32>
    %cst_15 = arith.constant 0.000000e+00 : bf16
    %18 = vector.broadcast %cst_15 : bf16 to vector<2x512xbf16>
    %c0_16 = arith.constant 0 : index
    %c0_17 = arith.constant 0 : index
    %19 = vector.load %arg13[%c0_16, %c0_17] : memref<20x512xbf16, #tpu.memory_space<vmem>>, vector<2x512xbf16>
    tpu.vector_store %arg13[%c0_16, %c0_17], %18 {strides = array<i32>} : memref<20x512xbf16, #tpu.memory_space<vmem>>, vector<2x512xbf16>,
    %cst_18 = arith.constant 0.000000e+00 : bf16
    %20 = vector.broadcast %cst_18 : bf16 to vector<2x512xbf16>
    %c18 = arith.constant 18 : index
    %c0_19 = arith.constant 0 : index
    %21 = vector.load %arg13[%c18, %c0_19] : memref<20x512xbf16, #tpu.memory_space<vmem>>, vector<2x512xbf16>
    tpu.vector_store %arg13[%c18, %c0_19], %20 {strides = array<i32>} : memref<20x512xbf16, #tpu.memory_space<vmem>>, vector<2x512xbf16>,
    %22 = arith.truncf %17 : vector<16x512xf32> to vector<16x512xbf16>
    %c2_20 = arith.constant 2 : index
    %c0_21 = arith.constant 0 : index
    %23 = vector.load %arg13[%c2_20, %c0_21] : memref<20x512xbf16, #tpu.memory_space<vmem>>, vector<16x512xbf16>
    tpu.vector_store %arg13[%c2_20, %c0_21], %22 {strides = array<i32>} : memref<20x512xbf16, #tpu.memory_space<vmem>>, vector<16x512xbf16>,
    %c0_22 = arith.constant 0 : index
    %c0_23 = arith.constant 0 : index
    %24 = vector.load %arg13[%c0_22, %c0_23] : memref<20x512xbf16, #tpu.memory_space<vmem>>, vector<16x512xbf16>
    %c1_24 = arith.constant 1 : index
    %c0_25 = arith.constant 0 : index
    %25 = vector.load %arg13[%c1_24, %c0_25] : memref<20x512xbf16, #tpu.memory_space<vmem>>, vector<16x512xbf16>
    %c2_26 = arith.constant 2 : index
    %c0_27 = arith.constant 0 : index
    %26 = vector.load %arg13[%c2_26, %c0_27] : memref<20x512xbf16, #tpu.memory_space<vmem>>, vector<16x512xbf16>
    %c3_28 = arith.constant 3 : index
    %c0_29 = arith.constant 0 : index
    %27 = vector.load %arg13[%c3_28, %c0_29] : memref<20x512xbf16, #tpu.memory_space<vmem>>, vector<16x512xbf16>
    %c4_30 = arith.constant 4 : index
    %c0_31 = arith.constant 0 : index
    %28 = vector.load %arg13[%c4_30, %c0_31] : memref<20x512xbf16, #tpu.memory_space<vmem>>, vector<16x512xbf16>
    %29 = tpu.concatenate %24, %25, %26, %27, %28 in 1 : vector<16x512xbf16>, vector<16x512xbf16>, vector<16x512xbf16>, vector<16x512xbf16>, vector<16x512xbf16> -> vector<16x2560xbf16>
    %c0_32 = arith.constant 0 : index
    %c0_33 = arith.constant 0 : index
    %30 = vector.load %arg4[%c0_32, %c0_33] : memref<2560x256xbf16, #tpu.memory_space<vmem>>, vector<2560x256xbf16>
    %cst_34 = arith.constant dense<0.000000e+00> : vector<16x256xf32>
    %31 = tpu.matmul %29, %30, %cst_34 {dimension_numbers = #tpu.dot_dimension_numbers<[1], [0], [0], [1], [0, 0, 1, 1], [], []>} : vector<16x2560xbf16>, vector<2560x256xbf16>, vector<16x256xf32> -> vector<16x256xf32>
    %c0_35 = arith.constant 0 : index
    %c0_36 = arith.constant 0 : index
    %32 = vector.load %arg5[%c0_35, %c0_36] : memref<1x256xf32, #tpu.memory_space<vmem>>, vector<1x256xf32>
    %33 = vector.broadcast %32 : vector<1x256xf32> to vector<16x256xf32>
    %34 = arith.addf %31, %33 : vector<16x256xf32>
    %cst_37 = arith.constant 0.000000e+00 : f32
    %35 = vector.broadcast %cst_37 : f32 to vector<16x256xf32>
    %36 = arith.maximumf %34, %35 : vector<16x256xf32>
    %cst_38 = arith.constant 0.000000e+00 : f32
    %37 = vector.broadcast %cst_38 : f32 to vector<2x256xf32>
    %c0_39 = arith.constant 0 : index
    %c0_40 = arith.constant 0 : index
    %38 = vector.load %arg14[%c0_39, %c0_40] : memref<20x256xf32, #tpu.memory_space<vmem>>, vector<2x256xf32>
    tpu.vector_store %arg14[%c0_39, %c0_40], %37 {strides = array<i32>} : memref<20x256xf32, #tpu.memory_space<vmem>>, vector<2x256xf32>,
    %cst_41 = arith.constant 0.000000e+00 : f32
    %39 = vector.broadcast %cst_41 : f32 to vector<2x256xf32>
    %c18_42 = arith.constant 18 : index
    %c0_43 = arith.constant 0 : index
    %40 = vector.load %arg14[%c18_42, %c0_43] : memref<20x256xf32, #tpu.memory_space<vmem>>, vector<2x256xf32>
    tpu.vector_store %arg14[%c18_42, %c0_43], %39 {strides = array<i32>} : memref<20x256xf32, #tpu.memory_space<vmem>>, vector<2x256xf32>,
    %c2_44 = arith.constant 2 : index
    %c0_45 = arith.constant 0 : index
    %41 = vector.load %arg14[%c2_44, %c0_45] : memref<20x256xf32, #tpu.memory_space<vmem>>, vector<16x256xf32>
    tpu.vector_store %arg14[%c2_44, %c0_45], %36 {strides = array<i32>} : memref<20x256xf32, #tpu.memory_space<vmem>>, vector<16x256xf32>,
    %c0_46 = arith.constant 0 : index
    %c0_47 = arith.constant 0 : index
    %42 = vector.load %arg14[%c0_46, %c0_47] : memref<20x256xf32, #tpu.memory_space<vmem>>, vector<16x256xf32>
    %c1_48 = arith.constant 1 : index
    %c0_49 = arith.constant 0 : index
    %43 = vector.load %arg14[%c1_48, %c0_49] : memref<20x256xf32, #tpu.memory_space<vmem>>, vector<16x256xf32>
    %c2_50 = arith.constant 2 : index
    %c0_51 = arith.constant 0 : index
    %44 = vector.load %arg14[%c2_50, %c0_51] : memref<20x256xf32, #tpu.memory_space<vmem>>, vector<16x256xf32>
    %c3_52 = arith.constant 3 : index
    %c0_53 = arith.constant 0 : index
    %45 = vector.load %arg14[%c3_52, %c0_53] : memref<20x256xf32, #tpu.memory_space<vmem>>, vector<16x256xf32>
    %c4_54 = arith.constant 4 : index
    %c0_55 = arith.constant 0 : index
    %46 = vector.load %arg14[%c4_54, %c0_55] : memref<20x256xf32, #tpu.memory_space<vmem>>, vector<16x256xf32>
    %47 = tpu.concatenate %42, %43, %44, %45, %46 in 1 : vector<16x256xf32>, vector<16x256xf32>, vector<16x256xf32>, vector<16x256xf32>, vector<16x256xf32> -> vector<16x1280xf32>
    %c0_56 = arith.constant 0 : index
    %c0_57 = arith.constant 0 : index
    %48 = vector.load %arg6[%c0_56, %c0_57] : memref<1280x128xf32, #tpu.memory_space<vmem>>, vector<1280x128xf32>
    %cst_58 = arith.constant dense<0.000000e+00> : vector<16x128xf32>
    %49 = tpu.matmul %47, %48, %cst_58 {dimension_numbers = #tpu.dot_dimension_numbers<[1], [0], [0], [1], [0, 0, 1, 1], [], []>} : vector<16x1280xf32>, vector<1280x128xf32>, vector<16x128xf32> -> vector<16x128xf32>
    %c0_59 = arith.constant 0 : index
    %c0_60 = arith.constant 0 : index
    %50 = vector.load %arg7[%c0_59, %c0_60] : memref<1x128xf32, #tpu.memory_space<vmem>>, vector<1x128xf32>
    %51 = vector.broadcast %50 : vector<1x128xf32> to vector<16x128xf32>
    %52 = arith.addf %49, %51 : vector<16x128xf32>
    %cst_61 = arith.constant 0.000000e+00 : f32
    %53 = vector.broadcast %cst_61 : f32 to vector<16x128xf32>
    %54 = arith.maximumf %52, %53 : vector<16x128xf32>
    %c0_62 = arith.constant 0 : index
    %c0_63 = arith.constant 0 : index
    %55 = vector.load %arg8[%c0_62, %c0_63] : memref<128x128xf32, #tpu.memory_space<vmem>>, vector<128x128xf32>
    %cst_64 = arith.constant dense<0.000000e+00> : vector<16x128xf32>
    %56 = tpu.matmul %54, %55, %cst_64 {dimension_numbers = #tpu.dot_dimension_numbers<[1], [0], [0], [1], [0, 0, 1, 1], [], []>} : vector<16x128xf32>, vector<128x128xf32>, vector<16x128xf32> -> vector<16x128xf32>
    %c0_65 = arith.constant 0 : index
    %c0_66 = arith.constant 0 : index
    %57 = vector.load %arg9[%c0_65, %c0_66] : memref<1x128xf32, #tpu.memory_space<vmem>>, vector<1x128xf32>
    %58 = vector.broadcast %57 : vector<1x128xf32> to vector<16x128xf32>
    %59 = arith.addf %56, %58 : vector<16x128xf32>
    %cst_67 = arith.constant 0.000000e+00 : f32
    %60 = vector.broadcast %cst_67 : f32 to vector<16x128xf32>
    %61 = arith.maximumf %59, %60 : vector<16x128xf32>
    %c0_68 = arith.constant 0 : index
    %c0_69 = arith.constant 0 : index
    %62 = vector.load %arg10[%c0_68, %c0_69] : memref<128x128xf32, #tpu.memory_space<vmem>>, vector<128x128xf32>
    %cst_70 = arith.constant dense<0.000000e+00> : vector<16x128xf32>
    %63 = tpu.matmul %61, %62, %cst_70 {dimension_numbers = #tpu.dot_dimension_numbers<[1], [0], [0], [1], [0, 0, 1, 1], [], []>} : vector<16x128xf32>, vector<128x128xf32>, vector<16x128xf32> -> vector<16x128xf32>
    %c0_71 = arith.constant 0 : index
    %c0_72 = arith.constant 0 : index
    %64 = vector.load %arg11[%c0_71, %c0_72] : memref<1x128xf32, #tpu.memory_space<vmem>>, vector<1x128xf32>
    %65 = vector.broadcast %64 : vector<1x128xf32> to vector<16x128xf32>
    %66 = arith.addf %63, %65 : vector<16x128xf32>
    %c0_73 = arith.constant 0 : index
    %c0_74 = arith.constant 0 : index
    %c0_75 = arith.constant 0 : index
    %67 = vector.load %arg12[%c0_73, %c0_74, %c0_75] : memref<1x16x128xf32, #tpu.memory_space<vmem>>, vector<1x16x128xf32>
    %68 = vector.shape_cast %67 : vector<1x16x128xf32> to vector<16x128xf32>
    %69 = vector.shape_cast %66 : vector<16x128xf32> to vector<1x16x128xf32>
    tpu.vector_store %arg12[%c0_73, %c0_74, %c0_75], %69 {strides = array<i32>} : memref<1x16x128xf32, #tpu.memory_space<vmem>>, vector<1x16x128xf32>,
    return
  }
  func.func @transform_0(%arg0: i32) -> (i32, i32, i32) {
    %c0_i32 = arith.constant 0 : i32
    %c0_i32_0 = arith.constant 0 : i32
    %c0_i32_1 = arith.constant 0 : i32
    return %arg0, %c0_i32, %c0_i32_0 : i32, i32, i32
  }
  func.func @transform_1(%arg0: i32) -> (i32, i32) {
    %c0_i32 = arith.constant 0 : i32
    %c0_i32_0 = arith.constant 0 : i32
    %c0_i32_1 = arith.constant 0 : i32
    return %c0_i32, %c0_i32_0 : i32, i32
  }
  func.func @transform_2(%arg0: i32) -> (i32, i32) {
    %c0_i32 = arith.constant 0 : i32
    %c0_i32_0 = arith.constant 0 : i32
    %c0_i32_1 = arith.constant 0 : i32
    return %c0_i32, %c0_i32_0 : i32, i32
  }
  func.func @transform_3(%arg0: i32) -> (i32, i32) {
    %c0_i32 = arith.constant 0 : i32
    %c0_i32_0 = arith.constant 0 : i32
    %c0_i32_1 = arith.constant 0 : i32
    return %c0_i32, %c0_i32_0 : i32, i32
  }
  func.func @transform_4(%arg0: i32) -> (i32, i32) {
    %c0_i32 = arith.constant 0 : i32
    %c0_i32_0 = arith.constant 0 : i32
    %c0_i32_1 = arith.constant 0 : i32
    return %c0_i32, %c0_i32_0 : i32, i32
  }
  func.func @transform_5(%arg0: i32) -> (i32, i32) {
    %c0_i32 = arith.constant 0 : i32
    %c0_i32_0 = arith.constant 0 : i32
    %c0_i32_1 = arith.constant 0 : i32
    return %c0_i32, %c0_i32_0 : i32, i32
  }
  func.func @transform_6(%arg0: i32) -> (i32, i32) {
    %c0_i32 = arith.constant 0 : i32
    %c0_i32_0 = arith.constant 0 : i32
    %c0_i32_1 = arith.constant 0 : i32
    return %c0_i32, %c0_i32_0 : i32, i32
  }
  func.func @transform_7(%arg0: i32) -> (i32, i32) {
    %c0_i32 = arith.constant 0 : i32
    %c0_i32_0 = arith.constant 0 : i32
    %c0_i32_1 = arith.constant 0 : i32
    return %c0_i32, %c0_i32_0 : i32, i32
  }
  func.func @transform_8(%arg0: i32) -> (i32, i32) {
    %c0_i32 = arith.constant 0 : i32
    %c0_i32_0 = arith.constant 0 : i32
    %c0_i32_1 = arith.constant 0 : i32
    return %c0_i32, %c0_i32_0 : i32, i32
  }
  func.func @transform_9(%arg0: i32) -> (i32, i32) {
    %c0_i32 = arith.constant 0 : i32
    %c0_i32_0 = arith.constant 0 : i32
    %c0_i32_1 = arith.constant 0 : i32
    return %c0_i32, %c0_i32_0 : i32, i32
  }
  func.func @transform_10(%arg0: i32) -> (i32, i32) {
    %c0_i32 = arith.constant 0 : i32
    %c0_i32_0 = arith.constant 0 : i32
    %c0_i32_1 = arith.constant 0 : i32
    return %c0_i32, %c0_i32_0 : i32, i32
  }
  func.func @transform_11(%arg0: i32) -> (i32, i32, i32) {
    %c0_i32 = arith.constant 0 : i32
    %c0_i32_0 = arith.constant 0 : i32
    %c0_i32_1 = arith.constant 0 : i32
    return %arg0, %c0_i32, %c0_i32_0 : i32, i32, i32
  }
}

</mosaic_0001>

<bundles_post_ra>
// kernel: model_forward.1
= control target key start
LH: loop header
LB: loop body
LE: loop exit
PB: predicated region body
PF: predicated region fallthrough
CT: control target
= control target key end

     0   :  { %s18760_s17 = smov 0   ;;  %s24856_s0 = inlined_call_operand.vmem [shape: bf16[2,20,1024], index: 0, kind: input, shape index: {}]   ;;  %s24857_s1 = inlined_call_operand.vmem [shape: bf16[5120,512], index: 1, kind: input, shape index: {}]   ;;  %s24858_s2 = inlined_call_operand.vmem [shape: f32[1,512], index: 2, kind: input, shape index: {}]   ;;  %s24859_s3 = inlined_call_operand.vmem [shape: bf16[2560,256], index: 3, kind: input, shape index: {}]   ;;  %s24860_s4 = inlined_call_operand.vmem [shape: f32[1,256], index: 4, kind: input, shape index: {}]   ;;  %s24861_s5 = inlined_call_operand.vmem [shape: f32[1280,128], index: 5, kind: input, shape index: {}]   ;;  %s24862_s6 = inlined_call_operand.vmem [shape: f32[1,128], index: 6, kind: input, shape index: {}]   ;;  %s24863_s7 = inlined_call_operand.vmem [shape: f32[128,128], index: 7, kind: input, shape index: {}]   ;;  %s24864_s8 = inlined_call_operand.vmem [shape: f32[1,128], index: 8, kind: input, shape index: {}]   ;;  %s24865_s9 = inlined_call_operand.vmem [shape: f32[128,128], index: 9, kind: input, shape index: {}]   ;;  %s24866_s10 = inlined_call_operand.vmem [shape: f32[1,128], index: 10, kind: input, shape index: {}]   ;;  %s24867_s11 = inlined_call_operand.vmem [shape: f32[2,16,128], index: 11, kind: output, shape index: {}]  }
   0x1 LB: > { %s13845_s18 = sadd.s32 4294967295, %s18696_s17   ;;  %p13849_p0 = scmp.ge.s32.totalorder %s18696_s17, 1  ;;  %s18696_s17 = sphi %s18760_s17, %s21_s17  }
   0x2   : > { %p337_p1 = scmp.lt.s32.totalorder %s18696_s17, 3 }
   0x4   : > { %p338_p2 = pnand %p13849_p0, %p337_p1 }
   0x5   : > { %v16258_v0 = vld [vmem:[%s24857_s1 + $0x4] ss:$16 sps:$4 sm:$0xff] (!%p338_p2)   ;;  %v16262_v2 = vld [vmem:[%s24857_s1] ss:$16 sps:$4 sm:$0xff] (!%p338_p2)   ;;  %p377_p3 = scmp.lt.s32.totalorder (!%p338_p2), %s13845_s18, 1  ;;  %vm597_vm1 = vcmask (!%p338_p2), 1046528  }
   0x6   : > { %341 = sbr.rel (%p338_p2) target bundleno = 3235 (0xca3), region = 64  ;;  %v16260_v1 = vld [vmem:[%s24857_s1 + $0x604] ss:$16 sps:$4 sm:$0xff] (!%p338_p2)   ;;  %8550 = vmatprep.subr.bf16.mxu1 (!%p338_p2), %v16258_v0  ;;  %v16263_v3 = vld [vmem:[%s24857_s1 + $0x600] ss:$16 sps:$4 sm:$0xff] (!%p338_p2)   ;;  %vm815_vm3 = vcmask (!%p338_p2), 1045504  }
   0x7   : > { %8679 = vmatprep.subr.bf16.mxu0 (!%p338_p2), %v16260_v1  ;;  %v16264_v4 = vld [vmem:[%s24857_s1 + $0x24] ss:$16 sps:$4 sm:$0xff] (!%p338_p2)   ;;  %8551 = vmatpush1.bf16.msra.mxu1 (!%p338_p2), %v16262_v2  ;;  %v16268_v6 = vld [vmem:[%s24857_s1 + $0x20] ss:$16 sps:$4 sm:$0xff] (!%p338_p2)   ;;  %vm472_vm0 = vsmask.f32 (!%p338_p2), 7424 }
   0x8   : > { %8680 = vmatpush1.bf16.msra.mxu0 (!%p338_p2), %v16263_v3  ;;  %v16266_v5 = vld [vmem:[%s24857_s1 + $0x624] ss:$16 sps:$4 sm:$0xff] (!%p338_p2)   ;;  %8552 = vmatprep.subr.bf16.mxu1 (!%p338_p2), %v16264_v4  ;;  %v16269_v7 = vld [vmem:[%s24857_s1 + $0x620] ss:$16 sps:$4 sm:$0xff] (!%p338_p2)   ;;  %vm650_vm2 = vsmask.f32 (!%p338_p2), 6400 }
   0x9   : > { %8681 = vmatprep.subr.bf16.mxu0 (!%p338_p2), %v16266_v5  ;;  %v16270_v8 = vld [vmem:[%s24857_s1 + $0x44] ss:$16 sps:$4 sm:$0xff] (!%p338_p2)   ;;  %v16274_v10 = vld [vmem:[%s24857_s1 + $0x40] ss:$16 sps:$4 sm:$0xff] (!%p338_p2)   ;;  %vm10302_vm4 = vcmask (!%p338_p2), 1040384   ;;  %vm10303_vm5 = vcmask (!%p338_p2), 1044484  }
   0xa   : > { %v16272_v9 = vld [vmem:[%s24857_s1 + $0x644] ss:$16 sps:$4 sm:$0xff] (!%p338_p2)   ;;  %v16275_v11 = vld [vmem:[%s24857_s1 + $0x640] ss:$16 sps:$4 sm:$0xff] (!%p338_p2)   ;;  %vm22981_vm6 = vmor (!%p338_p2), %vm10302_vm4, %vm10303_vm5  ;;  %vm12929_vm7 = vcmask (!%p338_p2), 1041408   ;;  %vm13012_vm8 = vcmask (!%p338_p2), 1044480  }
   0xb   : > { %8553 = vmatpush1.bf16.msra.mxu1 (!%p338_p2), %v16268_v6  ;;  %v16276_v12 = vld [vmem:[%s24857_s1 + $0x64] ss:$16 sps:$4 sm:$0xff] (!%p338_p2)   ;;  %v16280_v14 = vld [vmem:[%s24857_s1 + $0x60] ss:$16 sps:$4 sm:$0xff] (!%p338_p2)   ;;  %vm13031_vm9 = vcmask (!%p338_p2), 1043456  }
   0xc   : > { %8682 = vmatpush1.bf16.msra.mxu0 (!%p338_p2), %v16269_v7  ;;  %8554 = vmatprep.subr.bf16.mxu1 (!%p338_p2), %v16270_v8  ;;  %v16278_v13 = vld [vmem:[%s24857_s1 + $0x664] ss:$16 sps:$4 sm:$0xff] (!%p338_p2)   ;;  %v16281_v15 = vld [vmem:[%s24857_s1 + $0x660] ss:$16 sps:$4 sm:$0xff] (!%p338_p2)  }
   0xd   : > { %8683 = vmatprep.subr.bf16.mxu0 %v16272_v9  ;;  %v16282_v16 = vld [vmem:[%s24857_s1 + $0x84] ss:$16 sps:$4 sm:$0xff]   ;;  %v16286_v18 = vld [vmem:[%s24857_s1 + $0x80] ss:$16 sps:$4 sm:$0xff]   ;;  %s24871_s18 = smov (!%p377_p3, %s13845_s18), 1 }
   0xe   : > { %v16284_v17 = vld [vmem:[%s24857_s1 + $0x684] ss:$16 sps:$4 sm:$0xff]   ;;  %v16287_v19 = vld [vmem:[%s24857_s1 + $0x680] ss:$16 sps:$4 sm:$0xff]   ;;  %s16247_s29 = smul.u32 96, %s24871_s18  ;;  %s15522_s13 = sshll.u32 %s24871_s18, 4 }
   0xf   : > { %8555 = vmatpush1.bf16.msra.mxu1 %v16274_v10  ;;  %v16288_v20 = vld [vmem:[%s24857_s1 + $0xa4] ss:$16 sps:$4 sm:$0xff]   ;;  %v16292_v22 = vld [vmem:[%s24857_s1 + $0xa0] ss:$16 sps:$4 sm:$0xff]   ;;  %s386_s16 = scalar_lea.vmem %s24867_s11, %s15522_s13 }
  0x10   : > { %8684 = vmatpush1.bf16.msra.mxu0 %v16275_v11  ;;  %8556 = vmatprep.subr.bf16.mxu1 %v16276_v12  ;;  %v16290_v21 = vld [vmem:[%s24857_s1 + $0x6a4] ss:$16 sps:$4 sm:$0xff]   ;;  %v16293_v23 = vld [vmem:[%s24857_s1 + $0x6a0] ss:$16 sps:$4 sm:$0xff]   ;;  %s18910_s25 = scalar_lea.vmem %s24856_s0, %s16247_s29 }
  0x11   : > { %8685 = vmatprep.subr.bf16.mxu0 %v16278_v13  ;;  %v16294_v24 = vld [vmem:[%s24857_s1 + $0xc4] ss:$16 sps:$4 sm:$0xff]   ;;  %v16298_v26 = vld [vmem:[%s24857_s1 + $0xc0] ss:$16 sps:$4 sm:$0xff]   ;;  %v391_v53 = vld [vmem:[%s18910_s25 + $0x18] sm:$0xff] }
  0x12   : > { %v16296_v25 = vld [vmem:[%s24857_s1 + $0x6c4] ss:$16 sps:$4 sm:$0xff]   ;;  %v16299_v27 = vld [vmem:[%s24857_s1 + $0x6c0] ss:$16 sps:$4 sm:$0xff]   ;;  %v395_v54 = vld [vmem:[%s18910_s25 + $0x38] sm:$0xff] }
  0x13   : > { %8557 = vmatpush1.bf16.msra.mxu1 %v16280_v14  ;;  %v16300_v28 = vld [vmem:[%s24857_s1 + $0xe4] ss:$16 sps:$4 sm:$0xff]   ;;  %v16304_v30 = vld [vmem:[%s24857_s1 + $0xe0] ss:$16 sps:$4 sm:$0xff]   ;;  %v18937_v55 = vcombine.high %v391_v53, %v395_v54  ;;  %v18996_v11 = vcombine.low %v391_v53, %v395_v54 }
  0x14   : > { %8686 = vmatpush1.bf16.msra.mxu0 %v16281_v15  ;;  %8558 = vmatprep.subr.bf16.mxu1 %v16282_v16  ;;  %v16302_v29 = vld [vmem:[%s24857_s1 + $0x6e4] ss:$16 sps:$4 sm:$0xff]   ;;  %v16305_v31 = vld [vmem:[%s24857_s1 + $0x6e0] ss:$16 sps:$4 sm:$0xff]  }
  0x15   : > { %8687 = vmatprep.subr.bf16.mxu0 %v16284_v17  ;;  %v16306_v32 = vld [vmem:[%s24857_s1 + $0x104] ss:$16 sps:$4 sm:$0xff]   ;;  %v16310_v34 = vld [vmem:[%s24857_s1 + $0x100] ss:$16 sps:$4 sm:$0xff]   ;;  %8711 = vmatprep.mubr.bf16.mxu0 %v18937_v55 }
  0x16   : > { %v16308_v33 = vld [vmem:[%s24857_s1 + $0x704] ss:$16 sps:$4 sm:$0xff]   ;;  %v16311_v35 = vld [vmem:[%s24857_s1 + $0x700] ss:$16 sps:$4 sm:$0xff]  }
  0x17   : > { %8559 = vmatpush1.bf16.msra.mxu1 %v16286_v18  ;;  %v16312_v36 = vld [vmem:[%s24857_s1 + $0x124] ss:$16 sps:$4 sm:$0xff]   ;;  %v16316_v38 = vld [vmem:[%s24857_s1 + $0x120] ss:$16 sps:$4 sm:$0xff]  }
  0x18   : > { %8688 = vmatpush1.bf16.msra.mxu0 %v16287_v19  ;;  %8560 = vmatprep.subr.bf16.mxu1 %v16288_v20  ;;  %v16314_v37 = vld [vmem:[%s24857_s1 + $0x724] ss:$16 sps:$4 sm:$0xff]   ;;  %v16317_v39 = vld [vmem:[%s24857_s1 + $0x720] ss:$16 sps:$4 sm:$0xff]  }
  0x19   : > { %8689 = vmatprep.subr.bf16.mxu0 %v16290_v21  ;;  %v16318_v40 = vld [vmem:[%s24857_s1 + $0x144] ss:$16 sps:$4 sm:$0xff]   ;;  %v16322_v42 = vld [vmem:[%s24857_s1 + $0x140] ss:$16 sps:$4 sm:$0xff]  }
  0x1a   : > { %v16320_v41 = vld [vmem:[%s24857_s1 + $0x744] ss:$16 sps:$4 sm:$0xff]   ;;  %v16323_v43 = vld [vmem:[%s24857_s1 + $0x740] ss:$16 sps:$4 sm:$0xff]  }
  0x1b   : > { %8561 = vmatpush1.bf16.msra.mxu1 %v16292_v22  ;;  %v16324_v44 = vld [vmem:[%s24857_s1 + $0x164] ss:$16 sps:$4 sm:$0xff]   ;;  %v16328_v46 = vld [vmem:[%s24857_s1 + $0x160] ss:$16 sps:$4 sm:$0xff]  }
  0x1c   : > { %8690 = vmatpush1.bf16.msra.mxu0 %v16293_v23  ;;  %8562 = vmatprep.subr.bf16.mxu1 %v16294_v24  ;;  %v16326_v45 = vld [vmem:[%s24857_s1 + $0x764] ss:$16 sps:$4 sm:$0xff]   ;;  %v16329_v47 = vld [vmem:[%s24857_s1 + $0x760] ss:$16 sps:$4 sm:$0xff]  }
  0x1d   : > { %8691 = vmatprep.subr.bf16.mxu0 %v16296_v25  ;;  %v388_v48 = vld [vmem:[%s18910_s25] sm:$0xff] }
  0x1e   : > { %v392_v49 = vld [vmem:[%s18910_s25 + $0x20] sm:$0xff] }
  0x1f   : > { %8563 = vmatpush1.bf16.msra.mxu1 %v16298_v26  ;;  %v16330_v50 = vld [vmem:[%s24857_s1 + $0x184] ss:$16 sps:$4 sm:$0xff]   ;;  %v18932_v52 = vcombine.high %v388_v48, %v392_v49  ;;  %v16334_v56 = vld [vmem:[%s24857_s1 + $0x180] ss:$16 sps:$4 sm:$0xff]   ;;  %v18994_v10 = vcombine.low %v388_v48, %v392_v49 }
  0x20   : > { %8692 = vmatpush1.bf16.msra.mxu0 %v16299_v27  ;;  %8564 = vmatprep.subr.bf16.mxu1 %v16300_v28  ;;  %v16332_v51 = vld [vmem:[%s24857_s1 + $0x784] ss:$16 sps:$4 sm:$0xff]   ;;  %v16335_v57 = vld [vmem:[%s24857_s1 + $0x780] ss:$16 sps:$4 sm:$0xff]  }
  0x21   : > { %8693 = vmatprep.subr.bf16.mxu0 %v16302_v29  ;;  %8582 = vmatprep.mubr.bf16.mxu1 %v18932_v52  ;;  %v16336_v58 = vld [vmem:[%s24857_s1 + $0x1a4] ss:$16 sps:$4 sm:$0xff]   ;;  %v16340_v60 = vld [vmem:[%s24857_s1 + $0x1a0] ss:$16 sps:$4 sm:$0xff]  }
  0x22   : > { %v16338_v59 = vld [vmem:[%s24857_s1 + $0x7a4] ss:$16 sps:$4 sm:$0xff]   ;;  %v16341_v61 = vld [vmem:[%s24857_s1 + $0x7a0] ss:$16 sps:$4 sm:$0xff]  }
  0x23   : > { %8565 = vmatpush1.bf16.msra.mxu1 %v16304_v30  ;;  %v16342_v62 = vld [vmem:[%s24857_s1 + $0x1c4] ss:$16 sps:$4 sm:$0xff]   ;;  %v16346_v0 = vld [vmem:[%s24857_s1 + $0x1c0] ss:$16 sps:$4 sm:$0xff]  }
  0x24   : > { %8694 = vmatpush1.bf16.msra.mxu0 %v16305_v31  ;;  %8566 = vmatprep.subr.bf16.mxu1 %v16306_v32  ;;  %v16344_v63 = vld [vmem:[%s24857_s1 + $0x7c4] ss:$16 sps:$4 sm:$0xff]   ;;  %v16347_v1 = vld [vmem:[%s24857_s1 + $0x7c0] ss:$16 sps:$4 sm:$0xff]   ;;  %v488_v32 = vshll.u32 %v18932_v52, 16 }
  0x25   : > { %8695 = vmatprep.subr.bf16.mxu0 %v16308_v33  ;;  %v16348_v2 = vld [vmem:[%s24857_s1 + $0x1e4] ss:$16 sps:$4 sm:$0xff]   ;;  %v16352_v4 = vld [vmem:[%s24857_s1 + $0x1e0] ss:$16 sps:$4 sm:$0xff]  }
  0x26   : > { %v16350_v3 = vld [vmem:[%s24857_s1 + $0x7e4] ss:$16 sps:$4 sm:$0xff]   ;;  %v16353_v5 = vld [vmem:[%s24857_s1 + $0x7e0] ss:$16 sps:$4 sm:$0xff]  }
  0x27   : > { %8567 = vmatpush1.bf16.msra.mxu1 %v16310_v34  ;;  %v16356_v6 = vld [vmem:[%s24857_s1 + $0x204] ss:$16 sps:$4 sm:$0xff]   ;;  %v16354_v8 = vld [vmem:[%s24857_s1 + $0x200] ss:$16 sps:$4 sm:$0xff]  }
  0x28   : > { %8696 = vmatpush1.bf16.msra.mxu0 %v16311_v35  ;;  %8568 = vmatprep.subr.bf16.mxu1 %v16312_v36  ;;  %v16359_v7 = vld [vmem:[%s24857_s1 + $0x804] ss:$16 sps:$4 sm:$0xff]   ;;  %v16357_v9 = vld [vmem:[%s24857_s1 + $0x800] ss:$16 sps:$4 sm:$0xff]   ;;  %v19071_v36 = vld [vmem:[%s18910_s25 + $0x8] sm:$0xff] }
  0x29   : > { %8697 = vmatprep.subr.bf16.mxu0 %v16314_v37  ;;  %v16362_v12 = vld [vmem:[%s24857_s1 + $0x224] ss:$16 sps:$4 sm:$0xff]   ;;  %v16360_v14 = vld [vmem:[%s24857_s1 + $0x220] ss:$16 sps:$4 sm:$0xff]   ;;  %v19074_v37 = vld [vmem:[%s18910_s25 + $0x28] sm:$0xff] }
  0x2a   : > { %v16365_v13 = vld [vmem:[%s24857_s1 + $0x824] ss:$16 sps:$4 sm:$0xff]   ;;  %v16363_v15 = vld [vmem:[%s24857_s1 + $0x820] ss:$16 sps:$4 sm:$0xff]  }
  0x2b   : > { %8569 = vmatpush1.bf16.msra.mxu1 %v16316_v38  ;;  %v16368_v16 = vld [vmem:[%s24857_s1 + $0x244] ss:$16 sps:$4 sm:$0xff]   ;;  %v16366_v18 = vld [vmem:[%s24857_s1 + $0x240] ss:$16 sps:$4 sm:$0xff]   ;;  %v486_v38 = vshrl.u32 %v18932_v52, 16 }
  0x2c   : > { %8698 = vmatpush1.bf16.msra.mxu0 %v16317_v39  ;;  %8570 = vmatprep.subr.bf16.mxu1 %v16318_v40  ;;  %v16371_v17 = vld [vmem:[%s24857_s1 + $0x844] ss:$16 sps:$4 sm:$0xff]   ;;  %v16369_v19 = vld [vmem:[%s24857_s1 + $0x840] ss:$16 sps:$4 sm:$0xff]   ;;  %v490_v39 = vrot.slane %v488_v32, 1 }
  0x2d   : > { %8699 = vmatprep.subr.bf16.mxu0 %v16320_v41  ;;  %v16374_v20 = vld [vmem:[%s24857_s1 + $0x264] ss:$16 sps:$4 sm:$0xff]   ;;  %v16372_v22 = vld [vmem:[%s24857_s1 + $0x260] ss:$16 sps:$4 sm:$0xff]  }
  0x2e   : > { %v16377_v21 = vld [vmem:[%s24857_s1 + $0x864] ss:$16 sps:$4 sm:$0xff]   ;;  %v16375_v23 = vld [vmem:[%s24857_s1 + $0x860] ss:$16 sps:$4 sm:$0xff]   ;;  %v491_v48 = vor.u32 %v490_v39, %v486_v38  ;;  %v19227_v38 = vcombine.low %v19071_v36, %v19074_v37 }
  0x2f   : > { %8571 = vmatpush1.bf16.msra.mxu1 %v16322_v42  ;;  %v16380_v24 = vld [vmem:[%s24857_s1 + $0x284] ss:$16 sps:$4 sm:$0xff]   ;;  %v16378_v26 = vld [vmem:[%s24857_s1 + $0x280] ss:$16 sps:$4 sm:$0xff]   ;;  %v19085_v42 = vcombine.high %v19071_v36, %v19074_v37 }
  0x30   : > { %8700 = vmatpush1.bf16.msra.mxu0 %v16323_v43  ;;  %8572 = vmatprep.subr.bf16.mxu1 %v16324_v44  ;;  %v16383_v25 = vld [vmem:[%s24857_s1 + $0x884] ss:$16 sps:$4 sm:$0xff]   ;;  %v16381_v27 = vld [vmem:[%s24857_s1 + $0x880] ss:$16 sps:$4 sm:$0xff]  }
  0x31   : > { %8701 = vmatprep.subr.bf16.mxu0 %v16326_v45  ;;  %v16386_v28 = vld [vmem:[%s24857_s1 + $0x2a4] ss:$16 sps:$4 sm:$0xff]   ;;  %v16384_v30 = vld [vmem:[%s24857_s1 + $0x2a0] ss:$16 sps:$4 sm:$0xff]  }
  0x32   : > { %v16389_v29 = vld [vmem:[%s24857_s1 + $0x8a4] ss:$16 sps:$4 sm:$0xff]   ;;  %v16387_v31 = vld [vmem:[%s24857_s1 + $0x8a0] ss:$16 sps:$4 sm:$0xff]  }
  0x33   : > { %8573 = vmatpush1.bf16.msra.mxu1 %v16328_v46  ;;  %v16392_v33 = vld [vmem:[%s24857_s1 + $0x2c4] ss:$16 sps:$4 sm:$0xff]   ;;  %v16390_v35 = vld [vmem:[%s24857_s1 + $0x2c0] ss:$16 sps:$4 sm:$0xff]  }
  0x34   : > { %8702 = vmatpush1.bf16.msra.mxu0 %v16329_v47  ;;  %8574 = vmatprep.subr.bf16.mxu1 %v16330_v50  ;;  %v16395_v34 = vld [vmem:[%s24857_s1 + $0x8c4] ss:$16 sps:$4 sm:$0xff]   ;;  %v16393_v40 = vld [vmem:[%s24857_s1 + $0x8c0] ss:$16 sps:$4 sm:$0xff]  }
  0x35   : > { %8703 = vmatprep.subr.bf16.mxu0 %v16332_v51  ;;  %v16398_v41 = vld [vmem:[%s24857_s1 + $0x2e4] ss:$16 sps:$4 sm:$0xff]   ;;  %v16396_v46 = vld [vmem:[%s24857_s1 + $0x2e0] ss:$16 sps:$4 sm:$0xff]  }
  0x36   : > { %v19088_v43 = vld [vmem:[%s18910_s25 + $0x40] sm:$0x11]  ;;  %v19242_v37 = vld [vmem:[%s18910_s25 + $0x10] sm:$0xff] }
  0x37   : > { %8575 = vmatpush1.bf16.msra.mxu1 %v16334_v56  ;;  %v16401_v44 = vld [vmem:[%s24857_s1 + $0x8e4] ss:$16 sps:$4 sm:$0xff]   ;;  %v19095_v45 = vcombine.high %v19088_v43, %v19088_v43  ;;  %v16399_v47 = vld [vmem:[%s24857_s1 + $0x8e0] ss:$16 sps:$4 sm:$0xff]  }
  0x38   : > { %8704 = vmatpush1.bf16.msra.mxu0 %v16335_v57  ;;  %8576 = vmatprep.subr.bf16.mxu1 %v16336_v58  ;;  %v16404_v50 = vld [vmem:[%s24857_s1 + $0x304] ss:$16 sps:$4 sm:$0xff]   ;;  %v16402_v54 = vld [vmem:[%s24857_s1 + $0x300] ss:$16 sps:$4 sm:$0xff]  }
  0x39   : > { %8705 = vmatprep.subr.bf16.mxu0 %v16338_v59  ;;  %v493_v49 = vshll.u32 %v19095_v45, 16  ;;  %v16407_v51 = vld [vmem:[%s24857_s1 + $0x904] ss:$16 sps:$4 sm:$0xff]   ;;  %v16405_v56 = vld [vmem:[%s24857_s1 + $0x900] ss:$16 sps:$4 sm:$0xff]  }
  0x3a   : > { %v16410_v58 = vld [vmem:[%s24857_s1 + $0x324] ss:$16 sps:$4 sm:$0xff]   ;;  %v16458_v36 = vld [vmem:[%s24857_s1 + $0x420] ss:$16 sps:$4 sm:$0xff]  }
  0x3b   : > { %8577 = vmatpush1.bf16.msra.mxu1 %v16340_v60  ;;  %v495_v53 = vrot.slane %v493_v49, 1  ;;  %v16413_v59 = vld [vmem:[%s24857_s1 + $0x924] ss:$16 sps:$4 sm:$0xff]   ;;  %v16408_v60 = vld [vmem:[%s24857_s1 + $0x320] ss:$16 sps:$4 sm:$0xff]  }
  0x3c   : > { %8706 = vmatpush1.bf16.msra.mxu0 %v16341_v61  ;;  %8578 = vmatprep.subr.bf16.mxu1 %v16342_v62  ;;  %v16411_v61 = vld [vmem:[%s24857_s1 + $0x920] ss:$16 sps:$4 sm:$0xff]   ;;  %v16416_v62 = vld [vmem:[%s24857_s1 + $0x344] ss:$16 sps:$4 sm:$0xff]  }
  0x3d   : > { %8707 = vmatprep.subr.bf16.mxu0 %v16344_v63  ;;  %v19118_v57 = vsel %vm472_vm0, %v491_v48, %v495_v53  ;;  %v16419_v63 = vld [vmem:[%s24857_s1 + $0x944] ss:$16 sps:$4 sm:$0xff]   ;;  %v16461_v48 = vld [vmem:[%s24857_s1 + $0xa20] ss:$16 sps:$4 sm:$0xff]  }
  0x3e   : > { %v16456_v32 = vld [vmem:[%s24857_s1 + $0xa04] ss:$16 sps:$4 sm:$0xff]  }
  0x3f   : > { %8579 = vmatpush1.bf16.msra.mxu1 %v16346_v0  ;;  %v16414_v0 = vld [vmem:[%s24857_s1 + $0x340] ss:$16 sps:$4 sm:$0xff]   ;;  %v16466_v49 = vld [vmem:[%s24857_s1 + $0x444] ss:$16 sps:$4 sm:$0xff]  }
  0x40   : > { %8708 = vmatpush1.bf16.msra.mxu0 %v16347_v1  ;;  %8580 = vmatprep.subr.bf16.mxu1 %v16348_v2  ;;  %v16417_v1 = vld [vmem:[%s24857_s1 + $0x940] ss:$16 sps:$4 sm:$0xff]   ;;  %v16422_v2 = vld [vmem:[%s24857_s1 + $0x364] ss:$16 sps:$4 sm:$0xff]  }
  0x41   : > { %8709 = vmatprep.subr.bf16.mxu0 %v16350_v3  ;;  %v16425_v3 = vld [vmem:[%s24857_s1 + $0x964] ss:$16 sps:$4 sm:$0xff]  }
  0x42   : > { %v16469_v53 = vld [vmem:[%s24857_s1 + $0xa44] ss:$16 sps:$4 sm:$0xff]  }
  0x43   : > { %8581 = vmatpush1.bf16.msra.mxu1 %v16352_v4  ;;  %v16420_v4 = vld [vmem:[%s24857_s1 + $0x360] ss:$16 sps:$4 sm:$0xff]  }
  0x44   : > { %8710 = vmatpush1.bf16.msra.mxu0 %v16353_v5  ;;  %8593 = vmatprep.subr.bf16.mxu1 %v16356_v6  ;;  %v16423_v5 = vld [vmem:[%s24857_s1 + $0x960] ss:$16 sps:$4 sm:$0xff]   ;;  %v16428_v6 = vld [vmem:[%s24857_s1 + $0x384] ss:$16 sps:$4 sm:$0xff]  }
  0x45   : > { %8722 = vmatprep.subr.bf16.mxu0 %v16359_v7  ;;  %v16431_v7 = vld [vmem:[%s24857_s1 + $0x984] ss:$16 sps:$4 sm:$0xff]  }
  0x46   : > { %8583 = vmatmul.mubr.bf16.vlgmr.msra.gmra.mrb[0].mxu1 %v18994_v10 }
  0x47   : > { %8712 = vmatmul.mubr.bf16.vlgmr.msra.gmra.mrb[0].mxu0 %v18996_v11  ;;  %8594 = vmatpush1.bf16.msra.mxu1 %v16354_v8  ;;  %v16426_v8 = vld [vmem:[%s24857_s1 + $0x380] ss:$16 sps:$4 sm:$0xff]  }
  0x48   : > { %8723 = vmatpush1.bf16.msra.mxu0 %v16357_v9  ;;  %8595 = vmatprep.subr.bf16.mxu1 %v16362_v12  ;;  %v16429_v9 = vld [vmem:[%s24857_s1 + $0x980] ss:$16 sps:$4 sm:$0xff]   ;;  %v16434_v12 = vld [vmem:[%s24857_s1 + $0x3a4] ss:$16 sps:$4 sm:$0xff]  }
  0x49   : > { %8724 = vmatprep.subr.bf16.mxu0 %v16365_v13  ;;  %8625 = vmatprep.mubr.bf16.mxu1 %v19085_v42  ;;  %v16437_v13 = vld [vmem:[%s24857_s1 + $0x9a4] ss:$16 sps:$4 sm:$0xff]  }
  0x4a   : > { %8754 = vmatprep.mubr.bf16.mxu0 %v19118_v57 }
  0x4b   : > { %8596 = vmatpush1.bf16.msra.mxu1 %v16360_v14  ;;  %v16432_v14 = vld [vmem:[%s24857_s1 + $0x3a0] ss:$16 sps:$4 sm:$0xff]  }
  0x4c   : > { %8725 = vmatpush1.bf16.msra.mxu0 %v16363_v15  ;;  %8597 = vmatprep.subr.bf16.mxu1 %v16368_v16  ;;  %v16435_v15 = vld [vmem:[%s24857_s1 + $0x9a0] ss:$16 sps:$4 sm:$0xff]   ;;  %v16440_v16 = vld [vmem:[%s24857_s1 + $0x3c4] ss:$16 sps:$4 sm:$0xff]  }
  0x4d   : > { %8726 = vmatprep.subr.bf16.mxu0 %v16371_v17  ;;  %v19186_v17 = vcombine.low %v19088_v43, %v19088_v43  ;;  %v510_v43 = vshrl.u32 %v19085_v42, 16 }
  0x4f   : > { %8598 = vmatpush1.bf16.msra.mxu1 %v16366_v18  ;;  %v476_v18 = vshll.u32 %v18994_v10, 16 }
  0x50   : > { %8727 = vmatpush1.bf16.msra.mxu0 %v16369_v19  ;;  %8599 = vmatprep.subr.bf16.mxu1 %v16374_v20  ;;  %v16443_v19 = vld [vmem:[%s24857_s1 + $0x9c4] ss:$16 sps:$4 sm:$0xff]   ;;  %v16438_v20 = vld [vmem:[%s24857_s1 + $0x3c0] ss:$16 sps:$4 sm:$0xff]  }
  0x51   : > { %8728 = vmatprep.subr.bf16.mxu0 %v16377_v21  ;;  %v16441_v21 = vld [vmem:[%s24857_s1 + $0x9c0] ss:$16 sps:$4 sm:$0xff]  }
  0x53   : > { %8600 = vmatpush1.bf16.msra.mxu1 %v16372_v22  ;;  %v474_v22 = vshrl.u32 %v18994_v10, 16 }
  0x54   : > { %8729 = vmatpush1.bf16.msra.mxu0 %v16375_v23  ;;  %8601 = vmatprep.subr.bf16.mxu1 %v16380_v24  ;;  %v16446_v23 = vld [vmem:[%s24857_s1 + $0x3e4] ss:$16 sps:$4 sm:$0xff]   ;;  %v478_v24 = vrot.slane %v476_v18, 1 }
  0x55   : > { %8730 = vmatprep.subr.bf16.mxu0 %v16383_v25  ;;  %v481_v25 = vshll.u32 %v19186_v17, 16  ;;  %v16499_v18 = vld [vmem:[%s24857_s1 + $0xae4] ss:$16 sps:$4 sm:$0xff]  }
  0x57   : > { %8602 = vmatpush1.bf16.msra.mxu1 %v16378_v26  ;;  %v16449_v26 = vld [vmem:[%s24857_s1 + $0x9e4] ss:$16 sps:$4 sm:$0xff]  }
  0x58   : > { %8731 = vmatpush1.bf16.msra.mxu0 %v16381_v27  ;;  %8603 = vmatprep.subr.bf16.mxu1 %v16386_v28  ;;  %v16444_v27 = vld [vmem:[%s24857_s1 + $0x3e0] ss:$16 sps:$4 sm:$0xff]  }
  0x59   : > { %8732 = vmatprep.subr.bf16.mxu0 %v16389_v29  ;;  %v16447_v28 = vld [vmem:[%s24857_s1 + $0x9e0] ss:$16 sps:$4 sm:$0xff]   ;;  %v16452_v29 = vld [vmem:[%s24857_s1 + $0x404] ss:$16 sps:$4 sm:$0xff]  }
  0x5b   : > { %8604 = vmatpush1.bf16.msra.mxu1 %v16384_v30  ;;  %v479_v30 = vor.u32 %v478_v24, %v474_v22  ;;  %v16505_v22 = vld [vmem:[%s24857_s1 + $0xb04] ss:$16 sps:$4 sm:$0xff]   ;;  %v16503_v24 = vld [vmem:[%s24857_s1 + $0xb00] ss:$16 sps:$4 sm:$0xff]  }
  0x5c   : > { %8733 = vmatpush1.bf16.msra.mxu0 %v16387_v31  ;;  %8605 = vmatprep.subr.bf16.mxu1 %v16392_v33  ;;  %v483_v31 = vrot.slane %v481_v25, 1  ;;  %v512_v33 = vshll.u32 %v19085_v42, 16  ;;  %v16508_v25 = vld [vmem:[%s24857_s1 + $0x524] ss:$16 sps:$4 sm:$0xff]  }
  0x5d   : > { %8734 = vmatprep.subr.bf16.mxu0 %v16395_v34  ;;  %v16450_v34 = vld [vmem:[%s24857_s1 + $0x400] ss:$16 sps:$4 sm:$0xff]  }
  0x5e   : > { %v19230_v39 = vsel %vm472_vm0, %v479_v30, %v483_v31  ;;  %v16517_v30 = vld [vmem:[%s24857_s1 + $0xb44] ss:$16 sps:$4 sm:$0xff]   ;;  %v16512_v31 = vld [vmem:[%s24857_s1 + $0x540] ss:$16 sps:$4 sm:$0xff]  }
  0x5f   : > { %8606 = vmatpush1.bf16.msra.mxu1 %v16390_v35  ;;  %v16454_v35 = vld [vmem:[%s24857_s1 + $0xa00] ss:$16 sps:$4 sm:$0xff]  }
  0x60   : > { %8735 = vmatpush1.bf16.msra.mxu0 %v16393_v40  ;;  %8607 = vmatprep.subr.bf16.mxu1 %v16398_v41  ;;  %v16460_v40 = vld [vmem:[%s24857_s1 + $0x424] ss:$16 sps:$4 sm:$0xff]  }
  0x61   : > { %8736 = vmatprep.subr.bf16.mxu0 %v16401_v44  ;;  %v16463_v41 = vld [vmem:[%s24857_s1 + $0xa24] ss:$16 sps:$4 sm:$0xff]   ;;  %v514_v44 = vrot.slane %v512_v33, 1 }
  0x62   : > { %v16520_v33 = vld [vmem:[%s24857_s1 + $0x564] ss:$16 sps:$4 sm:$0xff]  }
  0x63   : > { %8608 = vmatpush1.bf16.msra.mxu1 %v16396_v46  ;;  %v19248_v46 = vld [vmem:[%s18910_s25 + $0x30] sm:$0xff] }
  0x64   : > { %8737 = vmatpush1.bf16.msra.mxu0 %v16399_v47  ;;  %8609 = vmatprep.subr.bf16.mxu1 %v16404_v50  ;;  %v19251_v47 = vld [vmem:[%s18910_s25 + $0x48] sm:$0x11]  ;;  %v19261_v50 = vcombine.high %v19242_v37, %v19248_v46 }
  0x65   : > { %8738 = vmatprep.subr.bf16.mxu0 %v16407_v51  ;;  %v19265_v51 = vcombine.high %v19251_v47, %v19251_v47 }
  0x67   : > { %8610 = vmatpush1.bf16.msra.mxu1 %v16402_v54  ;;  %v515_v54 = vor.u32 %v514_v44, %v510_v43  ;;  %v16524_v43 = vld [vmem:[%s24857_s1 + $0x580] ss:$16 sps:$4 sm:$0xff]  }
  0x68   : > { %8739 = vmatpush1.bf16.msra.mxu0 %v16405_v56  ;;  %8611 = vmatprep.subr.bf16.mxu1 %v16410_v58  ;;  %v517_v56 = vshll.u32 %v19265_v51, 16  ;;  %v16464_v58 = vld [vmem:[%s24857_s1 + $0x440] ss:$16 sps:$4 sm:$0xff]  }
  0x69   : > { %8740 = vmatprep.subr.bf16.mxu0 %v16413_v59  ;;  %v16467_v59 = vld [vmem:[%s24857_s1 + $0xa40] ss:$16 sps:$4 sm:$0xff]  }
  0x6a   : > { %v16527_v44 = vld [vmem:[%s24857_s1 + $0xb80] ss:$16 sps:$4 sm:$0xff]  }
  0x6b   : > { %8612 = vmatpush1.bf16.msra.mxu1 %v16408_v60  ;;  %v16472_v60 = vld [vmem:[%s24857_s1 + $0x464] ss:$16 sps:$4 sm:$0xff]  }
  0x6c   : > { %8741 = vmatpush1.bf16.msra.mxu0 %v16411_v61  ;;  %8613 = vmatprep.subr.bf16.mxu1 %v16416_v62  ;;  %v519_v61 = vrot.slane %v517_v56, 1  ;;  %v16475_v62 = vld [vmem:[%s24857_s1 + $0xa64] ss:$16 sps:$4 sm:$0xff]  }
  0x6d   : > { %8742 = vmatprep.subr.bf16.mxu0 %v16419_v63  ;;  %v16538_v56 = vld [vmem:[%s24857_s1 + $0x5c4] ss:$16 sps:$4 sm:$0xff]  }
  0x6e   : > { %v19285_v63 = vsel %vm472_vm0, %v515_v54, %v519_v61  ;;  %v16533_v54 = vld [vmem:[%s24857_s1 + $0xba0] ss:$16 sps:$4 sm:$0xff]   ;;  %v16541_v61 = vld [vmem:[%s24857_s1 + $0xbc4] ss:$16 sps:$4 sm:$0xff]  }
  0x6f   : > { %8614 = vmatpush1.bf16.msra.mxu1 %v16414_v0  ;;  %v16470_v0 = vld [vmem:[%s24857_s1 + $0x460] ss:$16 sps:$4 sm:$0xff]  }
  0x70   : > { %8743 = vmatpush1.bf16.msra.mxu0 %v16417_v1  ;;  %8615 = vmatprep.subr.bf16.mxu1 %v16422_v2  ;;  %v16473_v1 = vld [vmem:[%s24857_s1 + $0xa60] ss:$16 sps:$4 sm:$0xff]   ;;  %v16478_v2 = vld [vmem:[%s24857_s1 + $0x484] ss:$16 sps:$4 sm:$0xff]  }
  0x71   : > { %8744 = vmatprep.subr.bf16.mxu0 %v16425_v3  ;;  %v16481_v3 = vld [vmem:[%s24857_s1 + $0xa84] ss:$16 sps:$4 sm:$0xff]  }
  0x73   : > { %8616 = vmatpush1.bf16.msra.mxu1 %v16420_v4  ;;  %v16476_v4 = vld [vmem:[%s24857_s1 + $0x480] ss:$16 sps:$4 sm:$0xff]  }
  0x74   : > { %8745 = vmatpush1.bf16.msra.mxu0 %v16423_v5  ;;  %8617 = vmatprep.subr.bf16.mxu1 %v16428_v6  ;;  %v16479_v5 = vld [vmem:[%s24857_s1 + $0xa80] ss:$16 sps:$4 sm:$0xff]   ;;  %v16484_v6 = vld [vmem:[%s24857_s1 + $0x4a4] ss:$16 sps:$4 sm:$0xff]  }
  0x75   : > { %8746 = vmatprep.subr.bf16.mxu0 %v16431_v7  ;;  %v16487_v7 = vld [vmem:[%s24857_s1 + $0xaa4] ss:$16 sps:$4 sm:$0xff]  }
  0x77   : > { %8618 = vmatpush1.bf16.msra.mxu1 %v16426_v8  ;;  %v16482_v8 = vld [vmem:[%s24857_s1 + $0x4a0] ss:$16 sps:$4 sm:$0xff]  }
  0x78   : > { %8747 = vmatpush1.bf16.msra.mxu0 %v16429_v9  ;;  %8619 = vmatprep.subr.bf16.mxu1 %v16434_v12  ;;  %v16485_v9 = vld [vmem:[%s24857_s1 + $0xaa0] ss:$16 sps:$4 sm:$0xff]   ;;  %v16490_v12 = vld [vmem:[%s24857_s1 + $0x4c4] ss:$16 sps:$4 sm:$0xff]  }
  0x79   : > { %8748 = vmatprep.subr.bf16.mxu0 %v16437_v13  ;;  %v16493_v13 = vld [vmem:[%s24857_s1 + $0xac4] ss:$16 sps:$4 sm:$0xff]  }
  0x7b   : > { %8620 = vmatpush1.bf16.msra.mxu1 %v16432_v14  ;;  %v16488_v14 = vld [vmem:[%s24857_s1 + $0x4c0] ss:$16 sps:$4 sm:$0xff]  }
  0x7c   : > { %8749 = vmatpush1.bf16.msra.mxu0 %v16435_v15  ;;  %8621 = vmatprep.subr.bf16.mxu1 %v16440_v16  ;;  %v16491_v15 = vld [vmem:[%s24857_s1 + $0xac0] ss:$16 sps:$4 sm:$0xff]   ;;  %v16496_v16 = vld [vmem:[%s24857_s1 + $0x4e4] ss:$16 sps:$4 sm:$0xff]  }
  0x7d   : > { %8750 = vmatprep.subr.bf16.mxu0 %v16443_v19  ;;  %v16494_v19 = vld [vmem:[%s24857_s1 + $0x4e0] ss:$16 sps:$4 sm:$0xff]  }
  0x7f   : > { %8622 = vmatpush1.bf16.msra.mxu1 %v16438_v20  ;;  %v16497_v20 = vld [vmem:[%s24857_s1 + $0xae0] ss:$16 sps:$4 sm:$0xff]  }
  0x80   : > { %8751 = vmatpush1.bf16.msra.mxu0 %v16441_v21  ;;  %8623 = vmatprep.subr.bf16.mxu1 %v16446_v23  ;;  %v16502_v21 = vld [vmem:[%s24857_s1 + $0x504] ss:$16 sps:$4 sm:$0xff]   ;;  %v16500_v23 = vld [vmem:[%s24857_s1 + $0x500] ss:$16 sps:$4 sm:$0xff]  }
  0x81   : > { %8752 = vmatprep.subr.bf16.mxu0 %v16449_v26  ;;  %v16511_v26 = vld [vmem:[%s24857_s1 + $0xb24] ss:$16 sps:$4 sm:$0xff]  }
  0x83   : > { %8624 = vmatpush1.bf16.msra.mxu1 %v16444_v27  ;;  %v16506_v27 = vld [vmem:[%s24857_s1 + $0x520] ss:$16 sps:$4 sm:$0xff]  }
  0x84   : > { %8753 = vmatpush1.bf16.msra.mxu0 %v16447_v28  ;;  %8636 = vmatprep.subr.bf16.mxu1 %v16452_v29  ;;  %v16509_v28 = vld [vmem:[%s24857_s1 + $0xb20] ss:$16 sps:$4 sm:$0xff]   ;;  %v16514_v29 = vld [vmem:[%s24857_s1 + $0x544] ss:$16 sps:$4 sm:$0xff]  }
  0x85   : > { %8765 = vmatprep.subr.bf16.mxu0 %v16456_v32  ;;  %v16515_v32 = vld [vmem:[%s24857_s1 + $0xb40] ss:$16 sps:$4 sm:$0xff]  }
  0x86   : > { %8626 = vmatmul.mubr.bf16.vlgmr.msra.gmra.mrb[0].mxu1 %v19227_v38 }
  0x87   : > { %8755 = vmatmul.mubr.bf16.vlgmr.msra.gmra.mrb[0].mxu0 %v19230_v39  ;;  %8637 = vmatpush1.bf16.msra.mxu1 %v16450_v34  ;;  %v16523_v34 = vld [vmem:[%s24857_s1 + $0xb64] ss:$16 sps:$4 sm:$0xff]  }
  0x88   : > { %8766 = vmatpush1.bf16.msra.mxu0 %v16454_v35  ;;  %8638 = vmatprep.subr.bf16.mxu1 %v16460_v40  ;;  %v16518_v35 = vld [vmem:[%s24857_s1 + $0x560] ss:$16 sps:$4 sm:$0xff]  }
  0x89   : > { %8767 = vmatprep.subr.bf16.mxu0 %v16463_v41  ;;  %8668 = vmatprep.mubr.bf16.mxu1 %v19261_v50  ;;  %v16521_v40 = vld [vmem:[%s24857_s1 + $0xb60] ss:$16 sps:$4 sm:$0xff]   ;;  %v16526_v41 = vld [vmem:[%s24857_s1 + $0x584] ss:$16 sps:$4 sm:$0xff]  }
  0x8a   : > { %8797 = vmatprep.mubr.bf16.mxu0 %v19285_v63 }
  0x8b   : > { %8639 = vmatpush1.bf16.msra.mxu1 %v16458_v36  ;;  %v16529_v36 = vld [vmem:[%s24857_s1 + $0xb84] ss:$16 sps:$4 sm:$0xff]  }
  0x8c   : > { %8768 = vmatpush1.bf16.msra.mxu0 %v16461_v48  ;;  %8640 = vmatprep.subr.bf16.mxu1 %v16466_v49  ;;  %v16532_v48 = vld [vmem:[%s24857_s1 + $0x5a4] ss:$16 sps:$4 sm:$0xff]  }
  0x8d   : > { %8769 = vmatprep.subr.bf16.mxu0 %v16469_v53  ;;  %v16535_v49 = vld [vmem:[%s24857_s1 + $0xba4] ss:$16 sps:$4 sm:$0xff]   ;;  %v16530_v53 = vld [vmem:[%s24857_s1 + $0x5a0] ss:$16 sps:$4 sm:$0xff]  }
  0x8f   : > { %8641 = vmatpush1.bf16.msra.mxu1 %v16464_v58  ;;  %v19419_v58 = vcombine.low %v19251_v47, %v19251_v47  ;;  %v16539_v47 = vld [vmem:[%s24857_s1 + $0xbc0] ss:$16 sps:$4 sm:$0xff]  }
  0x90   : > { %8770 = vmatpush1.bf16.msra.mxu0 %v16467_v59  ;;  %8642 = vmatprep.subr.bf16.mxu1 %v16472_v60  ;;  %v500_v59 = vshll.u32 %v19227_v38, 16  ;;  %v19423_v60 = vld [vmem:[%s18910_s25 + $0x50] sm:$0x11] }
  0x91   : > { %8771 = vmatprep.subr.bf16.mxu0 %v16475_v62  ;;  %v498_v62 = vshrl.u32 %v19227_v38, 16 }
  0x93   : > { %8643 = vmatpush1.bf16.msra.mxu1 %v16470_v0  ;;  %v16536_v0 = vld [vmem:[%s24857_s1 + $0x5c0] ss:$16 sps:$4 sm:$0xff]  }
  0x94   : > { %8772 = vmatpush1.bf16.msra.mxu0 %v16473_v1  ;;  %8644 = vmatprep.subr.bf16.mxu1 %v16478_v2  ;;  %v19437_v1 = vcombine.high %v19423_v60, %v19423_v60  ;;  %v536_v2 = vshll.u32 %v19261_v50, 16 }
  0x95   : > { %8773 = vmatprep.subr.bf16.mxu0 %v16481_v3  ;;  %v16544_v3 = vld [vmem:[%s24857_s1 + $0x5e4] ss:$16 sps:$4 sm:$0xff]  }
  0x97   : > { %8645 = vmatpush1.bf16.msra.mxu1 %v16476_v4  ;;  %v502_v4 = vrot.slane %v500_v59, 1  ;;  %v16589_v59 = vld [vmem:[%s24857_s1 + $0xc8] ss:$16 sps:$4 sm:$0xff]  }
  0x98   : > { %8774 = vmatpush1.bf16.msra.mxu0 %v16479_v5  ;;  %8646 = vmatprep.subr.bf16.mxu1 %v16484_v6  ;;  %v505_v5 = vshll.u32 %v19419_v58, 16  ;;  %v16547_v6 = vld [vmem:[%s24857_s1 + $0xbe4] ss:$16 sps:$4 sm:$0xff]  }
  0x99   : > { %8775 = vmatprep.subr.bf16.mxu0 %v16487_v7  ;;  %v16542_v7 = vld [vmem:[%s24857_s1 + $0x5e0] ss:$16 sps:$4 sm:$0xff]  }
  0x9b   : > { %8647 = vmatpush1.bf16.msra.mxu1 %v16482_v8  ;;  %v16545_v8 = vld [vmem:[%s24857_s1 + $0xbe0] ss:$16 sps:$4 sm:$0xff]  }
  0x9c   : > { %8776 = vmatpush1.bf16.msra.mxu0 %v16485_v9  ;;  %8648 = vmatprep.subr.bf16.mxu1 %v16490_v12  ;;  %v534_v9 = vshrl.u32 %v19261_v50, 16  ;;  %v538_v12 = vrot.slane %v536_v2, 1  ;;  %v16600_v2 = vld [vmem:[%s24857_s1 + $0xd04] ss:$16 sps:$4 sm:$0xff]  }
  0x9d   : > { %8777 = vmatprep.subr.bf16.mxu0 %v16493_v13  ;;  %v541_v13 = vshll.u32 %v19437_v1, 16 }
  0x9f   : > { %8649 = vmatpush1.bf16.msra.mxu1 %v16488_v14  ;;  %v16551_v14 = vld [vmem:[%s24857_s1 + $0xc04] ss:$16 sps:$4 sm:$0xff]  }
  0xa0   : > { %8778 = vmatpush1.bf16.msra.mxu0 %v16491_v15  ;;  %8650 = vmatprep.subr.bf16.mxu1 %v16496_v16  ;;  %v503_v15 = vor.u32 %v502_v4, %v498_v62  ;;  %v507_v16 = vrot.slane %v505_v5, 1  ;;  %v16597_v62 = vld [vmem:[%s24857_s1 + $0xec] ss:$16 sps:$4 sm:$0xff]   ;;  %v16598_v4 = vld [vmem:[%s24857_s1 + $0xd00] ss:$16 sps:$4 sm:$0xff]  }
  0xa1   : > { %8779 = vmatprep.subr.bf16.mxu0 %v16499_v18  ;;  %v16554_v18 = vld [vmem:[%s24857_s1 + $0xc] ss:$16 sps:$4 sm:$0xff]   ;;  %v16601_v5 = vld [vmem:[%s24857_s1 + $0x108] ss:$16 sps:$4 sm:$0xff]  }
  0xa3   : > { %8651 = vmatpush1.bf16.msra.mxu1 %v16494_v19  ;;  %v19463_v19 = vcombine.low %v19242_v37, %v19248_v46  ;;  %v16558_v37 = vld [vmem:[%s24857_s1 + $0xc24] ss:$16 sps:$4 sm:$0xff]   ;;  %v16561_v46 = vld [vmem:[%s24857_s1 + $0x2c] ss:$16 sps:$4 sm:$0xff]  }
  0xa4   : > { %8780 = vmatpush1.bf16.msra.mxu0 %v16497_v20  ;;  %8652 = vmatprep.subr.bf16.mxu1 %v16502_v21  ;;  %v16549_v20 = vld [vmem:[%s24857_s1 + $0xc00] ss:$16 sps:$4 sm:$0xff]   ;;  %v16552_v21 = vld [vmem:[%s24857_s1 + $0x8] ss:$16 sps:$4 sm:$0xff]  }
  0xa5   : > { %8781 = vmatprep.subr.bf16.mxu0 %v16505_v22  ;;  %v539_v22 = vor.u32 %v538_v12, %v534_v9  ;;  %v16607_v9 = vld [vmem:[%s24857_s1 + $0x128] ss:$16 sps:$4 sm:$0xff]   ;;  %v16612_v12 = vld [vmem:[%s24857_s1 + $0xd44] ss:$16 sps:$4 sm:$0xff]  }
  0xa7   : > { %8653 = vmatpush1.bf16.msra.mxu1 %v16500_v23  ;;  %v543_v23 = vrot.slane %v541_v13, 1  ;;  %v16615_v13 = vld [vmem:[%s24857_s1 + $0x14c] ss:$16 sps:$4 sm:$0xff]  }
  0xa8   : > { %8782 = vmatpush1.bf16.msra.mxu0 %v16503_v24  ;;  %8654 = vmatprep.subr.bf16.mxu1 %v16508_v25  ;;  %v19472_v24 = vsel %vm472_vm0, %v503_v15, %v507_v16  ;;  %v16556_v25 = vld [vmem:[%s24857_s1 + $0xc20] ss:$16 sps:$4 sm:$0xff]   ;;  %v16613_v15 = vld [vmem:[%s24857_s1 + $0x148] ss:$16 sps:$4 sm:$0xff]   ;;  %v16618_v16 = vld [vmem:[%s24857_s1 + $0xd64] ss:$16 sps:$4 sm:$0xff]  }
  0xa9   : > { %8783 = vmatprep.subr.bf16.mxu0 %v16511_v26  ;;  %v16559_v26 = vld [vmem:[%s24857_s1 + $0x28] ss:$16 sps:$4 sm:$0xff]  }
  0xab   : > { %8655 = vmatpush1.bf16.msra.mxu1 %v16506_v27  ;;  %v19489_v27 = vsel %vm472_vm0, %v539_v22, %v543_v23  ;;  %v16624_v22 = vld [vmem:[%s24857_s1 + $0xd84] ss:$16 sps:$4 sm:$0xff]   ;;  %v16627_v23 = vld [vmem:[%s24857_s1 + $0x18c] ss:$16 sps:$4 sm:$0xff]  }
  0xac   : > { %8784 = vmatpush1.bf16.msra.mxu0 %v16509_v28  ;;  %8656 = vmatprep.subr.bf16.mxu1 %v16514_v29  ;;  %v16564_v28 = vld [vmem:[%s24857_s1 + $0xc44] ss:$16 sps:$4 sm:$0xff]   ;;  %v16567_v29 = vld [vmem:[%s24857_s1 + $0x4c] ss:$16 sps:$4 sm:$0xff]  }
  0xad   : > { %8785 = vmatprep.subr.bf16.mxu0 %v16517_v30  ;;  %v16562_v30 = vld [vmem:[%s24857_s1 + $0xc40] ss:$16 sps:$4 sm:$0xff]  }
  0xaf   : > { %8657 = vmatpush1.bf16.msra.mxu1 %v16512_v31  ;;  %v16565_v31 = vld [vmem:[%s24857_s1 + $0x48] ss:$16 sps:$4 sm:$0xff]  }
  0xb0   : > { %8786 = vmatpush1.bf16.msra.mxu0 %v16515_v32  ;;  %8658 = vmatprep.subr.bf16.mxu1 %v16520_v33  ;;  %v16570_v32 = vld [vmem:[%s24857_s1 + $0xc64] ss:$16 sps:$4 sm:$0xff]   ;;  %v16568_v33 = vld [vmem:[%s24857_s1 + $0xc60] ss:$16 sps:$4 sm:$0xff]  }
  0xb1   : > { %8787 = vmatprep.subr.bf16.mxu0 %v16523_v34  ;;  %v16571_v34 = vld [vmem:[%s24857_s1 + $0x68] ss:$16 sps:$4 sm:$0xff]  }
  0xb3   : > { %8659 = vmatpush1.bf16.msra.mxu1 %v16518_v35  ;;  %v16576_v35 = vld [vmem:[%s24857_s1 + $0xc84] ss:$16 sps:$4 sm:$0xff]  }
  0xb4   : > { %8788 = vmatpush1.bf16.msra.mxu0 %v16521_v40  ;;  %8660 = vmatprep.subr.bf16.mxu1 %v16526_v41  ;;  %v16579_v40 = vld [vmem:[%s24857_s1 + $0x8c] ss:$16 sps:$4 sm:$0xff]   ;;  %v16574_v41 = vld [vmem:[%s24857_s1 + $0xc80] ss:$16 sps:$4 sm:$0xff]  }
  0xb5   : > { %8789 = vmatprep.subr.bf16.mxu0 %v16529_v36  ;;  %v16577_v36 = vld [vmem:[%s24857_s1 + $0x88] ss:$16 sps:$4 sm:$0xff]  }
  0xb7   : > { %8661 = vmatpush1.bf16.msra.mxu1 %v16524_v43  ;;  %v16582_v43 = vld [vmem:[%s24857_s1 + $0xca4] ss:$16 sps:$4 sm:$0xff]  }
  0xb8   : > { %8790 = vmatpush1.bf16.msra.mxu0 %v16527_v44  ;;  %8662 = vmatprep.subr.bf16.mxu1 %v16532_v48  ;;  %v16585_v44 = vld [vmem:[%s24857_s1 + $0xac] ss:$16 sps:$4 sm:$0xff]   ;;  %v16580_v48 = vld [vmem:[%s24857_s1 + $0xca0] ss:$16 sps:$4 sm:$0xff]  }
  0xb9   : > { %8791 = vmatprep.subr.bf16.mxu0 %v16535_v49  ;;  %v16583_v49 = vld [vmem:[%s24857_s1 + $0xa8] ss:$16 sps:$4 sm:$0xff]  }
  0xbb   : > { %8663 = vmatpush1.bf16.msra.mxu1 %v16530_v53  ;;  %v16588_v53 = vld [vmem:[%s24857_s1 + $0xcc4] ss:$16 sps:$4 sm:$0xff]  }
  0xbc   : > { %8792 = vmatpush1.bf16.msra.mxu0 %v16533_v54  ;;  %8664 = vmatprep.subr.bf16.mxu1 %v16538_v56  ;;  %v16591_v54 = vld [vmem:[%s24857_s1 + $0xcc] ss:$16 sps:$4 sm:$0xff]   ;;  %v16586_v56 = vld [vmem:[%s24857_s1 + $0xcc0] ss:$16 sps:$4 sm:$0xff]  }
  0xbd   : > { %8793 = vmatprep.subr.bf16.mxu0 %v16541_v61  ;;  %v16594_v61 = vld [vmem:[%s24857_s1 + $0xce4] ss:$16 sps:$4 sm:$0xff]  }
  0xbf   : > { %8665 = vmatpush1.bf16.msra.mxu1 %v16536_v0  ;;  %v16592_v0 = vld [vmem:[%s24857_s1 + $0xce0] ss:$16 sps:$4 sm:$0xff]  }
  0xc0   : > { %8794 = vmatpush1.bf16.msra.mxu0 %v16539_v47  ;;  %8666 = vmatprep.subr.bf16.mxu1 %v16544_v3  ;;  %v16595_v47 = vld [vmem:[%s24857_s1 + $0xe8] ss:$16 sps:$4 sm:$0xff]   ;;  %v16603_v3 = vld [vmem:[%s24857_s1 + $0x10c] ss:$16 sps:$4 sm:$0xff]  }
  0xc1   : > { %8795 = vmatprep.subr.bf16.mxu0 %v16547_v6  ;;  %v16606_v6 = vld [vmem:[%s24857_s1 + $0xd24] ss:$16 sps:$4 sm:$0xff]  }
  0xc3   : > { %8667 = vmatpush1.bf16.msra.mxu1 %v16542_v7  ;;  %v16609_v7 = vld [vmem:[%s24857_s1 + $0x12c] ss:$16 sps:$4 sm:$0xff]  }
  0xc4   : > { %8796 = vmatpush1.bf16.msra.mxu0 %v16545_v8  ;;  %9410 = vmatprep.subr.bf16.mxu1 %v16554_v18  ;;  %v16604_v8 = vld [vmem:[%s24857_s1 + $0xd20] ss:$16 sps:$4 sm:$0xff]   ;;  %v16621_v18 = vld [vmem:[%s24857_s1 + $0x16c] ss:$16 sps:$4 sm:$0xff]  }
  0xc5   : > { %8808 = vmatprep.subr.bf16.mxu0 %v16551_v14  ;;  %v16610_v14 = vld [vmem:[%s24857_s1 + $0xd40] ss:$16 sps:$4 sm:$0xff]  }
  0xc6   : > { %8669 = vmatmul.mubr.bf16.vlgmr.msra.gmra.mrb[0].mxu1 %v19463_v19 }
  0xc7   : > { %8798 = vmatmul.mubr.bf16.vlgmr.msra.gmra.mrb[0].mxu0 %v19472_v24  ;;  %9411 = vmatpush1.bf16.msra.mxu1 %v16552_v21  ;;  %v16619_v21 = vld [vmem:[%s24857_s1 + $0x168] ss:$16 sps:$4 sm:$0xff]  }
  0xc8   : > { %8809 = vmatpush1.bf16.msra.mxu0 %v16549_v20  ;;  %9412 = vmatprep.subr.bf16.mxu1 %v16561_v46  ;;  %v16616_v20 = vld [vmem:[%s24857_s1 + $0xd60] ss:$16 sps:$4 sm:$0xff]   ;;  %v16625_v46 = vld [vmem:[%s24857_s1 + $0x188] ss:$16 sps:$4 sm:$0xff]  }
  0xc9   : > { %8810 = vmatprep.subr.bf16.mxu0 %v16558_v37  ;;  %8840 = vmatprep.mubr.bf16.mxu0 %v19489_v27  ;;  %v16622_v37 = vld [vmem:[%s24857_s1 + $0xd80] ss:$16 sps:$4 sm:$0xff]  }
  0xca   : > { %9442 = vmatprep.mubr.bf16.mxu1 %v18932_v52  ;;  %v16573_v52 = vld [vmem:[%s24857_s1 + $0x6c] ss:$16 sps:$4 sm:$0xff]  }
  0xcb   : > { %9413 = vmatpush1.bf16.msra.mxu1 %v16559_v26  ;;  %v16633_v26 = vld [vmem:[%s24857_s1 + $0x1ac] ss:$16 sps:$4 sm:$0xff]  }
  0xcc   : > { %8811 = vmatpush1.bf16.msra.mxu0 %v16556_v25  ;;  %9414 = vmatprep.subr.bf16.mxu1 %v16567_v29  ;;  %v16630_v25 = vld [vmem:[%s24857_s1 + $0xda4] ss:$16 sps:$4 sm:$0xff]   ;;  %v16631_v29 = vld [vmem:[%s24857_s1 + $0x1a8] ss:$16 sps:$4 sm:$0xff]  }
  0xcd   : > { %8812 = vmatprep.subr.bf16.mxu0 %v16564_v28  ;;  %v16628_v28 = vld [vmem:[%s24857_s1 + $0xda0] ss:$16 sps:$4 sm:$0xff]  }
  0xcf   : > { %9415 = vmatpush1.bf16.msra.mxu1 %v16565_v31  ;;  %v524_v31 = vshll.u32 %v19463_v19, 16 }
  0xd0   : > { %8813 = vmatpush1.bf16.msra.mxu0 %v16562_v30  ;;  %9416 = vmatprep.subr.bf16.mxu1 %v16573_v52  ;;  %v19639_v30 = vcombine.low %v19423_v60, %v19423_v60  ;;  %v16636_v52 = vld [vmem:[%s24857_s1 + $0xdc4] ss:$16 sps:$4 sm:$0xff]   ;;  %v522_v60 = vshrl.u32 %v19463_v19, 16 }
  0xd1   : > { %8814 = vmatprep.subr.bf16.mxu0 %v16570_v32  ;;  %v19643_v32 = vld [vmem:[%s18910_s25 + $0x58] sm:$0x11] }
  0xd3   : > { %9417 = vmatpush1.bf16.msra.mxu1 %v16571_v34  ;;  %v16634_v34 = vld [vmem:[%s24857_s1 + $0xdc0] ss:$16 sps:$4 sm:$0xff]  }
  0xd4   : > { %8815 = vmatpush1.bf16.msra.mxu0 %v16568_v33  ;;  %9418 = vmatprep.subr.bf16.mxu1 %v16579_v40  ;;  %v16639_v33 = vld [vmem:[%s24857_s1 + $0x1cc] ss:$16 sps:$4 sm:$0xff]   ;;  %v560_v40 = vshll.u32 %v18937_v55, 16 }
  0xd5   : > { %8816 = vmatprep.subr.bf16.mxu0 %v16576_v35  ;;  %v19657_v35 = vcombine.high %v19643_v32, %v19643_v32 }
  0xd7   : > { %9419 = vmatpush1.bf16.msra.mxu1 %v16577_v36  ;;  %v526_v36 = vrot.slane %v524_v31, 1  ;;  %v16686_v31 = vld [vmem:[%s24857_s1 + $0xec4] ss:$16 sps:$4 sm:$0xff]  }
  0xd8   : > { %8817 = vmatpush1.bf16.msra.mxu0 %v16574_v41  ;;  %9420 = vmatprep.subr.bf16.mxu1 %v16585_v44  ;;  %v16637_v41 = vld [vmem:[%s24857_s1 + $0x1c8] ss:$16 sps:$4 sm:$0xff]   ;;  %v16642_v44 = vld [vmem:[%s24857_s1 + $0xde4] ss:$16 sps:$4 sm:$0xff]  }
  0xd9   : > { %8818 = vmatprep.subr.bf16.mxu0 %v16582_v43  ;;  %v529_v43 = vshll.u32 %v19639_v30, 16 }
  0xdb   : > { %9421 = vmatpush1.bf16.msra.mxu1 %v16583_v49  ;;  %v16640_v49 = vld [vmem:[%s24857_s1 + $0xde0] ss:$16 sps:$4 sm:$0xff]  }
  0xdc   : > { %8819 = vmatpush1.bf16.msra.mxu0 %v16580_v48  ;;  %9422 = vmatprep.subr.bf16.mxu1 %v16591_v54  ;;  %v16645_v48 = vld [vmem:[%s24857_s1 + $0x1ec] ss:$16 sps:$4 sm:$0xff]   ;;  %v562_v54 = vrot.slane %v560_v40, 1 }
  0xdd   : > { %8820 = vmatprep.subr.bf16.mxu0 %v16588_v53  ;;  %v558_v53 = vshrl.u32 %v18937_v55, 16  ;;  %v16695_v40 = vld [vmem:[%s24857_s1 + $0x2ec] ss:$16 sps:$4 sm:$0xff]  }
  0xdf   : > { %9423 = vmatpush1.bf16.msra.mxu1 %v16589_v59  ;;  %v16643_v59 = vld [vmem:[%s24857_s1 + $0x1e8] ss:$16 sps:$4 sm:$0xff]  }
  0xe0   : > { %8821 = vmatpush1.bf16.msra.mxu0 %v16586_v56  ;;  %9424 = vmatprep.subr.bf16.mxu1 %v16597_v62  ;;  %v565_v56 = vshll.u32 %v19657_v35, 16  ;;  %v531_v62 = vrot.slane %v529_v43, 1  ;;  %v16698_v43 = vld [vmem:[%s24857_s1 + $0xf04] ss:$16 sps:$4 sm:$0xff]  }
  0xe1   : > { %8822 = vmatprep.subr.bf16.mxu0 %v16594_v61  ;;  %v527_v61 = vor.u32 %v526_v36, %v522_v60  ;;  %v16692_v60 = vld [vmem:[%s24857_s1 + $0xee4] ss:$16 sps:$4 sm:$0xff]   ;;  %v16693_v36 = vld [vmem:[%s24857_s1 + $0x2e8] ss:$16 sps:$4 sm:$0xff]  }
  0xe3   : > { %9425 = vmatpush1.bf16.msra.mxu1 %v16595_v47  ;;  %v16652_v47 = vld [vmem:[%s24857_s1 + $0x20c] ss:$16 sps:$4 sm:$0xff]  }
  0xe4   : > { %8823 = vmatpush1.bf16.msra.mxu0 %v16592_v0  ;;  %9426 = vmatprep.subr.bf16.mxu1 %v16603_v3  ;;  %v16649_v0 = vld [vmem:[%s24857_s1 + $0xe04] ss:$16 sps:$4 sm:$0xff]   ;;  %v563_v3 = vor.u32 %v562_v54, %v558_v53  ;;  %v16707_v54 = vld [vmem:[%s24857_s1 + $0x32c] ss:$16 sps:$4 sm:$0xff]  }
  0xe5   : > { %8824 = vmatprep.subr.bf16.mxu0 %v16600_v2  ;;  %v16647_v2 = vld [vmem:[%s24857_s1 + $0xe00] ss:$16 sps:$4 sm:$0xff]   ;;  %v16704_v53 = vld [vmem:[%s24857_s1 + $0xf24] ss:$16 sps:$4 sm:$0xff]  }
  0xe7   : > { %9427 = vmatpush1.bf16.msra.mxu1 %v16601_v5  ;;  %v16650_v5 = vld [vmem:[%s24857_s1 + $0x208] ss:$16 sps:$4 sm:$0xff]  }
  0xe8   : > { %8825 = vmatpush1.bf16.msra.mxu0 %v16598_v4  ;;  %9428 = vmatprep.subr.bf16.mxu1 %v16609_v7  ;;  %v567_v4 = vrot.slane %v565_v56, 1  ;;  %v16656_v7 = vld [vmem:[%s24857_s1 + $0xe24] ss:$16 sps:$4 sm:$0xff]   ;;  %v16702_v56 = vld [vmem:[%s24857_s1 + $0xf20] ss:$16 sps:$4 sm:$0xff]  }
  0xe9   : > { %8826 = vmatprep.subr.bf16.mxu0 %v16606_v6  ;;  %v19691_v6 = vsel %vm472_vm0, %v527_v61, %v531_v62  ;;  %v16710_v61 = vld [vmem:[%s24857_s1 + $0xf44] ss:$16 sps:$4 sm:$0xff]   ;;  %v16713_v62 = vld [vmem:[%s24857_s1 + $0x34c] ss:$16 sps:$4 sm:$0xff]  }
  0xeb   : > { %9429 = vmatpush1.bf16.msra.mxu1 %v16607_v9  ;;  %v19702_v9 = vsel %vm472_vm0, %v563_v3, %v567_v4  ;;  %v16719_v3 = vld [vmem:[%s24857_s1 + $0x36c] ss:$16 sps:$4 sm:$0xff]   ;;  %v16714_v4 = vld [vmem:[%s24857_s1 + $0xf60] ss:$16 sps:$4 sm:$0xff]  }
  0xec   : > { %8827 = vmatpush1.bf16.msra.mxu0 %v16604_v8  ;;  %9430 = vmatprep.subr.bf16.mxu1 %v16615_v13  ;;  %v16659_v8 = vld [vmem:[%s24857_s1 + $0x22c] ss:$16 sps:$4 sm:$0xff]   ;;  %v16657_v13 = vld [vmem:[%s24857_s1 + $0x228] ss:$16 sps:$4 sm:$0xff]  }
  0xed   : > { %8828 = vmatprep.subr.bf16.mxu0 %v16612_v12  ;;  %v16654_v12 = vld [vmem:[%s24857_s1 + $0xe20] ss:$16 sps:$4 sm:$0xff]  }
  0xef   : > { %9431 = vmatpush1.bf16.msra.mxu1 %v16613_v15  ;;  %v16660_v15 = vld [vmem:[%s24857_s1 + $0xe40] ss:$16 sps:$4 sm:$0xff]  }
  0xf0   : > { %8829 = vmatpush1.bf16.msra.mxu0 %v16610_v14  ;;  %9432 = vmatprep.subr.bf16.mxu1 %v16621_v18  ;;  %v16662_v14 = vld [vmem:[%s24857_s1 + $0xe44] ss:$16 sps:$4 sm:$0xff]  }
  0xf1   : > { %8830 = vmatprep.subr.bf16.mxu0 %v16618_v16  ;;  %v16663_v16 = vld [vmem:[%s24857_s1 + $0x248] ss:$16 sps:$4 sm:$0xff]   ;;  %v16668_v18 = vld [vmem:[%s24857_s1 + $0xe64] ss:$16 sps:$4 sm:$0xff]  }
  0xf3   : > { %9433 = vmatpush1.bf16.msra.mxu1 %v16619_v21  ;;  %v16669_v21 = vld [vmem:[%s24857_s1 + $0x268] ss:$16 sps:$4 sm:$0xff]  }
  0xf4   : > { %8831 = vmatpush1.bf16.msra.mxu0 %v16616_v20  ;;  %9434 = vmatprep.subr.bf16.mxu1 %v16627_v23  ;;  %v16666_v20 = vld [vmem:[%s24857_s1 + $0xe60] ss:$16 sps:$4 sm:$0xff]   ;;  %v16677_v23 = vld [vmem:[%s24857_s1 + $0x28c] ss:$16 sps:$4 sm:$0xff]  }
  0xf5   : > { %8832 = vmatprep.subr.bf16.mxu0 %v16624_v22  ;;  %v16674_v22 = vld [vmem:[%s24857_s1 + $0xe84] ss:$16 sps:$4 sm:$0xff]  }
  0xf7   : > { %9435 = vmatpush1.bf16.msra.mxu1 %v16625_v46  ;;  %v16675_v46 = vld [vmem:[%s24857_s1 + $0x288] ss:$16 sps:$4 sm:$0xff]  }
  0xf8   : > { %8833 = vmatpush1.bf16.msra.mxu0 %v16622_v37  ;;  %9436 = vmatprep.subr.bf16.mxu1 %v16633_v26  ;;  %v16672_v37 = vld [vmem:[%s24857_s1 + $0xe80] ss:$16 sps:$4 sm:$0xff]   ;;  %v16683_v26 = vld [vmem:[%s24857_s1 + $0x2ac] ss:$16 sps:$4 sm:$0xff]  }
  0xf9   : > { %8834 = vmatprep.subr.bf16.mxu0 %v16630_v25  ;;  %v16680_v25 = vld [vmem:[%s24857_s1 + $0xea4] ss:$16 sps:$4 sm:$0xff]  }
  0xfb   : > { %9437 = vmatpush1.bf16.msra.mxu1 %v16631_v29  ;;  %v16681_v29 = vld [vmem:[%s24857_s1 + $0x2a8] ss:$16 sps:$4 sm:$0xff]  }
  0xfc   : > { %8835 = vmatpush1.bf16.msra.mxu0 %v16628_v28  ;;  %9438 = vmatprep.subr.bf16.mxu1 %v16639_v33  ;;  %v16678_v28 = vld [vmem:[%s24857_s1 + $0xea0] ss:$16 sps:$4 sm:$0xff]  }
  0xfd   : > { %8836 = vmatprep.subr.bf16.mxu0 %v16636_v52  ;;  %v16689_v52 = vld [vmem:[%s24857_s1 + $0x2cc] ss:$16 sps:$4 sm:$0xff]   ;;  %v16684_v33 = vld [vmem:[%s24857_s1 + $0xec0] ss:$16 sps:$4 sm:$0xff]  }
  0xff   : > { %9439 = vmatpush1.bf16.msra.mxu1 %v16637_v41  ;;  %v16690_v41 = vld [vmem:[%s24857_s1 + $0xee0] ss:$16 sps:$4 sm:$0xff]  }
 0x100   : > { %8837 = vmatpush1.bf16.msra.mxu0 %v16634_v34  ;;  %9440 = vmatprep.subr.bf16.mxu1 %v16645_v48  ;;  %v16687_v34 = vld [vmem:[%s24857_s1 + $0x2c8] ss:$16 sps:$4 sm:$0xff]   ;;  %v16696_v48 = vld [vmem:[%s24857_s1 + $0xf00] ss:$16 sps:$4 sm:$0xff]  }
 0x101   : > { %8838 = vmatprep.subr.bf16.mxu0 %v16642_v44  ;;  %v16701_v44 = vld [vmem:[%s24857_s1 + $0x30c] ss:$16 sps:$4 sm:$0xff]  }
 0x103   : > { %9441 = vmatpush1.bf16.msra.mxu1 %v16643_v59  ;;  %v16705_v59 = vld [vmem:[%s24857_s1 + $0x328] ss:$16 sps:$4 sm:$0xff]  }
 0x104   : > { %8839 = vmatpush1.bf16.msra.mxu0 %v16640_v49  ;;  %9453 = vmatprep.subr.bf16.mxu1 %v16652_v47  ;;  %v16699_v49 = vld [vmem:[%s24857_s1 + $0x308] ss:$16 sps:$4 sm:$0xff]  }
 0x105   : > { %8851 = vmatprep.subr.bf16.mxu0 %v16649_v0  ;;  %v16708_v0 = vld [vmem:[%s24857_s1 + $0xf40] ss:$16 sps:$4 sm:$0xff]   ;;  %v16711_v47 = vld [vmem:[%s24857_s1 + $0x348] ss:$16 sps:$4 sm:$0xff]  }
 0x106   : > { %9443 = vmatmul.mubr.bf16.vlgmr.msra.gmra.mrb[4].mxu1 %v18994_v10  ;;  %v16665_v10 = vld [vmem:[%s24857_s1 + $0x24c] ss:$16 sps:$4 sm:$0xff]  }
 0x107   : > { %8841 = vmatmul.mubr.bf16.vlgmr.msra.gmra.mrb[0].mxu0 %v19691_v6  ;;  %9454 = vmatpush1.bf16.msra.mxu1 %v16650_v5  ;;  %v16717_v5 = vld [vmem:[%s24857_s1 + $0x368] ss:$16 sps:$4 sm:$0xff]  }
 0x108   : > { %8852 = vmatpush1.bf16.msra.mxu0 %v16647_v2  ;;  %9455 = vmatprep.subr.bf16.mxu1 %v16659_v8  ;;  %v16716_v2 = vld [vmem:[%s24857_s1 + $0xf64] ss:$16 sps:$4 sm:$0xff]   ;;  %v16725_v8 = vld [vmem:[%s24857_s1 + $0x38c] ss:$16 sps:$4 sm:$0xff]  }
 0x109   : > { %8853 = vmatprep.subr.bf16.mxu0 %v16656_v7  ;;  %8883 = vmatprep.mubr.bf16.mxu0 %v19702_v9  ;;  %v16722_v7 = vld [vmem:[%s24857_s1 + $0xf84] ss:$16 sps:$4 sm:$0xff]  }
 0x10a   : > { %9485 = vmatprep.mubr.bf16.mxu1 %v19085_v42  ;;  %v16671_v42 = vld [vmem:[%s24857_s1 + $0x26c] ss:$16 sps:$4 sm:$0xff]  }
 0x10b   : > { %9456 = vmatpush1.bf16.msra.mxu1 %v16657_v13  ;;  %v16723_v13 = vld [vmem:[%s24857_s1 + $0x388] ss:$16 sps:$4 sm:$0xff]  }
 0x10c   : > { %8854 = vmatpush1.bf16.msra.mxu0 %v16654_v12  ;;  %9457 = vmatprep.subr.bf16.mxu1 %v16665_v10  ;;  %v16720_v12 = vld [vmem:[%s24857_s1 + $0xf80] ss:$16 sps:$4 sm:$0xff]   ;;  %v16731_v10 = vld [vmem:[%s24857_s1 + $0x3ac] ss:$16 sps:$4 sm:$0xff]  }
 0x10d   : > { %8855 = vmatprep.subr.bf16.mxu0 %v16662_v14  ;;  %v16728_v14 = vld [vmem:[%s24857_s1 + $0xfa4] ss:$16 sps:$4 sm:$0xff]  }
 0x10f   : > { %9458 = vmatpush1.bf16.msra.mxu1 %v16663_v16  ;;  %v16726_v16 = vld [vmem:[%s24857_s1 + $0xfa0] ss:$16 sps:$4 sm:$0xff]  }
 0x110   : > { %8856 = vmatpush1.bf16.msra.mxu0 %v16660_v15  ;;  %9459 = vmatprep.subr.bf16.mxu1 %v16671_v42  ;;  %v548_v15 = vshll.u32 %v18996_v11, 16  ;;  %v19859_v42 = vcombine.low %v19643_v32, %v19643_v32  ;;  %v16735_v32 = vld [vmem:[%s24857_s1 + $0x3c8] ss:$16 sps:$4 sm:$0xff]  }
 0x111   : > { %8857 = vmatprep.subr.bf16.mxu0 %v16668_v18  ;;  %v16729_v18 = vld [vmem:[%s24857_s1 + $0x3a8] ss:$16 sps:$4 sm:$0xff]  }
 0x113   : > { %9460 = vmatpush1.bf16.msra.mxu1 %v16669_v21  ;;  %v16737_v21 = vld [vmem:[%s24857_s1 + $0x3cc] ss:$16 sps:$4 sm:$0xff]  }
 0x114   : > { %8858 = vmatpush1.bf16.msra.mxu0 %v16666_v20  ;;  %9461 = vmatprep.subr.bf16.mxu1 %v16677_v23  ;;  %v16734_v20 = vld [vmem:[%s24857_s1 + $0xfc4] ss:$16 sps:$4 sm:$0xff]   ;;  %v546_v23 = vshrl.u32 %v18996_v11, 16 }
 0x115   : > { %8859 = vmatprep.subr.bf16.mxu0 %v16674_v22  ;;  %v16732_v22 = vld [vmem:[%s24857_s1 + $0xfc0] ss:$16 sps:$4 sm:$0xff]  }
 0x117   : > { %9462 = vmatpush1.bf16.msra.mxu1 %v16675_v46  ;;  %v553_v46 = vshll.u32 %v19859_v42, 16 }
 0x118   : > { %8860 = vmatpush1.bf16.msra.mxu0 %v16672_v37  ;;  %9463 = vmatprep.subr.bf16.mxu1 %v16683_v26  ;;  %v550_v37 = vrot.slane %v548_v15, 1  ;;  %v16740_v26 = vld [vmem:[%s24857_s1 + $0xfe4] ss:$16 sps:$4 sm:$0xff]  }
 0x119   : > { %8861 = vmatprep.subr.bf16.mxu0 %v16680_v25  ;;  %v19876_v25 = vld [vmem:[%s18910_s25] sm:$0xee] }
 0x11a   : > { %v16784_v15 = vld [vmem:[%s24857_s1 + $0x10c4] ss:$16 sps:$4 sm:$0xff]  }
 0x11b   : > { %9464 = vmatpush1.bf16.msra.mxu1 %v16681_v29  ;;  %v19885_v29 = vld [vmem:[%s18910_s25 + $0x20] sm:$0xff] }
 0x11c   : > { %8862 = vmatpush1.bf16.msra.mxu0 %v16678_v28  ;;  %9465 = vmatprep.subr.bf16.mxu1 %v16689_v52  ;;  %v16743_v28 = vld [vmem:[%s24857_s1 + $0x3ec] ss:$16 sps:$4 sm:$0xff]   ;;  %v16738_v52 = vld [vmem:[%s24857_s1 + $0xfe0] ss:$16 sps:$4 sm:$0xff]  }
 0x11d   : > { %8863 = vmatprep.subr.bf16.mxu0 %v16686_v31  ;;  %v19889_v31 = vcombine.high %v19876_v25, %v19885_v29 }
 0x11f   : > { %9466 = vmatpush1.bf16.msra.mxu1 %v16687_v34  ;;  %v551_v34 = vor.u32 %v550_v37, %v546_v23  ;;  %v16788_v23 = vld [vmem:[%s24857_s1 + $0x10e0] ss:$16 sps:$4 sm:$0xff]   ;;  %v16791_v37 = vld [vmem:[%s24857_s1 + $0x4e8] ss:$16 sps:$4 sm:$0xff]  }
 0x120   : > { %8864 = vmatpush1.bf16.msra.mxu0 %v16684_v33  ;;  %9467 = vmatprep.subr.bf16.mxu1 %v16695_v40  ;;  %v16741_v33 = vld [vmem:[%s24857_s1 + $0x3e8] ss:$16 sps:$4 sm:$0xff]   ;;  %v16747_v40 = vld [vmem:[%s24857_s1 + $0x1004] ss:$16 sps:$4 sm:$0xff]  }
 0x121   : > { %8865 = vmatprep.subr.bf16.mxu0 %v16692_v60  ;;  %v555_v60 = vrot.slane %v553_v46, 1  ;;  %v16799_v46 = vld [vmem:[%s24857_s1 + $0x50c] ss:$16 sps:$4 sm:$0xff]  }
 0x123   : > { %9468 = vmatpush1.bf16.msra.mxu1 %v16693_v36  ;;  %v601_v36 = vrot.slane %v19889_v31, 1 }
 0x124   : > { %8866 = vmatpush1.bf16.msra.mxu0 %v16690_v41  ;;  %9469 = vmatprep.subr.bf16.mxu1 %v16701_v44  ;;  %v16750_v41 = vld [vmem:[%s24857_s1 + $0x40c] ss:$16 sps:$4 sm:$0xff]   ;;  %v16745_v44 = vld [vmem:[%s24857_s1 + $0x1000] ss:$16 sps:$4 sm:$0xff]  }
 0x125   : > { %8867 = vmatprep.subr.bf16.mxu0 %v16698_v43  ;;  %v602_v43 = vrot.slane %v19095_v45, 1  ;;  %v16754_v45 = vld [vmem:[%s24857_s1 + $0x1024] ss:$16 sps:$4 sm:$0xff]  }
 0x127   : > { %9470 = vmatpush1.bf16.msra.mxu1 %v16699_v49  ;;  %v19912_v49 = vsel %vm472_vm0, %v551_v34, %v555_v60  ;;  %v16800_v34 = vld [vmem:[%s24857_s1 + $0x1120] ss:$16 sps:$4 sm:$0xff]   ;;  %v16803_v60 = vld [vmem:[%s24857_s1 + $0x528] ss:$16 sps:$4 sm:$0xff]  }
 0x128   : > { %8868 = vmatpush1.bf16.msra.mxu0 %v16696_v48  ;;  %9471 = vmatprep.subr.bf16.mxu1 %v16707_v54  ;;  %v16748_v48 = vld [vmem:[%s24857_s1 + $0x408] ss:$16 sps:$4 sm:$0xff]   ;;  %v19923_v54 = vsel %vm597_vm1, %v601_v36, %v602_v43  ;;  %v16806_v36 = vld [vmem:[%s24857_s1 + $0x1140] ss:$16 sps:$4 sm:$0xff]  }
 0x129   : > { %8869 = vmatprep.subr.bf16.mxu0 %v16704_v53  ;;  %v16757_v53 = vld [vmem:[%s24857_s1 + $0x42c] ss:$16 sps:$4 sm:$0xff]   ;;  %v16809_v43 = vld [vmem:[%s24857_s1 + $0x548] ss:$16 sps:$4 sm:$0xff]  }
 0x12b   : > { %9472 = vmatpush1.bf16.msra.mxu1 %v16705_v59  ;;  %v16755_v59 = vld [vmem:[%s24857_s1 + $0x428] ss:$16 sps:$4 sm:$0xff]  }
 0x12c   : > { %8870 = vmatpush1.bf16.msra.mxu0 %v16702_v56  ;;  %9473 = vmatprep.subr.bf16.mxu1 %v16713_v62  ;;  %v16752_v56 = vld [vmem:[%s24857_s1 + $0x1020] ss:$16 sps:$4 sm:$0xff]  }
 0x12d   : > { %8871 = vmatprep.subr.bf16.mxu0 %v16710_v61  ;;  %v16760_v61 = vld [vmem:[%s24857_s1 + $0x1044] ss:$16 sps:$4 sm:$0xff]   ;;  %v16758_v62 = vld [vmem:[%s24857_s1 + $0x1040] ss:$16 sps:$4 sm:$0xff]  }
 0x12f   : > { %9474 = vmatpush1.bf16.msra.mxu1 %v16711_v47  ;;  %v16766_v47 = vld [vmem:[%s24857_s1 + $0x1064] ss:$16 sps:$4 sm:$0xff]  }
 0x130   : > { %8872 = vmatpush1.bf16.msra.mxu0 %v16708_v0  ;;  %9475 = vmatprep.subr.bf16.mxu1 %v16719_v3  ;;  %v16761_v0 = vld [vmem:[%s24857_s1 + $0x448] ss:$16 sps:$4 sm:$0xff]  }
 0x131   : > { %8873 = vmatprep.subr.bf16.mxu0 %v16716_v2  ;;  %v16764_v2 = vld [vmem:[%s24857_s1 + $0x1060] ss:$16 sps:$4 sm:$0xff]   ;;  %v16767_v3 = vld [vmem:[%s24857_s1 + $0x468] ss:$16 sps:$4 sm:$0xff]  }
 0x133   : > { %9476 = vmatpush1.bf16.msra.mxu1 %v16717_v5  ;;  %v16775_v5 = vld [vmem:[%s24857_s1 + $0x48c] ss:$16 sps:$4 sm:$0xff]  }
 0x134   : > { %8874 = vmatpush1.bf16.msra.mxu0 %v16714_v4  ;;  %9477 = vmatprep.subr.bf16.mxu1 %v16725_v8  ;;  %v16772_v4 = vld [vmem:[%s24857_s1 + $0x1084] ss:$16 sps:$4 sm:$0xff]   ;;  %v16773_v8 = vld [vmem:[%s24857_s1 + $0x488] ss:$16 sps:$4 sm:$0xff]  }
 0x135   : > { %8875 = vmatprep.subr.bf16.mxu0 %v16722_v7  ;;  %v16770_v7 = vld [vmem:[%s24857_s1 + $0x1080] ss:$16 sps:$4 sm:$0xff]  }
 0x137   : > { %9478 = vmatpush1.bf16.msra.mxu1 %v16723_v13  ;;  %v16781_v13 = vld [vmem:[%s24857_s1 + $0x4ac] ss:$16 sps:$4 sm:$0xff]  }
 0x138   : > { %8876 = vmatpush1.bf16.msra.mxu0 %v16720_v12  ;;  %9479 = vmatprep.subr.bf16.mxu1 %v16731_v10  ;;  %v16778_v12 = vld [vmem:[%s24857_s1 + $0x10a4] ss:$16 sps:$4 sm:$0xff]   ;;  %v16779_v10 = vld [vmem:[%s24857_s1 + $0x4a8] ss:$16 sps:$4 sm:$0xff]  }
 0x139   : > { %8877 = vmatprep.subr.bf16.mxu0 %v16728_v14  ;;  %v16776_v14 = vld [vmem:[%s24857_s1 + $0x10a0] ss:$16 sps:$4 sm:$0xff]  }
 0x13b   : > { %9480 = vmatpush1.bf16.msra.mxu1 %v16729_v18  ;;  %v16782_v18 = vld [vmem:[%s24857_s1 + $0x10c0] ss:$16 sps:$4 sm:$0xff]  }
 0x13c   : > { %8878 = vmatpush1.bf16.msra.mxu0 %v16726_v16  ;;  %9481 = vmatprep.subr.bf16.mxu1 %v16737_v21  ;;  %v16787_v16 = vld [vmem:[%s24857_s1 + $0x4cc] ss:$16 sps:$4 sm:$0xff]   ;;  %v16790_v21 = vld [vmem:[%s24857_s1 + $0x10e4] ss:$16 sps:$4 sm:$0xff]  }
 0x13d   : > { %8879 = vmatprep.subr.bf16.mxu0 %v16734_v20  ;;  %v16785_v20 = vld [vmem:[%s24857_s1 + $0x4c8] ss:$16 sps:$4 sm:$0xff]  }
 0x13f   : > { %9482 = vmatpush1.bf16.msra.mxu1 %v16735_v32  ;;  %v16796_v32 = vld [vmem:[%s24857_s1 + $0x1104] ss:$16 sps:$4 sm:$0xff]  }
 0x140   : > { %8880 = vmatpush1.bf16.msra.mxu0 %v16732_v22  ;;  %9483 = vmatprep.subr.bf16.mxu1 %v16743_v28  ;;  %v16793_v22 = vld [vmem:[%s24857_s1 + $0x4ec] ss:$16 sps:$4 sm:$0xff]   ;;  %v16797_v28 = vld [vmem:[%s24857_s1 + $0x508] ss:$16 sps:$4 sm:$0xff]  }
 0x141   : > { %8881 = vmatprep.subr.bf16.mxu0 %v16740_v26  ;;  %v16794_v26 = vld [vmem:[%s24857_s1 + $0x1100] ss:$16 sps:$4 sm:$0xff]  }
 0x143   : > { %9484 = vmatpush1.bf16.msra.mxu1 %v16741_v33  ;;  %v16805_v33 = vld [vmem:[%s24857_s1 + $0x52c] ss:$16 sps:$4 sm:$0xff]  }
 0x144   : > { %8882 = vmatpush1.bf16.msra.mxu0 %v16738_v52  ;;  %9496 = vmatprep.subr.bf16.mxu1 %v16750_v41  ;;  %v16802_v52 = vld [vmem:[%s24857_s1 + $0x1124] ss:$16 sps:$4 sm:$0xff]   ;;  %v16811_v41 = vld [vmem:[%s24857_s1 + $0x54c] ss:$16 sps:$4 sm:$0xff]  }
 0x145   : > { %8894 = vmatprep.subr.bf16.mxu0 %v16747_v40  ;;  %v16808_v40 = vld [vmem:[%s24857_s1 + $0x1144] ss:$16 sps:$4 sm:$0xff]  }
 0x146   : > { %9486 = vmatmul.mubr.bf16.vlgmr.msra.gmra.mrb[4].mxu1 %v19227_v38  ;;  %v16763_v38 = vld [vmem:[%s24857_s1 + $0x44c] ss:$16 sps:$4 sm:$0xff]  }
 0x147   : > { %8884 = vmatmul.mubr.bf16.vlgmr.msra.gmra.mrb[0].mxu0 %v19912_v49  ;;  %9497 = vmatpush1.bf16.msra.mxu1 %v16748_v48  ;;  %v16817_v48 = vld [vmem:[%s24857_s1 + $0x56c] ss:$16 sps:$4 sm:$0xff]  }
 0x148   : > { %8895 = vmatpush1.bf16.msra.mxu0 %v16745_v44  ;;  %9498 = vmatprep.subr.bf16.mxu1 %v16757_v53  ;;  %v16814_v44 = vld [vmem:[%s24857_s1 + $0x1164] ss:$16 sps:$4 sm:$0xff]   ;;  %v16815_v53 = vld [vmem:[%s24857_s1 + $0x568] ss:$16 sps:$4 sm:$0xff]  }
 0x149   : > { %8896 = vmatprep.subr.bf16.mxu0 %v16754_v45  ;;  %8926 = vmatprep.mubr.bf16.mxu0 %v19923_v54  ;;  %v16812_v45 = vld [vmem:[%s24857_s1 + $0x1160] ss:$16 sps:$4 sm:$0xff]  }
 0x14a   : > { %9528 = vmatprep.mubr.bf16.mxu1 %v19261_v50  ;;  %v16769_v50 = vld [vmem:[%s24857_s1 + $0x46c] ss:$16 sps:$4 sm:$0xff]  }
 0x14b   : > { %9499 = vmatpush1.bf16.msra.mxu1 %v16755_v59  ;;  %v16823_v59 = vld [vmem:[%s24857_s1 + $0x58c] ss:$16 sps:$4 sm:$0xff]  }
 0x14c   : > { %8897 = vmatpush1.bf16.msra.mxu0 %v16752_v56  ;;  %9500 = vmatprep.subr.bf16.mxu1 %v16763_v38  ;;  %v16820_v56 = vld [vmem:[%s24857_s1 + $0x1184] ss:$16 sps:$4 sm:$0xff]   ;;  %v16821_v38 = vld [vmem:[%s24857_s1 + $0x588] ss:$16 sps:$4 sm:$0xff]  }
 0x14d   : > { %8898 = vmatprep.subr.bf16.mxu0 %v16760_v61  ;;  %v16818_v61 = vld [vmem:[%s24857_s1 + $0x1180] ss:$16 sps:$4 sm:$0xff]  }
 0x14f   : > { %9501 = vmatpush1.bf16.msra.mxu1 %v16761_v0  ;;  %v16829_v0 = vld [vmem:[%s24857_s1 + $0x5ac] ss:$16 sps:$4 sm:$0xff]  }
 0x150   : > { %8899 = vmatpush1.bf16.msra.mxu0 %v16758_v62  ;;  %9502 = vmatprep.subr.bf16.mxu1 %v16769_v50  ;;  %v16826_v62 = vld [vmem:[%s24857_s1 + $0x11a4] ss:$16 sps:$4 sm:$0xff]   ;;  %v16827_v50 = vld [vmem:[%s24857_s1 + $0x5a8] ss:$16 sps:$4 sm:$0xff]  }
 0x151   : > { %8900 = vmatprep.subr.bf16.mxu0 %v16766_v47  ;;  %v16824_v47 = vld [vmem:[%s24857_s1 + $0x11a0] ss:$16 sps:$4 sm:$0xff]  }
 0x153   : > { %9503 = vmatpush1.bf16.msra.mxu1 %v16767_v3  ;;  %v16835_v3 = vld [vmem:[%s24857_s1 + $0x5cc] ss:$16 sps:$4 sm:$0xff]  }
 0x154   : > { %8901 = vmatpush1.bf16.msra.mxu0 %v16764_v2  ;;  %9504 = vmatprep.subr.bf16.mxu1 %v16775_v5  ;;  %v16832_v2 = vld [vmem:[%s24857_s1 + $0x11c4] ss:$16 sps:$4 sm:$0xff]   ;;  %v16833_v5 = vld [vmem:[%s24857_s1 + $0x5c8] ss:$16 sps:$4 sm:$0xff]  }
 0x155   : > { %8902 = vmatprep.subr.bf16.mxu0 %v16772_v4  ;;  %v16830_v4 = vld [vmem:[%s24857_s1 + $0x11c0] ss:$16 sps:$4 sm:$0xff]  }
 0x157   : > { %9505 = vmatpush1.bf16.msra.mxu1 %v16773_v8  ;;  %v20094_v8 = vld [vmem:[%s18910_s25 + $0x8] sm:$0xee] }
 0x158   : > { %8903 = vmatpush1.bf16.msra.mxu0 %v16770_v7  ;;  %9506 = vmatprep.subr.bf16.mxu1 %v16781_v13  ;;  %v20091_v7 = vcombine.low %v19876_v25, %v19885_v29  ;;  %v16841_v13 = vld [vmem:[%s24857_s1 + $0x5ec] ss:$16 sps:$4 sm:$0xff]   ;;  %v16836_v29 = vld [vmem:[%s24857_s1 + $0x11e0] ss:$16 sps:$4 sm:$0xff]  }
 0x159   : > { %8904 = vmatprep.subr.bf16.mxu0 %v16778_v12  ;;  %v16838_v12 = vld [vmem:[%s24857_s1 + $0x11e4] ss:$16 sps:$4 sm:$0xff]  }
 0x15b   : > { %9507 = vmatpush1.bf16.msra.mxu1 %v16779_v10  ;;  %v20104_v10 = vld [vmem:[%s18910_s25 + $0x28] sm:$0xff] }
 0x15c   : > { %8905 = vmatpush1.bf16.msra.mxu0 %v16776_v14  ;;  %9508 = vmatprep.subr.bf16.mxu1 %v16787_v16  ;;  %v599_v14 = vrot.slane %v19186_v17, 1  ;;  %v20108_v25 = vcombine.high %v20094_v8, %v20104_v10  ;;  %v598_v16 = vrot.slane %v20091_v7, 1  ;;  %v16844_v17 = vld [vmem:[%s24857_s1 + $0x1204] ss:$16 sps:$4 sm:$0xff]  }
 0x15d   : > { %8906 = vmatprep.subr.bf16.mxu0 %v16784_v15  ;;  %v16839_v15 = vld [vmem:[%s24857_s1 + $0x5e8] ss:$16 sps:$4 sm:$0xff]  }
 0x15f   : > { %9509 = vmatpush1.bf16.msra.mxu1 %v16785_v20  ;;  %v607_v20 = vrot.slane %v20108_v25, 1 }
 0x160   : > { %8907 = vmatpush1.bf16.msra.mxu0 %v16782_v18  ;;  %9510 = vmatprep.subr.bf16.mxu1 %v16793_v22  ;;  %v16847_v18 = vld [vmem:[%s24857_s1 + $0x60c] ss:$16 sps:$4 sm:$0xff]   ;;  %v16842_v22 = vld [vmem:[%s24857_s1 + $0x1200] ss:$16 sps:$4 sm:$0xff]  }
 0x161   : > { %8908 = vmatprep.subr.bf16.mxu0 %v16790_v21  ;;  %v608_v21 = vrot.slane %v19265_v51, 1  ;;  %v16853_v51 = vld [vmem:[%s24857_s1 + $0x62c] ss:$16 sps:$4 sm:$0xff]  }
 0x163   : > { %9511 = vmatpush1.bf16.msra.mxu1 %v16791_v37  ;;  %v20132_v37 = vsel %vm597_vm1, %v598_v16, %v599_v14  ;;  %v16892_v14 = vld [vmem:[%s24857_s1 + $0x1304] ss:$16 sps:$4 sm:$0xff]   ;;  %v16893_v16 = vld [vmem:[%s24857_s1 + $0x708] ss:$16 sps:$4 sm:$0xff]  }
 0x164   : > { %8909 = vmatpush1.bf16.msra.mxu0 %v16788_v23  ;;  %9512 = vmatprep.subr.bf16.mxu1 %v16799_v46  ;;  %v16845_v23 = vld [vmem:[%s24857_s1 + $0x608] ss:$16 sps:$4 sm:$0xff]   ;;  %v20143_v46 = vsel %vm597_vm1, %v607_v20, %v608_v21  ;;  %v16896_v20 = vld [vmem:[%s24857_s1 + $0x1320] ss:$16 sps:$4 sm:$0xff]  }
 0x165   : > { %8910 = vmatprep.subr.bf16.mxu0 %v16796_v32  ;;  %v16850_v32 = vld [vmem:[%s24857_s1 + $0x1224] ss:$16 sps:$4 sm:$0xff]   ;;  %v16899_v21 = vld [vmem:[%s24857_s1 + $0x728] ss:$16 sps:$4 sm:$0xff]  }
 0x167   : > { %9513 = vmatpush1.bf16.msra.mxu1 %v16797_v28  ;;  %v16851_v28 = vld [vmem:[%s24857_s1 + $0x628] ss:$16 sps:$4 sm:$0xff]  }
 0x168   : > { %8911 = vmatpush1.bf16.msra.mxu0 %v16794_v26  ;;  %9514 = vmatprep.subr.bf16.mxu1 %v16805_v33  ;;  %v16848_v26 = vld [vmem:[%s24857_s1 + $0x1220] ss:$16 sps:$4 sm:$0xff]  }
 0x169   : > { %8912 = vmatprep.subr.bf16.mxu0 %v16802_v52  ;;  %v16856_v52 = vld [vmem:[%s24857_s1 + $0x1244] ss:$16 sps:$4 sm:$0xff]   ;;  %v16854_v33 = vld [vmem:[%s24857_s1 + $0x1240] ss:$16 sps:$4 sm:$0xff]  }
 0x16b   : > { %9515 = vmatpush1.bf16.msra.mxu1 %v16803_v60  ;;  %v16862_v60 = vld [vmem:[%s24857_s1 + $0x1264] ss:$16 sps:$4 sm:$0xff]  }
 0x16c   : > { %8913 = vmatpush1.bf16.msra.mxu0 %v16800_v34  ;;  %9516 = vmatprep.subr.bf16.mxu1 %v16811_v41  ;;  %v16857_v34 = vld [vmem:[%s24857_s1 + $0x648] ss:$16 sps:$4 sm:$0xff]  }
 0x16d   : > { %8914 = vmatprep.subr.bf16.mxu0 %v16808_v40  ;;  %v16860_v40 = vld [vmem:[%s24857_s1 + $0x1260] ss:$16 sps:$4 sm:$0xff]   ;;  %v16863_v41 = vld [vmem:[%s24857_s1 + $0x668] ss:$16 sps:$4 sm:$0xff]  }
 0x16f   : > { %9517 = vmatpush1.bf16.msra.mxu1 %v16809_v43  ;;  %v16871_v43 = vld [vmem:[%s24857_s1 + $0x68c] ss:$16 sps:$4 sm:$0xff]  }
 0x170   : > { %8915 = vmatpush1.bf16.msra.mxu0 %v16806_v36  ;;  %9518 = vmatprep.subr.bf16.mxu1 %v16817_v48  ;;  %v16868_v36 = vld [vmem:[%s24857_s1 + $0x1284] ss:$16 sps:$4 sm:$0xff]   ;;  %v16869_v48 = vld [vmem:[%s24857_s1 + $0x688] ss:$16 sps:$4 sm:$0xff]  }
 0x171   : > { %8916 = vmatprep.subr.bf16.mxu0 %v16814_v44  ;;  %v16866_v44 = vld [vmem:[%s24857_s1 + $0x1280] ss:$16 sps:$4 sm:$0xff]  }
 0x173   : > { %9519 = vmatpush1.bf16.msra.mxu1 %v16815_v53  ;;  %v16877_v53 = vld [vmem:[%s24857_s1 + $0x6ac] ss:$16 sps:$4 sm:$0xff]  }
 0x174   : > { %8917 = vmatpush1.bf16.msra.mxu0 %v16812_v45  ;;  %9520 = vmatprep.subr.bf16.mxu1 %v16823_v59  ;;  %v16874_v45 = vld [vmem:[%s24857_s1 + $0x12a4] ss:$16 sps:$4 sm:$0xff]   ;;  %v16875_v59 = vld [vmem:[%s24857_s1 + $0x6a8] ss:$16 sps:$4 sm:$0xff]  }
 0x175   : > { %8918 = vmatprep.subr.bf16.mxu0 %v16820_v56  ;;  %v16872_v56 = vld [vmem:[%s24857_s1 + $0x12a0] ss:$16 sps:$4 sm:$0xff]  }
 0x177   : > { %9521 = vmatpush1.bf16.msra.mxu1 %v16821_v38  ;;  %v16883_v38 = vld [vmem:[%s24857_s1 + $0x6cc] ss:$16 sps:$4 sm:$0xff]  }
 0x178   : > { %8919 = vmatpush1.bf16.msra.mxu0 %v16818_v61  ;;  %9522 = vmatprep.subr.bf16.mxu1 %v16829_v0  ;;  %v16880_v61 = vld [vmem:[%s24857_s1 + $0x12c4] ss:$16 sps:$4 sm:$0xff]  }
 0x179   : > { %8920 = vmatprep.subr.bf16.mxu0 %v16826_v62 }
 0x17b   : > { %9523 = vmatpush1.bf16.msra.mxu1 %v16827_v50  ;;  %v16878_v50 = vld [vmem:[%s24857_s1 + $0x12c0] ss:$16 sps:$4 sm:$0xff]  }
 0x17c   : > { %8921 = vmatpush1.bf16.msra.mxu0 %v16824_v47  ;;  %9524 = vmatprep.subr.bf16.mxu1 %v16835_v3 }
 0x17d   : > { %8922 = vmatprep.subr.bf16.mxu0 %v16832_v2  ;;  %v16881_v2 = vld [vmem:[%s24857_s1 + $0x6c8] ss:$16 sps:$4 sm:$0xff]  }
 0x17f   : > { %9525 = vmatpush1.bf16.msra.mxu1 %v16833_v5  ;;  %v16889_v5 = vld [vmem:[%s24857_s1 + $0x6ec] ss:$16 sps:$4 sm:$0xff]  }
 0x180   : > { %8923 = vmatpush1.bf16.msra.mxu0 %v16830_v4  ;;  %9526 = vmatprep.subr.bf16.mxu1 %v16841_v13  ;;  %v16886_v4 = vld [vmem:[%s24857_s1 + $0x12e4] ss:$16 sps:$4 sm:$0xff]   ;;  %v16887_v13 = vld [vmem:[%s24857_s1 + $0x6e8] ss:$16 sps:$4 sm:$0xff]  }
 0x181   : > { %8924 = vmatprep.subr.bf16.mxu0 %v16838_v12  ;;  %v16884_v12 = vld [vmem:[%s24857_s1 + $0x12e0] ss:$16 sps:$4 sm:$0xff]  }
 0x183   : > { %9527 = vmatpush1.bf16.msra.mxu1 %v16839_v15  ;;  %v16890_v15 = vld [vmem:[%s24857_s1 + $0x1300] ss:$16 sps:$4 sm:$0xff]  }
 0x184   : > { %8925 = vmatpush1.bf16.msra.mxu0 %v16836_v29  ;;  %9539 = vmatprep.subr.bf16.mxu1 %v16847_v18  ;;  %v16895_v29 = vld [vmem:[%s24857_s1 + $0x70c] ss:$16 sps:$4 sm:$0xff]  }
 0x185   : > { %8937 = vmatprep.subr.bf16.mxu0 %v16844_v17  ;;  %v16898_v17 = vld [vmem:[%s24857_s1 + $0x1324] ss:$16 sps:$4 sm:$0xff]   ;;  %v16901_v18 = vld [vmem:[%s24857_s1 + $0x72c] ss:$16 sps:$4 sm:$0xff]  }
 0x186   : > { %9529 = vmatmul.mubr.bf16.vlgmr.msra.gmra.mrb[4].mxu1 %v19463_v19  ;;  %v16859_v19 = vld [vmem:[%s24857_s1 + $0x64c] ss:$16 sps:$4 sm:$0xff]  }
 0x187   : > { %8927 = vmatmul.mubr.bf16.vlgmr.msra.gmra.mrb[0].mxu0 %v20132_v37  ;;  %9540 = vmatpush1.bf16.msra.mxu1 %v16845_v23  ;;  %v16907_v23 = vld [vmem:[%s24857_s1 + $0x74c] ss:$16 sps:$4 sm:$0xff]  }
 0x188   : > { %8938 = vmatpush1.bf16.msra.mxu0 %v16842_v22  ;;  %9541 = vmatprep.subr.bf16.mxu1 %v16853_v51  ;;  %v16904_v22 = vld [vmem:[%s24857_s1 + $0x1344] ss:$16 sps:$4 sm:$0xff]   ;;  %v16905_v51 = vld [vmem:[%s24857_s1 + $0x748] ss:$16 sps:$4 sm:$0xff]  }
 0x189   : > { %8939 = vmatprep.subr.bf16.mxu0 %v16850_v32  ;;  %8969 = vmatprep.mubr.bf16.mxu0 %v20143_v46  ;;  %v16902_v32 = vld [vmem:[%s24857_s1 + $0x1340] ss:$16 sps:$4 sm:$0xff]  }
 0x18a   : > { %9571 = vmatprep.mubr.bf16.mxu1 %v18937_v55  ;;  %v16865_v55 = vld [vmem:[%s24857_s1 + $0x66c] ss:$16 sps:$4 sm:$0xff]  }
 0x18b   : > { %9542 = vmatpush1.bf16.msra.mxu1 %v16851_v28  ;;  %v16913_v28 = vld [vmem:[%s24857_s1 + $0x76c] ss:$16 sps:$4 sm:$0xff]  }
 0x18c   : > { %8940 = vmatpush1.bf16.msra.mxu0 %v16848_v26  ;;  %9543 = vmatprep.subr.bf16.mxu1 %v16859_v19  ;;  %v16910_v26 = vld [vmem:[%s24857_s1 + $0x1364] ss:$16 sps:$4 sm:$0xff]   ;;  %v16911_v19 = vld [vmem:[%s24857_s1 + $0x768] ss:$16 sps:$4 sm:$0xff]  }
 0x18d   : > { %8941 = vmatprep.subr.bf16.mxu0 %v16856_v52  ;;  %v16908_v52 = vld [vmem:[%s24857_s1 + $0x1360] ss:$16 sps:$4 sm:$0xff]  }
 0x18f   : > { %9544 = vmatpush1.bf16.msra.mxu1 %v16857_v34  ;;  %v16919_v34 = vld [vmem:[%s24857_s1 + $0x78c] ss:$16 sps:$4 sm:$0xff]  }
 0x190   : > { %8942 = vmatpush1.bf16.msra.mxu0 %v16854_v33  ;;  %9545 = vmatprep.subr.bf16.mxu1 %v16865_v55  ;;  %v16916_v33 = vld [vmem:[%s24857_s1 + $0x1384] ss:$16 sps:$4 sm:$0xff]   ;;  %v16917_v55 = vld [vmem:[%s24857_s1 + $0x788] ss:$16 sps:$4 sm:$0xff]  }
 0x191   : > { %8943 = vmatprep.subr.bf16.mxu0 %v16862_v60  ;;  %v16914_v60 = vld [vmem:[%s24857_s1 + $0x1380] ss:$16 sps:$4 sm:$0xff]  }
 0x193   : > { %9546 = vmatpush1.bf16.msra.mxu1 %v16863_v41  ;;  %v16925_v41 = vld [vmem:[%s24857_s1 + $0x7ac] ss:$16 sps:$4 sm:$0xff]  }
 0x194   : > { %8944 = vmatpush1.bf16.msra.mxu0 %v16860_v40  ;;  %9547 = vmatprep.subr.bf16.mxu1 %v16871_v43  ;;  %v16922_v40 = vld [vmem:[%s24857_s1 + $0x13a4] ss:$16 sps:$4 sm:$0xff]   ;;  %v16923_v43 = vld [vmem:[%s24857_s1 + $0x7a8] ss:$16 sps:$4 sm:$0xff]  }
 0x195   : > { %8945 = vmatprep.subr.bf16.mxu0 %v16868_v36  ;;  %v16920_v36 = vld [vmem:[%s24857_s1 + $0x13a0] ss:$16 sps:$4 sm:$0xff]  }
 0x197   : > { %9548 = vmatpush1.bf16.msra.mxu1 %v16869_v48  ;;  %v16931_v48 = vld [vmem:[%s24857_s1 + $0x7cc] ss:$16 sps:$4 sm:$0xff]  }
 0x198   : > { %8946 = vmatpush1.bf16.msra.mxu0 %v16866_v44  ;;  %9549 = vmatprep.subr.bf16.mxu1 %v16877_v53  ;;  %v16928_v44 = vld [vmem:[%s24857_s1 + $0x13c4] ss:$16 sps:$4 sm:$0xff]   ;;  %v16929_v53 = vld [vmem:[%s24857_s1 + $0x7c8] ss:$16 sps:$4 sm:$0xff]  }
 0x199   : > { %8947 = vmatprep.subr.bf16.mxu0 %v16874_v45  ;;  %v20207_v62 = vpop.f32.mrb[0].mxu1  ;;  %v16926_v45 = vld [vmem:[%s24857_s1 + $0x13c0] ss:$16 sps:$4 sm:$0xff]  }
 0x19a   : > { %v20209_v0 = vpop.f32.mrb[1].mxu1 }
 0x19b   : > { %v20211_v47 = vpop.f32.mrb[2].mxu1  ;;  %9550 = vmatpush1.bf16.msra.mxu1 %v16875_v59  ;;  %v20322_v59 = vld [vmem:[%s18910_s25 + $0x10] sm:$0xee] }
 0x19c   : > { %8948 = vmatpush1.bf16.msra.mxu0 %v16872_v56  ;;  %v20219_v3 = vpop.f32.mrb[3].mxu1  ;;  %9551 = vmatprep.subr.bf16.mxu1 %v16883_v38  ;;  %v20319_v56 = vcombine.low %v20094_v8, %v20104_v10  ;;  %v16937_v38 = vld [vmem:[%s24857_s1 + $0x7ec] ss:$16 sps:$4 sm:$0xff]   ;;  %v16935_v10 = vld [vmem:[%s24857_s1 + $0x7e8] ss:$16 sps:$4 sm:$0xff]  }
 0x19d   : > { %8949 = vmatprep.subr.bf16.mxu0 %v16880_v61  ;;  %v16934_v61 = vld [vmem:[%s24857_s1 + $0x13e4] ss:$16 sps:$4 sm:$0xff]  }
 0x19f   : > { %9552 = vmatpush1.bf16.msra.mxu1 %v16881_v2  ;;  %v20334_v2 = vld [vmem:[%s18910_s25 + $0x30] sm:$0xff] }
 0x1a0   : > { %8950 = vmatpush1.bf16.msra.mxu0 %v16878_v50  ;;  %9553 = vmatprep.subr.bf16.mxu1 %v16889_v5  ;;  %v16932_v50 = vld [vmem:[%s24857_s1 + $0x13e0] ss:$16 sps:$4 sm:$0xff]   ;;  %v20338_v8 = vcombine.high %v20322_v59, %v20334_v2  ;;  %v605_v5 = vrot.slane %v19419_v58, 1 }
 0x1a1   : > { %8951 = vmatprep.subr.bf16.mxu0 %v16886_v4  ;;  %v604_v4 = vrot.slane %v20319_v56, 1  ;;  %v16938_v58 = vld [vmem:[%s24857_s1 + $0x1400] ss:$16 sps:$4 sm:$0xff]  }
 0x1a3   : > { %9554 = vmatpush1.bf16.msra.mxu1 %v16887_v13  ;;  %v16943_v13 = vld [vmem:[%s24857_s1 + $0x80c] ss:$16 sps:$4 sm:$0xff]  }
 0x1a4   : > { %8952 = vmatpush1.bf16.msra.mxu0 %v16884_v12  ;;  %9555 = vmatprep.subr.bf16.mxu1 %v16895_v29  ;;  %v16940_v12 = vld [vmem:[%s24857_s1 + $0x1404] ss:$16 sps:$4 sm:$0xff]   ;;  %v614_v29 = vrot.slane %v19437_v1, 1  ;;  %v16949_v1 = vld [vmem:[%s24857_s1 + $0x82c] ss:$16 sps:$4 sm:$0xff]  }
 0x1a5   : > { %8953 = vmatprep.subr.bf16.mxu0 %v16892_v14  ;;  %v613_v14 = vrot.slane %v20338_v8, 1 }
 0x1a7   : > { %9556 = vmatpush1.bf16.msra.mxu1 %v16893_v16  ;;  %v20360_v16 = vsel %vm597_vm1, %v604_v4, %v605_v5  ;;  %v16986_v4 = vld [vmem:[%s24857_s1 + $0x1500] ss:$16 sps:$4 sm:$0xff]   ;;  %v16989_v5 = vld [vmem:[%s24857_s1 + $0x908] ss:$16 sps:$4 sm:$0xff]  }
 0x1a8   : > { %8954 = vmatpush1.bf16.msra.mxu0 %v16890_v15  ;;  %9557 = vmatprep.subr.bf16.mxu1 %v16901_v18  ;;  %v16941_v15 = vld [vmem:[%s24857_s1 + $0x808] ss:$16 sps:$4 sm:$0xff]   ;;  %v20371_v18 = vsel %vm597_vm1, %v613_v14, %v614_v29  ;;  %v16992_v14 = vld [vmem:[%s24857_s1 + $0x1520] ss:$16 sps:$4 sm:$0xff]  }
 0x1a9   : > { %8955 = vmatprep.subr.bf16.mxu0 %v16898_v17  ;;  %v16946_v17 = vld [vmem:[%s24857_s1 + $0x1424] ss:$16 sps:$4 sm:$0xff]   ;;  %v16995_v29 = vld [vmem:[%s24857_s1 + $0x928] ss:$16 sps:$4 sm:$0xff]  }
 0x1ab   : > { %9558 = vmatpush1.bf16.msra.mxu1 %v16899_v21  ;;  %v16947_v21 = vld [vmem:[%s24857_s1 + $0x828] ss:$16 sps:$4 sm:$0xff]  }
 0x1ac   : > { %8956 = vmatpush1.bf16.msra.mxu0 %v16896_v20  ;;  %9559 = vmatprep.subr.bf16.mxu1 %v16907_v23  ;;  %v16944_v20 = vld [vmem:[%s24857_s1 + $0x1420] ss:$16 sps:$4 sm:$0xff]  }
 0x1ad   : > { %8957 = vmatprep.subr.bf16.mxu0 %v16904_v22  ;;  %v16952_v22 = vld [vmem:[%s24857_s1 + $0x1444] ss:$16 sps:$4 sm:$0xff]   ;;  %v16950_v23 = vld [vmem:[%s24857_s1 + $0x1440] ss:$16 sps:$4 sm:$0xff]  }
 0x1af   : > { %9560 = vmatpush1.bf16.msra.mxu1 %v16905_v51  ;;  %v16958_v51 = vld [vmem:[%s24857_s1 + $0x1464] ss:$16 sps:$4 sm:$0xff]  }
 0x1b0   : > { %8958 = vmatpush1.bf16.msra.mxu0 %v16902_v32  ;;  %9561 = vmatprep.subr.bf16.mxu1 %v16913_v28  ;;  %v16953_v32 = vld [vmem:[%s24857_s1 + $0x848] ss:$16 sps:$4 sm:$0xff]  }
 0x1b1   : > { %8959 = vmatprep.subr.bf16.mxu0 %v16910_v26  ;;  %v16956_v26 = vld [vmem:[%s24857_s1 + $0x1460] ss:$16 sps:$4 sm:$0xff]   ;;  %v16959_v28 = vld [vmem:[%s24857_s1 + $0x868] ss:$16 sps:$4 sm:$0xff]  }
 0x1b3   : > { %9562 = vmatpush1.bf16.msra.mxu1 %v16911_v19  ;;  %v16967_v19 = vld [vmem:[%s24857_s1 + $0x88c] ss:$16 sps:$4 sm:$0xff]  }
 0x1b4   : > { %8960 = vmatpush1.bf16.msra.mxu0 %v16908_v52  ;;  %9563 = vmatprep.subr.bf16.mxu1 %v16919_v34  ;;  %v16964_v52 = vld [vmem:[%s24857_s1 + $0x1484] ss:$16 sps:$4 sm:$0xff]   ;;  %v16965_v34 = vld [vmem:[%s24857_s1 + $0x888] ss:$16 sps:$4 sm:$0xff]  }
 0x1b5   : > { %8961 = vmatprep.subr.bf16.mxu0 %v16916_v33  ;;  %v16962_v33 = vld [vmem:[%s24857_s1 + $0x1480] ss:$16 sps:$4 sm:$0xff]  }
 0x1b7   : > { %9564 = vmatpush1.bf16.msra.mxu1 %v16917_v55  ;;  %v16973_v55 = vld [vmem:[%s24857_s1 + $0x8ac] ss:$16 sps:$4 sm:$0xff]  }
 0x1b8   : > { %8962 = vmatpush1.bf16.msra.mxu0 %v16914_v60  ;;  %9565 = vmatprep.subr.bf16.mxu1 %v16925_v41  ;;  %v16970_v60 = vld [vmem:[%s24857_s1 + $0x14a4] ss:$16 sps:$4 sm:$0xff]   ;;  %v16971_v41 = vld [vmem:[%s24857_s1 + $0x8a8] ss:$16 sps:$4 sm:$0xff]  }
 0x1b9   : > { %8963 = vmatprep.subr.bf16.mxu0 %v16922_v40  ;;  %v16968_v40 = vld [vmem:[%s24857_s1 + $0x14a0] ss:$16 sps:$4 sm:$0xff]  }
 0x1bb   : > { %9566 = vmatpush1.bf16.msra.mxu1 %v16923_v43  ;;  %v16979_v43 = vld [vmem:[%s24857_s1 + $0x8cc] ss:$16 sps:$4 sm:$0xff]  }
 0x1bc   : > { %8964 = vmatpush1.bf16.msra.mxu0 %v16920_v36  ;;  %9567 = vmatprep.subr.bf16.mxu1 %v16931_v48  ;;  %v16976_v36 = vld [vmem:[%s24857_s1 + $0x14c4] ss:$16 sps:$4 sm:$0xff]   ;;  %v16977_v48 = vld [vmem:[%s24857_s1 + $0x8c8] ss:$16 sps:$4 sm:$0xff]  }
 0x1bd   : > { %8965 = vmatprep.subr.bf16.mxu0 %v16928_v44  ;;  %v16974_v44 = vld [vmem:[%s24857_s1 + $0x14c0] ss:$16 sps:$4 sm:$0xff]  }
 0x1bf   : > { %9568 = vmatpush1.bf16.msra.mxu1 %v16929_v53  ;;  %v16985_v53 = vld [vmem:[%s24857_s1 + $0x8ec] ss:$16 sps:$4 sm:$0xff]  }
 0x1c0   : > { %8966 = vmatpush1.bf16.msra.mxu0 %v16926_v45  ;;  %9569 = vmatprep.subr.bf16.mxu1 %v16937_v38  ;;  %v16982_v45 = vld [vmem:[%s24857_s1 + $0x14e4] ss:$16 sps:$4 sm:$0xff]   ;;  %v16983_v38 = vld [vmem:[%s24857_s1 + $0x8e8] ss:$16 sps:$4 sm:$0xff]  }
 0x1c1   : > { %8967 = vmatprep.subr.bf16.mxu0 %v16934_v61  ;;  %v16980_v61 = vld [vmem:[%s24857_s1 + $0x14e0] ss:$16 sps:$4 sm:$0xff]  }
 0x1c3   : > { %9570 = vmatpush1.bf16.msra.mxu1 %v16935_v10  ;;  %v16991_v10 = vld [vmem:[%s24857_s1 + $0x90c] ss:$16 sps:$4 sm:$0xff]  }
 0x1c4   : > { %8968 = vmatpush1.bf16.msra.mxu0 %v16932_v50  ;;  %9582 = vmatprep.subr.bf16.mxu1 %v16943_v13  ;;  %v16988_v50 = vld [vmem:[%s24857_s1 + $0x1504] ss:$16 sps:$4 sm:$0xff]   ;;  %v16997_v13 = vld [vmem:[%s24857_s1 + $0x92c] ss:$16 sps:$4 sm:$0xff]  }
 0x1c5   : > { %8980 = vmatprep.subr.bf16.mxu0 %v16940_v12  ;;  %v16994_v12 = vld [vmem:[%s24857_s1 + $0x1524] ss:$16 sps:$4 sm:$0xff]  }
 0x1c6   : > { %9572 = vmatmul.mubr.bf16.vlgmr.msra.gmra.mrb[4].mxu1 %v18996_v11  ;;  %v16955_v11 = vld [vmem:[%s24857_s1 + $0x84c] ss:$16 sps:$4 sm:$0xff]  }
 0x1c7   : > { %8970 = vmatmul.mubr.bf16.vlgmr.msra.gmra.mrb[0].mxu0 %v20360_v16  ;;  %9583 = vmatpush1.bf16.msra.mxu1 %v16941_v15  ;;  %v17003_v15 = vld [vmem:[%s24857_s1 + $0x94c] ss:$16 sps:$4 sm:$0xff]  }
 0x1c8   : > { %8981 = vmatpush1.bf16.msra.mxu0 %v16938_v58  ;;  %9584 = vmatprep.subr.bf16.mxu1 %v16949_v1  ;;  %v17000_v58 = vld [vmem:[%s24857_s1 + $0x1544] ss:$16 sps:$4 sm:$0xff]   ;;  %v17001_v1 = vld [vmem:[%s24857_s1 + $0x948] ss:$16 sps:$4 sm:$0xff]  }
 0x1c9   : > { %8982 = vmatprep.subr.bf16.mxu0 %v16946_v17  ;;  %9012 = vmatprep.mubr.bf16.mxu0 %v20371_v18  ;;  %v16998_v17 = vld [vmem:[%s24857_s1 + $0x1540] ss:$16 sps:$4 sm:$0xff]  }
 0x1ca   : > { %9614 = vmatprep.mubr.bf16.mxu1 %v19118_v57  ;;  %v16961_v57 = vld [vmem:[%s24857_s1 + $0x86c] ss:$16 sps:$4 sm:$0xff]  }
 0x1cb   : > { %9585 = vmatpush1.bf16.msra.mxu1 %v16947_v21  ;;  %v17009_v21 = vld [vmem:[%s24857_s1 + $0x96c] ss:$16 sps:$4 sm:$0xff]  }
 0x1cc   : > { %8983 = vmatpush1.bf16.msra.mxu0 %v16944_v20  ;;  %9586 = vmatprep.subr.bf16.mxu1 %v16955_v11  ;;  %v17006_v20 = vld [vmem:[%s24857_s1 + $0x1564] ss:$16 sps:$4 sm:$0xff]   ;;  %v17007_v11 = vld [vmem:[%s24857_s1 + $0x968] ss:$16 sps:$4 sm:$0xff]  }
 0x1cd   : > { %8984 = vmatprep.subr.bf16.mxu0 %v16952_v22  ;;  %v17004_v22 = vld [vmem:[%s24857_s1 + $0x1560] ss:$16 sps:$4 sm:$0xff]  }
 0x1cf   : > { %9587 = vmatpush1.bf16.msra.mxu1 %v16953_v32  ;;  %v17015_v32 = vld [vmem:[%s24857_s1 + $0x98c] ss:$16 sps:$4 sm:$0xff]  }
 0x1d0   : > { %8985 = vmatpush1.bf16.msra.mxu0 %v16950_v23  ;;  %9588 = vmatprep.subr.bf16.mxu1 %v16961_v57  ;;  %v17012_v23 = vld [vmem:[%s24857_s1 + $0x1584] ss:$16 sps:$4 sm:$0xff]   ;;  %v17013_v57 = vld [vmem:[%s24857_s1 + $0x988] ss:$16 sps:$4 sm:$0xff]  }
 0x1d1   : > { %8986 = vmatprep.subr.bf16.mxu0 %v16958_v51  ;;  %v17010_v51 = vld [vmem:[%s24857_s1 + $0x1580] ss:$16 sps:$4 sm:$0xff]  }
 0x1d3   : > { %9589 = vmatpush1.bf16.msra.mxu1 %v16959_v28  ;;  %v17021_v28 = vld [vmem:[%s24857_s1 + $0x9ac] ss:$16 sps:$4 sm:$0xff]  }
 0x1d4   : > { %8987 = vmatpush1.bf16.msra.mxu0 %v16956_v26  ;;  %9590 = vmatprep.subr.bf16.mxu1 %v16967_v19  ;;  %v17018_v26 = vld [vmem:[%s24857_s1 + $0x15a4] ss:$16 sps:$4 sm:$0xff]   ;;  %v17019_v19 = vld [vmem:[%s24857_s1 + $0x9a8] ss:$16 sps:$4 sm:$0xff]  }
 0x1d5   : > { %8988 = vmatprep.subr.bf16.mxu0 %v16964_v52  ;;  %v17016_v52 = vld [vmem:[%s24857_s1 + $0x15a0] ss:$16 sps:$4 sm:$0xff]  }
 0x1d7   : > { %9591 = vmatpush1.bf16.msra.mxu1 %v16965_v34  ;;  %v17027_v34 = vld [vmem:[%s24857_s1 + $0x9cc] ss:$16 sps:$4 sm:$0xff]  }
 0x1d8   : > { %8989 = vmatpush1.bf16.msra.mxu0 %v16962_v33  ;;  %9592 = vmatprep.subr.bf16.mxu1 %v16973_v55  ;;  %v17024_v33 = vld [vmem:[%s24857_s1 + $0x15c4] ss:$16 sps:$4 sm:$0xff]   ;;  %v17025_v55 = vld [vmem:[%s24857_s1 + $0x9c8] ss:$16 sps:$4 sm:$0xff]  }
 0x1d9   : > { %8990 = vmatprep.subr.bf16.mxu0 %v16970_v60  ;;  %v17022_v60 = vld [vmem:[%s24857_s1 + $0x15c0] ss:$16 sps:$4 sm:$0xff]  }
 0x1db   : > { %9593 = vmatpush1.bf16.msra.mxu1 %v16971_v41  ;;  %v20542_v41 = vld [vmem:[%s18910_s25 + $0x18] sm:$0xee] }
 0x1dc   : > { %8991 = vmatpush1.bf16.msra.mxu0 %v16968_v40  ;;  %9594 = vmatprep.subr.bf16.mxu1 %v16979_v43  ;;  %v20539_v40 = vcombine.low %v20322_v59, %v20334_v2  ;;  %v17033_v43 = vld [vmem:[%s24857_s1 + $0x9ec] ss:$16 sps:$4 sm:$0xff]   ;;  %v17028_v59 = vld [vmem:[%s24857_s1 + $0x15e0] ss:$16 sps:$4 sm:$0xff]   ;;  %v17031_v2 = vld [vmem:[%s24857_s1 + $0x9e8] ss:$16 sps:$4 sm:$0xff]  }
 0x1dd   : > { %8992 = vmatprep.subr.bf16.mxu0 %v16976_v36  ;;  %v17030_v36 = vld [vmem:[%s24857_s1 + $0x15e4] ss:$16 sps:$4 sm:$0xff]  }
 0x1df   : > { %9595 = vmatpush1.bf16.msra.mxu1 %v16977_v48 }
 0x1e0   : > { %8993 = vmatpush1.bf16.msra.mxu0 %v16974_v44  ;;  %9596 = vmatprep.subr.bf16.mxu1 %v16985_v53  ;;  %v20551_v44 = vld [vmem:[%s18910_s25 + $0x38] sm:$0xff]  ;;  %v611_v53 = vrot.slane %v19639_v30, 1  ;;  %v17034_v30 = vld [vmem:[%s24857_s1 + $0x1600] ss:$16 sps:$4 sm:$0xff]  }
 0x1e1   : > { %8994 = vmatprep.subr.bf16.mxu0 %v16982_v45  ;;  %v20555_v48 = vcombine.high %v20542_v41, %v20551_v44  ;;  %v610_v45 = vrot.slane %v20539_v40, 1 }
 0x1e3   : > { %9597 = vmatpush1.bf16.msra.mxu1 %v16983_v38  ;;  %v17039_v38 = vld [vmem:[%s24857_s1 + $0xa0c] ss:$16 sps:$4 sm:$0xff]  }
 0x1e4   : > { %8995 = vmatpush1.bf16.msra.mxu0 %v16980_v61  ;;  %9598 = vmatprep.subr.bf16.mxu1 %v16991_v10  ;;  %v17036_v61 = vld [vmem:[%s24857_s1 + $0x1604] ss:$16 sps:$4 sm:$0xff]   ;;  %v620_v10 = vrot.slane %v19657_v35, 1  ;;  %v17045_v35 = vld [vmem:[%s24857_s1 + $0xa2c] ss:$16 sps:$4 sm:$0xff]  }
 0x1e5   : > { %8996 = vmatprep.subr.bf16.mxu0 %v16988_v50  ;;  %v619_v50 = vrot.slane %v20555_v48, 1 }
 0x1e7   : > { %9599 = vmatpush1.bf16.msra.mxu1 %v16989_v5  ;;  %v20580_v5 = vsel %vm597_vm1, %v610_v45, %v611_v53  ;;  %v17082_v45 = vld [vmem:[%s24857_s1 + $0x1700] ss:$16 sps:$4 sm:$0xff]   ;;  %v17085_v53 = vld [vmem:[%s24857_s1 + $0xb08] ss:$16 sps:$4 sm:$0xff]  }
 0x1e8   : > { %8997 = vmatpush1.bf16.msra.mxu0 %v16986_v4  ;;  %9600 = vmatprep.subr.bf16.mxu1 %v16997_v13  ;;  %v17037_v4 = vld [vmem:[%s24857_s1 + $0xa08] ss:$16 sps:$4 sm:$0xff]   ;;  %v20591_v13 = vsel %vm597_vm1, %v619_v50, %v620_v10  ;;  %v17088_v50 = vld [vmem:[%s24857_s1 + $0x1720] ss:$16 sps:$4 sm:$0xff]  }
 0x1e9   : > { %8998 = vmatprep.subr.bf16.mxu0 %v16994_v12  ;;  %v17042_v12 = vld [vmem:[%s24857_s1 + $0x1624] ss:$16 sps:$4 sm:$0xff]   ;;  %v17091_v10 = vld [vmem:[%s24857_s1 + $0xb28] ss:$16 sps:$4 sm:$0xff]  }
 0x1eb   : > { %9601 = vmatpush1.bf16.msra.mxu1 %v16995_v29  ;;  %v17043_v29 = vld [vmem:[%s24857_s1 + $0xa28] ss:$16 sps:$4 sm:$0xff]  }
 0x1ec   : > { %8999 = vmatpush1.bf16.msra.mxu0 %v16992_v14  ;;  %9602 = vmatprep.subr.bf16.mxu1 %v17003_v15  ;;  %v17040_v14 = vld [vmem:[%s24857_s1 + $0x1620] ss:$16 sps:$4 sm:$0xff]  }
 0x1ed   : > { %9000 = vmatprep.subr.bf16.mxu0 %v17000_v58  ;;  %v17048_v58 = vld [vmem:[%s24857_s1 + $0x1644] ss:$16 sps:$4 sm:$0xff]   ;;  %v17046_v15 = vld [vmem:[%s24857_s1 + $0x1640] ss:$16 sps:$4 sm:$0xff]  }
 0x1ef   : > { %9603 = vmatpush1.bf16.msra.mxu1 %v17001_v1  ;;  %v17054_v1 = vld [vmem:[%s24857_s1 + $0x1664] ss:$16 sps:$4 sm:$0xff]  }
 0x1f0   : > { %9001 = vmatpush1.bf16.msra.mxu0 %v16998_v17  ;;  %9604 = vmatprep.subr.bf16.mxu1 %v17009_v21  ;;  %v17049_v17 = vld [vmem:[%s24857_s1 + $0xa48] ss:$16 sps:$4 sm:$0xff]  }
 0x1f1   : > { %9002 = vmatprep.subr.bf16.mxu0 %v17006_v20  ;;  %v17052_v20 = vld [vmem:[%s24857_s1 + $0x1660] ss:$16 sps:$4 sm:$0xff]   ;;  %v17055_v21 = vld [vmem:[%s24857_s1 + $0xa68] ss:$16 sps:$4 sm:$0xff]  }
 0x1f3   : > { %9605 = vmatpush1.bf16.msra.mxu1 %v17007_v11  ;;  %v17063_v11 = vld [vmem:[%s24857_s1 + $0xa8c] ss:$16 sps:$4 sm:$0xff]  }
 0x1f4   : > { %9003 = vmatpush1.bf16.msra.mxu0 %v17004_v22  ;;  %9606 = vmatprep.subr.bf16.mxu1 %v17015_v32  ;;  %v17060_v22 = vld [vmem:[%s24857_s1 + $0x1684] ss:$16 sps:$4 sm:$0xff]   ;;  %v17061_v32 = vld [vmem:[%s24857_s1 + $0xa88] ss:$16 sps:$4 sm:$0xff]  }
 0x1f5   : > { %9004 = vmatprep.subr.bf16.mxu0 %v17012_v23  ;;  %v17058_v23 = vld [vmem:[%s24857_s1 + $0x1680] ss:$16 sps:$4 sm:$0xff]  }
 0x1f7   : > { %9607 = vmatpush1.bf16.msra.mxu1 %v17013_v57  ;;  %v17069_v57 = vld [vmem:[%s24857_s1 + $0xaac] ss:$16 sps:$4 sm:$0xff]  }
 0x1f8   : > { %9005 = vmatpush1.bf16.msra.mxu0 %v17010_v51  ;;  %9608 = vmatprep.subr.bf16.mxu1 %v17021_v28  ;;  %v17066_v51 = vld [vmem:[%s24857_s1 + $0x16a4] ss:$16 sps:$4 sm:$0xff]   ;;  %v17067_v28 = vld [vmem:[%s24857_s1 + $0xaa8] ss:$16 sps:$4 sm:$0xff]  }
 0x1f9   : > { %9006 = vmatprep.subr.bf16.mxu0 %v17018_v26  ;;  %v17064_v26 = vld [vmem:[%s24857_s1 + $0x16a0] ss:$16 sps:$4 sm:$0xff]  }
 0x1fb   : > { %9609 = vmatpush1.bf16.msra.mxu1 %v17019_v19  ;;  %v17075_v19 = vld [vmem:[%s24857_s1 + $0xacc] ss:$16 sps:$4 sm:$0xff]  }
 0x1fc   : > { %9007 = vmatpush1.bf16.msra.mxu0 %v17016_v52  ;;  %9610 = vmatprep.subr.bf16.mxu1 %v17027_v34  ;;  %v17072_v52 = vld [vmem:[%s24857_s1 + $0x16c4] ss:$16 sps:$4 sm:$0xff]   ;;  %v17073_v34 = vld [vmem:[%s24857_s1 + $0xac8] ss:$16 sps:$4 sm:$0xff]  }
 0x1fd   : > { %9008 = vmatprep.subr.bf16.mxu0 %v17024_v33  ;;  %v17070_v33 = vld [vmem:[%s24857_s1 + $0x16c0] ss:$16 sps:$4 sm:$0xff]  }
 0x1ff   : > { %9611 = vmatpush1.bf16.msra.mxu1 %v17025_v55  ;;  %v17081_v55 = vld [vmem:[%s24857_s1 + $0xaec] ss:$16 sps:$4 sm:$0xff]  }
 0x200   : > { %9009 = vmatpush1.bf16.msra.mxu0 %v17022_v60  ;;  %9612 = vmatprep.subr.bf16.mxu1 %v17033_v43  ;;  %v17078_v60 = vld [vmem:[%s24857_s1 + $0x16e4] ss:$16 sps:$4 sm:$0xff]   ;;  %v17079_v43 = vld [vmem:[%s24857_s1 + $0xae8] ss:$16 sps:$4 sm:$0xff]  }
 0x201   : > { %9010 = vmatprep.subr.bf16.mxu0 %v17030_v36  ;;  %v17076_v36 = vld [vmem:[%s24857_s1 + $0x16e0] ss:$16 sps:$4 sm:$0xff]  }
 0x203   : > { %9613 = vmatpush1.bf16.msra.mxu1 %v17031_v2  ;;  %v17087_v2 = vld [vmem:[%s24857_s1 + $0xb0c] ss:$16 sps:$4 sm:$0xff]  }
 0x204   : > { %9011 = vmatpush1.bf16.msra.mxu0 %v17028_v59  ;;  %9625 = vmatprep.subr.bf16.mxu1 %v17039_v38  ;;  %v17084_v59 = vld [vmem:[%s24857_s1 + $0x1704] ss:$16 sps:$4 sm:$0xff]   ;;  %v17093_v38 = vld [vmem:[%s24857_s1 + $0xb2c] ss:$16 sps:$4 sm:$0xff]  }
 0x205   : > { %9023 = vmatprep.subr.bf16.mxu0 %v17036_v61  ;;  %v17090_v61 = vld [vmem:[%s24857_s1 + $0x1724] ss:$16 sps:$4 sm:$0xff]  }
 0x206   : > { %9615 = vmatmul.mubr.bf16.vlgmr.msra.gmra.mrb[4].mxu1 %v19230_v39  ;;  %v17051_v39 = vld [vmem:[%s24857_s1 + $0xa4c] ss:$16 sps:$4 sm:$0xff]  }
 0x207   : > { %9013 = vmatmul.mubr.bf16.vlgmr.msra.gmra.mrb[0].mxu0 %v20580_v5  ;;  %9626 = vmatpush1.bf16.msra.mxu1 %v17037_v4  ;;  %v17099_v4 = vld [vmem:[%s24857_s1 + $0xb4c] ss:$16 sps:$4 sm:$0xff]  }
 0x208   : > { %9024 = vmatpush1.bf16.msra.mxu0 %v17034_v30  ;;  %9627 = vmatprep.subr.bf16.mxu1 %v17045_v35  ;;  %v17096_v30 = vld [vmem:[%s24857_s1 + $0x1744] ss:$16 sps:$4 sm:$0xff]   ;;  %v17097_v35 = vld [vmem:[%s24857_s1 + $0xb48] ss:$16 sps:$4 sm:$0xff]  }
 0x209   : > { %9025 = vmatprep.subr.bf16.mxu0 %v17042_v12  ;;  %9055 = vmatprep.mubr.bf16.mxu0 %v20591_v13  ;;  %v17094_v12 = vld [vmem:[%s24857_s1 + $0x1740] ss:$16 sps:$4 sm:$0xff]  }
 0x20a   : > { %9657 = vmatprep.mubr.bf16.mxu1 %v19285_v63  ;;  %v17057_v63 = vld [vmem:[%s24857_s1 + $0xa6c] ss:$16 sps:$4 sm:$0xff]  }
 0x20b   : > { %9628 = vmatpush1.bf16.msra.mxu1 %v17043_v29  ;;  %v17105_v29 = vld [vmem:[%s24857_s1 + $0xb6c] ss:$16 sps:$4 sm:$0xff]  }
 0x20c   : > { %9026 = vmatpush1.bf16.msra.mxu0 %v17040_v14  ;;  %9629 = vmatprep.subr.bf16.mxu1 %v17051_v39  ;;  %v17102_v14 = vld [vmem:[%s24857_s1 + $0x1764] ss:$16 sps:$4 sm:$0xff]   ;;  %v17103_v39 = vld [vmem:[%s24857_s1 + $0xb68] ss:$16 sps:$4 sm:$0xff]  }
 0x20d   : > { %9027 = vmatprep.subr.bf16.mxu0 %v17048_v58  ;;  %v17100_v58 = vld [vmem:[%s24857_s1 + $0x1760] ss:$16 sps:$4 sm:$0xff]  }
 0x20f   : > { %9630 = vmatpush1.bf16.msra.mxu1 %v17049_v17  ;;  %v17111_v17 = vld [vmem:[%s24857_s1 + $0xb8c] ss:$16 sps:$4 sm:$0xff]  }
 0x210   : > { %9028 = vmatpush1.bf16.msra.mxu0 %v17046_v15  ;;  %9631 = vmatprep.subr.bf16.mxu1 %v17057_v63  ;;  %v17108_v15 = vld [vmem:[%s24857_s1 + $0x1784] ss:$16 sps:$4 sm:$0xff]   ;;  %v17109_v63 = vld [vmem:[%s24857_s1 + $0xb88] ss:$16 sps:$4 sm:$0xff]  }
 0x211   : > { %9029 = vmatprep.subr.bf16.mxu0 %v17054_v1  ;;  %v17106_v1 = vld [vmem:[%s24857_s1 + $0x1780] ss:$16 sps:$4 sm:$0xff]  }
 0x213   : > { %9632 = vmatpush1.bf16.msra.mxu1 %v17055_v21  ;;  %v17114_v21 = vld [vmem:[%s24857_s1 + $0x17a4] ss:$16 sps:$4 sm:$0xff]  }
 0x214   : > { %9030 = vmatpush1.bf16.msra.mxu0 %v17052_v20  ;;  %9633 = vmatprep.subr.bf16.mxu1 %v17063_v11  ;;  %v20734_v20 = vld [vmem:[%s18910_s25 + $0x40] sm:$0x33] }
 0x215   : > { %9031 = vmatprep.subr.bf16.mxu0 %v17060_v22  ;;  %v17117_v22 = vld [vmem:[%s24857_s1 + $0xbac] ss:$16 sps:$4 sm:$0xff]   ;;  %v20744_v11 = vcombine.high %v20734_v20, %v20734_v20 }
 0x217   : > { %9634 = vmatpush1.bf16.msra.mxu1 %v17061_v32  ;;  %v17115_v32 = vld [vmem:[%s24857_s1 + $0xba8] ss:$16 sps:$4 sm:$0xff]  }
 0x218   : > { %9032 = vmatpush1.bf16.msra.mxu0 %v17058_v23  ;;  %9635 = vmatprep.subr.bf16.mxu1 %v17069_v57  ;;  %v17112_v23 = vld [vmem:[%s24857_s1 + $0x17a0] ss:$16 sps:$4 sm:$0xff]   ;;  %v17123_v57 = vld [vmem:[%s24857_s1 + $0xbcc] ss:$16 sps:$4 sm:$0xff]  }
 0x219   : > { %9033 = vmatprep.subr.bf16.mxu0 %v17066_v51  ;;  %v17120_v51 = vld [vmem:[%s24857_s1 + $0x17c4] ss:$16 sps:$4 sm:$0xff]  }
 0x21b   : > { %9636 = vmatpush1.bf16.msra.mxu1 %v17067_v28  ;;  %v672_v28 = vshll.u32 %v19889_v31, 16 }
 0x21c   : > { %9034 = vmatpush1.bf16.msra.mxu0 %v17064_v26  ;;  %9637 = vmatprep.subr.bf16.mxu1 %v17075_v19  ;;  %v669_v26 = vshrl.u32 %v19889_v31, 16  ;;  %v680_v19 = vshll.u32 %v20744_v11, 16  ;;  %v17126_v31 = vld [vmem:[%s24857_s1 + $0x17e4] ss:$16 sps:$4 sm:$0xff]  }
 0x21d   : > { %9035 = vmatprep.subr.bf16.mxu0 %v17072_v52  ;;  %v677_v52 = vshrl.u32 %v20744_v11, 16 }
 0x21f   : > { %9638 = vmatpush1.bf16.msra.mxu1 %v17073_v34  ;;  %v17121_v34 = vld [vmem:[%s24857_s1 + $0xbc8] ss:$16 sps:$4 sm:$0xff]  }
 0x220   : > { %9036 = vmatpush1.bf16.msra.mxu0 %v17070_v33  ;;  %9639 = vmatprep.subr.bf16.mxu1 %v17081_v55  ;;  %v17118_v33 = vld [vmem:[%s24857_s1 + $0x17c0] ss:$16 sps:$4 sm:$0xff]   ;;  %v17129_v55 = vld [vmem:[%s24857_s1 + $0xbec] ss:$16 sps:$4 sm:$0xff]  }
 0x221   : > { %9037 = vmatprep.subr.bf16.mxu0 %v17078_v60  ;;  %v20770_v60 = vcombine.low %v20542_v41, %v20551_v44  ;;  %v17124_v41 = vld [vmem:[%s24857_s1 + $0x17e0] ss:$16 sps:$4 sm:$0xff]   ;;  %v17127_v44 = vld [vmem:[%s24857_s1 + $0xbe8] ss:$16 sps:$4 sm:$0xff]  }
 0x223   : > { %9640 = vmatpush1.bf16.msra.mxu1 %v17079_v43  ;;  %v674_v43 = vrot.slane %v672_v28, 2  ;;  %v17160_v28 = vld [vmem:[%s24857_s1 + $0x18a0] ss:$16 sps:$4 sm:$0xff]  }
 0x224   : > { %9038 = vmatpush1.bf16.msra.mxu0 %v17076_v36  ;;  %9641 = vmatprep.subr.bf16.mxu1 %v17087_v2  ;;  %v671_v36 = vrot.slane %v669_v26, 1  ;;  %v682_v2 = vrot.slane %v680_v19, 2  ;;  %v17165_v26 = vld [vmem:[%s24857_s1 + $0xcac] ss:$16 sps:$4 sm:$0xff]   ;;  %v17168_v19 = vld [vmem:[%s24857_s1 + $0x18c4] ss:$16 sps:$4 sm:$0xff]  }
 0x225   : > { %9039 = vmatprep.subr.bf16.mxu0 %v17084_v59  ;;  %v679_v59 = vrot.slane %v677_v52, 1  ;;  %v17163_v52 = vld [vmem:[%s24857_s1 + $0xca8] ss:$16 sps:$4 sm:$0xff]  }
 0x227   : > { %9642 = vmatpush1.bf16.msra.mxu1 %v17085_v53  ;;  %v617_v53 = vrot.slane %v19859_v42, 1  ;;  %v17133_v42 = vld [vmem:[%s24857_s1 + $0xc08] ss:$16 sps:$4 sm:$0xff]  }
 0x228   : > { %9040 = vmatpush1.bf16.msra.mxu0 %v17082_v45  ;;  %9643 = vmatprep.subr.bf16.mxu1 %v17093_v38  ;;  %v616_v45 = vrot.slane %v20770_v60, 1  ;;  %v17135_v38 = vld [vmem:[%s24857_s1 + $0xc0c] ss:$16 sps:$4 sm:$0xff]  }
 0x229   : > { %9041 = vmatprep.subr.bf16.mxu0 %v17090_v61  ;;  %v17132_v61 = vld [vmem:[%s24857_s1 + $0x1804] ss:$16 sps:$4 sm:$0xff]  }
 0x22b   : > { %9644 = vmatpush1.bf16.msra.mxu1 %v17091_v10  ;;  %v683_v10 = vor.u32 %v682_v2, %v679_v59  ;;  %v17175_v59 = vld [vmem:[%s24857_s1 + $0xce8] ss:$16 sps:$4 sm:$0xff]   ;;  %v17180_v2 = vld [vmem:[%s24857_s1 + $0x1904] ss:$16 sps:$4 sm:$0xff]  }
 0x22c   : > { %9042 = vmatpush1.bf16.msra.mxu0 %v17088_v50  ;;  %9645 = vmatprep.subr.bf16.mxu1 %v17099_v4  ;;  %v675_v50 = vor.u32 %v674_v43, %v671_v36  ;;  %v20799_v4 = vsel %vm597_vm1, %v616_v45, %v617_v53  ;;  %v17177_v36 = vld [vmem:[%s24857_s1 + $0xcec] ss:$16 sps:$4 sm:$0xff]   ;;  %v17172_v43 = vld [vmem:[%s24857_s1 + $0x18e0] ss:$16 sps:$4 sm:$0xff]   ;;  %v17181_v45 = vld [vmem:[%s24857_s1 + $0xd08] ss:$16 sps:$4 sm:$0xff]  }
 0x22d   : > { %9043 = vmatprep.subr.bf16.mxu0 %v17096_v30  ;;  %v17130_v30 = vld [vmem:[%s24857_s1 + $0x1800] ss:$16 sps:$4 sm:$0xff]   ;;  %v17186_v53 = vld [vmem:[%s24857_s1 + $0x1924] ss:$16 sps:$4 sm:$0xff]  }
 0x22f   : > { %9646 = vmatpush1.bf16.msra.mxu1 %v17097_v35  ;;  %v17141_v35 = vld [vmem:[%s24857_s1 + $0xc2c] ss:$16 sps:$4 sm:$0xff]  }
 0x230   : > { %9044 = vmatpush1.bf16.msra.mxu0 %v17094_v12  ;;  %9647 = vmatprep.subr.bf16.mxu1 %v17105_v29  ;;  %v17138_v12 = vld [vmem:[%s24857_s1 + $0x1824] ss:$16 sps:$4 sm:$0xff]   ;;  %v17136_v29 = vld [vmem:[%s24857_s1 + $0x1820] ss:$16 sps:$4 sm:$0xff]  }
 0x231   : > { %9045 = vmatprep.subr.bf16.mxu0 %v17102_v14  ;;  %v20810_v14 = vsel %vm650_vm2, %v675_v50, %v683_v10  ;;  %v17187_v50 = vld [vmem:[%s24857_s1 + $0xd28] ss:$16 sps:$4 sm:$0xff]   ;;  %v17192_v10 = vld [vmem:[%s24857_s1 + $0x1944] ss:$16 sps:$4 sm:$0xff]  }
 0x233   : > { %9648 = vmatpush1.bf16.msra.mxu1 %v17103_v39  ;;  %v17144_v39 = vld [vmem:[%s24857_s1 + $0x1844] ss:$16 sps:$4 sm:$0xff]  }
 0x234   : > { %9046 = vmatpush1.bf16.msra.mxu0 %v17100_v58  ;;  %9649 = vmatprep.subr.bf16.mxu1 %v17111_v17  ;;  %v17139_v58 = vld [vmem:[%s24857_s1 + $0xc28] ss:$16 sps:$4 sm:$0xff]  }
 0x235   : > { %9047 = vmatprep.subr.bf16.mxu0 %v17108_v15  ;;  %v17142_v15 = vld [vmem:[%s24857_s1 + $0x1840] ss:$16 sps:$4 sm:$0xff]   ;;  %v17145_v17 = vld [vmem:[%s24857_s1 + $0xc48] ss:$16 sps:$4 sm:$0xff]  }
 0x237   : > { %9650 = vmatpush1.bf16.msra.mxu1 %v17109_v63  ;;  %v17148_v63 = vld [vmem:[%s24857_s1 + $0x1860] ss:$16 sps:$4 sm:$0xff]  }
 0x238   : > { %9048 = vmatpush1.bf16.msra.mxu0 %v17106_v1  ;;  %9651 = vmatprep.subr.bf16.mxu1 %v17117_v22  ;;  %v17150_v1 = vld [vmem:[%s24857_s1 + $0x1864] ss:$16 sps:$4 sm:$0xff]  }
 0x239   : > { %9049 = vmatprep.subr.bf16.mxu0 %v17114_v21  ;;  %v17151_v21 = vld [vmem:[%s24857_s1 + $0xc68] ss:$16 sps:$4 sm:$0xff]   ;;  %v17156_v22 = vld [vmem:[%s24857_s1 + $0x1884] ss:$16 sps:$4 sm:$0xff]  }
 0x23b   : > { %9652 = vmatpush1.bf16.msra.mxu1 %v17115_v32  ;;  %v17154_v32 = vld [vmem:[%s24857_s1 + $0x1880] ss:$16 sps:$4 sm:$0xff]  }
 0x23c   : > { %9050 = vmatpush1.bf16.msra.mxu0 %v17112_v23  ;;  %9653 = vmatprep.subr.bf16.mxu1 %v17123_v57  ;;  %v17159_v23 = vld [vmem:[%s24857_s1 + $0xc8c] ss:$16 sps:$4 sm:$0xff]   ;;  %v17162_v57 = vld [vmem:[%s24857_s1 + $0x18a4] ss:$16 sps:$4 sm:$0xff]  }
 0x23d   : > { %9051 = vmatprep.subr.bf16.mxu0 %v17120_v51  ;;  %v17157_v51 = vld [vmem:[%s24857_s1 + $0xc88] ss:$16 sps:$4 sm:$0xff]  }
 0x23f   : > { %9654 = vmatpush1.bf16.msra.mxu1 %v17121_v34  ;;  %v17166_v34 = vld [vmem:[%s24857_s1 + $0x18c0] ss:$16 sps:$4 sm:$0xff]  }
 0x240   : > { %9052 = vmatpush1.bf16.msra.mxu0 %v17118_v33  ;;  %9655 = vmatprep.subr.bf16.mxu1 %v17129_v55  ;;  %v17171_v33 = vld [vmem:[%s24857_s1 + $0xccc] ss:$16 sps:$4 sm:$0xff]   ;;  %v17174_v55 = vld [vmem:[%s24857_s1 + $0x18e4] ss:$16 sps:$4 sm:$0xff]  }
 0x241   : > { %9053 = vmatprep.subr.bf16.mxu0 %v17126_v31  ;;  %v17169_v31 = vld [vmem:[%s24857_s1 + $0xcc8] ss:$16 sps:$4 sm:$0xff]  }
 0x243   : > { %9656 = vmatpush1.bf16.msra.mxu1 %v17127_v44  ;;  %v17178_v44 = vld [vmem:[%s24857_s1 + $0x1900] ss:$16 sps:$4 sm:$0xff]  }
 0x244   : > { %9054 = vmatpush1.bf16.msra.mxu0 %v17124_v41  ;;  %9668 = vmatprep.subr.bf16.mxu1 %v17135_v38  ;;  %v17183_v41 = vld [vmem:[%s24857_s1 + $0xd0c] ss:$16 sps:$4 sm:$0xff]   ;;  %v17184_v38 = vld [vmem:[%s24857_s1 + $0x1920] ss:$16 sps:$4 sm:$0xff]  }
 0x245   : > { %9066 = vmatprep.subr.bf16.mxu0 %v17132_v61  ;;  %v17189_v61 = vld [vmem:[%s24857_s1 + $0xd2c] ss:$16 sps:$4 sm:$0xff]  }
 0x246   : > { %9658 = vmatmul.mubr.bf16.vlgmr.msra.gmra.mrb[4].mxu1 %v19472_v24  ;;  %v17147_v24 = vld [vmem:[%s24857_s1 + $0xc4c] ss:$16 sps:$4 sm:$0xff]  }
 0x247   : > { %9056 = vmatmul.mubr.bf16.vlgmr.msra.gmra.mrb[0].mxu0 %v20799_v4  ;;  %9669 = vmatpush1.bf16.msra.mxu1 %v17133_v42  ;;  %v17190_v42 = vld [vmem:[%s24857_s1 + $0x1940] ss:$16 sps:$4 sm:$0xff]  }
 0x248   : > { %9067 = vmatpush1.bf16.msra.mxu0 %v17130_v30  ;;  %9670 = vmatprep.subr.bf16.mxu1 %v17141_v35  ;;  %v17195_v30 = vld [vmem:[%s24857_s1 + $0xd4c] ss:$16 sps:$4 sm:$0xff]   ;;  %v17198_v35 = vld [vmem:[%s24857_s1 + $0x1964] ss:$16 sps:$4 sm:$0xff]  }
 0x249   : > { %9068 = vmatprep.subr.bf16.mxu0 %v17138_v12  ;;  %9098 = vmatprep.mubr.bf16.mxu0 %v20810_v14  ;;  %v17193_v12 = vld [vmem:[%s24857_s1 + $0xd48] ss:$16 sps:$4 sm:$0xff]  }
 0x24a   : > { %9700 = vmatprep.mubr.bf16.mxu1 %v19489_v27  ;;  %v17153_v27 = vld [vmem:[%s24857_s1 + $0xc6c] ss:$16 sps:$4 sm:$0xff]  }
 0x24b   : > { %9671 = vmatpush1.bf16.msra.mxu1 %v17139_v58  ;;  %v17196_v58 = vld [vmem:[%s24857_s1 + $0x1960] ss:$16 sps:$4 sm:$0xff]  }
 0x24c   : > { %9069 = vmatpush1.bf16.msra.mxu0 %v17136_v29  ;;  %9672 = vmatprep.subr.bf16.mxu1 %v17147_v24  ;;  %v17201_v29 = vld [vmem:[%s24857_s1 + $0xd6c] ss:$16 sps:$4 sm:$0xff]   ;;  %v17204_v24 = vld [vmem:[%s24857_s1 + $0x1984] ss:$16 sps:$4 sm:$0xff]  }
 0x24d   : > { %9070 = vmatprep.subr.bf16.mxu0 %v17144_v39  ;;  %v17199_v39 = vld [vmem:[%s24857_s1 + $0xd68] ss:$16 sps:$4 sm:$0xff]  }
 0x24f   : > { %9673 = vmatpush1.bf16.msra.mxu1 %v17145_v17  ;;  %v17202_v17 = vld [vmem:[%s24857_s1 + $0x1980] ss:$16 sps:$4 sm:$0xff]  }
 0x250   : > { %9071 = vmatpush1.bf16.msra.mxu0 %v17142_v15  ;;  %9674 = vmatprep.subr.bf16.mxu1 %v17153_v27  ;;  %v17207_v15 = vld [vmem:[%s24857_s1 + $0xd8c] ss:$16 sps:$4 sm:$0xff]   ;;  %v20954_v27 = vcombine.low %v20734_v20, %v20734_v20  ;;  %v17211_v20 = vld [vmem:[%s24857_s1 + $0xda8] ss:$16 sps:$4 sm:$0xff]  }
 0x251   : > { %9072 = vmatprep.subr.bf16.mxu0 %v17150_v1  ;;  %v17205_v1 = vld [vmem:[%s24857_s1 + $0xd88] ss:$16 sps:$4 sm:$0xff]  }
 0x253   : > { %9675 = vmatpush1.bf16.msra.mxu1 %v17151_v21  ;;  %v17210_v21 = vld [vmem:[%s24857_s1 + $0x19a4] ss:$16 sps:$4 sm:$0xff]  }
 0x254   : > { %9073 = vmatpush1.bf16.msra.mxu0 %v17148_v63  ;;  %9676 = vmatprep.subr.bf16.mxu1 %v17159_v23  ;;  %v20957_v63 = vld [vmem:[%s18910_s25 + $0x48] sm:$0x33]  ;;  %v17208_v23 = vld [vmem:[%s24857_s1 + $0x19a0] ss:$16 sps:$4 sm:$0xff]  }
 0x255   : > { %9074 = vmatprep.subr.bf16.mxu0 %v17156_v22  ;;  %v17213_v22 = vld [vmem:[%s24857_s1 + $0xdac] ss:$16 sps:$4 sm:$0xff]  }
 0x257   : > { %9677 = vmatpush1.bf16.msra.mxu1 %v17157_v51  ;;  %v652_v51 = vshrl.u32 %v20091_v7, 16 }
 0x258   : > { %9075 = vmatpush1.bf16.msra.mxu0 %v17154_v32  ;;  %9678 = vmatprep.subr.bf16.mxu1 %v17165_v26  ;;  %v20973_v32 = vcombine.high %v20957_v63, %v20957_v63  ;;  %v660_v26 = vshrl.u32 %v20954_v27, 16 }
 0x259   : > { %9076 = vmatprep.subr.bf16.mxu0 %v17162_v57  ;;  %v655_v57 = vshll.u32 %v20091_v7, 16  ;;  %v17217_v7 = vld [vmem:[%s24857_s1 + $0xdc8] ss:$16 sps:$4 sm:$0xff]  }
 0x25b   : > { %9679 = vmatpush1.bf16.msra.mxu1 %v17163_v52  ;;  %v17216_v52 = vld [vmem:[%s24857_s1 + $0x19c4] ss:$16 sps:$4 sm:$0xff]  }
 0x25c   : > { %9077 = vmatpush1.bf16.msra.mxu0 %v17160_v28  ;;  %9680 = vmatprep.subr.bf16.mxu1 %v17171_v33  ;;  %v663_v28 = vshll.u32 %v20954_v27, 16  ;;  %v17214_v33 = vld [vmem:[%s24857_s1 + $0x19c0] ss:$16 sps:$4 sm:$0xff]  }
 0x25d   : > { %9078 = vmatprep.subr.bf16.mxu0 %v17168_v19  ;;  %v17219_v19 = vld [vmem:[%s24857_s1 + $0xdcc] ss:$16 sps:$4 sm:$0xff]  }
 0x25f   : > { %9681 = vmatpush1.bf16.msra.mxu1 %v17169_v31  ;;  %v706_v31 = vshll.u32 %v20108_v25, 16 }
 0x260   : > { %9079 = vmatpush1.bf16.msra.mxu0 %v17166_v34  ;;  %9682 = vmatprep.subr.bf16.mxu1 %v17177_v36  ;;  %v703_v34 = vshrl.u32 %v20108_v25, 16  ;;  %v714_v36 = vshll.u32 %v20973_v32, 16  ;;  %v17225_v25 = vld [vmem:[%s24857_s1 + $0xdec] ss:$16 sps:$4 sm:$0xff]  }
 0x261   : > { %9080 = vmatprep.subr.bf16.mxu0 %v17174_v55  ;;  %v711_v55 = vshrl.u32 %v20973_v32, 16 }
 0x263   : > { %9683 = vmatpush1.bf16.msra.mxu1 %v17175_v59  ;;  %v657_v59 = vrot.slane %v655_v57, 2  ;;  %v17243_v57 = vld [vmem:[%s24857_s1 + $0xe48] ss:$16 sps:$4 sm:$0xff]  }
 0x264   : > { %9081 = vmatpush1.bf16.msra.mxu0 %v17172_v43  ;;  %9684 = vmatprep.subr.bf16.mxu1 %v17183_v41  ;;  %v654_v43 = vrot.slane %v652_v51, 1  ;;  %v665_v41 = vrot.slane %v663_v28, 2  ;;  %v17240_v51 = vld [vmem:[%s24857_s1 + $0x1a40] ss:$16 sps:$4 sm:$0xff]  }
 0x265   : > { %9082 = vmatprep.subr.bf16.mxu0 %v17180_v2  ;;  %v662_v2 = vrot.slane %v660_v26, 1  ;;  %v17248_v26 = vld [vmem:[%s24857_s1 + $0x1a64] ss:$16 sps:$4 sm:$0xff]   ;;  %v17246_v28 = vld [vmem:[%s24857_s1 + $0x1a60] ss:$16 sps:$4 sm:$0xff]  }
 0x267   : > { %9685 = vmatpush1.bf16.msra.mxu1 %v17181_v45  ;;  %v705_v45 = vrot.slane %v703_v34, 1  ;;  %v17255_v34 = vld [vmem:[%s24857_s1 + $0xe88] ss:$16 sps:$4 sm:$0xff]  }
 0x268   : > { %9083 = vmatpush1.bf16.msra.mxu0 %v17178_v44  ;;  %9686 = vmatprep.subr.bf16.mxu1 %v17189_v61  ;;  %v17222_v44 = vld [vmem:[%s24857_s1 + $0x19e4] ss:$16 sps:$4 sm:$0xff]   ;;  %v713_v61 = vrot.slane %v711_v55, 1  ;;  %v17263_v55 = vld [vmem:[%s24857_s1 + $0xeac] ss:$16 sps:$4 sm:$0xff]  }
 0x269   : > { %9084 = vmatprep.subr.bf16.mxu0 %v17186_v53  ;;  %v708_v53 = vrot.slane %v706_v31, 2  ;;  %v17260_v31 = vld [vmem:[%s24857_s1 + $0x1aa4] ss:$16 sps:$4 sm:$0xff]  }
 0x26b   : > { %9687 = vmatpush1.bf16.msra.mxu1 %v17187_v50  ;;  %v17220_v50 = vld [vmem:[%s24857_s1 + $0x19e0] ss:$16 sps:$4 sm:$0xff]  }
 0x26c   : > { %9085 = vmatpush1.bf16.msra.mxu0 %v17184_v38  ;;  %9688 = vmatprep.subr.bf16.mxu1 %v17195_v30  ;;  %v716_v38 = vrot.slane %v714_v36, 2  ;;  %v658_v30 = vor.u32 %v657_v59, %v654_v43  ;;  %v17258_v36 = vld [vmem:[%s24857_s1 + $0x1aa0] ss:$16 sps:$4 sm:$0xff]   ;;  %v17261_v43 = vld [vmem:[%s24857_s1 + $0xea8] ss:$16 sps:$4 sm:$0xff]  }
 0x26d   : > { %9086 = vmatprep.subr.bf16.mxu0 %v17192_v10  ;;  %v17223_v10 = vld [vmem:[%s24857_s1 + $0xde8] ss:$16 sps:$4 sm:$0xff]   ;;  %v17266_v59 = vld [vmem:[%s24857_s1 + $0x1ac4] ss:$16 sps:$4 sm:$0xff]  }
 0x26f   : > { %9689 = vmatpush1.bf16.msra.mxu1 %v17193_v12  ;;  %v17229_v12 = vld [vmem:[%s24857_s1 + $0x1a04] ss:$16 sps:$4 sm:$0xff]  }
 0x270   : > { %9087 = vmatpush1.bf16.msra.mxu0 %v17190_v42  ;;  %9690 = vmatprep.subr.bf16.mxu1 %v17201_v29  ;;  %v666_v42 = vor.u32 %v665_v41, %v662_v2  ;;  %v709_v29 = vor.u32 %v708_v53, %v705_v45  ;;  %v17269_v2 = vld [vmem:[%s24857_s1 + $0xecc] ss:$16 sps:$4 sm:$0xff]   ;;  %v17264_v41 = vld [vmem:[%s24857_s1 + $0x1ac0] ss:$16 sps:$4 sm:$0xff]  }
 0x271   : > { %9088 = vmatprep.subr.bf16.mxu0 %v17198_v35  ;;  %v17232_v35 = vld [vmem:[%s24857_s1 + $0xe0c] ss:$16 sps:$4 sm:$0xff]   ;;  %v17270_v53 = vld [vmem:[%s24857_s1 + $0x1ae0] ss:$16 sps:$4 sm:$0xff]  }
 0x272   : > { %v17275_v45 = vld [vmem:[%s24857_s1 + $0xeec] ss:$16 sps:$4 sm:$0xff]  }
 0x273   : > { %9691 = vmatpush1.bf16.msra.mxu1 %v17199_v39  ;;  %v17227_v39 = vld [vmem:[%s24857_s1 + $0x1a00] ss:$16 sps:$4 sm:$0xff]  }
 0x274   : > { %9089 = vmatpush1.bf16.msra.mxu0 %v17196_v58  ;;  %9692 = vmatprep.subr.bf16.mxu1 %v17207_v15  ;;  %v717_v58 = vor.u32 %v716_v38, %v713_v61  ;;  %v21020_v15 = vsel %vm650_vm2, %v658_v30, %v666_v42  ;;  %v17273_v61 = vld [vmem:[%s24857_s1 + $0xee8] ss:$16 sps:$4 sm:$0xff]   ;;  %v17278_v38 = vld [vmem:[%s24857_s1 + $0x1b04] ss:$16 sps:$4 sm:$0xff]  }
 0x275   : > { %9090 = vmatprep.subr.bf16.mxu0 %v17204_v24  ;;  %v17230_v24 = vld [vmem:[%s24857_s1 + $0xe08] ss:$16 sps:$4 sm:$0xff]   ;;  %v17284_v42 = vld [vmem:[%s24857_s1 + $0x1b24] ss:$16 sps:$4 sm:$0xff]  }
 0x276   : > { %v17279_v30 = vld [vmem:[%s24857_s1 + $0xf08] ss:$16 sps:$4 sm:$0xff]  }
 0x277   : > { %9693 = vmatpush1.bf16.msra.mxu1 %v17205_v1  ;;  %v17239_v1 = vld [vmem:[%s24857_s1 + $0xe2c] ss:$16 sps:$4 sm:$0xff]  }
 0x278   : > { %9091 = vmatpush1.bf16.msra.mxu0 %v17202_v17  ;;  %9694 = vmatprep.subr.bf16.mxu1 %v17213_v22  ;;  %v17236_v17 = vld [vmem:[%s24857_s1 + $0x1a24] ss:$16 sps:$4 sm:$0xff]   ;;  %v17234_v22 = vld [vmem:[%s24857_s1 + $0x1a20] ss:$16 sps:$4 sm:$0xff]  }
 0x279   : > { %9092 = vmatprep.subr.bf16.mxu0 %v17210_v21  ;;  %v21031_v21 = vsel %vm650_vm2, %v709_v29, %v717_v58  ;;  %v17285_v29 = vld [vmem:[%s24857_s1 + $0xf28] ss:$16 sps:$4 sm:$0xff]   ;;  %v17290_v58 = vld [vmem:[%s24857_s1 + $0x1b44] ss:$16 sps:$4 sm:$0xff]  }
 0x27b   : > { %9695 = vmatpush1.bf16.msra.mxu1 %v17211_v20  ;;  %v17242_v20 = vld [vmem:[%s24857_s1 + $0x1a44] ss:$16 sps:$4 sm:$0xff]  }
 0x27c   : > { %9093 = vmatpush1.bf16.msra.mxu0 %v17208_v23  ;;  %9696 = vmatprep.subr.bf16.mxu1 %v17219_v19  ;;  %v17237_v23 = vld [vmem:[%s24857_s1 + $0xe28] ss:$16 sps:$4 sm:$0xff]   ;;  %v17254_v19 = vld [vmem:[%s24857_s1 + $0x1a84] ss:$16 sps:$4 sm:$0xff]  }
 0x27d   : > { %9094 = vmatprep.subr.bf16.mxu0 %v17216_v52  ;;  %v17249_v52 = vld [vmem:[%s24857_s1 + $0xe68] ss:$16 sps:$4 sm:$0xff]  }
 0x27f   : > { %9697 = vmatpush1.bf16.msra.mxu1 %v17217_v7  ;;  %v17252_v7 = vld [vmem:[%s24857_s1 + $0x1a80] ss:$16 sps:$4 sm:$0xff]  }
 0x280   : > { %9095 = vmatpush1.bf16.msra.mxu0 %v17214_v33  ;;  %9698 = vmatprep.subr.bf16.mxu1 %v17225_v25  ;;  %v17257_v33 = vld [vmem:[%s24857_s1 + $0xe8c] ss:$16 sps:$4 sm:$0xff]   ;;  %v17272_v25 = vld [vmem:[%s24857_s1 + $0x1ae4] ss:$16 sps:$4 sm:$0xff]  }
 0x281   : > { %9096 = vmatprep.subr.bf16.mxu0 %v17222_v44  ;;  %v17267_v44 = vld [vmem:[%s24857_s1 + $0xec8] ss:$16 sps:$4 sm:$0xff]  }
 0x283   : > { %9699 = vmatpush1.bf16.msra.mxu1 %v17223_v10  ;;  %v17276_v10 = vld [vmem:[%s24857_s1 + $0x1b00] ss:$16 sps:$4 sm:$0xff]  }
 0x284   : > { %9097 = vmatpush1.bf16.msra.mxu0 %v17220_v50  ;;  %9711 = vmatprep.subr.bf16.mxu1 %v17232_v35  ;;  %v17281_v50 = vld [vmem:[%s24857_s1 + $0xf0c] ss:$16 sps:$4 sm:$0xff]   ;;  %v17282_v35 = vld [vmem:[%s24857_s1 + $0x1b20] ss:$16 sps:$4 sm:$0xff]  }
 0x285   : > { %9109 = vmatprep.subr.bf16.mxu0 %v17229_v12  ;;  %v17287_v12 = vld [vmem:[%s24857_s1 + $0xf2c] ss:$16 sps:$4 sm:$0xff]  }
 0x286   : > { %9701 = vmatmul.mubr.bf16.vlgmr.msra.gmra.mrb[4].mxu1 %v19691_v6  ;;  %v17245_v6 = vld [vmem:[%s24857_s1 + $0xe4c] ss:$16 sps:$4 sm:$0xff]  }
 0x287   : > { %9099 = vmatmul.mubr.bf16.vlgmr.msra.gmra.mrb[0].mxu0 %v21020_v15  ;;  %9712 = vmatpush1.bf16.msra.mxu1 %v17230_v24  ;;  %v17288_v24 = vld [vmem:[%s24857_s1 + $0x1b40] ss:$16 sps:$4 sm:$0xff]  }
 0x288   : > { %9110 = vmatpush1.bf16.msra.mxu0 %v17227_v39  ;;  %9713 = vmatprep.subr.bf16.mxu1 %v17239_v1  ;;  %v17293_v39 = vld [vmem:[%s24857_s1 + $0xf4c] ss:$16 sps:$4 sm:$0xff]   ;;  %v17296_v1 = vld [vmem:[%s24857_s1 + $0x1b64] ss:$16 sps:$4 sm:$0xff]  }
 0x289   : > { %9111 = vmatprep.subr.bf16.mxu0 %v17236_v17  ;;  %9141 = vmatprep.mubr.bf16.mxu0 %v21031_v21  ;;  %v17291_v17 = vld [vmem:[%s24857_s1 + $0xf48] ss:$16 sps:$4 sm:$0xff]  }
 0x28a   : > { %9743 = vmatprep.mubr.bf16.mxu1 %v19702_v9  ;;  %v17251_v9 = vld [vmem:[%s24857_s1 + $0xe6c] ss:$16 sps:$4 sm:$0xff]  }
 0x28b   : > { %9714 = vmatpush1.bf16.msra.mxu1 %v17237_v23  ;;  %v17294_v23 = vld [vmem:[%s24857_s1 + $0x1b60] ss:$16 sps:$4 sm:$0xff]  }
 0x28c   : > { %9112 = vmatpush1.bf16.msra.mxu0 %v17234_v22  ;;  %9715 = vmatprep.subr.bf16.mxu1 %v17245_v6  ;;  %v17299_v22 = vld [vmem:[%s24857_s1 + $0xf6c] ss:$16 sps:$4 sm:$0xff]   ;;  %v17302_v6 = vld [vmem:[%s24857_s1 + $0x1b84] ss:$16 sps:$4 sm:$0xff]  }
 0x28d   : > { %9113 = vmatprep.subr.bf16.mxu0 %v17242_v20  ;;  %v17297_v20 = vld [vmem:[%s24857_s1 + $0xf68] ss:$16 sps:$4 sm:$0xff]  }
 0x28f   : > { %9716 = vmatpush1.bf16.msra.mxu1 %v17243_v57  ;;  %v17300_v57 = vld [vmem:[%s24857_s1 + $0x1b80] ss:$16 sps:$4 sm:$0xff]  }
 0x290   : > { %9114 = vmatpush1.bf16.msra.mxu0 %v17240_v51  ;;  %9717 = vmatprep.subr.bf16.mxu1 %v17251_v9  ;;  %v17305_v51 = vld [vmem:[%s24857_s1 + $0xf8c] ss:$16 sps:$4 sm:$0xff]   ;;  %v21175_v9 = vcombine.low %v20957_v63, %v20957_v63  ;;  %v17309_v63 = vld [vmem:[%s24857_s1 + $0xfa8] ss:$16 sps:$4 sm:$0xff]  }
 0x291   : > { %9115 = vmatprep.subr.bf16.mxu0 %v17248_v26  ;;  %v17303_v26 = vld [vmem:[%s24857_s1 + $0xf88] ss:$16 sps:$4 sm:$0xff]  }
 0x293   : > { %9718 = vmatpush1.bf16.msra.mxu1 %v17249_v52  ;;  %v17308_v52 = vld [vmem:[%s24857_s1 + $0x1ba4] ss:$16 sps:$4 sm:$0xff]  }
 0x294   : > { %9116 = vmatpush1.bf16.msra.mxu0 %v17246_v28  ;;  %9719 = vmatprep.subr.bf16.mxu1 %v17257_v33  ;;  %v21178_v28 = vld [vmem:[%s18910_s25 + $0x50] sm:$0x33] }
 0x295   : > { %9117 = vmatprep.subr.bf16.mxu0 %v17254_v19  ;;  %v17311_v19 = vld [vmem:[%s24857_s1 + $0xfac] ss:$16 sps:$4 sm:$0xff]   ;;  %v17306_v33 = vld [vmem:[%s24857_s1 + $0x1ba0] ss:$16 sps:$4 sm:$0xff]  }
 0x297   : > { %9720 = vmatpush1.bf16.msra.mxu1 %v17255_v34  ;;  %v686_v34 = vshrl.u32 %v20319_v56, 16 }
 0x298   : > { %9118 = vmatpush1.bf16.msra.mxu0 %v17252_v7  ;;  %9721 = vmatprep.subr.bf16.mxu1 %v17263_v55  ;;  %v21194_v7 = vcombine.high %v21178_v28, %v21178_v28  ;;  %v694_v55 = vshrl.u32 %v21175_v9, 16 }
 0x299   : > { %9119 = vmatprep.subr.bf16.mxu0 %v17260_v31  ;;  %v689_v31 = vshll.u32 %v20319_v56, 16  ;;  %v17315_v56 = vld [vmem:[%s24857_s1 + $0xfc8] ss:$16 sps:$4 sm:$0xff]  }
 0x29b   : > { %9722 = vmatpush1.bf16.msra.mxu1 %v17261_v43  ;;  %v17314_v43 = vld [vmem:[%s24857_s1 + $0x1bc4] ss:$16 sps:$4 sm:$0xff]  }
 0x29c   : > { %9120 = vmatpush1.bf16.msra.mxu0 %v17258_v36  ;;  %9723 = vmatprep.subr.bf16.mxu1 %v17269_v2  ;;  %v697_v36 = vshll.u32 %v21175_v9, 16  ;;  %v17312_v2 = vld [vmem:[%s24857_s1 + $0x1bc0] ss:$16 sps:$4 sm:$0xff]  }
 0x29d   : > { %9121 = vmatprep.subr.bf16.mxu0 %v17266_v59  ;;  %v17317_v59 = vld [vmem:[%s24857_s1 + $0xfcc] ss:$16 sps:$4 sm:$0xff]  }
 0x29f   : > { %9724 = vmatpush1.bf16.msra.mxu1 %v17267_v44  ;;  %v740_v44 = vshll.u32 %v20338_v8, 16 }
 0x2a0   : > { %9122 = vmatpush1.bf16.msra.mxu0 %v17264_v41  ;;  %9725 = vmatprep.subr.bf16.mxu1 %v17275_v45  ;;  %v737_v41 = vshrl.u32 %v20338_v8, 16  ;;  %v748_v45 = vshll.u32 %v21194_v7, 16  ;;  %v17323_v8 = vld [vmem:[%s24857_s1 + $0xfec] ss:$16 sps:$4 sm:$0xff]  }
 0x2a1   : > { %9123 = vmatprep.subr.bf16.mxu0 %v17272_v25  ;;  %v745_v25 = vshrl.u32 %v21194_v7, 16 }
 0x2a3   : > { %9726 = vmatpush1.bf16.msra.mxu1 %v17273_v61  ;;  %v691_v61 = vrot.slane %v689_v31, 2  ;;  %v17341_v31 = vld [vmem:[%s24857_s1 + $0x1048] ss:$16 sps:$4 sm:$0xff]  }
 0x2a4   : > { %9124 = vmatpush1.bf16.msra.mxu0 %v17270_v53  ;;  %9727 = vmatprep.subr.bf16.mxu1 %v17281_v50  ;;  %v688_v53 = vrot.slane %v686_v34, 1  ;;  %v699_v50 = vrot.slane %v697_v36, 2  ;;  %v17338_v34 = vld [vmem:[%s24857_s1 + $0x1c40] ss:$16 sps:$4 sm:$0xff]  }
 0x2a5   : > { %9125 = vmatprep.subr.bf16.mxu0 %v17278_v38  ;;  %v696_v38 = vrot.slane %v694_v55, 1  ;;  %v17346_v55 = vld [vmem:[%s24857_s1 + $0x1c64] ss:$16 sps:$4 sm:$0xff]   ;;  %v17344_v36 = vld [vmem:[%s24857_s1 + $0x1c60] ss:$16 sps:$4 sm:$0xff]  }
 0x2a7   : > { %9728 = vmatpush1.bf16.msra.mxu1 %v17279_v30  ;;  %v739_v30 = vrot.slane %v737_v41, 1  ;;  %v17353_v41 = vld [vmem:[%s24857_s1 + $0x1088] ss:$16 sps:$4 sm:$0xff]  }
 0x2a8   : > { %9126 = vmatpush1.bf16.msra.mxu0 %v17276_v10  ;;  %9729 = vmatprep.subr.bf16.mxu1 %v17287_v12  ;;  %v17320_v10 = vld [vmem:[%s24857_s1 + $0x1be4] ss:$16 sps:$4 sm:$0xff]   ;;  %v747_v12 = vrot.slane %v745_v25, 1  ;;  %v17361_v25 = vld [vmem:[%s24857_s1 + $0x10ac] ss:$16 sps:$4 sm:$0xff]  }
 0x2a9   : > { %9127 = vmatprep.subr.bf16.mxu0 %v17284_v42  ;;  %v742_v42 = vrot.slane %v740_v44, 2  ;;  %v17358_v44 = vld [vmem:[%s24857_s1 + $0x1ca4] ss:$16 sps:$4 sm:$0xff]  }
 0x2ab   : > { %9730 = vmatpush1.bf16.msra.mxu1 %v17285_v29  ;;  %v17318_v29 = vld [vmem:[%s24857_s1 + $0x1be0] ss:$16 sps:$4 sm:$0xff]  }
 0x2ac   : > { %9128 = vmatpush1.bf16.msra.mxu0 %v17282_v35  ;;  %9731 = vmatprep.subr.bf16.mxu1 %v17293_v39  ;;  %v750_v35 = vrot.slane %v748_v45, 2  ;;  %v692_v39 = vor.u32 %v691_v61, %v688_v53  ;;  %v17356_v45 = vld [vmem:[%s24857_s1 + $0x1ca0] ss:$16 sps:$4 sm:$0xff]   ;;  %v17359_v53 = vld [vmem:[%s24857_s1 + $0x10a8] ss:$16 sps:$4 sm:$0xff]  }
 0x2ad   : > { %9129 = vmatprep.subr.bf16.mxu0 %v17290_v58  ;;  %v17321_v58 = vld [vmem:[%s24857_s1 + $0xfe8] ss:$16 sps:$4 sm:$0xff]   ;;  %v17364_v61 = vld [vmem:[%s24857_s1 + $0x1cc4] ss:$16 sps:$4 sm:$0xff]  }
 0x2af   : > { %9732 = vmatpush1.bf16.msra.mxu1 %v17291_v17  ;;  %v17327_v17 = vld [vmem:[%s24857_s1 + $0x1c04] ss:$16 sps:$4 sm:$0xff]  }
 0x2b0   : > { %9130 = vmatpush1.bf16.msra.mxu0 %v17288_v24  ;;  %9733 = vmatprep.subr.bf16.mxu1 %v17299_v22  ;;  %v700_v24 = vor.u32 %v699_v50, %v696_v38  ;;  %v743_v22 = vor.u32 %v742_v42, %v739_v30  ;;  %v17367_v38 = vld [vmem:[%s24857_s1 + $0x10cc] ss:$16 sps:$4 sm:$0xff]   ;;  %v17362_v50 = vld [vmem:[%s24857_s1 + $0x1cc0] ss:$16 sps:$4 sm:$0xff]  }
 0x2b1   : > { %9131 = vmatprep.subr.bf16.mxu0 %v17296_v1  ;;  %v17330_v1 = vld [vmem:[%s24857_s1 + $0x100c] ss:$16 sps:$4 sm:$0xff]   ;;  %v17368_v42 = vld [vmem:[%s24857_s1 + $0x1ce0] ss:$16 sps:$4 sm:$0xff]  }
 0x2b2   : > { %v17373_v30 = vld [vmem:[%s24857_s1 + $0x10ec] ss:$16 sps:$4 sm:$0xff]  }
 0x2b3   : > { %9734 = vmatpush1.bf16.msra.mxu1 %v17297_v20  ;;  %v17325_v20 = vld [vmem:[%s24857_s1 + $0x1c00] ss:$16 sps:$4 sm:$0xff]  }
 0x2b4   : > { %9132 = vmatpush1.bf16.msra.mxu0 %v17294_v23  ;;  %9735 = vmatprep.subr.bf16.mxu1 %v17305_v51  ;;  %v751_v23 = vor.u32 %v750_v35, %v747_v12  ;;  %v21241_v51 = vsel %vm650_vm2, %v692_v39, %v700_v24  ;;  %v17371_v12 = vld [vmem:[%s24857_s1 + $0x10e8] ss:$16 sps:$4 sm:$0xff]   ;;  %v17376_v35 = vld [vmem:[%s24857_s1 + $0x1d04] ss:$16 sps:$4 sm:$0xff]  }
 0x2b5   : > { %9133 = vmatprep.subr.bf16.mxu0 %v17302_v6  ;;  %v17328_v6 = vld [vmem:[%s24857_s1 + $0x1008] ss:$16 sps:$4 sm:$0xff]   ;;  %v17382_v24 = vld [vmem:[%s24857_s1 + $0x1d24] ss:$16 sps:$4 sm:$0xff]  }
 0x2b6   : > { %v17377_v39 = vld [vmem:[%s24857_s1 + $0x1108] ss:$16 sps:$4 sm:$0xff]  }
 0x2b7   : > { %9736 = vmatpush1.bf16.msra.mxu1 %v17303_v26  ;;  %v17337_v26 = vld [vmem:[%s24857_s1 + $0x102c] ss:$16 sps:$4 sm:$0xff]  }
 0x2b8   : > { %9134 = vmatpush1.bf16.msra.mxu0 %v17300_v57  ;;  %9737 = vmatprep.subr.bf16.mxu1 %v17311_v19  ;;  %v17334_v57 = vld [vmem:[%s24857_s1 + $0x1c24] ss:$16 sps:$4 sm:$0xff]   ;;  %v17332_v19 = vld [vmem:[%s24857_s1 + $0x1c20] ss:$16 sps:$4 sm:$0xff]  }
 0x2b9   : > { %9135 = vmatprep.subr.bf16.mxu0 %v17308_v52  ;;  %v21252_v52 = vsel %vm650_vm2, %v743_v22, %v751_v23  ;;  %v17383_v22 = vld [vmem:[%s24857_s1 + $0x1128] ss:$16 sps:$4 sm:$0xff]   ;;  %v17388_v23 = vld [vmem:[%s24857_s1 + $0x1d44] ss:$16 sps:$4 sm:$0xff]  }
 0x2bb   : > { %9738 = vmatpush1.bf16.msra.mxu1 %v17309_v63  ;;  %v17340_v63 = vld [vmem:[%s24857_s1 + $0x1c44] ss:$16 sps:$4 sm:$0xff]  }
 0x2bc   : > { %9136 = vmatpush1.bf16.msra.mxu0 %v17306_v33  ;;  %9739 = vmatprep.subr.bf16.mxu1 %v17317_v59  ;;  %v17335_v33 = vld [vmem:[%s24857_s1 + $0x1028] ss:$16 sps:$4 sm:$0xff]   ;;  %v17352_v59 = vld [vmem:[%s24857_s1 + $0x1c84] ss:$16 sps:$4 sm:$0xff]  }
 0x2bd   : > { %9137 = vmatprep.subr.bf16.mxu0 %v17314_v43  ;;  %v17347_v43 = vld [vmem:[%s24857_s1 + $0x1068] ss:$16 sps:$4 sm:$0xff]  }
 0x2bf   : > { %9740 = vmatpush1.bf16.msra.mxu1 %v17315_v56  ;;  %v17350_v56 = vld [vmem:[%s24857_s1 + $0x1c80] ss:$16 sps:$4 sm:$0xff]  }
 0x2c0   : > { %9138 = vmatpush1.bf16.msra.mxu0 %v17312_v2  ;;  %9741 = vmatprep.subr.bf16.mxu1 %v17323_v8  ;;  %v17355_v2 = vld [vmem:[%s24857_s1 + $0x108c] ss:$16 sps:$4 sm:$0xff]   ;;  %v17370_v8 = vld [vmem:[%s24857_s1 + $0x1ce4] ss:$16 sps:$4 sm:$0xff]  }
 0x2c1   : > { %9139 = vmatprep.subr.bf16.mxu0 %v17320_v10  ;;  %v17365_v10 = vld [vmem:[%s24857_s1 + $0x10c8] ss:$16 sps:$4 sm:$0xff]  }
 0x2c3   : > { %9742 = vmatpush1.bf16.msra.mxu1 %v17321_v58  ;;  %v17374_v58 = vld [vmem:[%s24857_s1 + $0x1d00] ss:$16 sps:$4 sm:$0xff]  }
 0x2c4   : > { %9140 = vmatpush1.bf16.msra.mxu0 %v17318_v29  ;;  %9754 = vmatprep.subr.bf16.mxu1 %v17330_v1  ;;  %v17379_v29 = vld [vmem:[%s24857_s1 + $0x110c] ss:$16 sps:$4 sm:$0xff]   ;;  %v17380_v1 = vld [vmem:[%s24857_s1 + $0x1d20] ss:$16 sps:$4 sm:$0xff]  }
 0x2c5   : > { %9152 = vmatprep.subr.bf16.mxu0 %v17327_v17  ;;  %v17385_v17 = vld [vmem:[%s24857_s1 + $0x112c] ss:$16 sps:$4 sm:$0xff]  }
 0x2c6   : > { %9744 = vmatmul.mubr.bf16.vlgmr.msra.gmra.mrb[4].mxu1 %v19912_v49  ;;  %v17343_v49 = vld [vmem:[%s24857_s1 + $0x104c] ss:$16 sps:$4 sm:$0xff]  }
 0x2c7   : > { %9142 = vmatmul.mubr.bf16.vlgmr.msra.gmra.mrb[0].mxu0 %v21241_v51  ;;  %9755 = vmatpush1.bf16.msra.mxu1 %v17328_v6  ;;  %v17386_v6 = vld [vmem:[%s24857_s1 + $0x1d40] ss:$16 sps:$4 sm:$0xff]  }
 0x2c8   : > { %9153 = vmatpush1.bf16.msra.mxu0 %v17325_v20  ;;  %9756 = vmatprep.subr.bf16.mxu1 %v17337_v26  ;;  %v17391_v20 = vld [vmem:[%s24857_s1 + $0x114c] ss:$16 sps:$4 sm:$0xff]   ;;  %v17394_v26 = vld [vmem:[%s24857_s1 + $0x1d64] ss:$16 sps:$4 sm:$0xff]  }
 0x2c9   : > { %9154 = vmatprep.subr.bf16.mxu0 %v17334_v57  ;;  %9184 = vmatprep.mubr.bf16.mxu0 %v21252_v52  ;;  %v17389_v57 = vld [vmem:[%s24857_s1 + $0x1148] ss:$16 sps:$4 sm:$0xff]  }
 0x2ca   : > { %9786 = vmatprep.mubr.bf16.mxu1 %v19923_v54  ;;  %v17349_v54 = vld [vmem:[%s24857_s1 + $0x106c] ss:$16 sps:$4 sm:$0xff]  }
 0x2cb   : > { %9757 = vmatpush1.bf16.msra.mxu1 %v17335_v33  ;;  %v17392_v33 = vld [vmem:[%s24857_s1 + $0x1d60] ss:$16 sps:$4 sm:$0xff]  }
 0x2cc   : > { %9155 = vmatpush1.bf16.msra.mxu0 %v17332_v19  ;;  %9758 = vmatprep.subr.bf16.mxu1 %v17343_v49  ;;  %v17397_v19 = vld [vmem:[%s24857_s1 + $0x116c] ss:$16 sps:$4 sm:$0xff]   ;;  %v17400_v49 = vld [vmem:[%s24857_s1 + $0x1d84] ss:$16 sps:$4 sm:$0xff]  }
 0x2cd   : > { %9156 = vmatprep.subr.bf16.mxu0 %v17340_v63  ;;  %v17395_v63 = vld [vmem:[%s24857_s1 + $0x1168] ss:$16 sps:$4 sm:$0xff]  }
 0x2cf   : > { %9759 = vmatpush1.bf16.msra.mxu1 %v17341_v31  ;;  %v17398_v31 = vld [vmem:[%s24857_s1 + $0x1d80] ss:$16 sps:$4 sm:$0xff]  }
 0x2d0   : > { %9157 = vmatpush1.bf16.msra.mxu0 %v17338_v34  ;;  %9760 = vmatprep.subr.bf16.mxu1 %v17349_v54  ;;  %v17403_v34 = vld [vmem:[%s24857_s1 + $0x118c] ss:$16 sps:$4 sm:$0xff]   ;;  %v21396_v54 = vcombine.low %v21178_v28, %v21178_v28  ;;  %v17407_v28 = vld [vmem:[%s24857_s1 + $0x11a8] ss:$16 sps:$4 sm:$0xff]  }
 0x2d1   : > { %9158 = vmatprep.subr.bf16.mxu0 %v17346_v55  ;;  %v17401_v55 = vld [vmem:[%s24857_s1 + $0x1188] ss:$16 sps:$4 sm:$0xff]  }
 0x2d3   : > { %9761 = vmatpush1.bf16.msra.mxu1 %v17347_v43  ;;  %v17406_v43 = vld [vmem:[%s24857_s1 + $0x1da4] ss:$16 sps:$4 sm:$0xff]  }
 0x2d4   : > { %9159 = vmatpush1.bf16.msra.mxu0 %v17344_v36  ;;  %9762 = vmatprep.subr.bf16.mxu1 %v17355_v2  ;;  %v21399_v36 = vld [vmem:[%s18910_s25 + $0x58] sm:$0x33]  ;;  %v17404_v2 = vld [vmem:[%s24857_s1 + $0x1da0] ss:$16 sps:$4 sm:$0xff]  }
 0x2d5   : > { %9160 = vmatprep.subr.bf16.mxu0 %v17352_v59  ;;  %v17409_v59 = vld [vmem:[%s24857_s1 + $0x11ac] ss:$16 sps:$4 sm:$0xff]  }
 0x2d7   : > { %9763 = vmatpush1.bf16.msra.mxu1 %v17353_v41  ;;  %v720_v41 = vshrl.u32 %v20539_v40, 16 }
 0x2d8   : > { %9161 = vmatpush1.bf16.msra.mxu0 %v17350_v56  ;;  %9764 = vmatprep.subr.bf16.mxu1 %v17361_v25  ;;  %v21415_v56 = vcombine.high %v21399_v36, %v21399_v36  ;;  %v728_v25 = vshrl.u32 %v21396_v54, 16 }
 0x2d9   : > { %9162 = vmatprep.subr.bf16.mxu0 %v17358_v44  ;;  %v723_v44 = vshll.u32 %v20539_v40, 16  ;;  %v17413_v40 = vld [vmem:[%s24857_s1 + $0x11c8] ss:$16 sps:$4 sm:$0xff]  }
 0x2db   : > { %9765 = vmatpush1.bf16.msra.mxu1 %v17359_v53  ;;  %v17412_v53 = vld [vmem:[%s24857_s1 + $0x1dc4] ss:$16 sps:$4 sm:$0xff]  }
 0x2dc   : > { %9163 = vmatpush1.bf16.msra.mxu0 %v17356_v45  ;;  %9766 = vmatprep.subr.bf16.mxu1 %v17367_v38  ;;  %v731_v45 = vshll.u32 %v21396_v54, 16  ;;  %v17410_v38 = vld [vmem:[%s24857_s1 + $0x1dc0] ss:$16 sps:$4 sm:$0xff]  }
 0x2dd   : > { %9164 = vmatprep.subr.bf16.mxu0 %v17364_v61  ;;  %v17415_v61 = vld [vmem:[%s24857_s1 + $0x11cc] ss:$16 sps:$4 sm:$0xff]  }
 0x2df   : > { %9767 = vmatpush1.bf16.msra.mxu1 %v17365_v10  ;;  %v774_v10 = vshll.u32 %v20555_v48, 16 }
 0x2e0   : > { %9165 = vmatpush1.bf16.msra.mxu0 %v17362_v50  ;;  %9768 = vmatprep.subr.bf16.mxu1 %v17373_v30  ;;  %v771_v50 = vshrl.u32 %v20555_v48, 16  ;;  %v782_v30 = vshll.u32 %v21415_v56, 16  ;;  %v17421_v48 = vld [vmem:[%s24857_s1 + $0x11ec] ss:$16 sps:$4 sm:$0xff]  }
 0x2e1   : > { %9166 = vmatprep.subr.bf16.mxu0 %v17370_v8  ;;  %v779_v8 = vshrl.u32 %v21415_v56, 16 }
 0x2e3   : > { %9769 = vmatpush1.bf16.msra.mxu1 %v17371_v12  ;;  %v725_v12 = vrot.slane %v723_v44, 2  ;;  %v17439_v44 = vld [vmem:[%s24857_s1 + $0x1248] ss:$16 sps:$4 sm:$0xff]  }
 0x2e4   : > { %9167 = vmatpush1.bf16.msra.mxu0 %v17368_v42  ;;  %9770 = vmatprep.subr.bf16.mxu1 %v17379_v29  ;;  %v722_v42 = vrot.slane %v720_v41, 1  ;;  %v733_v29 = vrot.slane %v731_v45, 2  ;;  %v17436_v41 = vld [vmem:[%s24857_s1 + $0x1e40] ss:$16 sps:$4 sm:$0xff]  }
 0x2e5   : > { %9168 = vmatprep.subr.bf16.mxu0 %v17376_v35  ;;  %v730_v35 = vrot.slane %v728_v25, 1  ;;  %v17444_v25 = vld [vmem:[%s24857_s1 + $0x1e64] ss:$16 sps:$4 sm:$0xff]   ;;  %v17442_v45 = vld [vmem:[%s24857_s1 + $0x1e60] ss:$16 sps:$4 sm:$0xff]  }
 0x2e7   : > { %9771 = vmatpush1.bf16.msra.mxu1 %v17377_v39  ;;  %v773_v39 = vrot.slane %v771_v50, 1  ;;  %v17451_v50 = vld [vmem:[%s24857_s1 + $0x1288] ss:$16 sps:$4 sm:$0xff]  }
 0x2e8   : > { %9169 = vmatpush1.bf16.msra.mxu0 %v17374_v58  ;;  %9772 = vmatprep.subr.bf16.mxu1 %v17385_v17  ;;  %v17418_v58 = vld [vmem:[%s24857_s1 + $0x1de4] ss:$16 sps:$4 sm:$0xff]   ;;  %v781_v17 = vrot.slane %v779_v8, 1  ;;  %v17459_v8 = vld [vmem:[%s24857_s1 + $0x12ac] ss:$16 sps:$4 sm:$0xff]  }
 0x2e9   : > { %9170 = vmatprep.subr.bf16.mxu0 %v17382_v24  ;;  %v776_v24 = vrot.slane %v774_v10, 2  ;;  %v17456_v10 = vld [vmem:[%s24857_s1 + $0x1ea4] ss:$16 sps:$4 sm:$0xff]  }
 0x2eb   : > { %9773 = vmatpush1.bf16.msra.mxu1 %v17383_v22  ;;  %v17416_v22 = vld [vmem:[%s24857_s1 + $0x1de0] ss:$16 sps:$4 sm:$0xff]  }
 0x2ec   : > { %9171 = vmatpush1.bf16.msra.mxu0 %v17380_v1  ;;  %9774 = vmatprep.subr.bf16.mxu1 %v17391_v20  ;;  %v784_v1 = vrot.slane %v782_v30, 2  ;;  %v726_v20 = vor.u32 %v725_v12, %v722_v42  ;;  %v17454_v30 = vld [vmem:[%s24857_s1 + $0x1ea0] ss:$16 sps:$4 sm:$0xff]   ;;  %v17457_v42 = vld [vmem:[%s24857_s1 + $0x12a8] ss:$16 sps:$4 sm:$0xff]  }
 0x2ed   : > { %9172 = vmatprep.subr.bf16.mxu0 %v17388_v23  ;;  %v17419_v23 = vld [vmem:[%s24857_s1 + $0x11e8] ss:$16 sps:$4 sm:$0xff]   ;;  %v17462_v12 = vld [vmem:[%s24857_s1 + $0x1ec4] ss:$16 sps:$4 sm:$0xff]  }
 0x2ef   : > { %9775 = vmatpush1.bf16.msra.mxu1 %v17389_v57  ;;  %v17425_v57 = vld [vmem:[%s24857_s1 + $0x1e04] ss:$16 sps:$4 sm:$0xff]  }
 0x2f0   : > { %9173 = vmatpush1.bf16.msra.mxu0 %v17386_v6  ;;  %9776 = vmatprep.subr.bf16.mxu1 %v17397_v19  ;;  %v734_v6 = vor.u32 %v733_v29, %v730_v35  ;;  %v777_v19 = vor.u32 %v776_v24, %v773_v39  ;;  %v17465_v35 = vld [vmem:[%s24857_s1 + $0x12cc] ss:$16 sps:$4 sm:$0xff]   ;;  %v17460_v29 = vld [vmem:[%s24857_s1 + $0x1ec0] ss:$16 sps:$4 sm:$0xff]  }
 0x2f1   : > { %9174 = vmatprep.subr.bf16.mxu0 %v17394_v26  ;;  %v17428_v26 = vld [vmem:[%s24857_s1 + $0x120c] ss:$16 sps:$4 sm:$0xff]   ;;  %v17466_v24 = vld [vmem:[%s24857_s1 + $0x1ee0] ss:$16 sps:$4 sm:$0xff]  }
 0x2f2   : > { %v17471_v39 = vld [vmem:[%s24857_s1 + $0x12ec] ss:$16 sps:$4 sm:$0xff]  }
 0x2f3   : > { %9777 = vmatpush1.bf16.msra.mxu1 %v17395_v63  ;;  %v17423_v63 = vld [vmem:[%s24857_s1 + $0x1e00] ss:$16 sps:$4 sm:$0xff]  }
 0x2f4   : > { %9175 = vmatpush1.bf16.msra.mxu0 %v17392_v33  ;;  %9778 = vmatprep.subr.bf16.mxu1 %v17403_v34  ;;  %v785_v33 = vor.u32 %v784_v1, %v781_v17  ;;  %v21462_v34 = vsel %vm650_vm2, %v726_v20, %v734_v6  ;;  %v17469_v17 = vld [vmem:[%s24857_s1 + $0x12e8] ss:$16 sps:$4 sm:$0xff]   ;;  %v17474_v1 = vld [vmem:[%s24857_s1 + $0x1f04] ss:$16 sps:$4 sm:$0xff]  }
 0x2f5   : > { %9176 = vmatprep.subr.bf16.mxu0 %v17400_v49  ;;  %v17426_v49 = vld [vmem:[%s24857_s1 + $0x1208] ss:$16 sps:$4 sm:$0xff]   ;;  %v17480_v6 = vld [vmem:[%s24857_s1 + $0x1f24] ss:$16 sps:$4 sm:$0xff]  }
 0x2f6   : > { %v17475_v20 = vld [vmem:[%s24857_s1 + $0x1308] ss:$16 sps:$4 sm:$0xff]  }
 0x2f7   : > { %9779 = vmatpush1.bf16.msra.mxu1 %v17401_v55  ;;  %v17435_v55 = vld [vmem:[%s24857_s1 + $0x122c] ss:$16 sps:$4 sm:$0xff]  }
 0x2f8   : > { %9177 = vmatpush1.bf16.msra.mxu0 %v17398_v31  ;;  %9780 = vmatprep.subr.bf16.mxu1 %v17409_v59  ;;  %v17432_v31 = vld [vmem:[%s24857_s1 + $0x1e24] ss:$16 sps:$4 sm:$0xff]   ;;  %v17430_v59 = vld [vmem:[%s24857_s1 + $0x1e20] ss:$16 sps:$4 sm:$0xff]  }
 0x2f9   : > { %9178 = vmatprep.subr.bf16.mxu0 %v17406_v43  ;;  %v21473_v43 = vsel %vm650_vm2, %v777_v19, %v785_v33  ;;  %v17481_v19 = vld [vmem:[%s24857_s1 + $0x1328] ss:$16 sps:$4 sm:$0xff]   ;;  %v17486_v33 = vld [vmem:[%s24857_s1 + $0x1f44] ss:$16 sps:$4 sm:$0xff]  }
 0x2fb   : > { %9781 = vmatpush1.bf16.msra.mxu1 %v17407_v28  ;;  %v17438_v28 = vld [vmem:[%s24857_s1 + $0x1e44] ss:$16 sps:$4 sm:$0xff]  }
 0x2fc   : > { %9179 = vmatpush1.bf16.msra.mxu0 %v17404_v2  ;;  %9782 = vmatprep.subr.bf16.mxu1 %v17415_v61  ;;  %v17433_v2 = vld [vmem:[%s24857_s1 + $0x1228] ss:$16 sps:$4 sm:$0xff]   ;;  %v17450_v61 = vld [vmem:[%s24857_s1 + $0x1e84] ss:$16 sps:$4 sm:$0xff]  }
 0x2fd   : > { %9180 = vmatprep.subr.bf16.mxu0 %v17412_v53  ;;  %v17445_v53 = vld [vmem:[%s24857_s1 + $0x1268] ss:$16 sps:$4 sm:$0xff]  }
 0x2ff   : > { %9783 = vmatpush1.bf16.msra.mxu1 %v17413_v40  ;;  %v17448_v40 = vld [vmem:[%s24857_s1 + $0x1e80] ss:$16 sps:$4 sm:$0xff]  }
 0x300   : > { %9181 = vmatpush1.bf16.msra.mxu0 %v17410_v38  ;;  %9784 = vmatprep.subr.bf16.mxu1 %v17421_v48  ;;  %v17453_v38 = vld [vmem:[%s24857_s1 + $0x128c] ss:$16 sps:$4 sm:$0xff]   ;;  %v17468_v48 = vld [vmem:[%s24857_s1 + $0x1ee4] ss:$16 sps:$4 sm:$0xff]  }
 0x301   : > { %9182 = vmatprep.subr.bf16.mxu0 %v17418_v58  ;;  %v17463_v58 = vld [vmem:[%s24857_s1 + $0x12c8] ss:$16 sps:$4 sm:$0xff]  }
 0x303   : > { %9785 = vmatpush1.bf16.msra.mxu1 %v17419_v23  ;;  %v17472_v23 = vld [vmem:[%s24857_s1 + $0x1f00] ss:$16 sps:$4 sm:$0xff]  }
 0x304   : > { %9183 = vmatpush1.bf16.msra.mxu0 %v17416_v22  ;;  %9797 = vmatprep.subr.bf16.mxu1 %v17428_v26  ;;  %v17477_v22 = vld [vmem:[%s24857_s1 + $0x130c] ss:$16 sps:$4 sm:$0xff]   ;;  %v17478_v26 = vld [vmem:[%s24857_s1 + $0x1f20] ss:$16 sps:$4 sm:$0xff]  }
 0x305   : > { %9195 = vmatprep.subr.bf16.mxu0 %v17425_v57  ;;  %v17483_v57 = vld [vmem:[%s24857_s1 + $0x132c] ss:$16 sps:$4 sm:$0xff]  }
 0x306   : > { %9787 = vmatmul.mubr.bf16.vlgmr.msra.gmra.mrb[4].mxu1 %v20132_v37  ;;  %v17441_v37 = vld [vmem:[%s24857_s1 + $0x124c] ss:$16 sps:$4 sm:$0xff]  }
 0x307   : > { %9185 = vmatmul.mubr.bf16.vlgmr.msra.gmra.mrb[0].mxu0 %v21462_v34  ;;  %9798 = vmatpush1.bf16.msra.mxu1 %v17426_v49  ;;  %v17484_v49 = vld [vmem:[%s24857_s1 + $0x1f40] ss:$16 sps:$4 sm:$0xff]  }
 0x308   : > { %9196 = vmatpush1.bf16.msra.mxu0 %v17423_v63  ;;  %9799 = vmatprep.subr.bf16.mxu1 %v17435_v55  ;;  %v17489_v63 = vld [vmem:[%s24857_s1 + $0x134c] ss:$16 sps:$4 sm:$0xff]   ;;  %v17492_v55 = vld [vmem:[%s24857_s1 + $0x1f64] ss:$16 sps:$4 sm:$0xff]  }
 0x309   : > { %9197 = vmatprep.subr.bf16.mxu0 %v17432_v31  ;;  %9227 = vmatprep.mubr.bf16.mxu0 %v21473_v43  ;;  %v17487_v31 = vld [vmem:[%s24857_s1 + $0x1348] ss:$16 sps:$4 sm:$0xff]  }
 0x30a   : > { %9829 = vmatprep.mubr.bf16.mxu1 %v20143_v46  ;;  %v17447_v46 = vld [vmem:[%s24857_s1 + $0x126c] ss:$16 sps:$4 sm:$0xff]  }
 0x30b   : > { %9800 = vmatpush1.bf16.msra.mxu1 %v17433_v2  ;;  %v17490_v2 = vld [vmem:[%s24857_s1 + $0x1f60] ss:$16 sps:$4 sm:$0xff]  }
 0x30c   : > { %9198 = vmatpush1.bf16.msra.mxu0 %v17430_v59  ;;  %9801 = vmatprep.subr.bf16.mxu1 %v17441_v37  ;;  %v17495_v59 = vld [vmem:[%s24857_s1 + $0x136c] ss:$16 sps:$4 sm:$0xff]   ;;  %v17498_v37 = vld [vmem:[%s24857_s1 + $0x1f84] ss:$16 sps:$4 sm:$0xff]  }
 0x30d   : > { %9199 = vmatprep.subr.bf16.mxu0 %v17438_v28  ;;  %v17493_v28 = vld [vmem:[%s24857_s1 + $0x1368] ss:$16 sps:$4 sm:$0xff]  }
 0x30f   : > { %9802 = vmatpush1.bf16.msra.mxu1 %v17439_v44  ;;  %v17496_v44 = vld [vmem:[%s24857_s1 + $0x1f80] ss:$16 sps:$4 sm:$0xff]  }
 0x310   : > { %9200 = vmatpush1.bf16.msra.mxu0 %v17436_v41  ;;  %9803 = vmatprep.subr.bf16.mxu1 %v17447_v46  ;;  %v17501_v41 = vld [vmem:[%s24857_s1 + $0x138c] ss:$16 sps:$4 sm:$0xff]   ;;  %v21617_v46 = vcombine.low %v21399_v36, %v21399_v36  ;;  %v17505_v36 = vld [vmem:[%s24857_s1 + $0x13a8] ss:$16 sps:$4 sm:$0xff]  }
 0x311   : > { %9201 = vmatprep.subr.bf16.mxu0 %v17444_v25  ;;  %v17499_v25 = vld [vmem:[%s24857_s1 + $0x1388] ss:$16 sps:$4 sm:$0xff]  }
 0x313   : > { %9804 = vmatpush1.bf16.msra.mxu1 %v17445_v53  ;;  %v17507_v53 = vld [vmem:[%s24857_s1 + $0x13ac] ss:$16 sps:$4 sm:$0xff]  }
 0x314   : > { %9202 = vmatpush1.bf16.msra.mxu0 %v17442_v45  ;;  %9805 = vmatprep.subr.bf16.mxu1 %v17453_v38  ;;  %v17504_v45 = vld [vmem:[%s24857_s1 + $0x1fa4] ss:$16 sps:$4 sm:$0xff]   ;;  %v754_v38 = vshrl.u32 %v20770_v60, 16 }
 0x315   : > { %9203 = vmatprep.subr.bf16.mxu0 %v17450_v61  ;;  %v17502_v61 = vld [vmem:[%s24857_s1 + $0x1fa0] ss:$16 sps:$4 sm:$0xff]  }
 0x317   : > { %9806 = vmatpush1.bf16.msra.mxu1 %v17451_v50  ;;  %v762_v50 = vshrl.u32 %v21617_v46, 16 }
 0x318   : > { %9204 = vmatpush1.bf16.msra.mxu0 %v17448_v40  ;;  %9807 = vmatprep.subr.bf16.mxu1 %v17459_v8  ;;  %v757_v40 = vshll.u32 %v20770_v60, 16  ;;  %v17510_v8 = vld [vmem:[%s24857_s1 + $0x1fc4] ss:$16 sps:$4 sm:$0xff]   ;;  %v17511_v60 = vld [vmem:[%s24857_s1 + $0x13c8] ss:$16 sps:$4 sm:$0xff]  }
 0x319   : > { %9205 = vmatprep.subr.bf16.mxu0 %v17456_v10  ;;  %v765_v10 = vshll.u32 %v21617_v46, 16 }
 0x31b   : > { %9808 = vmatpush1.bf16.msra.mxu1 %v17457_v42  ;;  %v17508_v42 = vld [vmem:[%s24857_s1 + $0x1fc0] ss:$16 sps:$4 sm:$0xff]  }
 0x31c   : > { %9206 = vmatpush1.bf16.msra.mxu0 %v17454_v30  ;;  %9809 = vmatprep.subr.bf16.mxu1 %v17465_v35  ;;  %v17513_v30 = vld [vmem:[%s24857_s1 + $0x13cc] ss:$16 sps:$4 sm:$0xff]   ;;  %v759_v35 = vrot.slane %v757_v40, 2  ;;  %v17549_v40 = vld [vmem:[%s24857_s1 + $0x1488] ss:$16 sps:$4 sm:$0xff]  }
 0x31d   : > { %9207 = vmatprep.subr.bf16.mxu0 %v17462_v12  ;;  %v756_v12 = vrot.slane %v754_v38, 1  ;;  %v17551_v38 = vld [vmem:[%s24857_s1 + $0x148c] ss:$16 sps:$4 sm:$0xff]  }
 0x31f   : > { %9810 = vmatpush1.bf16.msra.mxu1 %v17463_v58  ;;  %v767_v58 = vrot.slane %v765_v10, 2  ;;  %v17557_v10 = vld [vmem:[%s24857_s1 + $0x14ac] ss:$16 sps:$4 sm:$0xff]  }
 0x320   : > { %9208 = vmatpush1.bf16.msra.mxu0 %v17460_v29  ;;  %9811 = vmatprep.subr.bf16.mxu1 %v17471_v39  ;;  %v764_v29 = vrot.slane %v762_v50, 1  ;;  %v17516_v39 = vld [vmem:[%s24857_s1 + $0x1fe4] ss:$16 sps:$4 sm:$0xff]  }
 0x321   : > { %9209 = vmatprep.subr.bf16.mxu0 %v17468_v48  ;;  %v21648_v48 = vld [vmem:[%s18910_s25] sm:$0xcc] }
 0x322   : > { %v17554_v50 = vld [vmem:[%s24857_s1 + $0x20a4] ss:$16 sps:$4 sm:$0xff]  }
 0x323   : > { %9812 = vmatpush1.bf16.msra.mxu1 %v17469_v17  ;;  %v21657_v17 = vld [vmem:[%s18910_s25 + $0x20] sm:$0xff] }
 0x324   : > { %9210 = vmatpush1.bf16.msra.mxu0 %v17466_v24  ;;  %9813 = vmatprep.subr.bf16.mxu1 %v17477_v22  ;;  %v17519_v24 = vld [vmem:[%s24857_s1 + $0x13ec] ss:$16 sps:$4 sm:$0xff]   ;;  %v17514_v22 = vld [vmem:[%s24857_s1 + $0x1fe0] ss:$16 sps:$4 sm:$0xff]  }
 0x325   : > { %9211 = vmatprep.subr.bf16.mxu0 %v17474_v1  ;;  %v13886_v1 = vcombine.high %v21648_v48, %v21657_v17 }
 0x327   : > { %9814 = vmatpush1.bf16.msra.mxu1 %v17475_v20  ;;  %v760_v20 = vor.u32 %v759_v35, %v756_v12  ;;  %v17558_v12 = vld [vmem:[%s24857_s1 + $0x20c0] ss:$16 sps:$4 sm:$0xff]   ;;  %v17561_v35 = vld [vmem:[%s24857_s1 + $0x14c8] ss:$16 sps:$4 sm:$0xff]  }
 0x328   : > { %9212 = vmatpush1.bf16.msra.mxu0 %v17472_v23  ;;  %9815 = vmatprep.subr.bf16.mxu1 %v17483_v57  ;;  %v17517_v23 = vld [vmem:[%s24857_s1 + $0x13e8] ss:$16 sps:$4 sm:$0xff]   ;;  %v17523_v57 = vld [vmem:[%s24857_s1 + $0x2004] ss:$16 sps:$4 sm:$0xff]  }
 0x329   : > { %9213 = vmatprep.subr.bf16.mxu0 %v17480_v6  ;;  %v768_v6 = vor.u32 %v767_v58, %v764_v29  ;;  %v17566_v29 = vld [vmem:[%s24857_s1 + $0x20e4] ss:$16 sps:$4 sm:$0xff]   ;;  %v17569_v58 = vld [vmem:[%s24857_s1 + $0x14ec] ss:$16 sps:$4 sm:$0xff]  }
 0x32b   : > { %9816 = vmatpush1.bf16.msra.mxu1 %v17481_v19  ;;  %v819_v19 = vrot.slane %v13886_v1, 2  ;;  %v17572_v1 = vld [vmem:[%s24857_s1 + $0x2104] ss:$16 sps:$4 sm:$0xff]  }
 0x32c   : > { %9214 = vmatpush1.bf16.msra.mxu0 %v17478_v26  ;;  %9817 = vmatprep.subr.bf16.mxu1 %v17489_v63  ;;  %v17526_v26 = vld [vmem:[%s24857_s1 + $0x140c] ss:$16 sps:$4 sm:$0xff]   ;;  %v17521_v63 = vld [vmem:[%s24857_s1 + $0x2000] ss:$16 sps:$4 sm:$0xff]  }
 0x32d   : > { %9215 = vmatprep.subr.bf16.mxu0 %v17486_v33  ;;  %v820_v33 = vrot.slane %v20744_v11, 2  ;;  %v17530_v11 = vld [vmem:[%s24857_s1 + $0x2024] ss:$16 sps:$4 sm:$0xff]  }
 0x32f   : > { %9818 = vmatpush1.bf16.msra.mxu1 %v17487_v31  ;;  %v21681_v31 = vsel %vm650_vm2, %v760_v20, %v768_v6  ;;  %v17573_v20 = vld [vmem:[%s24857_s1 + $0x1508] ss:$16 sps:$4 sm:$0xff]   ;;  %v17578_v6 = vld [vmem:[%s24857_s1 + $0x2124] ss:$16 sps:$4 sm:$0xff]  }
 0x330   : > { %9216 = vmatpush1.bf16.msra.mxu0 %v17484_v49  ;;  %9819 = vmatprep.subr.bf16.mxu1 %v17495_v59  ;;  %v17524_v49 = vld [vmem:[%s24857_s1 + $0x1408] ss:$16 sps:$4 sm:$0xff]   ;;  %v21692_v59 = vsel %vm815_vm3, %v819_v19, %v820_v33  ;;  %v17584_v33 = vld [vmem:[%s24857_s1 + $0x2144] ss:$16 sps:$4 sm:$0xff]  }
 0x331   : > { %9217 = vmatprep.subr.bf16.mxu0 %v17492_v55  ;;  %v17533_v55 = vld [vmem:[%s24857_s1 + $0x142c] ss:$16 sps:$4 sm:$0xff]   ;;  %v17579_v19 = vld [vmem:[%s24857_s1 + $0x1528] ss:$16 sps:$4 sm:$0xff]  }
 0x333   : > { %9820 = vmatpush1.bf16.msra.mxu1 %v17493_v28  ;;  %v17531_v28 = vld [vmem:[%s24857_s1 + $0x1428] ss:$16 sps:$4 sm:$0xff]  }
 0x334   : > { %9218 = vmatpush1.bf16.msra.mxu0 %v17490_v2  ;;  %9821 = vmatprep.subr.bf16.mxu1 %v17501_v41  ;;  %v17528_v2 = vld [vmem:[%s24857_s1 + $0x2020] ss:$16 sps:$4 sm:$0xff]  }
 0x335   : > { %9219 = vmatprep.subr.bf16.mxu0 %v17498_v37  ;;  %v17536_v37 = vld [vmem:[%s24857_s1 + $0x2044] ss:$16 sps:$4 sm:$0xff]   ;;  %v17534_v41 = vld [vmem:[%s24857_s1 + $0x2040] ss:$16 sps:$4 sm:$0xff]  }
 0x337   : > { %9822 = vmatpush1.bf16.msra.mxu1 %v17499_v25  ;;  %v17542_v25 = vld [vmem:[%s24857_s1 + $0x2064] ss:$16 sps:$4 sm:$0xff]  }
 0x338   : > { %9220 = vmatpush1.bf16.msra.mxu0 %v17496_v44  ;;  %9823 = vmatprep.subr.bf16.mxu1 %v17507_v53  ;;  %v17537_v44 = vld [vmem:[%s24857_s1 + $0x1448] ss:$16 sps:$4 sm:$0xff]  }
 0x339   : > { %9221 = vmatprep.subr.bf16.mxu0 %v17504_v45  ;;  %v17540_v45 = vld [vmem:[%s24857_s1 + $0x2060] ss:$16 sps:$4 sm:$0xff]   ;;  %v17543_v53 = vld [vmem:[%s24857_s1 + $0x1468] ss:$16 sps:$4 sm:$0xff]  }
 0x33b   : > { %9824 = vmatpush1.bf16.msra.mxu1 %v17505_v36  ;;  %v17546_v36 = vld [vmem:[%s24857_s1 + $0x2080] ss:$16 sps:$4 sm:$0xff]  }
 0x33c   : > { %9222 = vmatpush1.bf16.msra.mxu0 %v17502_v61  ;;  %9825 = vmatprep.subr.bf16.mxu1 %v17513_v30  ;;  %v17548_v61 = vld [vmem:[%s24857_s1 + $0x2084] ss:$16 sps:$4 sm:$0xff]   ;;  %v17555_v30 = vld [vmem:[%s24857_s1 + $0x14a8] ss:$16 sps:$4 sm:$0xff]  }
 0x33d   : > { %9223 = vmatprep.subr.bf16.mxu0 %v17510_v8  ;;  %v17552_v8 = vld [vmem:[%s24857_s1 + $0x20a0] ss:$16 sps:$4 sm:$0xff]  }
 0x33f   : > { %9826 = vmatpush1.bf16.msra.mxu1 %v17511_v60  ;;  %v17563_v60 = vld [vmem:[%s24857_s1 + $0x14cc] ss:$16 sps:$4 sm:$0xff]  }
 0x340   : > { %9224 = vmatpush1.bf16.msra.mxu0 %v17508_v42  ;;  %9827 = vmatprep.subr.bf16.mxu1 %v17519_v24  ;;  %v17560_v42 = vld [vmem:[%s24857_s1 + $0x20c4] ss:$16 sps:$4 sm:$0xff]   ;;  %v17567_v24 = vld [vmem:[%s24857_s1 + $0x14e8] ss:$16 sps:$4 sm:$0xff]  }
 0x341   : > { %9225 = vmatprep.subr.bf16.mxu0 %v17516_v39  ;;  %v17564_v39 = vld [vmem:[%s24857_s1 + $0x20e0] ss:$16 sps:$4 sm:$0xff]  }
 0x343   : > { %9828 = vmatpush1.bf16.msra.mxu1 %v17517_v23  ;;  %v17570_v23 = vld [vmem:[%s24857_s1 + $0x2100] ss:$16 sps:$4 sm:$0xff]  }
 0x344   : > { %9226 = vmatpush1.bf16.msra.mxu0 %v17514_v22  ;;  %9840 = vmatprep.subr.bf16.mxu1 %v17526_v26  ;;  %v17575_v22 = vld [vmem:[%s24857_s1 + $0x150c] ss:$16 sps:$4 sm:$0xff]   ;;  %v17576_v26 = vld [vmem:[%s24857_s1 + $0x2120] ss:$16 sps:$4 sm:$0xff]  }
 0x345   : > { %9238 = vmatprep.subr.bf16.mxu0 %v17523_v57  ;;  %v17581_v57 = vld [vmem:[%s24857_s1 + $0x152c] ss:$16 sps:$4 sm:$0xff]  }
 0x346   : > { %9830 = vmatmul.mubr.bf16.vlgmr.msra.gmra.mrb[4].mxu1 %v20360_v16  ;;  %v17539_v16 = vld [vmem:[%s24857_s1 + $0x144c] ss:$16 sps:$4 sm:$0xff]  }
 0x347   : > { %9228 = vmatmul.mubr.bf16.vlgmr.msra.gmra.mrb[0].mxu0 %v21681_v31  ;;  %9841 = vmatpush1.bf16.msra.mxu1 %v17524_v49  ;;  %v17582_v49 = vld [vmem:[%s24857_s1 + $0x2140] ss:$16 sps:$4 sm:$0xff]  }
 0x348   : > { %9239 = vmatpush1.bf16.msra.mxu0 %v17521_v63  ;;  %9842 = vmatprep.subr.bf16.mxu1 %v17533_v55  ;;  %v17587_v63 = vld [vmem:[%s24857_s1 + $0x154c] ss:$16 sps:$4 sm:$0xff]   ;;  %v17590_v55 = vld [vmem:[%s24857_s1 + $0x2164] ss:$16 sps:$4 sm:$0xff]  }
 0x349   : > { %9240 = vmatprep.subr.bf16.mxu0 %v17530_v11  ;;  %9270 = vmatprep.mubr.bf16.mxu0 %v21692_v59  ;;  %v17585_v11 = vld [vmem:[%s24857_s1 + $0x1548] ss:$16 sps:$4 sm:$0xff]  }
 0x34a   : > { %9872 = vmatprep.mubr.bf16.mxu1 %v20371_v18  ;;  %v17545_v18 = vld [vmem:[%s24857_s1 + $0x146c] ss:$16 sps:$4 sm:$0xff]  }
 0x34b   : > { %9843 = vmatpush1.bf16.msra.mxu1 %v17531_v28  ;;  %v17588_v28 = vld [vmem:[%s24857_s1 + $0x2160] ss:$16 sps:$4 sm:$0xff]  }
 0x34c   : > { %9241 = vmatpush1.bf16.msra.mxu0 %v17528_v2  ;;  %9844 = vmatprep.subr.bf16.mxu1 %v17539_v16  ;;  %v17593_v2 = vld [vmem:[%s24857_s1 + $0x156c] ss:$16 sps:$4 sm:$0xff]   ;;  %v17596_v16 = vld [vmem:[%s24857_s1 + $0x2184] ss:$16 sps:$4 sm:$0xff]  }
 0x34d   : > { %9242 = vmatprep.subr.bf16.mxu0 %v17536_v37  ;;  %v17591_v37 = vld [vmem:[%s24857_s1 + $0x1568] ss:$16 sps:$4 sm:$0xff]  }
 0x34f   : > { %9845 = vmatpush1.bf16.msra.mxu1 %v17537_v44  ;;  %v17594_v44 = vld [vmem:[%s24857_s1 + $0x2180] ss:$16 sps:$4 sm:$0xff]  }
 0x350   : > { %9243 = vmatpush1.bf16.msra.mxu0 %v17534_v41  ;;  %9846 = vmatprep.subr.bf16.mxu1 %v17545_v18  ;;  %v17599_v41 = vld [vmem:[%s24857_s1 + $0x158c] ss:$16 sps:$4 sm:$0xff]   ;;  %v17602_v18 = vld [vmem:[%s24857_s1 + $0x21a4] ss:$16 sps:$4 sm:$0xff]  }
 0x351   : > { %9244 = vmatprep.subr.bf16.mxu0 %v17542_v25  ;;  %v17597_v25 = vld [vmem:[%s24857_s1 + $0x1588] ss:$16 sps:$4 sm:$0xff]  }
 0x353   : > { %9847 = vmatpush1.bf16.msra.mxu1 %v17543_v53  ;;  %v17600_v53 = vld [vmem:[%s24857_s1 + $0x21a0] ss:$16 sps:$4 sm:$0xff]  }
 0x354   : > { %9245 = vmatpush1.bf16.msra.mxu0 %v17540_v45  ;;  %9848 = vmatprep.subr.bf16.mxu1 %v17551_v38  ;;  %v17605_v45 = vld [vmem:[%s24857_s1 + $0x15ac] ss:$16 sps:$4 sm:$0xff]   ;;  %v17608_v38 = vld [vmem:[%s24857_s1 + $0x21c4] ss:$16 sps:$4 sm:$0xff]  }
 0x355   : > { %9246 = vmatprep.subr.bf16.mxu0 %v17548_v61  ;;  %v17603_v61 = vld [vmem:[%s24857_s1 + $0x15a8] ss:$16 sps:$4 sm:$0xff]  }
 0x357   : > { %9849 = vmatpush1.bf16.msra.mxu1 %v17549_v40  ;;  %v17606_v40 = vld [vmem:[%s24857_s1 + $0x21c0] ss:$16 sps:$4 sm:$0xff]  }
 0x358   : > { %9247 = vmatpush1.bf16.msra.mxu0 %v17546_v36  ;;  %9850 = vmatprep.subr.bf16.mxu1 %v17557_v10  ;;  %v17611_v36 = vld [vmem:[%s24857_s1 + $0x15cc] ss:$16 sps:$4 sm:$0xff]   ;;  %v13885_v10 = vcombine.low %v21648_v48, %v21657_v17  ;;  %v17615_v17 = vld [vmem:[%s24857_s1 + $0x15e8] ss:$16 sps:$4 sm:$0xff]  }
 0x359   : > { %9248 = vmatprep.subr.bf16.mxu0 %v17554_v50  ;;  %v17609_v50 = vld [vmem:[%s24857_s1 + $0x15c8] ss:$16 sps:$4 sm:$0xff]  }
 0x35b   : > { %9851 = vmatpush1.bf16.msra.mxu1 %v17555_v30  ;;  %v17614_v30 = vld [vmem:[%s24857_s1 + $0x21e4] ss:$16 sps:$4 sm:$0xff]  }
 0x35c   : > { %9249 = vmatpush1.bf16.msra.mxu0 %v17552_v8  ;;  %9852 = vmatprep.subr.bf16.mxu1 %v17563_v60  ;;  %v21861_v8 = vld [vmem:[%s18910_s25 + $0x8] sm:$0xcc]  ;;  %v17612_v60 = vld [vmem:[%s24857_s1 + $0x21e0] ss:$16 sps:$4 sm:$0xff]  }
 0x35d   : > { %9250 = vmatprep.subr.bf16.mxu0 %v17560_v42  ;;  %v17617_v42 = vld [vmem:[%s24857_s1 + $0x15ec] ss:$16 sps:$4 sm:$0xff]  }
 0x35f   : > { %9853 = vmatpush1.bf16.msra.mxu1 %v17561_v35  ;;  %v816_v35 = vrot.slane %v13885_v10, 2  ;;  %v17663_v10 = vld [vmem:[%s24857_s1 + $0x16e8] ss:$16 sps:$4 sm:$0xff]  }
 0x360   : > { %9251 = vmatpush1.bf16.msra.mxu0 %v17558_v12  ;;  %9854 = vmatprep.subr.bf16.mxu1 %v17569_v58  ;;  %v21873_v12 = vld [vmem:[%s18910_s25 + $0x28] sm:$0xff]  ;;  %v17620_v58 = vld [vmem:[%s24857_s1 + $0x2204] ss:$16 sps:$4 sm:$0xff]  }
 0x361   : > { %9252 = vmatprep.subr.bf16.mxu0 %v17566_v29  ;;  %v13888_v48 = vcombine.high %v21861_v8, %v21873_v12  ;;  %v817_v29 = vrot.slane %v20954_v27, 2  ;;  %v17621_v27 = vld [vmem:[%s24857_s1 + $0x1608] ss:$16 sps:$4 sm:$0xff]  }
 0x363   : > { %9855 = vmatpush1.bf16.msra.mxu1 %v17567_v24  ;;  %v825_v24 = vrot.slane %v13888_v48, 2  ;;  %v17669_v48 = vld [vmem:[%s24857_s1 + $0x1708] ss:$16 sps:$4 sm:$0xff]  }
 0x364   : > { %9253 = vmatpush1.bf16.msra.mxu0 %v17564_v39  ;;  %9856 = vmatprep.subr.bf16.mxu1 %v17575_v22  ;;  %v17623_v39 = vld [vmem:[%s24857_s1 + $0x160c] ss:$16 sps:$4 sm:$0xff]   ;;  %v17618_v22 = vld [vmem:[%s24857_s1 + $0x2200] ss:$16 sps:$4 sm:$0xff]  }
 0x365   : > { %9254 = vmatprep.subr.bf16.mxu0 %v17572_v1  ;;  %v826_v1 = vrot.slane %v20973_v32, 2  ;;  %v17629_v32 = vld [vmem:[%s24857_s1 + $0x162c] ss:$16 sps:$4 sm:$0xff]  }
 0x367   : > { %9857 = vmatpush1.bf16.msra.mxu1 %v17573_v20  ;;  %v17626_v20 = vld [vmem:[%s24857_s1 + $0x2224] ss:$16 sps:$4 sm:$0xff]  }
 0x368   : > { %9255 = vmatpush1.bf16.msra.mxu0 %v17570_v23  ;;  %9858 = vmatprep.subr.bf16.mxu1 %v17581_v57  ;;  %v21895_v23 = vsel %vm815_vm3, %v816_v35, %v817_v29  ;;  %v17624_v57 = vld [vmem:[%s24857_s1 + $0x2220] ss:$16 sps:$4 sm:$0xff]   ;;  %v17677_v35 = vld [vmem:[%s24857_s1 + $0x172c] ss:$16 sps:$4 sm:$0xff]  }
 0x369   : > { %9256 = vmatprep.subr.bf16.mxu0 %v17578_v6  ;;  %v21906_v6 = vsel %vm815_vm3, %v825_v24, %v826_v1  ;;  %v17672_v29 = vld [vmem:[%s24857_s1 + $0x2320] ss:$16 sps:$4 sm:$0xff]   ;;  %v17683_v24 = vld [vmem:[%s24857_s1 + $0x174c] ss:$16 sps:$4 sm:$0xff]  }
 0x36a   : > { %v17678_v1 = vld [vmem:[%s24857_s1 + $0x2340] ss:$16 sps:$4 sm:$0xff]  }
 0x36b   : > { %9859 = vmatpush1.bf16.msra.mxu1 %v17579_v19  ;;  %v17632_v19 = vld [vmem:[%s24857_s1 + $0x2244] ss:$16 sps:$4 sm:$0xff]  }
 0x36c   : > { %9257 = vmatpush1.bf16.msra.mxu0 %v17576_v26  ;;  %9860 = vmatprep.subr.bf16.mxu1 %v17587_v63  ;;  %v17627_v26 = vld [vmem:[%s24857_s1 + $0x1628] ss:$16 sps:$4 sm:$0xff]  }
 0x36d   : > { %9258 = vmatprep.subr.bf16.mxu0 %v17584_v33  ;;  %v17630_v33 = vld [vmem:[%s24857_s1 + $0x2240] ss:$16 sps:$4 sm:$0xff]   ;;  %v17633_v63 = vld [vmem:[%s24857_s1 + $0x1648] ss:$16 sps:$4 sm:$0xff]  }
 0x36f   : > { %9861 = vmatpush1.bf16.msra.mxu1 %v17585_v11  ;;  %v17636_v11 = vld [vmem:[%s24857_s1 + $0x2260] ss:$16 sps:$4 sm:$0xff]  }
 0x370   : > { %9259 = vmatpush1.bf16.msra.mxu0 %v17582_v49  ;;  %9862 = vmatprep.subr.bf16.mxu1 %v17593_v2  ;;  %v17638_v49 = vld [vmem:[%s24857_s1 + $0x2264] ss:$16 sps:$4 sm:$0xff]  }
 0x371   : > { %9260 = vmatprep.subr.bf16.mxu0 %v17590_v55  ;;  %v17639_v55 = vld [vmem:[%s24857_s1 + $0x1668] ss:$16 sps:$4 sm:$0xff]   ;;  %v17644_v2 = vld [vmem:[%s24857_s1 + $0x2284] ss:$16 sps:$4 sm:$0xff]  }
 0x373   : > { %9863 = vmatpush1.bf16.msra.mxu1 %v17591_v37  ;;  %v17642_v37 = vld [vmem:[%s24857_s1 + $0x2280] ss:$16 sps:$4 sm:$0xff]  }
 0x374   : > { %9261 = vmatpush1.bf16.msra.mxu0 %v17588_v28  ;;  %9864 = vmatprep.subr.bf16.mxu1 %v17599_v41  ;;  %v17647_v28 = vld [vmem:[%s24857_s1 + $0x168c] ss:$16 sps:$4 sm:$0xff]   ;;  %v17650_v41 = vld [vmem:[%s24857_s1 + $0x22a4] ss:$16 sps:$4 sm:$0xff]  }
 0x375   : > { %9262 = vmatprep.subr.bf16.mxu0 %v17596_v16  ;;  %v17645_v16 = vld [vmem:[%s24857_s1 + $0x1688] ss:$16 sps:$4 sm:$0xff]  }
 0x377   : > { %9865 = vmatpush1.bf16.msra.mxu1 %v17597_v25  ;;  %v17648_v25 = vld [vmem:[%s24857_s1 + $0x22a0] ss:$16 sps:$4 sm:$0xff]  }
 0x378   : > { %9263 = vmatpush1.bf16.msra.mxu0 %v17594_v44  ;;  %9866 = vmatprep.subr.bf16.mxu1 %v17605_v45  ;;  %v17653_v44 = vld [vmem:[%s24857_s1 + $0x16ac] ss:$16 sps:$4 sm:$0xff]   ;;  %v17656_v45 = vld [vmem:[%s24857_s1 + $0x22c4] ss:$16 sps:$4 sm:$0xff]  }
 0x379   : > { %9264 = vmatprep.subr.bf16.mxu0 %v17602_v18  ;;  %v17651_v18 = vld [vmem:[%s24857_s1 + $0x16a8] ss:$16 sps:$4 sm:$0xff]  }
 0x37b   : > { %9867 = vmatpush1.bf16.msra.mxu1 %v17603_v61  ;;  %v17654_v61 = vld [vmem:[%s24857_s1 + $0x22c0] ss:$16 sps:$4 sm:$0xff]  }
 0x37c   : > { %9265 = vmatpush1.bf16.msra.mxu0 %v17600_v53  ;;  %9868 = vmatprep.subr.bf16.mxu1 %v17611_v36  ;;  %v17659_v53 = vld [vmem:[%s24857_s1 + $0x16cc] ss:$16 sps:$4 sm:$0xff]   ;;  %v17662_v36 = vld [vmem:[%s24857_s1 + $0x22e4] ss:$16 sps:$4 sm:$0xff]  }
 0x37d   : > { %9266 = vmatprep.subr.bf16.mxu0 %v17608_v38  ;;  %v17657_v38 = vld [vmem:[%s24857_s1 + $0x16c8] ss:$16 sps:$4 sm:$0xff]  }
 0x37f   : > { %9869 = vmatpush1.bf16.msra.mxu1 %v17609_v50  ;;  %v17660_v50 = vld [vmem:[%s24857_s1 + $0x22e0] ss:$16 sps:$4 sm:$0xff]  }
 0x380   : > { %9267 = vmatpush1.bf16.msra.mxu0 %v17606_v40  ;;  %9870 = vmatprep.subr.bf16.mxu1 %v17617_v42  ;;  %v17665_v40 = vld [vmem:[%s24857_s1 + $0x16ec] ss:$16 sps:$4 sm:$0xff]  }
 0x381   : > { %9268 = vmatprep.subr.bf16.mxu0 %v17614_v30  ;;  %v17668_v30 = vld [vmem:[%s24857_s1 + $0x2304] ss:$16 sps:$4 sm:$0xff]   ;;  %v17671_v42 = vld [vmem:[%s24857_s1 + $0x170c] ss:$16 sps:$4 sm:$0xff]  }
 0x383   : > { %9871 = vmatpush1.bf16.msra.mxu1 %v17615_v17  ;;  %v17674_v17 = vld [vmem:[%s24857_s1 + $0x2324] ss:$16 sps:$4 sm:$0xff]  }
 0x384   : > { %9269 = vmatpush1.bf16.msra.mxu0 %v17612_v60  ;;  %9883 = vmatprep.subr.bf16.mxu1 %v17623_v39  ;;  %v17666_v60 = vld [vmem:[%s24857_s1 + $0x2300] ss:$16 sps:$4 sm:$0xff]   ;;  %v17680_v39 = vld [vmem:[%s24857_s1 + $0x2344] ss:$16 sps:$4 sm:$0xff]  }
 0x385   : > { %9281 = vmatprep.subr.bf16.mxu0 %v17620_v58  ;;  %v17675_v58 = vld [vmem:[%s24857_s1 + $0x1728] ss:$16 sps:$4 sm:$0xff]  }
 0x386   : > { %9873 = vmatmul.mubr.bf16.vlgmr.msra.gmra.mrb[4].mxu1 %v20580_v5  ;;  %v17635_v5 = vld [vmem:[%s24857_s1 + $0x164c] ss:$16 sps:$4 sm:$0xff]  }
 0x387   : > { %9271 = vmatmul.mubr.bf16.vlgmr.msra.gmra.mrb[0].mxu0 %v21895_v23  ;;  %9884 = vmatpush1.bf16.msra.mxu1 %v17621_v27  ;;  %v17686_v27 = vld [vmem:[%s24857_s1 + $0x2364] ss:$16 sps:$4 sm:$0xff]  }
 0x388   : > { %9282 = vmatpush1.bf16.msra.mxu0 %v17618_v22  ;;  %9885 = vmatprep.subr.bf16.mxu1 %v17629_v32  ;;  %v17681_v22 = vld [vmem:[%s24857_s1 + $0x1748] ss:$16 sps:$4 sm:$0xff]   ;;  %v17684_v32 = vld [vmem:[%s24857_s1 + $0x2360] ss:$16 sps:$4 sm:$0xff]  }
 0x389   : > { %9283 = vmatprep.subr.bf16.mxu0 %v17626_v20  ;;  %9313 = vmatprep.mubr.bf16.mxu0 %v21906_v6  ;;  %v17689_v20 = vld [vmem:[%s24857_s1 + $0x176c] ss:$16 sps:$4 sm:$0xff]  }
 0x38a   : > { %9915 = vmatprep.mubr.bf16.mxu1 %v20591_v13  ;;  %v17641_v13 = vld [vmem:[%s24857_s1 + $0x166c] ss:$16 sps:$4 sm:$0xff]  }
 0x38b   : > { %9886 = vmatpush1.bf16.msra.mxu1 %v17627_v26  ;;  %v17692_v26 = vld [vmem:[%s24857_s1 + $0x2384] ss:$16 sps:$4 sm:$0xff]  }
 0x38c   : > { %9284 = vmatpush1.bf16.msra.mxu0 %v17624_v57  ;;  %9887 = vmatprep.subr.bf16.mxu1 %v17635_v5  ;;  %v17687_v57 = vld [vmem:[%s24857_s1 + $0x1768] ss:$16 sps:$4 sm:$0xff]   ;;  %v17690_v5 = vld [vmem:[%s24857_s1 + $0x2380] ss:$16 sps:$4 sm:$0xff]  }
 0x38d   : > { %9285 = vmatprep.subr.bf16.mxu0 %v17632_v19  ;;  %v17695_v19 = vld [vmem:[%s24857_s1 + $0x178c] ss:$16 sps:$4 sm:$0xff]  }
 0x38f   : > { %9888 = vmatpush1.bf16.msra.mxu1 %v17633_v63  ;;  %v17698_v63 = vld [vmem:[%s24857_s1 + $0x23a4] ss:$16 sps:$4 sm:$0xff]  }
 0x390   : > { %9286 = vmatpush1.bf16.msra.mxu0 %v17630_v33  ;;  %9889 = vmatprep.subr.bf16.mxu1 %v17641_v13  ;;  %v17693_v33 = vld [vmem:[%s24857_s1 + $0x1788] ss:$16 sps:$4 sm:$0xff]   ;;  %v17696_v13 = vld [vmem:[%s24857_s1 + $0x23a0] ss:$16 sps:$4 sm:$0xff]  }
 0x391   : > { %9287 = vmatprep.subr.bf16.mxu0 %v17638_v49  ;;  %v17701_v49 = vld [vmem:[%s24857_s1 + $0x17ac] ss:$16 sps:$4 sm:$0xff]  }
 0x393   : > { %9890 = vmatpush1.bf16.msra.mxu1 %v17639_v55  ;;  %v17704_v55 = vld [vmem:[%s24857_s1 + $0x23c4] ss:$16 sps:$4 sm:$0xff]  }
 0x394   : > { %9288 = vmatpush1.bf16.msra.mxu0 %v17636_v11  ;;  %9891 = vmatprep.subr.bf16.mxu1 %v17647_v28  ;;  %v17699_v11 = vld [vmem:[%s24857_s1 + $0x17a8] ss:$16 sps:$4 sm:$0xff]   ;;  %v17702_v28 = vld [vmem:[%s24857_s1 + $0x23c0] ss:$16 sps:$4 sm:$0xff]  }
 0x395   : > { %9289 = vmatprep.subr.bf16.mxu0 %v17644_v2  ;;  %v17707_v2 = vld [vmem:[%s24857_s1 + $0x17cc] ss:$16 sps:$4 sm:$0xff]  }
 0x397   : > { %9892 = vmatpush1.bf16.msra.mxu1 %v17645_v16  ;;  %v13887_v16 = vcombine.low %v21861_v8, %v21873_v12  ;;  %v17708_v8 = vld [vmem:[%s24857_s1 + $0x23e0] ss:$16 sps:$4 sm:$0xff]   ;;  %v17711_v12 = vld [vmem:[%s24857_s1 + $0x17e8] ss:$16 sps:$4 sm:$0xff]  }
 0x398   : > { %9290 = vmatpush1.bf16.msra.mxu0 %v17642_v37  ;;  %9893 = vmatprep.subr.bf16.mxu1 %v17653_v44  ;;  %v17705_v37 = vld [vmem:[%s24857_s1 + $0x17c8] ss:$16 sps:$4 sm:$0xff]   ;;  %v17710_v44 = vld [vmem:[%s24857_s1 + $0x23e4] ss:$16 sps:$4 sm:$0xff]  }
 0x399   : > { %9291 = vmatprep.subr.bf16.mxu0 %v17650_v41  ;;  %v22075_v41 = vld [vmem:[%s18910_s25 + $0x10] sm:$0xcc] }
 0x39b   : > { %9894 = vmatpush1.bf16.msra.mxu1 %v17651_v18  ;;  %v22084_v18 = vld [vmem:[%s18910_s25 + $0x30] sm:$0xff] }
 0x39c   : > { %9292 = vmatpush1.bf16.msra.mxu0 %v17648_v25  ;;  %9895 = vmatprep.subr.bf16.mxu1 %v17659_v53  ;;  %v17713_v25 = vld [vmem:[%s24857_s1 + $0x17ec] ss:$16 sps:$4 sm:$0xff]   ;;  %v822_v53 = vrot.slane %v13887_v16, 2 }
 0x39d   : > { %9293 = vmatprep.subr.bf16.mxu0 %v17656_v45  ;;  %v13890_v45 = vcombine.high %v22075_v41, %v22084_v18  ;;  %v17767_v16 = vld [vmem:[%s24857_s1 + $0x190c] ss:$16 sps:$4 sm:$0xff]  }
 0x39f   : > { %9896 = vmatpush1.bf16.msra.mxu1 %v17657_v38  ;;  %v17716_v38 = vld [vmem:[%s24857_s1 + $0x2404] ss:$16 sps:$4 sm:$0xff]  }
 0x3a0   : > { %9294 = vmatpush1.bf16.msra.mxu0 %v17654_v61  ;;  %9897 = vmatprep.subr.bf16.mxu1 %v17665_v40  ;;  %v823_v61 = vrot.slane %v21175_v9, 2  ;;  %v831_v40 = vrot.slane %v13890_v45, 2  ;;  %v17717_v9 = vld [vmem:[%s24857_s1 + $0x1808] ss:$16 sps:$4 sm:$0xff]   ;;  %v17770_v45 = vld [vmem:[%s24857_s1 + $0x2524] ss:$16 sps:$4 sm:$0xff]  }
 0x3a1   : > { %9295 = vmatprep.subr.bf16.mxu0 %v17662_v36  ;;  %v17719_v36 = vld [vmem:[%s24857_s1 + $0x180c] ss:$16 sps:$4 sm:$0xff]  }
 0x3a3   : > { %9898 = vmatpush1.bf16.msra.mxu1 %v17663_v10  ;;  %v17714_v10 = vld [vmem:[%s24857_s1 + $0x2400] ss:$16 sps:$4 sm:$0xff]  }
 0x3a4   : > { %9296 = vmatpush1.bf16.msra.mxu0 %v17660_v50  ;;  %9899 = vmatprep.subr.bf16.mxu1 %v17671_v42  ;;  %v832_v50 = vrot.slane %v21194_v7, 2  ;;  %v17722_v42 = vld [vmem:[%s24857_s1 + $0x2424] ss:$16 sps:$4 sm:$0xff]   ;;  %v17725_v7 = vld [vmem:[%s24857_s1 + $0x182c] ss:$16 sps:$4 sm:$0xff]  }
 0x3a5   : > { %9297 = vmatprep.subr.bf16.mxu0 %v17668_v30  ;;  %v22109_v30 = vsel %vm815_vm3, %v822_v53, %v823_v61  ;;  %v17771_v53 = vld [vmem:[%s24857_s1 + $0x1928] ss:$16 sps:$4 sm:$0xff]   ;;  %v17776_v61 = vld [vmem:[%s24857_s1 + $0x2544] ss:$16 sps:$4 sm:$0xff]  }
 0x3a7   : > { %9900 = vmatpush1.bf16.msra.mxu1 %v17669_v48  ;;  %v17720_v48 = vld [vmem:[%s24857_s1 + $0x2420] ss:$16 sps:$4 sm:$0xff]  }
 0x3a8   : > { %9298 = vmatpush1.bf16.msra.mxu0 %v17666_v60  ;;  %9901 = vmatprep.subr.bf16.mxu1 %v17677_v35  ;;  %v22120_v60 = vsel %vm815_vm3, %v831_v40, %v832_v50  ;;  %v17728_v35 = vld [vmem:[%s24857_s1 + $0x2444] ss:$16 sps:$4 sm:$0xff]   ;;  %v17777_v40 = vld [vmem:[%s24857_s1 + $0x1948] ss:$16 sps:$4 sm:$0xff]  }
 0x3a9   : > { %9299 = vmatprep.subr.bf16.mxu0 %v17674_v17  ;;  %v17723_v17 = vld [vmem:[%s24857_s1 + $0x1828] ss:$16 sps:$4 sm:$0xff]   ;;  %v17782_v50 = vld [vmem:[%s24857_s1 + $0x2564] ss:$16 sps:$4 sm:$0xff]  }
 0x3ab   : > { %9902 = vmatpush1.bf16.msra.mxu1 %v17675_v58  ;;  %v17729_v58 = vld [vmem:[%s24857_s1 + $0x1848] ss:$16 sps:$4 sm:$0xff]  }
 0x3ac   : > { %9300 = vmatpush1.bf16.msra.mxu0 %v17672_v29  ;;  %9903 = vmatprep.subr.bf16.mxu1 %v17683_v24  ;;  %v17726_v29 = vld [vmem:[%s24857_s1 + $0x2440] ss:$16 sps:$4 sm:$0xff]  }
 0x3ad   : > { %9301 = vmatprep.subr.bf16.mxu0 %v17680_v39  ;;  %v17734_v39 = vld [vmem:[%s24857_s1 + $0x2464] ss:$16 sps:$4 sm:$0xff]   ;;  %v17732_v24 = vld [vmem:[%s24857_s1 + $0x2460] ss:$16 sps:$4 sm:$0xff]  }
 0x3af   : > { %9904 = vmatpush1.bf16.msra.mxu1 %v17681_v22  ;;  %v17740_v22 = vld [vmem:[%s24857_s1 + $0x2484] ss:$16 sps:$4 sm:$0xff]  }
 0x3b0   : > { %9302 = vmatpush1.bf16.msra.mxu0 %v17678_v1  ;;  %9905 = vmatprep.subr.bf16.mxu1 %v17689_v20  ;;  %v17735_v1 = vld [vmem:[%s24857_s1 + $0x1868] ss:$16 sps:$4 sm:$0xff]   ;;  %v17738_v20 = vld [vmem:[%s24857_s1 + $0x2480] ss:$16 sps:$4 sm:$0xff]  }
 0x3b1   : > { %9303 = vmatprep.subr.bf16.mxu0 %v17686_v27  ;;  %v17743_v27 = vld [vmem:[%s24857_s1 + $0x188c] ss:$16 sps:$4 sm:$0xff]  }
 0x3b3   : > { %9906 = vmatpush1.bf16.msra.mxu1 %v17687_v57  ;;  %v17746_v57 = vld [vmem:[%s24857_s1 + $0x24a4] ss:$16 sps:$4 sm:$0xff]  }
 0x3b4   : > { %9304 = vmatpush1.bf16.msra.mxu0 %v17684_v32  ;;  %9907 = vmatprep.subr.bf16.mxu1 %v17695_v19  ;;  %v17741_v32 = vld [vmem:[%s24857_s1 + $0x1888] ss:$16 sps:$4 sm:$0xff]   ;;  %v17744_v19 = vld [vmem:[%s24857_s1 + $0x24a0] ss:$16 sps:$4 sm:$0xff]  }
 0x3b5   : > { %9305 = vmatprep.subr.bf16.mxu0 %v17692_v26  ;;  %v17749_v26 = vld [vmem:[%s24857_s1 + $0x18ac] ss:$16 sps:$4 sm:$0xff]  }
 0x3b7   : > { %9908 = vmatpush1.bf16.msra.mxu1 %v17693_v33  ;;  %v17752_v33 = vld [vmem:[%s24857_s1 + $0x24c4] ss:$16 sps:$4 sm:$0xff]  }
 0x3b8   : > { %9306 = vmatpush1.bf16.msra.mxu0 %v17690_v5  ;;  %9909 = vmatprep.subr.bf16.mxu1 %v17701_v49  ;;  %v17747_v5 = vld [vmem:[%s24857_s1 + $0x18a8] ss:$16 sps:$4 sm:$0xff]   ;;  %v17750_v49 = vld [vmem:[%s24857_s1 + $0x24c0] ss:$16 sps:$4 sm:$0xff]  }
 0x3b9   : > { %9307 = vmatprep.subr.bf16.mxu0 %v17698_v63  ;;  %v17755_v63 = vld [vmem:[%s24857_s1 + $0x18cc] ss:$16 sps:$4 sm:$0xff]  }
 0x3bb   : > { %9910 = vmatpush1.bf16.msra.mxu1 %v17699_v11  ;;  %v17758_v11 = vld [vmem:[%s24857_s1 + $0x24e4] ss:$16 sps:$4 sm:$0xff]  }
 0x3bc   : > { %9308 = vmatpush1.bf16.msra.mxu0 %v17696_v13  ;;  %9911 = vmatprep.subr.bf16.mxu1 %v17707_v2  ;;  %v17753_v13 = vld [vmem:[%s24857_s1 + $0x18c8] ss:$16 sps:$4 sm:$0xff]   ;;  %v17756_v2 = vld [vmem:[%s24857_s1 + $0x24e0] ss:$16 sps:$4 sm:$0xff]  }
 0x3bd   : > { %9309 = vmatprep.subr.bf16.mxu0 %v17704_v55  ;;  %v17761_v55 = vld [vmem:[%s24857_s1 + $0x18ec] ss:$16 sps:$4 sm:$0xff]  }
 0x3bf   : > { %9912 = vmatpush1.bf16.msra.mxu1 %v17705_v37  ;;  %v17764_v37 = vld [vmem:[%s24857_s1 + $0x2504] ss:$16 sps:$4 sm:$0xff]  }
 0x3c0   : > { %9310 = vmatpush1.bf16.msra.mxu0 %v17702_v28  ;;  %9913 = vmatprep.subr.bf16.mxu1 %v17713_v25  ;;  %v17759_v28 = vld [vmem:[%s24857_s1 + $0x18e8] ss:$16 sps:$4 sm:$0xff]  }
 0x3c1   : > { %9311 = vmatprep.subr.bf16.mxu0 %v17710_v44  ;;  %v17762_v44 = vld [vmem:[%s24857_s1 + $0x2500] ss:$16 sps:$4 sm:$0xff]   ;;  %v17765_v25 = vld [vmem:[%s24857_s1 + $0x1908] ss:$16 sps:$4 sm:$0xff]  }
 0x3c3   : > { %9914 = vmatpush1.bf16.msra.mxu1 %v17711_v12  ;;  %v17768_v12 = vld [vmem:[%s24857_s1 + $0x2520] ss:$16 sps:$4 sm:$0xff]  }
 0x3c4   : > { %9312 = vmatpush1.bf16.msra.mxu0 %v17708_v8  ;;  %9926 = vmatprep.subr.bf16.mxu1 %v17719_v36  ;;  %v17773_v8 = vld [vmem:[%s24857_s1 + $0x192c] ss:$16 sps:$4 sm:$0xff]   ;;  %v17774_v36 = vld [vmem:[%s24857_s1 + $0x2540] ss:$16 sps:$4 sm:$0xff]  }
 0x3c5   : > { %9324 = vmatprep.subr.bf16.mxu0 %v17716_v38  ;;  %v17779_v38 = vld [vmem:[%s24857_s1 + $0x194c] ss:$16 sps:$4 sm:$0xff]  }
 0x3c6   : > { %9916 = vmatmul.mubr.bf16.vlgmr.msra.gmra.mrb[4].mxu1 %v20799_v4  ;;  %v17731_v4 = vld [vmem:[%s24857_s1 + $0x184c] ss:$16 sps:$4 sm:$0xff]  }
 0x3c7   : > { %9314 = vmatmul.mubr.bf16.vlgmr.msra.gmra.mrb[0].mxu0 %v22109_v30  ;;  %9927 = vmatpush1.bf16.msra.mxu1 %v17717_v9  ;;  %v17780_v9 = vld [vmem:[%s24857_s1 + $0x2560] ss:$16 sps:$4 sm:$0xff]  }
 0x3c8   : > { %9325 = vmatpush1.bf16.msra.mxu0 %v17714_v10  ;;  %9928 = vmatprep.subr.bf16.mxu1 %v17725_v7  ;;  %v17785_v10 = vld [vmem:[%s24857_s1 + $0x196c] ss:$16 sps:$4 sm:$0xff]   ;;  %v17788_v7 = vld [vmem:[%s24857_s1 + $0x2584] ss:$16 sps:$4 sm:$0xff]  }
 0x3c9   : > { %9326 = vmatprep.subr.bf16.mxu0 %v17722_v42  ;;  %9356 = vmatprep.mubr.bf16.mxu0 %v22120_v60  ;;  %v17783_v42 = vld [vmem:[%s24857_s1 + $0x1968] ss:$16 sps:$4 sm:$0xff]  }
 0x3ca   : > { %9958 = vmatprep.mubr.bf16.mxu1 %v20810_v14  ;;  %v17737_v14 = vld [vmem:[%s24857_s1 + $0x186c] ss:$16 sps:$4 sm:$0xff]  }
 0x3cb   : > { %9929 = vmatpush1.bf16.msra.mxu1 %v17723_v17  ;;  %v17786_v17 = vld [vmem:[%s24857_s1 + $0x2580] ss:$16 sps:$4 sm:$0xff]  }
 0x3cc   : > { %9327 = vmatpush1.bf16.msra.mxu0 %v17720_v48  ;;  %9930 = vmatprep.subr.bf16.mxu1 %v17731_v4  ;;  %v17791_v48 = vld [vmem:[%s24857_s1 + $0x198c] ss:$16 sps:$4 sm:$0xff]   ;;  %v17794_v4 = vld [vmem:[%s24857_s1 + $0x25a4] ss:$16 sps:$4 sm:$0xff]  }
 0x3cd   : > { %9328 = vmatprep.subr.bf16.mxu0 %v17728_v35  ;;  %v17789_v35 = vld [vmem:[%s24857_s1 + $0x1988] ss:$16 sps:$4 sm:$0xff]  }
 0x3cf   : > { %9931 = vmatpush1.bf16.msra.mxu1 %v17729_v58  ;;  %v17792_v58 = vld [vmem:[%s24857_s1 + $0x25a0] ss:$16 sps:$4 sm:$0xff]  }
 0x3d0   : > { %9329 = vmatpush1.bf16.msra.mxu0 %v17726_v29  ;;  %9932 = vmatprep.subr.bf16.mxu1 %v17737_v14  ;;  %v17797_v29 = vld [vmem:[%s24857_s1 + $0x19ac] ss:$16 sps:$4 sm:$0xff]   ;;  %v17800_v14 = vld [vmem:[%s24857_s1 + $0x25c4] ss:$16 sps:$4 sm:$0xff]  }
 0x3d1   : > { %9330 = vmatprep.subr.bf16.mxu0 %v17734_v39  ;;  %v17795_v39 = vld [vmem:[%s24857_s1 + $0x19a8] ss:$16 sps:$4 sm:$0xff]  }
 0x3d3   : > { %9933 = vmatpush1.bf16.msra.mxu1 %v17735_v1  ;;  %v17798_v1 = vld [vmem:[%s24857_s1 + $0x25c0] ss:$16 sps:$4 sm:$0xff]  }
 0x3d4   : > { %9331 = vmatpush1.bf16.msra.mxu0 %v17732_v24  ;;  %9934 = vmatprep.subr.bf16.mxu1 %v17743_v27  ;;  %v17803_v24 = vld [vmem:[%s24857_s1 + $0x19cc] ss:$16 sps:$4 sm:$0xff]   ;;  %v13889_v27 = vcombine.low %v22075_v41, %v22084_v18  ;;  %v17804_v41 = vld [vmem:[%s24857_s1 + $0x25e0] ss:$16 sps:$4 sm:$0xff]   ;;  %v17807_v18 = vld [vmem:[%s24857_s1 + $0x19e8] ss:$16 sps:$4 sm:$0xff]  }
 0x3d5   : > { %9332 = vmatprep.subr.bf16.mxu0 %v17740_v22  ;;  %v17801_v22 = vld [vmem:[%s24857_s1 + $0x19c8] ss:$16 sps:$4 sm:$0xff]  }
 0x3d7   : > { %9935 = vmatpush1.bf16.msra.mxu1 %v17741_v32  ;;  %v17806_v32 = vld [vmem:[%s24857_s1 + $0x25e4] ss:$16 sps:$4 sm:$0xff]  }
 0x3d8   : > { %9333 = vmatpush1.bf16.msra.mxu0 %v17738_v20  ;;  %9936 = vmatprep.subr.bf16.mxu1 %v17749_v26  ;;  %v22289_v20 = vld [vmem:[%s18910_s25 + $0x18] sm:$0xcc] }
 0x3d9   : > { %9334 = vmatprep.subr.bf16.mxu0 %v17746_v57  ;;  %v17809_v57 = vld [vmem:[%s24857_s1 + $0x19ec] ss:$16 sps:$4 sm:$0xff]  }
 0x3da   : > { %v22298_v26 = vld [vmem:[%s18910_s25 + $0x38] sm:$0xff] }
 0x3db   : > { %9937 = vmatpush1.bf16.msra.mxu1 %v17747_v5  ;;  %v828_v5 = vrot.slane %v13889_v27, 2  ;;  %v17861_v27 = vld [vmem:[%s24857_s1 + $0x1b08] ss:$16 sps:$4 sm:$0xff]  }
 0x3dc   : > { %9335 = vmatpush1.bf16.msra.mxu0 %v17744_v19  ;;  %9938 = vmatprep.subr.bf16.mxu1 %v17755_v63  ;;  %v13892_v19 = vcombine.high %v22289_v20, %v22298_v26  ;;  %v17812_v63 = vld [vmem:[%s24857_s1 + $0x2604] ss:$16 sps:$4 sm:$0xff]  }
 0x3dd   : > { %9336 = vmatprep.subr.bf16.mxu0 %v17752_v33  ;;  %v829_v33 = vrot.slane %v21396_v54, 2  ;;  %v17813_v54 = vld [vmem:[%s24857_s1 + $0x1a08] ss:$16 sps:$4 sm:$0xff]  }
 0x3df   : > { %9939 = vmatpush1.bf16.msra.mxu1 %v17753_v13  ;;  %v837_v13 = vrot.slane %v13892_v19, 2  ;;  %v17864_v19 = vld [vmem:[%s24857_s1 + $0x2720] ss:$16 sps:$4 sm:$0xff]  }
 0x3e0   : > { %9337 = vmatpush1.bf16.msra.mxu0 %v17750_v49  ;;  %9940 = vmatprep.subr.bf16.mxu1 %v17761_v55  ;;  %v17815_v49 = vld [vmem:[%s24857_s1 + $0x1a0c] ss:$16 sps:$4 sm:$0xff]   ;;  %v17810_v55 = vld [vmem:[%s24857_s1 + $0x2600] ss:$16 sps:$4 sm:$0xff]  }
 0x3e1   : > { %9338 = vmatprep.subr.bf16.mxu0 %v17758_v11  ;;  %v838_v11 = vrot.slane %v21415_v56, 2  ;;  %v17821_v56 = vld [vmem:[%s24857_s1 + $0x1a2c] ss:$16 sps:$4 sm:$0xff]  }
 0x3e3   : > { %9941 = vmatpush1.bf16.msra.mxu1 %v17759_v28  ;;  %v17818_v28 = vld [vmem:[%s24857_s1 + $0x2624] ss:$16 sps:$4 sm:$0xff]  }
 0x3e4   : > { %9339 = vmatpush1.bf16.msra.mxu0 %v17756_v2  ;;  %9942 = vmatprep.subr.bf16.mxu1 %v17767_v16  ;;  %v22323_v2 = vsel %vm815_vm3, %v828_v5, %v829_v33  ;;  %v17816_v16 = vld [vmem:[%s24857_s1 + $0x2620] ss:$16 sps:$4 sm:$0xff]   ;;  %v17875_v5 = vld [vmem:[%s24857_s1 + $0x1b4c] ss:$16 sps:$4 sm:$0xff]  }
 0x3e5   : > { %9340 = vmatprep.subr.bf16.mxu0 %v17764_v37  ;;  %v22334_v37 = vsel %vm815_vm3, %v837_v13, %v838_v11  ;;  %v17870_v33 = vld [vmem:[%s24857_s1 + $0x2740] ss:$16 sps:$4 sm:$0xff]   ;;  %v17881_v13 = vld [vmem:[%s24857_s1 + $0x1b6c] ss:$16 sps:$4 sm:$0xff]  }
 0x3e6   : > { %v17876_v11 = vld [vmem:[%s24857_s1 + $0x2760] ss:$16 sps:$4 sm:$0xff]  }
 0x3e7   : > { %9943 = vmatpush1.bf16.msra.mxu1 %v17765_v25  ;;  %v17824_v25 = vld [vmem:[%s24857_s1 + $0x2644] ss:$16 sps:$4 sm:$0xff]  }
 0x3e8   : > { %9341 = vmatpush1.bf16.msra.mxu0 %v17762_v44  ;;  %9944 = vmatprep.subr.bf16.mxu1 %v17773_v8  ;;  %v17819_v44 = vld [vmem:[%s24857_s1 + $0x1a28] ss:$16 sps:$4 sm:$0xff]  }
 0x3e9   : > { %9342 = vmatprep.subr.bf16.mxu0 %v17770_v45  ;;  %v17822_v45 = vld [vmem:[%s24857_s1 + $0x2640] ss:$16 sps:$4 sm:$0xff]   ;;  %v17825_v8 = vld [vmem:[%s24857_s1 + $0x1a48] ss:$16 sps:$4 sm:$0xff]  }
 0x3eb   : > { %9945 = vmatpush1.bf16.msra.mxu1 %v17771_v53  ;;  %v17828_v53 = vld [vmem:[%s24857_s1 + $0x2660] ss:$16 sps:$4 sm:$0xff]  }
 0x3ec   : > { %9343 = vmatpush1.bf16.msra.mxu0 %v17768_v12  ;;  %9946 = vmatprep.subr.bf16.mxu1 %v17779_v38  ;;  %v17830_v12 = vld [vmem:[%s24857_s1 + $0x2664] ss:$16 sps:$4 sm:$0xff]  }
 0x3ed   : > { %9344 = vmatprep.subr.bf16.mxu0 %v17776_v61  ;;  %v17831_v61 = vld [vmem:[%s24857_s1 + $0x1a68] ss:$16 sps:$4 sm:$0xff]   ;;  %v17836_v38 = vld [vmem:[%s24857_s1 + $0x2684] ss:$16 sps:$4 sm:$0xff]  }
 0x3ef   : > { %9947 = vmatpush1.bf16.msra.mxu1 %v17777_v40  ;;  %v17834_v40 = vld [vmem:[%s24857_s1 + $0x2680] ss:$16 sps:$4 sm:$0xff]  }
 0x3f0   : > { %9345 = vmatpush1.bf16.msra.mxu0 %v17774_v36  ;;  %9948 = vmatprep.subr.bf16.mxu1 %v17785_v10  ;;  %v17839_v36 = vld [vmem:[%s24857_s1 + $0x1a8c] ss:$16 sps:$4 sm:$0xff]   ;;  %v17842_v10 = vld [vmem:[%s24857_s1 + $0x26a4] ss:$16 sps:$4 sm:$0xff]  }
 0x3f1   : > { %9346 = vmatprep.subr.bf16.mxu0 %v17782_v50  ;;  %v17837_v50 = vld [vmem:[%s24857_s1 + $0x1a88] ss:$16 sps:$4 sm:$0xff]  }
 0x3f3   : > { %9949 = vmatpush1.bf16.msra.mxu1 %v17783_v42  ;;  %v17840_v42 = vld [vmem:[%s24857_s1 + $0x26a0] ss:$16 sps:$4 sm:$0xff]  }
 0x3f4   : > { %9347 = vmatpush1.bf16.msra.mxu0 %v17780_v9  ;;  %9950 = vmatprep.subr.bf16.mxu1 %v17791_v48  ;;  %v17845_v9 = vld [vmem:[%s24857_s1 + $0x1aac] ss:$16 sps:$4 sm:$0xff]   ;;  %v17848_v48 = vld [vmem:[%s24857_s1 + $0x26c4] ss:$16 sps:$4 sm:$0xff]  }
 0x3f5   : > { %9348 = vmatprep.subr.bf16.mxu0 %v17788_v7  ;;  %v17843_v7 = vld [vmem:[%s24857_s1 + $0x1aa8] ss:$16 sps:$4 sm:$0xff]  }
 0x3f7   : > { %9951 = vmatpush1.bf16.msra.mxu1 %v17789_v35  ;;  %v17846_v35 = vld [vmem:[%s24857_s1 + $0x26c0] ss:$16 sps:$4 sm:$0xff]  }
 0x3f8   : > { %9349 = vmatpush1.bf16.msra.mxu0 %v17786_v17  ;;  %9952 = vmatprep.subr.bf16.mxu1 %v17797_v29  ;;  %v17851_v17 = vld [vmem:[%s24857_s1 + $0x1acc] ss:$16 sps:$4 sm:$0xff]   ;;  %v17854_v29 = vld [vmem:[%s24857_s1 + $0x26e4] ss:$16 sps:$4 sm:$0xff]  }
 0x3f9   : > { %9350 = vmatprep.subr.bf16.mxu0 %v17794_v4  ;;  %v17849_v4 = vld [vmem:[%s24857_s1 + $0x1ac8] ss:$16 sps:$4 sm:$0xff]  }
 0x3fb   : > { %9953 = vmatpush1.bf16.msra.mxu1 %v17795_v39  ;;  %v17852_v39 = vld [vmem:[%s24857_s1 + $0x26e0] ss:$16 sps:$4 sm:$0xff]  }
 0x3fc   : > { %9351 = vmatpush1.bf16.msra.mxu0 %v17792_v58  ;;  %9954 = vmatprep.subr.bf16.mxu1 %v17803_v24  ;;  %v17857_v58 = vld [vmem:[%s24857_s1 + $0x1aec] ss:$16 sps:$4 sm:$0xff]   ;;  %v17860_v24 = vld [vmem:[%s24857_s1 + $0x2704] ss:$16 sps:$4 sm:$0xff]  }
 0x3fd   : > { %9352 = vmatprep.subr.bf16.mxu0 %v17800_v14  ;;  %v17855_v14 = vld [vmem:[%s24857_s1 + $0x1ae8] ss:$16 sps:$4 sm:$0xff]  }
 0x3ff   : > { %9955 = vmatpush1.bf16.msra.mxu1 %v17801_v22  ;;  %v17858_v22 = vld [vmem:[%s24857_s1 + $0x2700] ss:$16 sps:$4 sm:$0xff]  }
 0x400   : > { %9353 = vmatpush1.bf16.msra.mxu0 %v17798_v1  ;;  %9956 = vmatprep.subr.bf16.mxu1 %v17809_v57  ;;  %v17863_v1 = vld [vmem:[%s24857_s1 + $0x1b0c] ss:$16 sps:$4 sm:$0xff]  }
 0x401   : > { %9354 = vmatprep.subr.bf16.mxu0 %v17806_v32  ;;  %v17866_v32 = vld [vmem:[%s24857_s1 + $0x2724] ss:$16 sps:$4 sm:$0xff]   ;;  %v17869_v57 = vld [vmem:[%s24857_s1 + $0x1b2c] ss:$16 sps:$4 sm:$0xff]  }
 0x403   : > { %9957 = vmatpush1.bf16.msra.mxu1 %v17807_v18  ;;  %v17872_v18 = vld [vmem:[%s24857_s1 + $0x2744] ss:$16 sps:$4 sm:$0xff]  }
 0x404   : > { %9355 = vmatpush1.bf16.msra.mxu0 %v17804_v41  ;;  %9969 = vmatprep.subr.bf16.mxu1 %v17815_v49  ;;  %v17867_v41 = vld [vmem:[%s24857_s1 + $0x1b28] ss:$16 sps:$4 sm:$0xff]   ;;  %v17878_v49 = vld [vmem:[%s24857_s1 + $0x2764] ss:$16 sps:$4 sm:$0xff]  }
 0x405   : > { %9367 = vmatprep.subr.bf16.mxu0 %v17812_v63  ;;  %v17873_v63 = vld [vmem:[%s24857_s1 + $0x1b48] ss:$16 sps:$4 sm:$0xff]  }
 0x406   : > { %9959 = vmatmul.mubr.bf16.vlgmr.msra.gmra.mrb[4].mxu1 %v21020_v15  ;;  %v17827_v15 = vld [vmem:[%s24857_s1 + $0x1a4c] ss:$16 sps:$4 sm:$0xff]  }
 0x407   : > { %9357 = vmatmul.mubr.bf16.vlgmr.msra.gmra.mrb[0].mxu0 %v22323_v2  ;;  %9970 = vmatpush1.bf16.msra.mxu1 %v17813_v54  ;;  %v17884_v54 = vld [vmem:[%s24857_s1 + $0x2784] ss:$16 sps:$4 sm:$0xff]  }
 0x408   : > { %9368 = vmatpush1.bf16.msra.mxu0 %v17810_v55  ;;  %9971 = vmatprep.subr.bf16.mxu1 %v17821_v56  ;;  %v17879_v55 = vld [vmem:[%s24857_s1 + $0x1b68] ss:$16 sps:$4 sm:$0xff]   ;;  %v17882_v56 = vld [vmem:[%s24857_s1 + $0x2780] ss:$16 sps:$4 sm:$0xff]  }
 0x409   : > { %9369 = vmatprep.subr.bf16.mxu0 %v17818_v28  ;;  %9399 = vmatprep.mubr.bf16.mxu0 %v22334_v37  ;;  %v17887_v28 = vld [vmem:[%s24857_s1 + $0x1b8c] ss:$16 sps:$4 sm:$0xff]  }
 0x40a   : > { %10001 = vmatprep.mubr.bf16.mxu1 %v21031_v21  ;;  %v17833_v21 = vld [vmem:[%s24857_s1 + $0x1a6c] ss:$16 sps:$4 sm:$0xff]  }
 0x40b   : > { %9972 = vmatpush1.bf16.msra.mxu1 %v17819_v44  ;;  %v17890_v44 = vld [vmem:[%s24857_s1 + $0x27a4] ss:$16 sps:$4 sm:$0xff]  }
 0x40c   : > { %9370 = vmatpush1.bf16.msra.mxu0 %v17816_v16  ;;  %9973 = vmatprep.subr.bf16.mxu1 %v17827_v15  ;;  %v17885_v16 = vld [vmem:[%s24857_s1 + $0x1b88] ss:$16 sps:$4 sm:$0xff]   ;;  %v17888_v15 = vld [vmem:[%s24857_s1 + $0x27a0] ss:$16 sps:$4 sm:$0xff]  }
 0x40d   : > { %9371 = vmatprep.subr.bf16.mxu0 %v17824_v25  ;;  %v17893_v25 = vld [vmem:[%s24857_s1 + $0x1bac] ss:$16 sps:$4 sm:$0xff]  }
 0x40f   : > { %9974 = vmatpush1.bf16.msra.mxu1 %v17825_v8  ;;  %v17896_v8 = vld [vmem:[%s24857_s1 + $0x27c4] ss:$16 sps:$4 sm:$0xff]  }
 0x410   : > { %9372 = vmatpush1.bf16.msra.mxu0 %v17822_v45  ;;  %9975 = vmatprep.subr.bf16.mxu1 %v17833_v21  ;;  %v17891_v45 = vld [vmem:[%s24857_s1 + $0x1ba8] ss:$16 sps:$4 sm:$0xff]   ;;  %v17894_v21 = vld [vmem:[%s24857_s1 + $0x27c0] ss:$16 sps:$4 sm:$0xff]  }
 0x411   : > { %9373 = vmatprep.subr.bf16.mxu0 %v17830_v12  ;;  %v17899_v12 = vld [vmem:[%s24857_s1 + $0x1bcc] ss:$16 sps:$4 sm:$0xff]  }
 0x413   : > { %9976 = vmatpush1.bf16.msra.mxu1 %v17831_v61  ;;  %v13891_v61 = vcombine.low %v22289_v20, %v22298_v26  ;;  %v17903_v20 = vld [vmem:[%s24857_s1 + $0x1be8] ss:$16 sps:$4 sm:$0xff]  }
 0x414   : > { %9374 = vmatpush1.bf16.msra.mxu0 %v17828_v53  ;;  %9977 = vmatprep.subr.bf16.mxu1 %v17839_v36  ;;  %v17897_v53 = vld [vmem:[%s24857_s1 + $0x1bc8] ss:$16 sps:$4 sm:$0xff]   ;;  %v17905_v36 = vld [vmem:[%s24857_s1 + $0x1bec] ss:$16 sps:$4 sm:$0xff]  }
 0x415   : > { %9375 = vmatprep.subr.bf16.mxu0 %v17836_v38  ;;  %v17902_v38 = vld [vmem:[%s24857_s1 + $0x27e4] ss:$16 sps:$4 sm:$0xff]   ;;  %v834_v26 = vrot.slane %v13891_v61, 2  ;;  %v17956_v61 = vld [vmem:[%s24857_s1 + $0x1e0c] ss:$16 sps:$4 sm:$0xff]  }
 0x417   : > { %9978 = vmatpush1.bf16.msra.mxu1 %v17837_v50  ;;  %v835_v50 = vrot.slane %v21617_v46, 2  ;;  %v17911_v46 = vld [vmem:[%s24857_s1 + $0x1c2c] ss:$16 sps:$4 sm:$0xff]  }
 0x418   : > { %9376 = vmatpush1.bf16.msra.mxu0 %v17834_v40  ;;  %9979 = vmatprep.subr.bf16.mxu1 %v17845_v9  ;;  %v17900_v40 = vld [vmem:[%s24857_s1 + $0x27e0] ss:$16 sps:$4 sm:$0xff]  }
 0x419   : > { %9377 = vmatprep.subr.bf16.mxu0 %v17842_v10  ;;  %v17908_v10 = vld [vmem:[%s24857_s1 + $0x1c0c] ss:$16 sps:$4 sm:$0xff]   ;;  %v22519_v9 = vsel %vm815_vm3, %v834_v26, %v835_v50  ;;  %v18071_v50 = vld [vmem:[%s24859_s3 + $0x60] ss:$8 sps:$4 sm:$0xff]  }
 0x41a   : > { %v18073_v26 = vld [vmem:[%s24859_s3 + $0x64] ss:$8 sps:$4 sm:$0xff]  }
 0x41b   : > { %9980 = vmatpush1.bf16.msra.mxu1 %v17843_v7  ;;  %v17909_v7 = vld [vmem:[%s24857_s1 + $0x1c28] ss:$16 sps:$4 sm:$0xff]  }
 0x41c   : > { %9378 = vmatpush1.bf16.msra.mxu0 %v17840_v42  ;;  %9981 = vmatprep.subr.bf16.mxu1 %v17851_v17  ;;  %v17906_v42 = vld [vmem:[%s24857_s1 + $0x1c08] ss:$16 sps:$4 sm:$0xff]  }
 0x41d   : > { %9379 = vmatprep.subr.bf16.mxu0 %v17848_v48  ;;  %v17914_v48 = vld [vmem:[%s24857_s1 + $0x1c4c] ss:$16 sps:$4 sm:$0xff]   ;;  %v17912_v17 = vld [vmem:[%s24857_s1 + $0x1c48] ss:$16 sps:$4 sm:$0xff]  }
 0x41f   : > { %9982 = vmatpush1.bf16.msra.mxu1 %v17849_v4  ;;  %v17918_v4 = vld [vmem:[%s24857_s1 + $0x1c88] ss:$16 sps:$4 sm:$0xff]  }
 0x420   : > { %9380 = vmatpush1.bf16.msra.mxu0 %v17846_v35  ;;  %9983 = vmatprep.subr.bf16.mxu1 %v17857_v58  ;;  %v17920_v35 = vld [vmem:[%s24857_s1 + $0x1c8c] ss:$16 sps:$4 sm:$0xff]   ;;  %v17921_v58 = vld [vmem:[%s24857_s1 + $0x1ca8] ss:$16 sps:$4 sm:$0xff]  }
 0x421   : > { %9381 = vmatprep.subr.bf16.mxu0 %v17854_v29  ;;  %v17923_v29 = vld [vmem:[%s24857_s1 + $0x1cac] ss:$16 sps:$4 sm:$0xff]  }
 0x423   : > { %9984 = vmatpush1.bf16.msra.mxu1 %v17855_v14  ;;  %v17924_v14 = vld [vmem:[%s24857_s1 + $0x1cc8] ss:$16 sps:$4 sm:$0xff]  }
 0x424   : > { %9382 = vmatpush1.bf16.msra.mxu0 %v17852_v39  ;;  %9985 = vmatprep.subr.bf16.mxu1 %v17863_v1  ;;  %v17926_v39 = vld [vmem:[%s24857_s1 + $0x1ccc] ss:$16 sps:$4 sm:$0xff]   ;;  %v17927_v1 = vld [vmem:[%s24857_s1 + $0x1ce8] ss:$16 sps:$4 sm:$0xff]  }
 0x425   : > { %9383 = vmatprep.subr.bf16.mxu0 %v17860_v24  ;;  %v17929_v24 = vld [vmem:[%s24857_s1 + $0x1cec] ss:$16 sps:$4 sm:$0xff]  }
 0x427   : > { %9986 = vmatpush1.bf16.msra.mxu1 %v17861_v27  ;;  %v17930_v27 = vld [vmem:[%s24857_s1 + $0x1d08] ss:$16 sps:$4 sm:$0xff]  }
 0x428   : > { %9384 = vmatpush1.bf16.msra.mxu0 %v17858_v22  ;;  %9987 = vmatprep.subr.bf16.mxu1 %v17869_v57  ;;  %v17932_v22 = vld [vmem:[%s24857_s1 + $0x1d0c] ss:$16 sps:$4 sm:$0xff]   ;;  %v17933_v57 = vld [vmem:[%s24857_s1 + $0x1d28] ss:$16 sps:$4 sm:$0xff]  }
 0x429   : > { %9385 = vmatprep.subr.bf16.mxu0 %v17866_v32  ;;  %v17935_v32 = vld [vmem:[%s24857_s1 + $0x1d2c] ss:$16 sps:$4 sm:$0xff]  }
 0x42b   : > { %9988 = vmatpush1.bf16.msra.mxu1 %v17867_v41  ;;  %v17936_v41 = vld [vmem:[%s24857_s1 + $0x1d48] ss:$16 sps:$4 sm:$0xff]  }
 0x42c   : > { %9386 = vmatpush1.bf16.msra.mxu0 %v17864_v19  ;;  %9989 = vmatprep.subr.bf16.mxu1 %v17875_v5  ;;  %v17938_v19 = vld [vmem:[%s24857_s1 + $0x1d4c] ss:$16 sps:$4 sm:$0xff]  }
 0x42d   : > { %9387 = vmatprep.subr.bf16.mxu0 %v17872_v18  ;;  %v17941_v18 = vld [vmem:[%s24857_s1 + $0x1d6c] ss:$16 sps:$4 sm:$0xff]  }
 0x42e   : > { %v18037_v5 = vld [vmem:[%s24859_s3 + $0x4] ss:$8 sps:$4 sm:$0xff]  }
 0x42f   : > { %9990 = vmatpush1.bf16.msra.mxu1 %v17873_v63  ;;  %v17939_v63 = vld [vmem:[%s24857_s1 + $0x1d68] ss:$16 sps:$4 sm:$0xff]  }
 0x430   : > { %9388 = vmatpush1.bf16.msra.mxu0 %v17870_v33  ;;  %9991 = vmatprep.subr.bf16.mxu1 %v17881_v13  ;;  %v18035_v33 = vld [vmem:[%s24859_s3] ss:$8 sps:$4 sm:$0xff]   ;;  %v18043_v13 = vld [vmem:[%s24859_s3 + $0x14] ss:$8 sps:$4 sm:$0xff]  }
 0x431   : > { %9389 = vmatprep.subr.bf16.mxu0 %v17878_v49  ;;  %v17944_v49 = vld [vmem:[%s24857_s1 + $0x1d8c] ss:$16 sps:$4 sm:$0xff]  }
 0x433   : > { %9992 = vmatpush1.bf16.msra.mxu1 %v17879_v55  ;;  %v17942_v55 = vld [vmem:[%s24857_s1 + $0x1d88] ss:$16 sps:$4 sm:$0xff]  }
 0x434   : > { %9390 = vmatpush1.bf16.msra.mxu0 %v17876_v11  ;;  %9993 = vmatprep.subr.bf16.mxu1 %v17887_v28  ;;  %v18041_v11 = vld [vmem:[%s24859_s3 + $0x10] ss:$8 sps:$4 sm:$0xff]   ;;  %v18049_v28 = vld [vmem:[%s24859_s3 + $0x24] ss:$8 sps:$4 sm:$0xff]  }
 0x435   : > { %9391 = vmatprep.subr.bf16.mxu0 %v17884_v54  ;;  %v17947_v54 = vld [vmem:[%s24857_s1 + $0x1dac] ss:$16 sps:$4 sm:$0xff]  }
 0x437   : > { %9994 = vmatpush1.bf16.msra.mxu1 %v17885_v16  ;;  %v17945_v16 = vld [vmem:[%s24857_s1 + $0x1da8] ss:$16 sps:$4 sm:$0xff]  }
 0x438   : > { %9392 = vmatpush1.bf16.msra.mxu0 %v17882_v56  ;;  %9995 = vmatprep.subr.bf16.mxu1 %v17893_v25  ;;  %v18047_v56 = vld [vmem:[%s24859_s3 + $0x20] ss:$8 sps:$4 sm:$0xff]   ;;  %v18055_v25 = vld [vmem:[%s24859_s3 + $0x34] ss:$8 sps:$4 sm:$0xff]  }
 0x439   : > { %9393 = vmatprep.subr.bf16.mxu0 %v17890_v44  ;;  %v17950_v44 = vld [vmem:[%s24857_s1 + $0x1dcc] ss:$16 sps:$4 sm:$0xff]  }
 0x43b   : > { %9996 = vmatpush1.bf16.msra.mxu1 %v17891_v45  ;;  %v17948_v45 = vld [vmem:[%s24857_s1 + $0x1dc8] ss:$16 sps:$4 sm:$0xff]  }
 0x43c   : > { %9394 = vmatpush1.bf16.msra.mxu0 %v17888_v15  ;;  %9997 = vmatprep.subr.bf16.mxu1 %v17899_v12  ;;  %v18053_v15 = vld [vmem:[%s24859_s3 + $0x30] ss:$8 sps:$4 sm:$0xff]   ;;  %v18061_v12 = vld [vmem:[%s24859_s3 + $0x44] ss:$8 sps:$4 sm:$0xff]  }
 0x43d   : > { %9395 = vmatprep.subr.bf16.mxu0 %v17896_v8  ;;  %v17953_v8 = vld [vmem:[%s24857_s1 + $0x1dec] ss:$16 sps:$4 sm:$0xff]  }
 0x43f   : > { %9998 = vmatpush1.bf16.msra.mxu1 %v17897_v53  ;;  %v17951_v53 = vld [vmem:[%s24857_s1 + $0x1de8] ss:$16 sps:$4 sm:$0xff]  }
 0x440   : > { %9396 = vmatpush1.bf16.msra.mxu0 %v17894_v21  ;;  %9999 = vmatprep.subr.bf16.mxu1 %v17905_v36  ;;  %v18059_v21 = vld [vmem:[%s24859_s3 + $0x40] ss:$8 sps:$4 sm:$0xff]   ;;  %v18065_v36 = vld [vmem:[%s24859_s3 + $0x50] ss:$8 sps:$4 sm:$0xff]  }
 0x441   : > { %9397 = vmatprep.subr.bf16.mxu0 %v17902_v38  ;;  %v18067_v38 = vld [vmem:[%s24859_s3 + $0x54] ss:$8 sps:$4 sm:$0xff]  }
 0x443   : > { %10000 = vmatpush1.bf16.msra.mxu1 %v17903_v20  ;;  %v17959_v20 = vld [vmem:[%s24857_s1 + $0x1e2c] ss:$16 sps:$4 sm:$0xff]  }
 0x444   : > { %9398 = vmatpush1.bf16.msra.mxu0 %v17900_v40  ;;  %10012 = vmatprep.subr.bf16.mxu1 %v17908_v10  ;;  %v17954_v40 = vld [vmem:[%s24857_s1 + $0x1e08] ss:$16 sps:$4 sm:$0xff]  }
 0x445   : > { %12487 = vmatprep.subr.bf16.mxu0 %v18037_v5  ;;  %v17957_v10 = vld [vmem:[%s24857_s1 + $0x1e28] ss:$16 sps:$4 sm:$0xff]   ;;  %v17980_v5 = vld [vmem:[%s24857_s1 + $0x1f0c] ss:$16 sps:$4 sm:$0xff]  }
 0x446   : > { %10002 = vmatmul.mubr.bf16.vlgmr.msra.gmra.mrb[4].mxu1 %v21241_v51  ;;  %v17917_v51 = vld [vmem:[%s24857_s1 + $0x1c6c] ss:$16 sps:$4 sm:$0xff]  }
 0x447   : > { %9400 = vmatmul.mubr.bf16.vlgmr.msra.gmra.mrb[0].mxu0 %v22519_v9  ;;  %10013 = vmatpush1.bf16.msra.mxu1 %v17906_v42  ;;  %v17962_v42 = vld [vmem:[%s24857_s1 + $0x1e4c] ss:$16 sps:$4 sm:$0xff]  }
 0x448   : > { %10044 = vmatprep.mubr.bf16.mxu1 %v21252_v52  ;;  %10014 = vmatprep.subr.bf16.mxu1 %v17911_v46  ;;  %v17915_v52 = vld [vmem:[%s24857_s1 + $0x1c68] ss:$16 sps:$4 sm:$0xff]   ;;  %v18079_v46 = vld [vmem:[%s24859_s3 + $0x74] ss:$8 sps:$4 sm:$0xff]  }
 0x449   : > { %12488 = vmatpush1.bf16.msra.mxu0 %v18035_v33  ;;  %v18115_v33 = vld [vmem:[%s24859_s3 + $0xd4] ss:$8 sps:$4 sm:$0xff]  }
 0x44a   : > { %12489 = vmatprep.subr.bf16.mxu0 %v18043_v13  ;;  %v18698_v13 = vmov 0  }
 0x44b   : > { %10015 = vmatpush1.bf16.msra.mxu1 %v17909_v7  ;;  %v17965_v7 = vld [vmem:[%s24857_s1 + $0x1e6c] ss:$16 sps:$4 sm:$0xff]   ;;  %10278 = vst [vmem:[#allocation2] sm:$0x11] %v18698_v13  ;;  %10280 = vst [vmem:[#allocation2 + $0x20] sm:$0x22] %v18698_v13 }
 0x44c   : > { %10016 = vmatprep.subr.bf16.mxu1 %v17914_v48  ;;  %v18085_v48 = vld [vmem:[%s24859_s3 + $0x84] ss:$8 sps:$4 sm:$0xff]   ;;  %10281 = vst [vmem:[#allocation2 + $0x28] sm:$0x22] %v18698_v13  ;;  %10279 = vst [vmem:[#allocation2 + $0x8] sm:$0x11] %v18698_v13 }
 0x44d   : > { %12490 = vmatpush1.bf16.msra.mxu0 %v18041_v11  ;;  %v17983_v11 = vld [vmem:[%s24857_s1 + $0x1f2c] ss:$16 sps:$4 sm:$0xff]  }
 0x44e   : > { %12491 = vmatprep.subr.bf16.mxu0 %v18049_v28  ;;  %v17981_v28 = vld [vmem:[%s24857_s1 + $0x1f28] ss:$16 sps:$4 sm:$0xff]   ;;  %v18076_v13 = vld [vmem:[%s24857_s1 + $0x222c] ss:$16 sps:$4 sm:$0xff]  }
 0x44f   : > { %10017 = vmatpush1.bf16.msra.mxu1 %v17912_v17  ;;  %v18083_v17 = vld [vmem:[%s24859_s3 + $0x80] ss:$8 sps:$4 sm:$0xff]  }
 0x450   : > { %10018 = vmatprep.subr.bf16.mxu1 %v17917_v51  ;;  %v17963_v51 = vld [vmem:[%s24857_s1 + $0x1e68] ss:$16 sps:$4 sm:$0xff]  }
 0x451   : > { %12492 = vmatpush1.bf16.msra.mxu0 %v18047_v56  ;;  %v17986_v56 = vld [vmem:[%s24857_s1 + $0x1f4c] ss:$16 sps:$4 sm:$0xff]  }
 0x452   : > { %12493 = vmatprep.subr.bf16.mxu0 %v18055_v25  ;;  %v17984_v25 = vld [vmem:[%s24857_s1 + $0x1f48] ss:$16 sps:$4 sm:$0xff]  }
 0x453   : > { %10019 = vmatpush1.bf16.msra.mxu1 %v17915_v52  ;;  %v17968_v52 = vld [vmem:[%s24857_s1 + $0x1e8c] ss:$16 sps:$4 sm:$0xff]  }
 0x454   : > { %10020 = vmatprep.subr.bf16.mxu1 %v17920_v35  ;;  %v18091_v35 = vld [vmem:[%s24859_s3 + $0x94] ss:$8 sps:$4 sm:$0xff]  }
 0x455   : > { %12494 = vmatpush1.bf16.msra.mxu0 %v18053_v15  ;;  %v17989_v15 = vld [vmem:[%s24857_s1 + $0x1f6c] ss:$16 sps:$4 sm:$0xff]  }
 0x456   : > { %12495 = vmatprep.subr.bf16.mxu0 %v18061_v12  ;;  %v17990_v12 = vld [vmem:[%s24857_s1 + $0x1f88] ss:$16 sps:$4 sm:$0xff]  }
 0x457   : > { %10021 = vmatpush1.bf16.msra.mxu1 %v17918_v4  ;;  %v18089_v4 = vld [vmem:[%s24859_s3 + $0x90] ss:$8 sps:$4 sm:$0xff]  }
 0x458   : > { %10022 = vmatprep.subr.bf16.mxu1 %v17923_v29  ;;  %v17966_v29 = vld [vmem:[%s24857_s1 + $0x1e88] ss:$16 sps:$4 sm:$0xff]  }
 0x459   : > { %12496 = vmatpush1.bf16.msra.mxu0 %v18059_v21  ;;  %v17995_v21 = vld [vmem:[%s24857_s1 + $0x1fac] ss:$16 sps:$4 sm:$0xff]  }
 0x45a   : > { %12497 = vmatprep.subr.bf16.mxu0 %v18067_v38  ;;  %v17996_v38 = vld [vmem:[%s24857_s1 + $0x1fc8] ss:$16 sps:$4 sm:$0xff]  }
 0x45b   : > { %10023 = vmatpush1.bf16.msra.mxu1 %v17921_v58  ;;  %v17971_v58 = vld [vmem:[%s24857_s1 + $0x1eac] ss:$16 sps:$4 sm:$0xff]  }
 0x45c   : > { %10024 = vmatprep.subr.bf16.mxu1 %v17926_v39  ;;  %v18097_v39 = vld [vmem:[%s24859_s3 + $0xa4] ss:$8 sps:$4 sm:$0xff]  }
 0x45d   : > { %12498 = vmatpush1.bf16.msra.mxu0 %v18065_v36  ;;  %v18001_v36 = vld [vmem:[%s24857_s1 + $0x1fec] ss:$16 sps:$4 sm:$0xff]  }
 0x45e   : > { %12499 = vmatprep.subr.bf16.mxu0 %v18073_v26  ;;  %v18002_v26 = vld [vmem:[%s24857_s1 + $0x2008] ss:$16 sps:$4 sm:$0xff]  }
 0x45f   : > { %10025 = vmatpush1.bf16.msra.mxu1 %v17924_v14  ;;  %v18095_v14 = vld [vmem:[%s24859_s3 + $0xa0] ss:$8 sps:$4 sm:$0xff]  }
 0x460   : > { %10026 = vmatprep.subr.bf16.mxu1 %v17929_v24  ;;  %v17969_v24 = vld [vmem:[%s24857_s1 + $0x1ea8] ss:$16 sps:$4 sm:$0xff]  }
 0x461   : > { %12500 = vmatpush1.bf16.msra.mxu0 %v18071_v50  ;;  %v18007_v50 = vld [vmem:[%s24857_s1 + $0x202c] ss:$16 sps:$4 sm:$0xff]  }
 0x462   : > { %12501 = vmatprep.subr.bf16.mxu0 %v18079_v46  ;;  %v18008_v46 = vld [vmem:[%s24857_s1 + $0x2048] ss:$16 sps:$4 sm:$0xff]  }
 0x463   : > { %10027 = vmatpush1.bf16.msra.mxu1 %v17927_v1  ;;  %v17974_v1 = vld [vmem:[%s24857_s1 + $0x1ecc] ss:$16 sps:$4 sm:$0xff]  }
 0x464   : > { %10028 = vmatprep.subr.bf16.mxu1 %v17932_v22  ;;  %v18103_v22 = vld [vmem:[%s24859_s3 + $0xb4] ss:$8 sps:$4 sm:$0xff]  }
 0x467   : > { %10029 = vmatpush1.bf16.msra.mxu1 %v17930_v27  ;;  %v18101_v27 = vld [vmem:[%s24859_s3 + $0xb0] ss:$8 sps:$4 sm:$0xff]  }
 0x468   : > { %10030 = vmatprep.subr.bf16.mxu1 %v17935_v32  ;;  %v17972_v32 = vld [vmem:[%s24857_s1 + $0x1ec8] ss:$16 sps:$4 sm:$0xff]  }
 0x46b   : > { %10031 = vmatpush1.bf16.msra.mxu1 %v17933_v57  ;;  %v17977_v57 = vld [vmem:[%s24857_s1 + $0x1eec] ss:$16 sps:$4 sm:$0xff]  }
 0x46c   : > { %10032 = vmatprep.subr.bf16.mxu1 %v17938_v19  ;;  %v18109_v19 = vld [vmem:[%s24859_s3 + $0xc4] ss:$8 sps:$4 sm:$0xff]  }
 0x46f   : > { %10033 = vmatpush1.bf16.msra.mxu1 %v17936_v41  ;;  %v18107_v41 = vld [vmem:[%s24859_s3 + $0xc0] ss:$8 sps:$4 sm:$0xff]  }
 0x470   : > { %10034 = vmatprep.subr.bf16.mxu1 %v17941_v18  ;;  %v17975_v18 = vld [vmem:[%s24857_s1 + $0x1ee8] ss:$16 sps:$4 sm:$0xff]  }
 0x473   : > { %10035 = vmatpush1.bf16.msra.mxu1 %v17939_v63  ;;  %v18113_v63 = vld [vmem:[%s24859_s3 + $0xd0] ss:$8 sps:$4 sm:$0xff]  }
 0x474   : > { %10036 = vmatprep.subr.bf16.mxu1 %v17944_v49  ;;  %v17978_v49 = vld [vmem:[%s24857_s1 + $0x1f08] ss:$16 sps:$4 sm:$0xff]  }
 0x477   : > { %10037 = vmatpush1.bf16.msra.mxu1 %v17942_v55  ;;  %v18121_v55 = vld [vmem:[%s24859_s3 + $0xe4] ss:$8 sps:$4 sm:$0xff]  }
 0x478   : > { %10038 = vmatprep.subr.bf16.mxu1 %v17947_v54  ;;  %v18119_v54 = vld [vmem:[%s24859_s3 + $0xe0] ss:$8 sps:$4 sm:$0xff]  }
 0x47b   : > { %10039 = vmatpush1.bf16.msra.mxu1 %v17945_v16  ;;  %v18127_v16 = vld [vmem:[%s24859_s3 + $0xf4] ss:$8 sps:$4 sm:$0xff]  }
 0x47c   : > { %10040 = vmatprep.subr.bf16.mxu1 %v17950_v44  ;;  %v18125_v44 = vld [vmem:[%s24859_s3 + $0xf0] ss:$8 sps:$4 sm:$0xff]  }
 0x47f   : > { %10041 = vmatpush1.bf16.msra.mxu1 %v17948_v45  ;;  %v17987_v45 = vld [vmem:[%s24857_s1 + $0x1f68] ss:$16 sps:$4 sm:$0xff]  }
 0x480   : > { %10042 = vmatprep.subr.bf16.mxu1 %v17953_v8  ;;  %v17992_v8 = vld [vmem:[%s24857_s1 + $0x1f8c] ss:$16 sps:$4 sm:$0xff]  }
 0x483   : > { %10043 = vmatpush1.bf16.msra.mxu1 %v17951_v53  ;;  %v17993_v53 = vld [vmem:[%s24857_s1 + $0x1fa8] ss:$16 sps:$4 sm:$0xff]  }
 0x484   : > { %10055 = vmatprep.subr.bf16.mxu1 %v17956_v61  ;;  %v17998_v61 = vld [vmem:[%s24857_s1 + $0x1fcc] ss:$16 sps:$4 sm:$0xff]  }
 0x486   : > { %10045 = vmatmul.mubr.bf16.vlgmr.msra.gmra.mrb[4].mxu1 %v21462_v34  ;;  %v18077_v34 = vld [vmem:[%s24859_s3 + $0x70] ss:$8 sps:$4 sm:$0xff]  }
 0x487   : > { %10056 = vmatpush1.bf16.msra.mxu1 %v17954_v40  ;;  %10087 = vmatprep.mubr.bf16.mxu1 %v21473_v43  ;;  %v17960_v43 = vld [vmem:[%s24857_s1 + $0x1e48] ss:$16 sps:$4 sm:$0xff]  }
 0x488   : > { %10057 = vmatprep.subr.bf16.mxu1 %v17959_v20  ;;  %12502 = vmatpush1.bf16.msra.mxu0 %v18077_v34  ;;  %v17999_v40 = vld [vmem:[%s24857_s1 + $0x1fe8] ss:$16 sps:$4 sm:$0xff]   ;;  %v18004_v20 = vld [vmem:[%s24857_s1 + $0x200c] ss:$16 sps:$4 sm:$0xff]  }
 0x489   : > { %12503 = vmatprep.subr.bf16.mxu0 %v18085_v48  ;;  %v18016_v34 = vld [vmem:[%s24857_s1 + $0x208c] ss:$16 sps:$4 sm:$0xff]   ;;  %v18017_v48 = vld [vmem:[%s24857_s1 + $0x20a8] ss:$16 sps:$4 sm:$0xff]  }
 0x48b   : > { %10058 = vmatpush1.bf16.msra.mxu1 %v17957_v10  ;;  %v18005_v10 = vld [vmem:[%s24857_s1 + $0x2028] ss:$16 sps:$4 sm:$0xff]  }
 0x48c   : > { %10059 = vmatprep.subr.bf16.mxu1 %v17962_v42  ;;  %12504 = vmatpush1.bf16.msra.mxu0 %v18083_v17  ;;  %v18010_v42 = vld [vmem:[%s24857_s1 + $0x204c] ss:$16 sps:$4 sm:$0xff]  }
 0x48d   : > { %12505 = vmatprep.subr.bf16.mxu0 %v18091_v35  ;;  %v18022_v17 = vld [vmem:[%s24857_s1 + $0x20cc] ss:$16 sps:$4 sm:$0xff]   ;;  %v18023_v35 = vld [vmem:[%s24857_s1 + $0x20e8] ss:$16 sps:$4 sm:$0xff]  }
 0x48f   : > { %10060 = vmatpush1.bf16.msra.mxu1 %v17960_v43  ;;  %v18014_v43 = vld [vmem:[%s24857_s1 + $0x2088] ss:$16 sps:$4 sm:$0xff]  }
 0x490   : > { %10061 = vmatprep.subr.bf16.mxu1 %v17965_v7  ;;  %12506 = vmatpush1.bf16.msra.mxu0 %v18089_v4  ;;  %v18019_v7 = vld [vmem:[%s24857_s1 + $0x20ac] ss:$16 sps:$4 sm:$0xff]  }
 0x491   : > { %12507 = vmatprep.subr.bf16.mxu0 %v18097_v39  ;;  %v18028_v4 = vld [vmem:[%s24857_s1 + $0x210c] ss:$16 sps:$4 sm:$0xff]   ;;  %v18029_v39 = vld [vmem:[%s24857_s1 + $0x2128] ss:$16 sps:$4 sm:$0xff]  }
 0x493   : > { %10062 = vmatpush1.bf16.msra.mxu1 %v17963_v51  ;;  %v18020_v51 = vld [vmem:[%s24857_s1 + $0x20c8] ss:$16 sps:$4 sm:$0xff]  }
 0x494   : > { %10063 = vmatprep.subr.bf16.mxu1 %v17968_v52  ;;  %12508 = vmatpush1.bf16.msra.mxu0 %v18095_v14  ;;  %v18025_v52 = vld [vmem:[%s24857_s1 + $0x20ec] ss:$16 sps:$4 sm:$0xff]  }
 0x495   : > { %12509 = vmatprep.subr.bf16.mxu0 %v18103_v22  ;;  %v18034_v14 = vld [vmem:[%s24857_s1 + $0x214c] ss:$16 sps:$4 sm:$0xff]   ;;  %v18038_v22 = vld [vmem:[%s24857_s1 + $0x2168] ss:$16 sps:$4 sm:$0xff]  }
 0x497   : > { %10064 = vmatpush1.bf16.msra.mxu1 %v17966_v29  ;;  %v18026_v29 = vld [vmem:[%s24857_s1 + $0x2108] ss:$16 sps:$4 sm:$0xff]  }
 0x498   : > { %10065 = vmatprep.subr.bf16.mxu1 %v17971_v58  ;;  %12510 = vmatpush1.bf16.msra.mxu0 %v18101_v27  ;;  %v18031_v58 = vld [vmem:[%s24857_s1 + $0x212c] ss:$16 sps:$4 sm:$0xff]  }
 0x499   : > { %12511 = vmatprep.subr.bf16.mxu0 %v18109_v19  ;;  %v18046_v27 = vld [vmem:[%s24857_s1 + $0x218c] ss:$16 sps:$4 sm:$0xff]   ;;  %v18050_v19 = vld [vmem:[%s24857_s1 + $0x21a8] ss:$16 sps:$4 sm:$0xff]  }
 0x49b   : > { %10066 = vmatpush1.bf16.msra.mxu1 %v17969_v24  ;;  %v18032_v24 = vld [vmem:[%s24857_s1 + $0x2148] ss:$16 sps:$4 sm:$0xff]  }
 0x49c   : > { %10067 = vmatprep.subr.bf16.mxu1 %v17974_v1  ;;  %12512 = vmatpush1.bf16.msra.mxu0 %v18107_v41  ;;  %v18040_v1 = vld [vmem:[%s24857_s1 + $0x216c] ss:$16 sps:$4 sm:$0xff]  }
 0x49d   : > { %12513 = vmatprep.subr.bf16.mxu0 %v18115_v33  ;;  %v18058_v41 = vld [vmem:[%s24857_s1 + $0x21cc] ss:$16 sps:$4 sm:$0xff]   ;;  %v18062_v33 = vld [vmem:[%s24857_s1 + $0x21e8] ss:$16 sps:$4 sm:$0xff]  }
 0x49f   : > { %10068 = vmatpush1.bf16.msra.mxu1 %v17972_v32  ;;  %v18044_v32 = vld [vmem:[%s24857_s1 + $0x2188] ss:$16 sps:$4 sm:$0xff]  }
 0x4a0   : > { %10069 = vmatprep.subr.bf16.mxu1 %v17977_v57  ;;  %12514 = vmatpush1.bf16.msra.mxu0 %v18113_v63  ;;  %v18052_v57 = vld [vmem:[%s24857_s1 + $0x21ac] ss:$16 sps:$4 sm:$0xff]  }
 0x4a1   : > { %12515 = vmatprep.subr.bf16.mxu0 %v18121_v55  ;;  %v18070_v63 = vld [vmem:[%s24857_s1 + $0x220c] ss:$16 sps:$4 sm:$0xff]   ;;  %v2130_v55 = vlaneseq }
 0x4a3   : > { %10070 = vmatpush1.bf16.msra.mxu1 %v17975_v18  ;;  %v18056_v18 = vld [vmem:[%s24857_s1 + $0x21c8] ss:$16 sps:$4 sm:$0xff]  }
 0x4a4   : > { %10071 = vmatprep.subr.bf16.mxu1 %v17980_v5  ;;  %12516 = vmatpush1.bf16.msra.mxu0 %v18119_v54  ;;  %v18064_v5 = vld [vmem:[%s24857_s1 + $0x21ec] ss:$16 sps:$4 sm:$0xff]  }
 0x4a5   : > { %12517 = vmatprep.subr.bf16.mxu0 %v18127_v16  ;;  %v18082_v54 = vld [vmem:[%s24857_s1 + $0x224c] ss:$16 sps:$4 sm:$0xff]  }
 0x4a7   : > { %10072 = vmatpush1.bf16.msra.mxu1 %v17978_v49  ;;  %v18068_v49 = vld [vmem:[%s24857_s1 + $0x2208] ss:$16 sps:$4 sm:$0xff]  }
 0x4a8   : > { %10073 = vmatprep.subr.bf16.mxu1 %v17983_v11  ;;  %12518 = vmatpush1.bf16.msra.mxu0 %v18125_v44  ;;  %v18074_v11 = vld [vmem:[%s24857_s1 + $0x2228] ss:$16 sps:$4 sm:$0xff]   ;;  %v18094_v44 = vld [vmem:[%s24857_s1 + $0x228c] ss:$16 sps:$4 sm:$0xff]  }
 0x4ab   : > { %10074 = vmatpush1.bf16.msra.mxu1 %v17981_v28  ;;  %v18080_v28 = vld [vmem:[%s24857_s1 + $0x2248] ss:$16 sps:$4 sm:$0xff]  }
 0x4ac   : > { %10075 = vmatprep.subr.bf16.mxu1 %v17986_v56  ;;  %v22929_v56 = vshrl.u32 %v2130_v55, 7 }
 0x4ae   : > { %v2132_v16 = vsub.s32 0, %v22929_v56 }
 0x4af   : > { %10076 = vmatpush1.bf16.msra.mxu1 %v17984_v25  ;;  %v22944_v25 = vld [vmem:[%s24858_s2] sm:$0xf] }
 0x4b0   : > { %10077 = vmatprep.subr.bf16.mxu1 %v17989_v15  ;;  %v2136_v15 = vsub.s32 1, %v22929_v56 }
 0x4b3   : > { %10078 = vmatpush1.bf16.msra.mxu1 %v17987_v45  ;;  %v18092_v45 = vld [vmem:[%s24857_s1 + $0x2288] ss:$16 sps:$4 sm:$0xff]  }
 0x4b4   : > { %10079 = vmatprep.subr.bf16.mxu1 %v17992_v8  ;;  %v2133_v8 = vrot.slane %v22944_v25, %v2132_v16 }
 0x4b7   : > { %10080 = vmatpush1.bf16.msra.mxu1 %v17990_v12  ;;  %v18100_v12 = vld [vmem:[%s24857_s1 + $0x22ac] ss:$16 sps:$4 sm:$0xff]  }
 0x4b8   : > { %10081 = vmatprep.subr.bf16.mxu1 %v17995_v21  ;;  %v2137_v21 = vrot.slane %v22944_v25, %v2136_v15 }
 0x4bb   : > { %10082 = vmatpush1.bf16.msra.mxu1 %v17993_v53  ;;  %v18098_v53 = vld [vmem:[%s24857_s1 + $0x22a8] ss:$16 sps:$4 sm:$0xff]  }
 0x4bc   : > { %10083 = vmatprep.subr.bf16.mxu1 %v17998_v61  ;;  %v16047_v61 = vadd.f32 %v20207_v62, %v2133_v8  ;;  %v18104_v62 = vld [vmem:[%s24857_s1 + $0x22c8] ss:$16 sps:$4 sm:$0xff]  }
 0x4bf   : > { %10084 = vmatpush1.bf16.msra.mxu1 %v17996_v38  ;;  %v18106_v38 = vld [vmem:[%s24857_s1 + $0x22cc] ss:$16 sps:$4 sm:$0xff]  }
 0x4c0   : > { %10085 = vmatprep.subr.bf16.mxu1 %v18001_v36  ;;  %v16049_v36 = vadd.f32 %v20209_v0, %v2137_v21  ;;  %v18112_v0 = vld [vmem:[%s24857_s1 + $0x22ec] ss:$16 sps:$4 sm:$0xff]  }
 0x4c3   : > { %10086 = vmatpush1.bf16.msra.mxu1 %v17999_v40 }
 0x4c4   : > { %10098 = vmatprep.subr.bf16.mxu1 %v18004_v20  ;;  %v16051_v20 = vadd.f32 %v20211_v47, %v2133_v8 }
 0x4c6   : > { %10088 = vmatmul.mubr.bf16.vlgmr.msra.gmra.mrb[4].mxu1 %v21681_v31  ;;  %v18013_v31 = vld [vmem:[%s24857_s1 + $0x206c] ss:$16 sps:$4 sm:$0xff]  }
 0x4c7   : > { %10099 = vmatpush1.bf16.msra.mxu1 %v18002_v26  ;;  %10130 = vmatprep.mubr.bf16.mxu1 %v21692_v59  ;;  %v18011_v59 = vld [vmem:[%s24857_s1 + $0x2068] ss:$16 sps:$4 sm:$0xff]  }
 0x4c8   : > { %10100 = vmatprep.subr.bf16.mxu1 %v18007_v50 }
 0x4cb   : > { %10101 = vmatpush1.bf16.msra.mxu1 %v18005_v10  ;;  %v16053_v10 = vadd.f32 %v20219_v3, %v2137_v21  ;;  %v18139_v21 = vld [vmem:[%s24857_s1 + $0x23ac] ss:$16 sps:$4 sm:$0xff]  }
 0x4cc   : > { %10102 = vmatprep.subr.bf16.mxu1 %v18010_v42 }
 0x4cf   : > { %10103 = vmatpush1.bf16.msra.mxu1 %v18008_v46 }
 0x4d0   : > { %10104 = vmatprep.subr.bf16.mxu1 %v18013_v31 }
 0x4d3   : > { %10105 = vmatpush1.bf16.msra.mxu1 %v18011_v59 }
 0x4d4   : > { %10106 = vmatprep.subr.bf16.mxu1 %v18016_v34 }
 0x4d7   : > { %10107 = vmatpush1.bf16.msra.mxu1 %v18014_v43 }
 0x4d8   : > { %10108 = vmatprep.subr.bf16.mxu1 %v18019_v7 }
 0x4db   : > { %10109 = vmatpush1.bf16.msra.mxu1 %v18017_v48 }
 0x4dc   : > { %10110 = vmatprep.subr.bf16.mxu1 %v18022_v17  ;;  %v18110_v17 = vld [vmem:[%s24857_s1 + $0x22e8] ss:$16 sps:$4 sm:$0xff]  }
 0x4df   : > { %10111 = vmatpush1.bf16.msra.mxu1 %v18020_v51  ;;  %v18118_v51 = vld [vmem:[%s24857_s1 + $0x230c] ss:$16 sps:$4 sm:$0xff]  }
 0x4e0   : > { %10112 = vmatprep.subr.bf16.mxu1 %v18025_v52 }
 0x4e3   : > { %10113 = vmatpush1.bf16.msra.mxu1 %v18023_v35 }
 0x4e4   : > { %10114 = vmatprep.subr.bf16.mxu1 %v18028_v4 }
 0x4e7   : > { %10115 = vmatpush1.bf16.msra.mxu1 %v18026_v29 }
 0x4e8   : > { %10116 = vmatprep.subr.bf16.mxu1 %v18031_v58 }
 0x4eb   : > { %10117 = vmatpush1.bf16.msra.mxu1 %v18029_v39  ;;  %v18116_v39 = vld [vmem:[%s24857_s1 + $0x2308] ss:$16 sps:$4 sm:$0xff]  }
 0x4ec   : > { %10118 = vmatprep.subr.bf16.mxu1 %v18034_v14  ;;  %v18124_v14 = vld [vmem:[%s24857_s1 + $0x232c] ss:$16 sps:$4 sm:$0xff]  }
 0x4ef   : > { %10119 = vmatpush1.bf16.msra.mxu1 %v18032_v24 }
 0x4f0   : > { %10120 = vmatprep.subr.bf16.mxu1 %v18040_v1 }
 0x4f3   : > { %10121 = vmatpush1.bf16.msra.mxu1 %v18038_v22  ;;  %v18122_v22 = vld [vmem:[%s24857_s1 + $0x2328] ss:$16 sps:$4 sm:$0xff]  }
 0x4f4   : > { %10122 = vmatprep.subr.bf16.mxu1 %v18046_v27  ;;  %v18130_v27 = vld [vmem:[%s24857_s1 + $0x234c] ss:$16 sps:$4 sm:$0xff]  }
 0x4f7   : > { %10123 = vmatpush1.bf16.msra.mxu1 %v18044_v32 }
 0x4f8   : > { %10124 = vmatprep.subr.bf16.mxu1 %v18052_v57  ;;  %v18128_v57 = vld [vmem:[%s24857_s1 + $0x2348] ss:$16 sps:$4 sm:$0xff]  }
 0x4fb   : > { %10125 = vmatpush1.bf16.msra.mxu1 %v18050_v19 }
 0x4fc   : > { %10126 = vmatprep.subr.bf16.mxu1 %v18058_v41 }
 0x4ff   : > { %10127 = vmatpush1.bf16.msra.mxu1 %v18056_v18 }
 0x500   : > { %10128 = vmatprep.subr.bf16.mxu1 %v18064_v5  ;;  %v18133_v5 = vld [vmem:[%s24857_s1 + $0x236c] ss:$16 sps:$4 sm:$0xff]  }
 0x503   : > { %10129 = vmatpush1.bf16.msra.mxu1 %v18062_v33 }
 0x504   : > { %10141 = vmatprep.subr.bf16.mxu1 %v18070_v63 }
 0x506   : > { %10131 = vmatmul.mubr.bf16.vlgmr.msra.gmra.mrb[4].mxu1 %v21895_v23  ;;  %v18088_v23 = vld [vmem:[%s24857_s1 + $0x226c] ss:$16 sps:$4 sm:$0xff]  }
 0x507   : > { %10142 = vmatpush1.bf16.msra.mxu1 %v18068_v49  ;;  %10173 = vmatprep.mubr.bf16.mxu1 %v21906_v6  ;;  %v18086_v6 = vld [vmem:[%s24857_s1 + $0x2268] ss:$16 sps:$4 sm:$0xff]  }
 0x508   : > { %10143 = vmatprep.subr.bf16.mxu1 %v18076_v13  ;;  %v18131_v13 = vld [vmem:[%s24857_s1 + $0x2368] ss:$16 sps:$4 sm:$0xff]  }
 0x50b   : > { %10144 = vmatpush1.bf16.msra.mxu1 %v18074_v11 }
 0x50c   : > { %10145 = vmatprep.subr.bf16.mxu1 %v18082_v54  ;;  %v18136_v54 = vld [vmem:[%s24857_s1 + $0x238c] ss:$16 sps:$4 sm:$0xff]  }
 0x50f   : > { %10146 = vmatpush1.bf16.msra.mxu1 %v18080_v28 }
 0x510   : > { %10147 = vmatprep.subr.bf16.mxu1 %v18088_v23 }
 0x513   : > { %10148 = vmatpush1.bf16.msra.mxu1 %v18086_v6 }
 0x514   : > { %10149 = vmatprep.subr.bf16.mxu1 %v18094_v44 }
 0x517   : > { %10150 = vmatpush1.bf16.msra.mxu1 %v18092_v45 }
 0x518   : > { %10151 = vmatprep.subr.bf16.mxu1 %v18100_v12  ;;  %v18134_v12 = vld [vmem:[%s24857_s1 + $0x2388] ss:$16 sps:$4 sm:$0xff]  }
 0x51a   : > { %v9401_v40 = vpop.f32.mrb[0].mxu0 }
 0x51b   : > { %v16048_v26 = vadd.f32 %v16047_v61, %v9401_v40  ;;  %v9403_v50 = vpop.f32.mrb[1].mxu0  ;;  %10152 = vmatpush1.bf16.msra.mxu1 %v18098_v53 }
 0x51c   : > { %v16050_v42 = vadd.f32 %v16049_v36, %v9403_v50  ;;  %v9405_v46 = vpop.f32.mrb[2].mxu0  ;;  %10153 = vmatprep.subr.bf16.mxu1 %v18106_v38  ;;  %v18142_v50 = vld [vmem:[%s24857_s1 + $0x23cc] ss:$16 sps:$4 sm:$0xff]  }
 0x51d   : > { %v10270_v31 = vmax.f32 %v16048_v26, 0.0  ;;  %v16052_v59 = vadd.f32 %v16051_v20, %v9405_v46  ;;  %v9407_v34 = vpop.f32.mrb[3].mxu0  ;;  %v18137_v26 = vld [vmem:[%s24857_s1 + $0x23a8] ss:$16 sps:$4 sm:$0xff]  }
 0x51e   : > { %v10271_v47 = vmax.f32 %v16050_v42, 0.0  ;;  %v16054_v43 = vadd.f32 %v16053_v10, %v9407_v34 }
 0x51f   : > { %v10274_v7 = vmax.f32 %v16052_v59, 0.0  ;;  %10154 = vmatpush1.bf16.msra.mxu1 %v18104_v62 }
 0x520   : > { %v15523_v48 = vpack.c.bf16 %v10271_v47, %v10270_v31  ;;  %v10275_v3 = vmax.f32 %v16054_v43, 0.0  ;;  %10155 = vmatprep.subr.bf16.mxu1 %v18112_v0  ;;  %v18140_v31 = vld [vmem:[%s24857_s1 + $0x23c8] ss:$16 sps:$4 sm:$0xff]   ;;  %v18145_v0 = vld [vmem:[%s24857_s1 + $0x23ec] ss:$16 sps:$4 sm:$0xff]  }
 0x521   : > { %v18143_v47 = vld [vmem:[%s24857_s1 + $0x23e8] ss:$16 sps:$4 sm:$0xff]   ;;  %v18148_v43 = vld [vmem:[%s24857_s1 + $0x240c] ss:$16 sps:$4 sm:$0xff]  }
 0x522   : > { %v10305_v52 = vrot.slane %v15523_v48, 7  ;;  %v15525_v35 = vpack.c.bf16 %v10275_v3, %v10274_v7  ;;  %v18146_v7 = vld [vmem:[%s24857_s1 + $0x2408] ss:$16 sps:$4 sm:$0xff]   ;;  %v18151_v48 = vld [vmem:[%s24857_s1 + $0x242c] ss:$16 sps:$4 sm:$0xff]  }
 0x523   : > { %10156 = vmatpush1.bf16.msra.mxu1 %v18110_v17  ;;  %v18242_v3 = vld [vmem:[%s24859_s3 + $0x100] ss:$8 sps:$4 sm:$0xff]   ;;  %v18244_v17 = vld [vmem:[%s24859_s3 + $0x104] ss:$8 sps:$4 sm:$0xff]  }
 0x524   : > { %v10307_v29 = vrot.slane %v10305_v52, 4  ;;  %10321 = vst [vmem:[#allocation2] sm:$0xee] %v10305_v52  ;;  %v10308_v58 = vrot.slane %v15525_v35, 7  ;;  %10157 = vmatprep.subr.bf16.mxu1 %v18118_v51  ;;  %v18149_v51 = vld [vmem:[%s24857_s1 + $0x2428] ss:$16 sps:$4 sm:$0xff]   ;;  %12530 = vmatprep.subr.bf16.mxu0 %v18244_v17 }
 0x525   : > { %v18247_v52 = vld [vmem:[%s24859_s3 + $0x114] ss:$8 sps:$4 sm:$0xff]   ;;  %v18245_v35 = vld [vmem:[%s24859_s3 + $0x110] ss:$8 sps:$4 sm:$0xff]  }
 0x526   : > { %v10309_v24 = vsel %vm22981_vm6, %v10307_v29, %v10308_v58  ;;  %v10313_v1 = vrot.slane %v10308_v58, 4  ;;  %v18152_v29 = vld [vmem:[%s24857_s1 + $0x2448] ss:$16 sps:$4 sm:$0xff]   ;;  %v18157_v58 = vld [vmem:[%s24857_s1 + $0x246c] ss:$16 sps:$4 sm:$0xff]  }
 0x527   : > { %10158 = vmatpush1.bf16.msra.mxu1 %v18116_v39  ;;  %v18248_v39 = vld [vmem:[%s24859_s3 + $0x120] ss:$8 sps:$4 sm:$0xff]   ;;  %v18187_v17 = vld [vmem:[%s24857_s1 + $0x25ac] ss:$16 sps:$4 sm:$0xff]  }
 0x528   : > { %10325 = vst [vmem:[#allocation2 + $0x20] sm:$0x11] %v10313_v1  ;;  %10159 = vmatprep.subr.bf16.mxu1 %v18124_v14  ;;  %v18253_v14 = vld [vmem:[%s24859_s3 + $0x134] ss:$8 sps:$4 sm:$0xff]  }
 0x529   : > { %v18160_v1 = vld [vmem:[%s24857_s1 + $0x248c] ss:$16 sps:$4 sm:$0xff]  }
 0x52b   : > { %v10327_v32 = vld [vmem:[#allocation2] sm:$0xff]  ;;  %10160 = vmatpush1.bf16.msra.mxu1 %v18122_v22  ;;  %v18251_v22 = vld [vmem:[%s24859_s3 + $0x130] ss:$8 sps:$4 sm:$0xff]  }
 0x52c   : > { %v23002_v19 = vcombine.low %v10327_v32, %v10309_v24  ;;  %v23004_v41 = vcombine.high %v10327_v32, %v10309_v24  ;;  %v10333_v18 = vld [vmem:[#allocation2] sm:$0xee]  ;;  %10161 = vmatprep.subr.bf16.mxu1 %v18130_v27  ;;  %v18158_v32 = vld [vmem:[%s24857_s1 + $0x2488] ss:$16 sps:$4 sm:$0xff]  }
 0x52d   : > { %v23011_v63 = vcombine.high %v10333_v18, %v10309_v24  ;;  %v23013_v49 = vcombine.low %v10333_v18, %v10309_v24  ;;  %v10337_v28 = vld [vmem:[#allocation2] sm:$0xcc] }
 0x52e   : > { %12519 = vmatprep.mubr.bf16.mxu0 %v23004_v41  ;;  %v15194_v40 = vcombine.high %v10337_v28, %v10309_v24  ;;  %v15193_v20 = vcombine.low %v10337_v28, %v10309_v24  ;;  %v18155_v24 = vld [vmem:[%s24857_s1 + $0x2468] ss:$16 sps:$4 sm:$0xff]   ;;  %v18256_v27 = vld [vmem:[%s24859_s3 + $0x144] ss:$8 sps:$4 sm:$0xff]  }
 0x52f   : > { %12520 = vmatmul.mubr.bf16.vlgmr.msra.gmra.mrb[4].mxu0 %v23002_v19  ;;  %v10331_v33 = vld [vmem:[#allocation2 + $0x20] sm:$0x11]  ;;  %10162 = vmatpush1.bf16.msra.mxu1 %v18128_v57  ;;  %v10434_v23 = vrot.slane %v23011_v63, 1  ;;  %v10431_v44 = vrot.slane %v23013_v49, 1  ;;  %v18163_v57 = vld [vmem:[%s24857_s1 + $0x24ac] ss:$16 sps:$4 sm:$0xff]  }
 0x530   : > { %v23018_v11 = vcombine.high %v10331_v33, %v10331_v33  ;;  %v23020_v55 = vcombine.low %v10331_v33, %v10331_v33  ;;  %10163 = vmatprep.subr.bf16.mxu1 %v18133_v5  ;;  %v10335_v8 = vld [vmem:[#allocation2 + $0x20] sm:$0x33]  ;;  %v10542_v10 = vrot.slane %v15194_v40, 2  ;;  %v10539_v46 = vrot.slane %v15193_v20, 2  ;;  %12531 = vmatpush1.bf16.msra.mxu0 %v18242_v3  ;;  %v18259_v5 = vld [vmem:[%s24859_s3 + $0x154] ss:$8 sps:$4 sm:$0xff]  }
 0x531   : > { %v23041_v38 = vcombine.high %v10335_v8, %v10335_v8  ;;  %v23043_v36 = vcombine.low %v10335_v8, %v10335_v8  ;;  %12532 = vmatprep.subr.bf16.mxu0 %v18247_v52  ;;  %v18254_v18 = vld [vmem:[%s24859_s3 + $0x140] ss:$8 sps:$4 sm:$0xff]   ;;  %v18262_v28 = vld [vmem:[%s24859_s3 + $0x164] ss:$8 sps:$4 sm:$0xff]  }
 0x532   : > { %v10435_v6 = vrot.slane %v23018_v11, 1  ;;  %v10432_v45 = vrot.slane %v23020_v55, 1  ;;  %v18161_v33 = vld [vmem:[%s24857_s1 + $0x24a8] ss:$16 sps:$4 sm:$0xff]   ;;  %v18268_v40 = vld [vmem:[%s24859_s3 + $0x184] ss:$8 sps:$4 sm:$0xff]  }
 0x533   : > { %10164 = vmatpush1.bf16.msra.mxu1 %v18131_v13  ;;  %v10543_v42 = vrot.slane %v23041_v38, 2  ;;  %v10540_v62 = vrot.slane %v23043_v36, 2  ;;  %v18166_v13 = vld [vmem:[%s24857_s1 + $0x24cc] ss:$16 sps:$4 sm:$0xff]   ;;  %v18167_v8 = vld [vmem:[%s24857_s1 + $0x24e8] ss:$16 sps:$4 sm:$0xff]  }
 0x534   : > { %10165 = vmatprep.subr.bf16.mxu1 %v18136_v54  ;;  %v23036_v53 = vsel %vm597_vm1, %v10434_v23, %v10435_v6  ;;  %v23039_v61 = vsel %vm597_vm1, %v10431_v44, %v10432_v45  ;;  %12533 = vmatpush1.bf16.msra.mxu0 %v18245_v35  ;;  %v18257_v54 = vld [vmem:[%s24859_s3 + $0x150] ss:$8 sps:$4 sm:$0xff]   ;;  %v18169_v6 = vld [vmem:[%s24857_s1 + $0x24ec] ss:$16 sps:$4 sm:$0xff]   ;;  %v18260_v44 = vld [vmem:[%s24859_s3 + $0x160] ss:$8 sps:$4 sm:$0xff]  }
 0x535   : > { %v23057_v59 = vsel %vm815_vm3, %v10542_v10, %v10543_v42  ;;  %v23060_v34 = vsel %vm815_vm3, %v10539_v46, %v10540_v62  ;;  %v18164_v23 = vld [vmem:[%s24857_s1 + $0x24c8] ss:$16 sps:$4 sm:$0xff]   ;;  %v18265_v45 = vld [vmem:[%s24859_s3 + $0x174] ss:$8 sps:$4 sm:$0xff]  }
 0x536   : > { %v18170_v20 = vld [vmem:[%s24857_s1 + $0x2508] ss:$16 sps:$4 sm:$0xff]   ;;  %v18271_v10 = vld [vmem:[%s24859_s3 + $0x194] ss:$8 sps:$4 sm:$0xff]  }
 0x537   : > { %10166 = vmatpush1.bf16.msra.mxu1 %v18134_v12  ;;  %v18172_v12 = vld [vmem:[%s24857_s1 + $0x250c] ss:$16 sps:$4 sm:$0xff]   ;;  %v18173_v42 = vld [vmem:[%s24857_s1 + $0x2528] ss:$16 sps:$4 sm:$0xff]  }
 0x538   : > { %10167 = vmatprep.subr.bf16.mxu1 %v18139_v21  ;;  %v18263_v21 = vld [vmem:[%s24859_s3 + $0x170] ss:$8 sps:$4 sm:$0xff]   ;;  %v18178_v46 = vld [vmem:[%s24857_s1 + $0x254c] ss:$16 sps:$4 sm:$0xff]  }
 0x539   : > { %v18269_v62 = vld [vmem:[%s24859_s3 + $0x190] ss:$8 sps:$4 sm:$0xff]   ;;  %v18190_v52 = vld [vmem:[%s24857_s1 + $0x25cc] ss:$16 sps:$4 sm:$0xff]  }
 0x53a   : > { %v18182_v3 = vld [vmem:[%s24857_s1 + $0x2588] ss:$16 sps:$4 sm:$0xff]   ;;  %v18193_v35 = vld [vmem:[%s24857_s1 + $0x25ec] ss:$16 sps:$4 sm:$0xff]  }
 0x53b   : > { %10168 = vmatpush1.bf16.msra.mxu1 %v18137_v26  ;;  %v18175_v26 = vld [vmem:[%s24857_s1 + $0x252c] ss:$16 sps:$4 sm:$0xff]  }
 0x53c   : > { %10169 = vmatprep.subr.bf16.mxu1 %v18142_v50  ;;  %v18266_v50 = vld [vmem:[%s24859_s3 + $0x180] ss:$8 sps:$4 sm:$0xff]  }
 0x53f   : > { %10170 = vmatpush1.bf16.msra.mxu1 %v18140_v31  ;;  %v18274_v31 = vld [vmem:[%s24859_s3 + $0x1a4] ss:$8 sps:$4 sm:$0xff]  }
 0x540   : > { %10171 = vmatprep.subr.bf16.mxu1 %v18145_v0  ;;  %v18176_v0 = vld [vmem:[%s24857_s1 + $0x2548] ss:$16 sps:$4 sm:$0xff]  }
 0x543   : > { %10172 = vmatpush1.bf16.msra.mxu1 %v18143_v47  ;;  %v18181_v47 = vld [vmem:[%s24857_s1 + $0x256c] ss:$16 sps:$4 sm:$0xff]  }
 0x544   : > { %10184 = vmatprep.subr.bf16.mxu1 %v18148_v43  ;;  %v18272_v43 = vld [vmem:[%s24859_s3 + $0x1a0] ss:$8 sps:$4 sm:$0xff]  }
 0x546   : > { %10174 = vmatmul.mubr.bf16.vlgmr.msra.gmra.mrb[4].mxu1 %v22109_v30  ;;  %v18154_v30 = vld [vmem:[%s24857_s1 + $0x244c] ss:$16 sps:$4 sm:$0xff]  }
 0x547   : > { %10185 = vmatpush1.bf16.msra.mxu1 %v18146_v7  ;;  %10216 = vmatprep.mubr.bf16.mxu1 %v22120_v60  ;;  %v18250_v60 = vld [vmem:[%s24859_s3 + $0x124] ss:$8 sps:$4 sm:$0xff]   ;;  %v18179_v7 = vld [vmem:[%s24857_s1 + $0x2568] ss:$16 sps:$4 sm:$0xff]  }
 0x548   : > { %10186 = vmatprep.subr.bf16.mxu1 %v18151_v48  ;;  %12534 = vmatprep.subr.bf16.mxu0 %v18250_v60  ;;  %v18184_v48 = vld [vmem:[%s24857_s1 + $0x258c] ss:$16 sps:$4 sm:$0xff]   ;;  %v18191_v60 = vld [vmem:[%s24857_s1 + $0x25e8] ss:$16 sps:$4 sm:$0xff]  }
 0x549   : > { %12535 = vmatpush1.bf16.msra.mxu0 %v18248_v39  ;;  %v18199_v39 = vld [vmem:[%s24857_s1 + $0x262c] ss:$16 sps:$4 sm:$0xff]  }
 0x54a   : > { %12536 = vmatprep.subr.bf16.mxu0 %v18253_v14  ;;  %v18197_v14 = vld [vmem:[%s24857_s1 + $0x2628] ss:$16 sps:$4 sm:$0xff]  }
 0x54b   : > { %10187 = vmatpush1.bf16.msra.mxu1 %v18149_v51  ;;  %v18185_v51 = vld [vmem:[%s24857_s1 + $0x25a8] ss:$16 sps:$4 sm:$0xff]  }
 0x54c   : > { %10188 = vmatprep.subr.bf16.mxu1 %v18154_v30  ;;  %v18188_v30 = vld [vmem:[%s24857_s1 + $0x25c8] ss:$16 sps:$4 sm:$0xff]  }
 0x54d   : > { %12537 = vmatpush1.bf16.msra.mxu0 %v18251_v22  ;;  %v18208_v22 = vld [vmem:[%s24857_s1 + $0x268c] ss:$16 sps:$4 sm:$0xff]  }
 0x54e   : > { %12538 = vmatprep.subr.bf16.mxu0 %v18256_v27  ;;  %v18206_v27 = vld [vmem:[%s24857_s1 + $0x2688] ss:$16 sps:$4 sm:$0xff]  }
 0x54f   : > { %10189 = vmatpush1.bf16.msra.mxu1 %v18152_v29  ;;  %v18196_v29 = vld [vmem:[%s24857_s1 + $0x260c] ss:$16 sps:$4 sm:$0xff]  }
 0x550   : > { %10190 = vmatprep.subr.bf16.mxu1 %v18157_v58  ;;  %v18194_v58 = vld [vmem:[%s24857_s1 + $0x2608] ss:$16 sps:$4 sm:$0xff]  }
 0x551   : > { %12539 = vmatpush1.bf16.msra.mxu0 %v18254_v18  ;;  %v18214_v18 = vld [vmem:[%s24857_s1 + $0x26cc] ss:$16 sps:$4 sm:$0xff]  }
 0x552   : > { %12540 = vmatprep.subr.bf16.mxu0 %v18259_v5  ;;  %v18212_v5 = vld [vmem:[%s24857_s1 + $0x26c8] ss:$16 sps:$4 sm:$0xff]  }
 0x553   : > { %10191 = vmatpush1.bf16.msra.mxu1 %v18155_v24  ;;  %v18202_v24 = vld [vmem:[%s24857_s1 + $0x264c] ss:$16 sps:$4 sm:$0xff]  }
 0x554   : > { %10192 = vmatprep.subr.bf16.mxu1 %v18160_v1  ;;  %v18200_v1 = vld [vmem:[%s24857_s1 + $0x2648] ss:$16 sps:$4 sm:$0xff]  }
 0x555   : > { %12541 = vmatpush1.bf16.msra.mxu0 %v18257_v54  ;;  %v18220_v54 = vld [vmem:[%s24857_s1 + $0x270c] ss:$16 sps:$4 sm:$0xff]  }
 0x556   : > { %12542 = vmatprep.subr.bf16.mxu0 %v18262_v28  ;;  %v18218_v28 = vld [vmem:[%s24857_s1 + $0x2708] ss:$16 sps:$4 sm:$0xff]  }
 0x557   : > { %10193 = vmatpush1.bf16.msra.mxu1 %v18158_v32  ;;  %v18211_v32 = vld [vmem:[%s24857_s1 + $0x26ac] ss:$16 sps:$4 sm:$0xff]  }
 0x558   : > { %10194 = vmatprep.subr.bf16.mxu1 %v18163_v57  ;;  %v18209_v57 = vld [vmem:[%s24857_s1 + $0x26a8] ss:$16 sps:$4 sm:$0xff]  }
 0x559   : > { %12543 = vmatpush1.bf16.msra.mxu0 %v18260_v44  ;;  %v18226_v44 = vld [vmem:[%s24857_s1 + $0x274c] ss:$16 sps:$4 sm:$0xff]  }
 0x55a   : > { %12544 = vmatprep.subr.bf16.mxu0 %v18265_v45  ;;  %v18224_v45 = vld [vmem:[%s24857_s1 + $0x2748] ss:$16 sps:$4 sm:$0xff]  }
 0x55b   : > { %10195 = vmatpush1.bf16.msra.mxu1 %v18161_v33  ;;  %v18217_v33 = vld [vmem:[%s24857_s1 + $0x26ec] ss:$16 sps:$4 sm:$0xff]  }
 0x55c   : > { %10196 = vmatprep.subr.bf16.mxu1 %v18166_v13  ;;  %v18215_v13 = vld [vmem:[%s24857_s1 + $0x26e8] ss:$16 sps:$4 sm:$0xff]  }
 0x55d   : > { %12545 = vmatpush1.bf16.msra.mxu0 %v18263_v21  ;;  %v18232_v21 = vld [vmem:[%s24857_s1 + $0x278c] ss:$16 sps:$4 sm:$0xff]  }
 0x55e   : > { %12546 = vmatprep.subr.bf16.mxu0 %v18268_v40  ;;  %v18230_v40 = vld [vmem:[%s24857_s1 + $0x2788] ss:$16 sps:$4 sm:$0xff]  }
 0x55f   : > { %10197 = vmatpush1.bf16.msra.mxu1 %v18164_v23  ;;  %v18223_v23 = vld [vmem:[%s24857_s1 + $0x272c] ss:$16 sps:$4 sm:$0xff]  }
 0x560   : > { %10198 = vmatprep.subr.bf16.mxu1 %v18169_v6  ;;  %v18221_v6 = vld [vmem:[%s24857_s1 + $0x2728] ss:$16 sps:$4 sm:$0xff]  }
 0x561   : > { %12547 = vmatpush1.bf16.msra.mxu0 %v18266_v50  ;;  %v18238_v50 = vld [vmem:[%s24857_s1 + $0x27cc] ss:$16 sps:$4 sm:$0xff]  }
 0x562   : > { %12548 = vmatprep.subr.bf16.mxu0 %v18271_v10  ;;  %v18236_v10 = vld [vmem:[%s24857_s1 + $0x27c8] ss:$16 sps:$4 sm:$0xff]  }
 0x563   : > { %10199 = vmatpush1.bf16.msra.mxu1 %v18167_v8  ;;  %v18229_v8 = vld [vmem:[%s24857_s1 + $0x276c] ss:$16 sps:$4 sm:$0xff]  }
 0x564   : > { %10200 = vmatprep.subr.bf16.mxu1 %v18172_v12  ;;  %v18227_v12 = vld [vmem:[%s24857_s1 + $0x2768] ss:$16 sps:$4 sm:$0xff]  }
 0x565   : > { %12549 = vmatpush1.bf16.msra.mxu0 %v18269_v62  ;;  %v18277_v62 = vld [vmem:[%s24859_s3 + $0x1b4] ss:$8 sps:$4 sm:$0xff]  }
 0x566   : > { %12550 = vmatprep.subr.bf16.mxu0 %v18274_v31  ;;  %v18275_v31 = vld [vmem:[%s24859_s3 + $0x1b0] ss:$8 sps:$4 sm:$0xff]  }
 0x567   : > { %10201 = vmatpush1.bf16.msra.mxu1 %v18170_v20  ;;  %v18235_v20 = vld [vmem:[%s24857_s1 + $0x27ac] ss:$16 sps:$4 sm:$0xff]  }
 0x568   : > { %10202 = vmatprep.subr.bf16.mxu1 %v18175_v26  ;;  %v18233_v26 = vld [vmem:[%s24857_s1 + $0x27a8] ss:$16 sps:$4 sm:$0xff]  }
 0x569   : > { %12551 = vmatpush1.bf16.msra.mxu0 %v18272_v43  ;;  %v18281_v43 = vld [vmem:[%s24859_s3 + $0x1d0] ss:$8 sps:$4 sm:$0xff]  }
 0x56a   : > { %12552 = vmatprep.subr.bf16.mxu0 %v18277_v62 }
 0x56b   : > { %10203 = vmatpush1.bf16.msra.mxu1 %v18173_v42  ;;  %v18241_v42 = vld [vmem:[%s24857_s1 + $0x27ec] ss:$16 sps:$4 sm:$0xff]  }
 0x56c   : > { %10204 = vmatprep.subr.bf16.mxu1 %v18178_v46  ;;  %v18239_v46 = vld [vmem:[%s24857_s1 + $0x27e8] ss:$16 sps:$4 sm:$0xff]  }
 0x56d   : > { %12553 = vmatpush1.bf16.msra.mxu0 %v18275_v31 }
 0x56f   : > { %10205 = vmatpush1.bf16.msra.mxu1 %v18176_v0  ;;  %v18280_v0 = vld [vmem:[%s24859_s3 + $0x1c4] ss:$8 sps:$4 sm:$0xff]  }
 0x570   : > { %10206 = vmatprep.subr.bf16.mxu1 %v18181_v47  ;;  %v18278_v47 = vld [vmem:[%s24859_s3 + $0x1c0] ss:$8 sps:$4 sm:$0xff]   ;;  %12554 = vmatprep.subr.bf16.mxu0 %v18280_v0  ;;  %v18299_v0 = vld [vmem:[%s24859_s3 + $0x224] ss:$8 sps:$4 sm:$0xff]  }
 0x571   : > { %12555 = vmatpush1.bf16.msra.mxu0 %v18278_v47 }
 0x573   : > { %10207 = vmatpush1.bf16.msra.mxu1 %v18179_v7  ;;  %v18286_v7 = vld [vmem:[%s24859_s3 + $0x1e4] ss:$8 sps:$4 sm:$0xff]  }
 0x574   : > { %10208 = vmatprep.subr.bf16.mxu1 %v18184_v48  ;;  %v18284_v48 = vld [vmem:[%s24859_s3 + $0x1e0] ss:$8 sps:$4 sm:$0xff]  }
 0x577   : > { %10209 = vmatpush1.bf16.msra.mxu1 %v18182_v3  ;;  %v18287_v3 = vld [vmem:[%s24859_s3 + $0x1f0] ss:$8 sps:$4 sm:$0xff]  }
 0x578   : > { %10210 = vmatprep.subr.bf16.mxu1 %v18187_v17  ;;  %v18289_v17 = vld [vmem:[%s24859_s3 + $0x1f4] ss:$8 sps:$4 sm:$0xff]  }
 0x57b   : > { %10211 = vmatpush1.bf16.msra.mxu1 %v18185_v51  ;;  %v18292_v51 = vld [vmem:[%s24859_s3 + $0x204] ss:$8 sps:$4 sm:$0xff]  }
 0x57c   : > { %10212 = vmatprep.subr.bf16.mxu1 %v18190_v52  ;;  %v2140_v52 = vsub.s32 2, %v22929_v56 }
 0x57f   : > { %10213 = vmatpush1.bf16.msra.mxu1 %v18188_v30  ;;  %v2144_v30 = vsub.s32 3, %v22929_v56 }
 0x580   : > { %10214 = vmatprep.subr.bf16.mxu1 %v18193_v35  ;;  %v2141_v35 = vrot.slane %v22944_v25, %v2140_v52 }
 0x583   : > { %10215 = vmatpush1.bf16.msra.mxu1 %v18191_v60  ;;  %v2145_v60 = vrot.slane %v22944_v25, %v2144_v30  ;;  %v10384_v25 = vshll.u32 %v23004_v41, 16 }
 0x584   : > { %10227 = vmatprep.subr.bf16.mxu1 %v18196_v29 }
 0x586   : > { %10217 = vmatmul.mubr.bf16.vlgmr.msra.gmra.mrb[4].mxu1 %v22323_v2  ;;  %v18205_v2 = vld [vmem:[%s24857_s1 + $0x266c] ss:$16 sps:$4 sm:$0xff]  }
 0x587   : > { %10228 = vmatpush1.bf16.msra.mxu1 %v18194_v58  ;;  %10259 = vmatprep.mubr.bf16.mxu1 %v22334_v37  ;;  %v18203_v37 = vld [vmem:[%s24857_s1 + $0x2668] ss:$16 sps:$4 sm:$0xff]  }
 0x588   : > { %10229 = vmatprep.subr.bf16.mxu1 %v18199_v39 }
 0x58b   : > { %10230 = vmatpush1.bf16.msra.mxu1 %v18197_v14 }
 0x58c   : > { %10231 = vmatprep.subr.bf16.mxu1 %v18202_v24 }
 0x58f   : > { %10232 = vmatpush1.bf16.msra.mxu1 %v18200_v1 }
 0x590   : > { %10233 = vmatprep.subr.bf16.mxu1 %v18205_v2 }
 0x593   : > { %10234 = vmatpush1.bf16.msra.mxu1 %v18203_v37 }
 0x594   : > { %10235 = vmatprep.subr.bf16.mxu1 %v18208_v22 }
 0x597   : > { %10236 = vmatpush1.bf16.msra.mxu1 %v18206_v27 }
 0x598   : > { %10237 = vmatprep.subr.bf16.mxu1 %v18211_v32 }
 0x59b   : > { %10238 = vmatpush1.bf16.msra.mxu1 %v18209_v57 }
 0x59c   : > { %10239 = vmatprep.subr.bf16.mxu1 %v18214_v18 }
 0x59f   : > { %10240 = vmatpush1.bf16.msra.mxu1 %v18212_v5 }
 0x5a0   : > { %10241 = vmatprep.subr.bf16.mxu1 %v18217_v33 }
 0x5a3   : > { %10242 = vmatpush1.bf16.msra.mxu1 %v18215_v13 }
 0x5a4   : > { %10243 = vmatprep.subr.bf16.mxu1 %v18220_v54 }
 0x5a7   : > { %10244 = vmatpush1.bf16.msra.mxu1 %v18218_v28 }
 0x5a8   : > { %10245 = vmatprep.subr.bf16.mxu1 %v18223_v23 }
 0x5ab   : > { %10246 = vmatpush1.bf16.msra.mxu1 %v18221_v6  ;;  %v10389_v6 = vshll.u32 %v23018_v11, 16  ;;  %v18296_v11 = vld [vmem:[%s24859_s3 + $0x214] ss:$8 sps:$4 sm:$0xff]  }
 0x5ac   : > { %10247 = vmatprep.subr.bf16.mxu1 %v18226_v44  ;;  %v10386_v44 = vrot.slane %v10384_v25, 1  ;;  %v18317_v25 = vld [vmem:[%s24859_s3 + $0x284] ss:$8 sps:$4 sm:$0xff]  }
 0x5af   : > { %10248 = vmatpush1.bf16.msra.mxu1 %v18224_v45 }
 0x5b0   : > { %10249 = vmatprep.subr.bf16.mxu1 %v18229_v8  ;;  %v10382_v8 = vshrl.u32 %v23004_v41, 16 }
 0x5b2   : > { %v10387_v4 = vor.u32 %v10386_v44, %v10382_v8  ;;  %v18323_v44 = vld [vmem:[%s24859_s3 + $0x2a4] ss:$8 sps:$4 sm:$0xff]   ;;  %v18326_v8 = vld [vmem:[%s24859_s3 + $0x2b4] ss:$8 sps:$4 sm:$0xff]  }
 0x5b3   : > { %10250 = vmatpush1.bf16.msra.mxu1 %v18227_v12  ;;  %v10391_v12 = vrot.slane %v10389_v6, 1  ;;  %v18318_v6 = vld [vmem:[%s24859_s3 + $0x290] ss:$8 sps:$4 sm:$0xff]  }
 0x5b4   : > { %10251 = vmatprep.subr.bf16.mxu1 %v18232_v21 }
 0x5b5   : > { %v10392_v41 = vsel %vm472_vm0, %v10387_v4, %v10391_v12  ;;  %v18324_v12 = vld [vmem:[%s24859_s3 + $0x2b0] ss:$8 sps:$4 sm:$0xff]   ;;  %v18332_v4 = vld [vmem:[%s24859_s3 + $0x2d4] ss:$8 sps:$4 sm:$0xff]  }
 0x5b7   : > { %10252 = vmatpush1.bf16.msra.mxu1 %v18230_v40 }
 0x5b8   : > { %10253 = vmatprep.subr.bf16.mxu1 %v18235_v20  ;;  %v18290_v20 = vld [vmem:[%s24859_s3 + $0x200] ss:$8 sps:$4 sm:$0xff]  }
 0x5bb   : > { %10254 = vmatpush1.bf16.msra.mxu1 %v18233_v26 }
 0x5bc   : > { %10255 = vmatprep.subr.bf16.mxu1 %v18238_v50 }
 0x5bf   : > { %10256 = vmatpush1.bf16.msra.mxu1 %v18236_v10 }
 0x5c0   : > { %10257 = vmatprep.subr.bf16.mxu1 %v18241_v42 }
 0x5c3   : > { %10258 = vmatpush1.bf16.msra.mxu1 %v18239_v46  ;;  %v18294_v46 = vld [vmem:[%s24859_s3 + $0x210] ss:$8 sps:$4 sm:$0xff]  }
 0x5c6   : > { %10260 = vmatmul.mubr.bf16.vlgmr.msra.gmra.mrb[4].mxu1 %v22519_v9  ;;  %v18283_v9 = vld [vmem:[%s24859_s3 + $0x1d4] ss:$8 sps:$4 sm:$0xff]  }
 0x5c7   : > { %12556 = vmatprep.subr.bf16.mxu0 %v18283_v9 }
 0x5c8   : > { %12557 = vmatpush1.bf16.msra.mxu0 %v18281_v43 }
 0x5c9   : > { %12558 = vmatprep.subr.bf16.mxu0 %v18286_v7 }
 0x5cc   : > { %12559 = vmatpush1.bf16.msra.mxu0 %v18284_v48 }
 0x5cd   : > { %12560 = vmatprep.subr.bf16.mxu0 %v18289_v17  ;;  %v18297_v17 = vld [vmem:[%s24859_s3 + $0x220] ss:$8 sps:$4 sm:$0xff]  }
 0x5d0   : > { %12561 = vmatpush1.bf16.msra.mxu0 %v18287_v3 }
 0x5d1   : > { %12573 = vmatprep.subr.bf16.mxu0 %v18292_v51  ;;  %v18302_v51 = vld [vmem:[%s24859_s3 + $0x234] ss:$8 sps:$4 sm:$0xff]  }
 0x699   : > { %v10261_v29 = vpop.f32.mrb[4].mxu1 }
 0x69a   : > { %v16055_v58 = vadd.f32 %v10261_v29, %v2141_v35  ;;  %v10263_v39 = vpop.f32.mrb[5].mxu1 }
 0x69b   : > { %v16056_v14 = vadd.f32 %v10263_v39, %v2145_v60  ;;  %v10265_v24 = vpop.f32.mrb[6].mxu1  ;;  %v18300_v39 = vld [vmem:[%s24859_s3 + $0x230] ss:$8 sps:$4 sm:$0xff]  }
 0x69c   : > { %v10272_v1 = vmax.f32 %v16055_v58, 0.0  ;;  %v16057_v2 = vadd.f32 %v10265_v24, %v2141_v35  ;;  %v10267_v37 = vpop.f32.mrb[7].mxu1 }
 0x69d   : > { %v10273_v22 = vmax.f32 %v16056_v14, 0.0  ;;  %v16058_v27 = vadd.f32 %v10267_v37, %v2145_v60  ;;  %v18305_v14 = vld [vmem:[%s24859_s3 + $0x244] ss:$8 sps:$4 sm:$0xff]  }
 0x69e   : > { %v10276_v32 = vmax.f32 %v16057_v2, 0.0 }
 0x69f   : > { %v15524_v57 = vpack.c.bf16 %v10273_v22, %v10272_v1  ;;  %v10277_v18 = vmax.f32 %v16058_v27, 0.0  ;;  %v18303_v22 = vld [vmem:[%s24859_s3 + $0x240] ss:$8 sps:$4 sm:$0xff]  }
 0x6a1   : > { %v10306_v5 = vrot.slane %v15524_v57, 7  ;;  %v15526_v33 = vpack.c.bf16 %v10277_v18, %v10276_v32  ;;  %v18308_v57 = vld [vmem:[%s24859_s3 + $0x254] ss:$8 sps:$4 sm:$0xff]   ;;  %v18306_v18 = vld [vmem:[%s24859_s3 + $0x250] ss:$8 sps:$4 sm:$0xff]  }
 0x6a3   : > { %v10310_v13 = vrot.slane %v10306_v5, 4  ;;  %10322 = vst [vmem:[#allocation2 + $0x8] sm:$0xee] %v10306_v5  ;;  %v10311_v54 = vrot.slane %v15526_v33, 7  ;;  %v18311_v5 = vld [vmem:[%s24859_s3 + $0x264] ss:$8 sps:$4 sm:$0xff]  }
 0x6a4   : > { %v18309_v33 = vld [vmem:[%s24859_s3 + $0x260] ss:$8 sps:$4 sm:$0xff]  }
 0x6a5   : > { %v10312_v28 = vsel %vm22981_vm6, %v10310_v13, %v10311_v54  ;;  %v10314_v23 = vrot.slane %v10311_v54, 4  ;;  %v18314_v13 = vld [vmem:[%s24859_s3 + $0x274] ss:$8 sps:$4 sm:$0xff]   ;;  %v18312_v54 = vld [vmem:[%s24859_s3 + $0x270] ss:$8 sps:$4 sm:$0xff]  }
 0x6a7   : > { %10326 = vst [vmem:[#allocation2 + $0x28] sm:$0x11] %v10314_v23  ;;  %v18320_v23 = vld [vmem:[%s24859_s3 + $0x294] ss:$8 sps:$4 sm:$0xff]  }
 0x6aa   : > { %v10328_v45 = vld [vmem:[#allocation2 + $0x8] sm:$0xff] }
 0x6ab   : > { %v23373_v21 = vcombine.low %v10328_v45, %v10312_v28  ;;  %v23375_v40 = vcombine.high %v10328_v45, %v10312_v28  ;;  %v10334_v26 = vld [vmem:[#allocation2 + $0x8] sm:$0xee] }
 0x6ac   : > { %v23386_v10 = vcombine.high %v10334_v26, %v10312_v28  ;;  %v23388_v42 = vcombine.low %v10334_v26, %v10312_v28  ;;  %v10338_v47 = vld [vmem:[#allocation2 + $0x8] sm:$0xcc] }
 0x6ad   : > { %12562 = vmatprep.mubr.bf16.mxu0 %v23375_v40  ;;  %v15196_v29 = vcombine.high %v10338_v47, %v10312_v28  ;;  %v15195_v58 = vcombine.low %v10338_v47, %v10312_v28  ;;  %v18315_v28 = vld [vmem:[%s24859_s3 + $0x280] ss:$8 sps:$4 sm:$0xff]   ;;  %v18338_v47 = vld [vmem:[%s24859_s3 + $0x2f4] ss:$8 sps:$4 sm:$0xff]  }
 0x6ae   : > { %12563 = vmatmul.mubr.bf16.vlgmr.msra.gmra.mrb[4].mxu0 %v23373_v21  ;;  %v10332_v50 = vld [vmem:[#allocation2 + $0x28] sm:$0x11]  ;;  %v10440_v9 = vrot.slane %v23386_v10, 1  ;;  %v10437_v7 = vrot.slane %v23388_v42, 1 }
 0x6af   : > { %12574 = vmatpush1.bf16.msra.mxu0 %v18290_v20  ;;  %12605 = vmatprep.mubr.bf16.mxu0 %v10392_v41  ;;  %v23393_v62 = vcombine.high %v10332_v50, %v10332_v50  ;;  %v23395_v31 = vcombine.low %v10332_v50, %v10332_v50  ;;  %v10336_v3 = vld [vmem:[#allocation2 + $0x28] sm:$0x33]  ;;  %v10548_v24 = vrot.slane %v15196_v29, 2  ;;  %v10545_v2 = vrot.slane %v15195_v58, 2 }
 0x6b0   : > { %12575 = vmatprep.subr.bf16.mxu0 %v18296_v11  ;;  %v23416_v35 = vcombine.high %v10336_v3, %v10336_v3  ;;  %v23418_v60 = vcombine.low %v10336_v3, %v10336_v3  ;;  %v18321_v45 = vld [vmem:[%s24859_s3 + $0x2a0] ss:$8 sps:$4 sm:$0xff]   ;;  %v18329_v20 = vld [vmem:[%s24859_s3 + $0x2c4] ss:$8 sps:$4 sm:$0xff]   ;;  %v18330_v11 = vld [vmem:[%s24859_s3 + $0x2d0] ss:$8 sps:$4 sm:$0xff]  }
 0x6b1   : > { %v10441_v43 = vrot.slane %v23393_v62, 1  ;;  %v10438_v48 = vrot.slane %v23395_v31, 1  ;;  %v18327_v26 = vld [vmem:[%s24859_s3 + $0x2c0] ss:$8 sps:$4 sm:$0xff]   ;;  %v18335_v41 = vld [vmem:[%s24859_s3 + $0x2e4] ss:$8 sps:$4 sm:$0xff]  }
 0x6b2   : > { %v10549_v1 = vrot.slane %v23416_v35, 2  ;;  %v10546_v37 = vrot.slane %v23418_v60, 2  ;;  %v18333_v50 = vld [vmem:[%s24859_s3 + $0x2e0] ss:$8 sps:$4 sm:$0xff]   ;;  %v18342_v3 = vld [vmem:[%s24859_s3 + $0x304] ss:$8 sps:$4 sm:$0xff]  }
 0x6b3   : > { %12576 = vmatpush1.bf16.msra.mxu0 %v18294_v46  ;;  %v23411_v52 = vsel %vm597_vm1, %v10440_v9, %v10441_v43  ;;  %v23414_v30 = vsel %vm597_vm1, %v10437_v7, %v10438_v48  ;;  %v10372_v46 = vshll.u32 %v23002_v19, 16  ;;  %v10377_v9 = vshll.u32 %v23020_v55, 16  ;;  %v18336_v7 = vld [vmem:[%s24859_s3 + $0x2f0] ss:$8 sps:$4 sm:$0xff]  }
 0x6b4   : > { %12577 = vmatprep.subr.bf16.mxu0 %v18299_v0  ;;  %v23432_v27 = vsel %vm815_vm3, %v10548_v24, %v10549_v1  ;;  %v23435_v32 = vsel %vm815_vm3, %v10545_v2, %v10546_v37  ;;  %v10408_v0 = vshll.u32 %v23375_v40, 16  ;;  %v10413_v43 = vshll.u32 %v23393_v62, 16  ;;  %v18346_v24 = vld [vmem:[%s24859_s3 + $0x314] ss:$8 sps:$4 sm:$0xff]   ;;  %v18349_v2 = vld [vmem:[%s24859_s3 + $0x324] ss:$8 sps:$4 sm:$0xff]  }
 0x6b5   : > { %v10374_v48 = vrot.slane %v10372_v46, 1  ;;  %v10379_v29 = vrot.slane %v10377_v9, 1  ;;  %v10406_v58 = vshrl.u32 %v23375_v40, 16  ;;  %v18344_v40 = vld [vmem:[%s24859_s3 + $0x310] ss:$8 sps:$4 sm:$0xff]   ;;  %v10396_v9 = vshll.u32 %v23373_v21, 16 }
 0x6b6   : > { %v10415_v55 = vrot.slane %v10413_v43, 1  ;;  %v18347_v37 = vld [vmem:[%s24859_s3 + $0x320] ss:$8 sps:$4 sm:$0xff]   ;;  %v18380_v46 = vld [vmem:[%s24859_s3 + $0x3d0] ss:$8 sps:$4 sm:$0xff]  }
 0x6b7   : > { %12578 = vmatpush1.bf16.msra.mxu0 %v18297_v17  ;;  %v10410_v17 = vrot.slane %v10408_v0, 1  ;;  %v18385_v0 = vld [vmem:[%s24859_s3 + $0x3e4] ss:$8 sps:$4 sm:$0xff]   ;;  %v18388_v43 = vld [vmem:[%s24859_s3 + $0x3f4] ss:$8 sps:$4 sm:$0xff]  }
 0x6b8   : > { %12579 = vmatprep.subr.bf16.mxu0 %v18302_v51  ;;  %v10370_v51 = vshrl.u32 %v23002_v19, 16 }
 0x6ba   : > { %v10375_v62 = vor.u32 %v10374_v48, %v10370_v51  ;;  %v18386_v48 = vld [vmem:[%s24859_s3 + $0x3f0] ss:$8 sps:$4 sm:$0xff]   ;;  %v10394_v51 = vshrl.u32 %v23373_v21, 16 }
 0x6bb   : > { %12580 = vmatpush1.bf16.msra.mxu0 %v18300_v39  ;;  %v18340_v39 = vld [vmem:[%s24859_s3 + $0x300] ss:$8 sps:$4 sm:$0xff]   ;;  %v18393_v21 = vld [vmem:[%s24859_s3 + $0x410] ss:$8 sps:$4 sm:$0xff]  }
 0x6bc   : > { %12581 = vmatprep.subr.bf16.mxu0 %v18305_v14  ;;  %v10411_v14 = vor.u32 %v10410_v17, %v10406_v58  ;;  %v10380_v1 = vsel %vm472_vm0, %v10375_v62, %v10379_v29  ;;  %v18392_v17 = vld [vmem:[%s24859_s3 + $0x404] ss:$8 sps:$4 sm:$0xff]  }
 0x6be   : > { %v10416_v19 = vsel %vm472_vm0, %v10411_v14, %v10415_v55  ;;  %v18395_v55 = vld [vmem:[%s24859_s3 + $0x414] ss:$8 sps:$4 sm:$0xff]   ;;  %v18396_v14 = vld [vmem:[%s24859_s3 + $0x420] ss:$8 sps:$4 sm:$0xff]  }
 0x6bf   : > { %12582 = vmatpush1.bf16.msra.mxu0 %v18303_v22  ;;  %v18352_v22 = vld [vmem:[%s24859_s3 + $0x334] ss:$8 sps:$4 sm:$0xff]  }
 0x6c0   : > { %12583 = vmatprep.subr.bf16.mxu0 %v18308_v57  ;;  %v18350_v57 = vld [vmem:[%s24859_s3 + $0x330] ss:$8 sps:$4 sm:$0xff]  }
 0x6c3   : > { %12584 = vmatpush1.bf16.msra.mxu0 %v18306_v18  ;;  %v18355_v18 = vld [vmem:[%s24859_s3 + $0x344] ss:$8 sps:$4 sm:$0xff]  }
 0x6c4   : > { %12585 = vmatprep.subr.bf16.mxu0 %v18311_v5  ;;  %v18353_v5 = vld [vmem:[%s24859_s3 + $0x340] ss:$8 sps:$4 sm:$0xff]  }
 0x6c7   : > { %12586 = vmatpush1.bf16.msra.mxu0 %v18309_v33  ;;  %v18358_v33 = vld [vmem:[%s24859_s3 + $0x354] ss:$8 sps:$4 sm:$0xff]  }
 0x6c8   : > { %12587 = vmatprep.subr.bf16.mxu0 %v18314_v13  ;;  %v18356_v13 = vld [vmem:[%s24859_s3 + $0x350] ss:$8 sps:$4 sm:$0xff]  }
 0x6cb   : > { %12588 = vmatpush1.bf16.msra.mxu0 %v18312_v54  ;;  %v18361_v54 = vld [vmem:[%s24859_s3 + $0x364] ss:$8 sps:$4 sm:$0xff]  }
 0x6cc   : > { %12589 = vmatprep.subr.bf16.mxu0 %v18317_v25  ;;  %v18359_v25 = vld [vmem:[%s24859_s3 + $0x360] ss:$8 sps:$4 sm:$0xff]  }
 0x6cf   : > { %12590 = vmatpush1.bf16.msra.mxu0 %v18315_v28  ;;  %v18364_v28 = vld [vmem:[%s24859_s3 + $0x374] ss:$8 sps:$4 sm:$0xff]  }
 0x6d0   : > { %12591 = vmatprep.subr.bf16.mxu0 %v18320_v23  ;;  %v18362_v23 = vld [vmem:[%s24859_s3 + $0x370] ss:$8 sps:$4 sm:$0xff]  }
 0x6d3   : > { %12592 = vmatpush1.bf16.msra.mxu0 %v18318_v6  ;;  %v18367_v6 = vld [vmem:[%s24859_s3 + $0x384] ss:$8 sps:$4 sm:$0xff]  }
 0x6d4   : > { %12593 = vmatprep.subr.bf16.mxu0 %v18323_v44  ;;  %v18365_v44 = vld [vmem:[%s24859_s3 + $0x380] ss:$8 sps:$4 sm:$0xff]  }
 0x6d7   : > { %12594 = vmatpush1.bf16.msra.mxu0 %v18321_v45  ;;  %v18370_v45 = vld [vmem:[%s24859_s3 + $0x394] ss:$8 sps:$4 sm:$0xff]  }
 0x6d8   : > { %12595 = vmatprep.subr.bf16.mxu0 %v18326_v8  ;;  %v18368_v8 = vld [vmem:[%s24859_s3 + $0x390] ss:$8 sps:$4 sm:$0xff]  }
 0x6db   : > { %12596 = vmatpush1.bf16.msra.mxu0 %v18324_v12  ;;  %v18373_v12 = vld [vmem:[%s24859_s3 + $0x3a4] ss:$8 sps:$4 sm:$0xff]  }
 0x6dc   : > { %12597 = vmatprep.subr.bf16.mxu0 %v18329_v20  ;;  %v18371_v20 = vld [vmem:[%s24859_s3 + $0x3a0] ss:$8 sps:$4 sm:$0xff]  }
 0x6df   : > { %12598 = vmatpush1.bf16.msra.mxu0 %v18327_v26  ;;  %v18376_v26 = vld [vmem:[%s24859_s3 + $0x3b4] ss:$8 sps:$4 sm:$0xff]  }
 0x6e0   : > { %12599 = vmatprep.subr.bf16.mxu0 %v18332_v4  ;;  %v18374_v4 = vld [vmem:[%s24859_s3 + $0x3b0] ss:$8 sps:$4 sm:$0xff]  }
 0x6e3   : > { %12600 = vmatpush1.bf16.msra.mxu0 %v18330_v11  ;;  %v18379_v11 = vld [vmem:[%s24859_s3 + $0x3c4] ss:$8 sps:$4 sm:$0xff]  }
 0x6e4   : > { %12601 = vmatprep.subr.bf16.mxu0 %v18335_v41  ;;  %v18377_v41 = vld [vmem:[%s24859_s3 + $0x3c0] ss:$8 sps:$4 sm:$0xff]  }
 0x6e7   : > { %12602 = vmatpush1.bf16.msra.mxu0 %v18333_v50  ;;  %v18382_v50 = vld [vmem:[%s24859_s3 + $0x3d4] ss:$8 sps:$4 sm:$0xff]  }
 0x6e8   : > { %12603 = vmatprep.subr.bf16.mxu0 %v18338_v47  ;;  %v18383_v47 = vld [vmem:[%s24859_s3 + $0x3e0] ss:$8 sps:$4 sm:$0xff]  }
 0x6eb   : > { %12604 = vmatpush1.bf16.msra.mxu0 %v18336_v7  ;;  %v10401_v7 = vshll.u32 %v23395_v31, 16  ;;  %v18390_v31 = vld [vmem:[%s24859_s3 + $0x400] ss:$8 sps:$4 sm:$0xff]  }
 0x6ec   : > { %12616 = vmatprep.subr.bf16.mxu0 %v18342_v3  ;;  %v10398_v3 = vrot.slane %v10396_v9, 1  ;;  %v18444_v9 = vld [vmem:[%s24859_s3 + $0x520] ss:$8 sps:$4 sm:$0xff]  }
 0x6ed   : > { %v10403_v29 = vrot.slane %v10401_v7, 1  ;;  %v18450_v7 = vld [vmem:[%s24859_s3 + $0x540] ss:$8 sps:$4 sm:$0xff]  }
 0x6ee   : > { %12606 = vmatmul.mubr.bf16.vlgmr.msra.gmra.mrb[4].mxu0 %v10380_v1  ;;  %v10399_v58 = vor.u32 %v10398_v3, %v10394_v51  ;;  %v18404_v1 = vld [vmem:[%s24859_s3 + $0x444] ss:$8 sps:$4 sm:$0xff]   ;;  %v18453_v3 = vld [vmem:[%s24859_s3 + $0x550] ss:$8 sps:$4 sm:$0xff]   ;;  %v18456_v51 = vld [vmem:[%s24859_s3 + $0x560] ss:$8 sps:$4 sm:$0xff]  }
 0x6ef   : > { %12617 = vmatpush1.bf16.msra.mxu0 %v18340_v39  ;;  %12648 = vmatprep.mubr.bf16.mxu0 %v10416_v19  ;;  %v18398_v39 = vld [vmem:[%s24859_s3 + $0x424] ss:$8 sps:$4 sm:$0xff]   ;;  %v18402_v19 = vld [vmem:[%s24859_s3 + $0x440] ss:$8 sps:$4 sm:$0xff]  }
 0x6f0   : > { %12618 = vmatprep.subr.bf16.mxu0 %v18346_v24  ;;  %v10404_v62 = vsel %vm472_vm0, %v10399_v58, %v10403_v29  ;;  %v18401_v24 = vld [vmem:[%s24859_s3 + $0x434] ss:$8 sps:$4 sm:$0xff]   ;;  %v18459_v58 = vld [vmem:[%s24859_s3 + $0x570] ss:$8 sps:$4 sm:$0xff]  }
 0x6f1   : > { %v18461_v29 = vld [vmem:[%s24859_s3 + $0x574] ss:$8 sps:$4 sm:$0xff]  }
 0x6f3   : > { %12619 = vmatpush1.bf16.msra.mxu0 %v18344_v40  ;;  %v18407_v40 = vld [vmem:[%s24859_s3 + $0x454] ss:$8 sps:$4 sm:$0xff]  }
 0x6f4   : > { %12620 = vmatprep.subr.bf16.mxu0 %v18349_v2  ;;  %v18405_v2 = vld [vmem:[%s24859_s3 + $0x450] ss:$8 sps:$4 sm:$0xff]  }
 0x6f7   : > { %12621 = vmatpush1.bf16.msra.mxu0 %v18347_v37  ;;  %v18410_v37 = vld [vmem:[%s24859_s3 + $0x464] ss:$8 sps:$4 sm:$0xff]  }
 0x6f8   : > { %12622 = vmatprep.subr.bf16.mxu0 %v18352_v22  ;;  %v18408_v22 = vld [vmem:[%s24859_s3 + $0x460] ss:$8 sps:$4 sm:$0xff]  }
 0x6fb   : > { %12623 = vmatpush1.bf16.msra.mxu0 %v18350_v57  ;;  %v18413_v57 = vld [vmem:[%s24859_s3 + $0x474] ss:$8 sps:$4 sm:$0xff]  }
 0x6fc   : > { %12624 = vmatprep.subr.bf16.mxu0 %v18355_v18  ;;  %v18411_v18 = vld [vmem:[%s24859_s3 + $0x470] ss:$8 sps:$4 sm:$0xff]  }
 0x6ff   : > { %12625 = vmatpush1.bf16.msra.mxu0 %v18353_v5  ;;  %v18416_v5 = vld [vmem:[%s24859_s3 + $0x484] ss:$8 sps:$4 sm:$0xff]  }
 0x700   : > { %12626 = vmatprep.subr.bf16.mxu0 %v18358_v33  ;;  %v18414_v33 = vld [vmem:[%s24859_s3 + $0x480] ss:$8 sps:$4 sm:$0xff]  }
 0x703   : > { %12627 = vmatpush1.bf16.msra.mxu0 %v18356_v13  ;;  %v18419_v13 = vld [vmem:[%s24859_s3 + $0x494] ss:$8 sps:$4 sm:$0xff]  }
 0x704   : > { %12628 = vmatprep.subr.bf16.mxu0 %v18361_v54  ;;  %v18417_v54 = vld [vmem:[%s24859_s3 + $0x490] ss:$8 sps:$4 sm:$0xff]  }
 0x707   : > { %12629 = vmatpush1.bf16.msra.mxu0 %v18359_v25  ;;  %v18422_v25 = vld [vmem:[%s24859_s3 + $0x4a4] ss:$8 sps:$4 sm:$0xff]  }
 0x708   : > { %12630 = vmatprep.subr.bf16.mxu0 %v18364_v28  ;;  %v18420_v28 = vld [vmem:[%s24859_s3 + $0x4a0] ss:$8 sps:$4 sm:$0xff]  }
 0x70b   : > { %12631 = vmatpush1.bf16.msra.mxu0 %v18362_v23  ;;  %v18425_v23 = vld [vmem:[%s24859_s3 + $0x4b4] ss:$8 sps:$4 sm:$0xff]  }
 0x70c   : > { %12632 = vmatprep.subr.bf16.mxu0 %v18367_v6  ;;  %v18423_v6 = vld [vmem:[%s24859_s3 + $0x4b0] ss:$8 sps:$4 sm:$0xff]  }
 0x70f   : > { %12633 = vmatpush1.bf16.msra.mxu0 %v18365_v44  ;;  %v18428_v44 = vld [vmem:[%s24859_s3 + $0x4c4] ss:$8 sps:$4 sm:$0xff]  }
 0x710   : > { %12634 = vmatprep.subr.bf16.mxu0 %v18370_v45  ;;  %v18426_v45 = vld [vmem:[%s24859_s3 + $0x4c0] ss:$8 sps:$4 sm:$0xff]  }
 0x713   : > { %12635 = vmatpush1.bf16.msra.mxu0 %v18368_v8  ;;  %v18431_v8 = vld [vmem:[%s24859_s3 + $0x4d4] ss:$8 sps:$4 sm:$0xff]  }
 0x714   : > { %12636 = vmatprep.subr.bf16.mxu0 %v18373_v12  ;;  %v18429_v12 = vld [vmem:[%s24859_s3 + $0x4d0] ss:$8 sps:$4 sm:$0xff]  }
 0x717   : > { %12637 = vmatpush1.bf16.msra.mxu0 %v18371_v20  ;;  %v18434_v20 = vld [vmem:[%s24859_s3 + $0x4e4] ss:$8 sps:$4 sm:$0xff]  }
 0x718   : > { %12638 = vmatprep.subr.bf16.mxu0 %v18376_v26  ;;  %v18432_v26 = vld [vmem:[%s24859_s3 + $0x4e0] ss:$8 sps:$4 sm:$0xff]  }
 0x71b   : > { %12639 = vmatpush1.bf16.msra.mxu0 %v18374_v4  ;;  %v18437_v4 = vld [vmem:[%s24859_s3 + $0x4f4] ss:$8 sps:$4 sm:$0xff]  }
 0x71c   : > { %12640 = vmatprep.subr.bf16.mxu0 %v18379_v11  ;;  %v18435_v11 = vld [vmem:[%s24859_s3 + $0x4f0] ss:$8 sps:$4 sm:$0xff]  }
 0x71f   : > { %12641 = vmatpush1.bf16.msra.mxu0 %v18377_v41  ;;  %v18440_v41 = vld [vmem:[%s24859_s3 + $0x504] ss:$8 sps:$4 sm:$0xff]  }
 0x720   : > { %12642 = vmatprep.subr.bf16.mxu0 %v18382_v50  ;;  %v18438_v50 = vld [vmem:[%s24859_s3 + $0x500] ss:$8 sps:$4 sm:$0xff]  }
 0x723   : > { %12643 = vmatpush1.bf16.msra.mxu0 %v18380_v46  ;;  %v18443_v46 = vld [vmem:[%s24859_s3 + $0x514] ss:$8 sps:$4 sm:$0xff]  }
 0x724   : > { %12644 = vmatprep.subr.bf16.mxu0 %v18385_v0  ;;  %v18441_v0 = vld [vmem:[%s24859_s3 + $0x510] ss:$8 sps:$4 sm:$0xff]  }
 0x727   : > { %12645 = vmatpush1.bf16.msra.mxu0 %v18383_v47  ;;  %v18446_v47 = vld [vmem:[%s24859_s3 + $0x524] ss:$8 sps:$4 sm:$0xff]  }
 0x728   : > { %12646 = vmatprep.subr.bf16.mxu0 %v18388_v43  ;;  %v18452_v43 = vld [vmem:[%s24859_s3 + $0x544] ss:$8 sps:$4 sm:$0xff]  }
 0x72b   : > { %12647 = vmatpush1.bf16.msra.mxu0 %v18386_v48  ;;  %v18455_v48 = vld [vmem:[%s24859_s3 + $0x554] ss:$8 sps:$4 sm:$0xff]  }
 0x72c   : > { %12659 = vmatprep.subr.bf16.mxu0 %v18392_v17  ;;  %v18458_v17 = vld [vmem:[%s24859_s3 + $0x564] ss:$8 sps:$4 sm:$0xff]  }
 0x72e   : > { %12649 = vmatmul.mubr.bf16.vlgmr.msra.gmra.mrb[4].mxu0 %v10404_v62  ;;  %v18467_v62 = vld [vmem:[%s24859_s3 + $0x594] ss:$8 sps:$4 sm:$0xff]  }
 0x72f   : > { %12660 = vmatpush1.bf16.msra.mxu0 %v18390_v31  ;;  %12691 = vmatprep.mubr.bf16.mxu0 %v23036_v53  ;;  %v18399_v53 = vld [vmem:[%s24859_s3 + $0x430] ss:$8 sps:$4 sm:$0xff]   ;;  %v18464_v31 = vld [vmem:[%s24859_s3 + $0x584] ss:$8 sps:$4 sm:$0xff]  }
 0x730   : > { %12661 = vmatprep.subr.bf16.mxu0 %v18395_v55  ;;  %v18462_v55 = vld [vmem:[%s24859_s3 + $0x580] ss:$8 sps:$4 sm:$0xff]  }
 0x733   : > { %12662 = vmatpush1.bf16.msra.mxu0 %v18393_v21  ;;  %v18465_v21 = vld [vmem:[%s24859_s3 + $0x590] ss:$8 sps:$4 sm:$0xff]  }
 0x734   : > { %12663 = vmatprep.subr.bf16.mxu0 %v18398_v39  ;;  %v18470_v39 = vld [vmem:[%s24859_s3 + $0x5a4] ss:$8 sps:$4 sm:$0xff]  }
 0x737   : > { %12664 = vmatpush1.bf16.msra.mxu0 %v18396_v14  ;;  %v18468_v14 = vld [vmem:[%s24859_s3 + $0x5a0] ss:$8 sps:$4 sm:$0xff]  }
 0x738   : > { %12665 = vmatprep.subr.bf16.mxu0 %v18401_v24  ;;  %v18473_v24 = vld [vmem:[%s24859_s3 + $0x5b4] ss:$8 sps:$4 sm:$0xff]  }
 0x73b   : > { %12666 = vmatpush1.bf16.msra.mxu0 %v18399_v53  ;;  %v18471_v53 = vld [vmem:[%s24859_s3 + $0x5b0] ss:$8 sps:$4 sm:$0xff]  }
 0x73c   : > { %12667 = vmatprep.subr.bf16.mxu0 %v18404_v1  ;;  %v18476_v1 = vld [vmem:[%s24859_s3 + $0x5c4] ss:$8 sps:$4 sm:$0xff]  }
 0x73f   : > { %12668 = vmatpush1.bf16.msra.mxu0 %v18402_v19  ;;  %v18474_v19 = vld [vmem:[%s24859_s3 + $0x5c0] ss:$8 sps:$4 sm:$0xff]  }
 0x740   : > { %12669 = vmatprep.subr.bf16.mxu0 %v18407_v40  ;;  %v18479_v40 = vld [vmem:[%s24859_s3 + $0x5d4] ss:$8 sps:$4 sm:$0xff]  }
 0x743   : > { %12670 = vmatpush1.bf16.msra.mxu0 %v18405_v2  ;;  %v18477_v2 = vld [vmem:[%s24859_s3 + $0x5d0] ss:$8 sps:$4 sm:$0xff]  }
 0x744   : > { %12671 = vmatprep.subr.bf16.mxu0 %v18410_v37  ;;  %v18482_v37 = vld [vmem:[%s24859_s3 + $0x5e4] ss:$8 sps:$4 sm:$0xff]  }
 0x747   : > { %12672 = vmatpush1.bf16.msra.mxu0 %v18408_v22  ;;  %v10483_v22 = vshrl.u32 %v23041_v38, 16 }
 0x748   : > { %12673 = vmatprep.subr.bf16.mxu0 %v18413_v57  ;;  %v10486_v57 = vshll.u32 %v23041_v38, 16  ;;  %v18483_v38 = vld [vmem:[%s24859_s3 + $0x5f0] ss:$8 sps:$4 sm:$0xff]  }
 0x74b   : > { %12674 = vmatpush1.bf16.msra.mxu0 %v18411_v18  ;;  %v18480_v18 = vld [vmem:[%s24859_s3 + $0x5e0] ss:$8 sps:$4 sm:$0xff]  }
 0x74c   : > { %12675 = vmatprep.subr.bf16.mxu0 %v18416_v5  ;;  %v18485_v5 = vld [vmem:[%s24859_s3 + $0x5f4] ss:$8 sps:$4 sm:$0xff]  }
 0x74f   : > { %12676 = vmatpush1.bf16.msra.mxu0 %v18414_v33  ;;  %v10475_v33 = vshrl.u32 %v23011_v63, 16 }
 0x750   : > { %12677 = vmatprep.subr.bf16.mxu0 %v18419_v13  ;;  %v10478_v13 = vshll.u32 %v23011_v63, 16  ;;  %v18486_v63 = vld [vmem:[%s24859_s3 + $0x600] ss:$8 sps:$4 sm:$0xff]  }
 0x753   : > { %12678 = vmatpush1.bf16.msra.mxu0 %v18417_v54  ;;  %v10485_v54 = vrot.slane %v10483_v22, 1  ;;  %v10512_v22 = vshll.u32 %v23386_v10, 16 }
 0x754   : > { %12679 = vmatprep.subr.bf16.mxu0 %v18422_v25  ;;  %v10488_v25 = vrot.slane %v10486_v57, 2 }
 0x757   : > { %12680 = vmatpush1.bf16.msra.mxu0 %v18420_v28  ;;  %v18488_v28 = vld [vmem:[%s24859_s3 + $0x604] ss:$8 sps:$4 sm:$0xff]  }
 0x758   : > { %12681 = vmatprep.subr.bf16.mxu0 %v18425_v23  ;;  %v10477_v23 = vrot.slane %v10475_v33, 1  ;;  %v18532_v33 = vld [vmem:[%s24859_s3 + $0x6f0] ss:$8 sps:$4 sm:$0xff]  }
 0x75b   : > { %12682 = vmatpush1.bf16.msra.mxu0 %v18423_v6  ;;  %v10480_v6 = vrot.slane %v10478_v13, 2 }
 0x75c   : > { %12683 = vmatprep.subr.bf16.mxu0 %v18428_v44  ;;  %v10489_v44 = vor.u32 %v10488_v25, %v10485_v54  ;;  %v18538_v54 = vld [vmem:[%s24859_s3 + $0x704] ss:$8 sps:$4 sm:$0xff]  }
 0x75f   : > { %12684 = vmatpush1.bf16.msra.mxu0 %v18426_v45  ;;  %v10481_v45 = vor.u32 %v10480_v6, %v10477_v23  ;;  %v18536_v6 = vld [vmem:[%s24859_s3 + $0x700] ss:$8 sps:$4 sm:$0xff]  }
 0x760   : > { %12685 = vmatprep.subr.bf16.mxu0 %v18431_v8  ;;  %v18492_v8 = vld [vmem:[%s24859_s3 + $0x614] ss:$8 sps:$4 sm:$0xff]  }
 0x763   : > { %12686 = vmatpush1.bf16.msra.mxu0 %v18429_v12  ;;  %v10490_v12 = vsel %vm650_vm2, %v10481_v45, %v10489_v44 }
 0x764   : > { %12687 = vmatprep.subr.bf16.mxu0 %v18434_v20  ;;  %v18490_v20 = vld [vmem:[%s24859_s3 + $0x610] ss:$8 sps:$4 sm:$0xff]  }
 0x767   : > { %12688 = vmatpush1.bf16.msra.mxu0 %v18432_v26  ;;  %v18495_v26 = vld [vmem:[%s24859_s3 + $0x624] ss:$8 sps:$4 sm:$0xff]  }
 0x768   : > { %12689 = vmatprep.subr.bf16.mxu0 %v18437_v4  ;;  %v18493_v4 = vld [vmem:[%s24859_s3 + $0x620] ss:$8 sps:$4 sm:$0xff]  }
 0x76b   : > { %12690 = vmatpush1.bf16.msra.mxu0 %v18435_v11  ;;  %v18496_v11 = vld [vmem:[%s24859_s3 + $0x630] ss:$8 sps:$4 sm:$0xff]  }
 0x76c   : > { %12702 = vmatprep.subr.bf16.mxu0 %v18440_v41  ;;  %v18501_v41 = vld [vmem:[%s24859_s3 + $0x644] ss:$8 sps:$4 sm:$0xff]  }
 0x76e   : > { %12692 = vmatmul.mubr.bf16.vlgmr.msra.gmra.mrb[4].mxu0 %v23039_v61  ;;  %v18449_v61 = vld [vmem:[%s24859_s3 + $0x534] ss:$8 sps:$4 sm:$0xff]  }
 0x76f   : > { %12703 = vmatpush1.bf16.msra.mxu0 %v18438_v50  ;;  %12734 = vmatprep.mubr.bf16.mxu0 %v23411_v52  ;;  %v18447_v52 = vld [vmem:[%s24859_s3 + $0x530] ss:$8 sps:$4 sm:$0xff]   ;;  %v18499_v50 = vld [vmem:[%s24859_s3 + $0x640] ss:$8 sps:$4 sm:$0xff]  }
 0x770   : > { %12704 = vmatprep.subr.bf16.mxu0 %v18443_v46  ;;  %v18504_v46 = vld [vmem:[%s24859_s3 + $0x654] ss:$8 sps:$4 sm:$0xff]  }
 0x773   : > { %12705 = vmatpush1.bf16.msra.mxu0 %v18441_v0  ;;  %v18502_v0 = vld [vmem:[%s24859_s3 + $0x650] ss:$8 sps:$4 sm:$0xff]  }
 0x774   : > { %12706 = vmatprep.subr.bf16.mxu0 %v18446_v47  ;;  %v18507_v47 = vld [vmem:[%s24859_s3 + $0x664] ss:$8 sps:$4 sm:$0xff]  }
 0x777   : > { %12707 = vmatpush1.bf16.msra.mxu0 %v18444_v9  ;;  %v18505_v9 = vld [vmem:[%s24859_s3 + $0x660] ss:$8 sps:$4 sm:$0xff]  }
 0x778   : > { %12708 = vmatprep.subr.bf16.mxu0 %v18449_v61  ;;  %v18510_v61 = vld [vmem:[%s24859_s3 + $0x674] ss:$8 sps:$4 sm:$0xff]  }
 0x77b   : > { %12709 = vmatpush1.bf16.msra.mxu0 %v18447_v52  ;;  %v18508_v52 = vld [vmem:[%s24859_s3 + $0x670] ss:$8 sps:$4 sm:$0xff]  }
 0x77c   : > { %12710 = vmatprep.subr.bf16.mxu0 %v18452_v43  ;;  %v18513_v43 = vld [vmem:[%s24859_s3 + $0x684] ss:$8 sps:$4 sm:$0xff]  }
 0x77f   : > { %12711 = vmatpush1.bf16.msra.mxu0 %v18450_v7  ;;  %v18511_v7 = vld [vmem:[%s24859_s3 + $0x680] ss:$8 sps:$4 sm:$0xff]  }
 0x780   : > { %12712 = vmatprep.subr.bf16.mxu0 %v18455_v48  ;;  %v18516_v48 = vld [vmem:[%s24859_s3 + $0x694] ss:$8 sps:$4 sm:$0xff]  }
 0x783   : > { %12713 = vmatpush1.bf16.msra.mxu0 %v18453_v3  ;;  %v18514_v3 = vld [vmem:[%s24859_s3 + $0x690] ss:$8 sps:$4 sm:$0xff]  }
 0x784   : > { %12714 = vmatprep.subr.bf16.mxu0 %v18458_v17  ;;  %v18519_v17 = vld [vmem:[%s24859_s3 + $0x6a4] ss:$8 sps:$4 sm:$0xff]  }
 0x787   : > { %12715 = vmatpush1.bf16.msra.mxu0 %v18456_v51  ;;  %v18517_v51 = vld [vmem:[%s24859_s3 + $0x6a0] ss:$8 sps:$4 sm:$0xff]  }
 0x788   : > { %12716 = vmatprep.subr.bf16.mxu0 %v18461_v29  ;;  %v18522_v29 = vld [vmem:[%s24859_s3 + $0x6b4] ss:$8 sps:$4 sm:$0xff]  }
 0x78b   : > { %12717 = vmatpush1.bf16.msra.mxu0 %v18459_v58  ;;  %v18520_v58 = vld [vmem:[%s24859_s3 + $0x6b0] ss:$8 sps:$4 sm:$0xff]  }
 0x78c   : > { %12718 = vmatprep.subr.bf16.mxu0 %v18464_v31  ;;  %v18525_v31 = vld [vmem:[%s24859_s3 + $0x6c4] ss:$8 sps:$4 sm:$0xff]  }
 0x78f   : > { %12719 = vmatpush1.bf16.msra.mxu0 %v18462_v55  ;;  %v18523_v55 = vld [vmem:[%s24859_s3 + $0x6c0] ss:$8 sps:$4 sm:$0xff]  }
 0x790   : > { %12720 = vmatprep.subr.bf16.mxu0 %v18467_v62  ;;  %v18528_v62 = vld [vmem:[%s24859_s3 + $0x6d4] ss:$8 sps:$4 sm:$0xff]  }
 0x793   : > { %12721 = vmatpush1.bf16.msra.mxu0 %v18465_v21  ;;  %v18526_v21 = vld [vmem:[%s24859_s3 + $0x6d0] ss:$8 sps:$4 sm:$0xff]  }
 0x794   : > { %12722 = vmatprep.subr.bf16.mxu0 %v18470_v39  ;;  %v18531_v39 = vld [vmem:[%s24859_s3 + $0x6e4] ss:$8 sps:$4 sm:$0xff]  }
 0x797   : > { %12723 = vmatpush1.bf16.msra.mxu0 %v18468_v14  ;;  %v10466_v14 = vshrl.u32 %v23043_v36, 16 }
 0x798   : > { %12724 = vmatprep.subr.bf16.mxu0 %v18473_v24  ;;  %v10469_v24 = vshll.u32 %v23043_v36, 16  ;;  %v10509_v36 = vshrl.u32 %v23386_v10, 16 }
 0x799   : > { %v10468_v57 = vrot.slane %v10466_v14, 1  ;;  %v10503_v14 = vshll.u32 %v23418_v60, 16 }
 0x79a   : > { %v10511_v25 = vrot.slane %v10509_v36, 1 }
 0x79b   : > { %12725 = vmatpush1.bf16.msra.mxu0 %v18471_v53  ;;  %v10517_v53 = vshrl.u32 %v23416_v35, 16 }
 0x79c   : > { %12726 = vmatprep.subr.bf16.mxu0 %v18476_v1  ;;  %v10520_v1 = vshll.u32 %v23416_v35, 16  ;;  %v10471_v35 = vrot.slane %v10469_v24, 2  ;;  %v18579_v24 = vld [vmem:[%s24859_s3 + $0x7e0] ss:$8 sps:$4 sm:$0xff]  }
 0x79f   : > { %12727 = vmatpush1.bf16.msra.mxu0 %v18474_v19  ;;  %v18529_v19 = vld [vmem:[%s24859_s3 + $0x6e0] ss:$8 sps:$4 sm:$0xff]  }
 0x7a0   : > { %12728 = vmatprep.subr.bf16.mxu0 %v18479_v40  ;;  %v10458_v40 = vshrl.u32 %v23013_v49, 16 }
 0x7a2   : > { %v10460_v13 = vrot.slane %v10458_v40, 1 }
 0x7a3   : > { %12729 = vmatpush1.bf16.msra.mxu0 %v18477_v2  ;;  %v10461_v2 = vshll.u32 %v23013_v49, 16 }
 0x7a4   : > { %12730 = vmatprep.subr.bf16.mxu0 %v18482_v37  ;;  %v18534_v37 = vld [vmem:[%s24859_s3 + $0x6f4] ss:$8 sps:$4 sm:$0xff]  }
 0x7a5   : > { %v10463_v49 = vrot.slane %v10461_v2, 2  ;;  %v10505_v2 = vrot.slane %v10503_v14, 2  ;;  %v18616_v14 = vld [vmem:[%s24859_s3 + $0x8a0] ss:$8 sps:$4 sm:$0xff]  }
 0x7a7   : > { %12731 = vmatpush1.bf16.msra.mxu0 %v18480_v18  ;;  %v10519_v18 = vrot.slane %v10517_v53, 1  ;;  %v10464_v23 = vor.u32 %v10463_v49, %v10460_v13  ;;  %v10492_v53 = vshrl.u32 %v23388_v42, 16  ;;  %v18594_v13 = vld [vmem:[%s24859_s3 + $0x824] ss:$8 sps:$4 sm:$0xff]  }
 0x7a8   : > { %12732 = vmatprep.subr.bf16.mxu0 %v18485_v5  ;;  %v10522_v5 = vrot.slane %v10520_v1, 2  ;;  %v10495_v1 = vshll.u32 %v23388_v42, 16  ;;  %v13062_v49 = vld [vmem:[%s24861_s5 + $0x80] sm:$0xff] }
 0x7aa   : > { %v10523_v10 = vor.u32 %v10522_v5, %v10519_v18  ;;  %v10497_v36 = vrot.slane %v10495_v1, 2  ;;  %v18591_v18 = vld [vmem:[%s24859_s3 + $0x814] ss:$8 sps:$4 sm:$0xff]   ;;  %v18624_v1 = vld [vmem:[%s24859_s3 + $0x8c4] ss:$8 sps:$4 sm:$0xff]  }
 0x7ab   : > { %12733 = vmatpush1.bf16.msra.mxu0 %v18483_v38  ;;  %v10514_v38 = vrot.slane %v10512_v22, 2  ;;  %v18588_v22 = vld [vmem:[%s24859_s3 + $0x804] ss:$8 sps:$4 sm:$0xff]  }
 0x7ac   : > { %12745 = vmatprep.subr.bf16.mxu0 %v18488_v28  ;;  %v10472_v28 = vor.u32 %v10471_v35, %v10468_v57  ;;  %v18586_v35 = vld [vmem:[%s24859_s3 + $0x800] ss:$8 sps:$4 sm:$0xff]  }
 0x7ad   : > { %v10515_v44 = vor.u32 %v10514_v38, %v10511_v25  ;;  %v13046_v25 = vld [vmem:[%s24861_s5] sm:$0xff] }
 0x7ae   : > { %12735 = vmatmul.mubr.bf16.vlgmr.msra.gmra.mrb[4].mxu0 %v23414_v30  ;;  %v18498_v30 = vld [vmem:[%s24859_s3 + $0x634] ss:$8 sps:$4 sm:$0xff]   ;;  %v10473_v45 = vsel %vm650_vm2, %v10464_v23, %v10472_v28  ;;  %v13047_v28 = vld [vmem:[%s24861_s5 + $0x8] sm:$0xff] }
 0x7af   : > { %12746 = vmatpush1.bf16.msra.mxu0 %v18486_v63  ;;  %12777 = vmatprep.mubr.bf16.mxu0 %v10490_v12  ;;  %v18542_v63 = vld [vmem:[%s24859_s3 + $0x714] ss:$8 sps:$4 sm:$0xff]   ;;  %v18540_v12 = vld [vmem:[%s24859_s3 + $0x710] ss:$8 sps:$4 sm:$0xff]  }
 0x7b0   : > { %12747 = vmatprep.subr.bf16.mxu0 %v18492_v8  ;;  %v10524_v8 = vsel %vm650_vm2, %v10515_v44, %v10523_v10  ;;  %v13064_v10 = vld [vmem:[%s24861_s5 + $0x90] sm:$0xff]  ;;  %v13065_v23 = vld [vmem:[%s24861_s5 + $0x98] sm:$0xff] }
 0x7b1   : > { %v15827_v44 = vpack.c.bf16 %v13065_v23, %v13064_v10  ;;  %v18657_v10 = vld [vmem:[%s24859_s3 + $0x974] ss:$8 sps:$4 sm:$0xff]   ;;  %v18655_v23 = vld [vmem:[%s24859_s3 + $0x970] ss:$8 sps:$4 sm:$0xff]  }
 0x7b3   : > { %12748 = vmatpush1.bf16.msra.mxu0 %v18490_v20  ;;  %v18545_v20 = vld [vmem:[%s24859_s3 + $0x724] ss:$8 sps:$4 sm:$0xff]  }
 0x7b4   : > { %12749 = vmatprep.subr.bf16.mxu0 %v18495_v26  ;;  %v18543_v26 = vld [vmem:[%s24859_s3 + $0x720] ss:$8 sps:$4 sm:$0xff]  }
 0x7b7   : > { %12750 = vmatpush1.bf16.msra.mxu0 %v18493_v4  ;;  %v18548_v4 = vld [vmem:[%s24859_s3 + $0x734] ss:$8 sps:$4 sm:$0xff]  }
 0x7b8   : > { %12751 = vmatprep.subr.bf16.mxu0 %v18498_v30  ;;  %v18546_v30 = vld [vmem:[%s24859_s3 + $0x730] ss:$8 sps:$4 sm:$0xff]  }
 0x7bb   : > { %12752 = vmatpush1.bf16.msra.mxu0 %v18496_v11  ;;  %v18551_v11 = vld [vmem:[%s24859_s3 + $0x744] ss:$8 sps:$4 sm:$0xff]  }
 0x7bc   : > { %12753 = vmatprep.subr.bf16.mxu0 %v18501_v41  ;;  %v18549_v41 = vld [vmem:[%s24859_s3 + $0x740] ss:$8 sps:$4 sm:$0xff]  }
 0x7bf   : > { %12754 = vmatpush1.bf16.msra.mxu0 %v18499_v50  ;;  %v18554_v50 = vld [vmem:[%s24859_s3 + $0x754] ss:$8 sps:$4 sm:$0xff]  }
 0x7c0   : > { %12755 = vmatprep.subr.bf16.mxu0 %v18504_v46  ;;  %v18552_v46 = vld [vmem:[%s24859_s3 + $0x750] ss:$8 sps:$4 sm:$0xff]  }
 0x7c3   : > { %12756 = vmatpush1.bf16.msra.mxu0 %v18502_v0  ;;  %v18557_v0 = vld [vmem:[%s24859_s3 + $0x764] ss:$8 sps:$4 sm:$0xff]  }
 0x7c4   : > { %12757 = vmatprep.subr.bf16.mxu0 %v18507_v47  ;;  %v18555_v47 = vld [vmem:[%s24859_s3 + $0x760] ss:$8 sps:$4 sm:$0xff]  }
 0x7c7   : > { %12758 = vmatpush1.bf16.msra.mxu0 %v18505_v9  ;;  %v18560_v9 = vld [vmem:[%s24859_s3 + $0x774] ss:$8 sps:$4 sm:$0xff]  }
 0x7c8   : > { %12759 = vmatprep.subr.bf16.mxu0 %v18510_v61  ;;  %v18558_v61 = vld [vmem:[%s24859_s3 + $0x770] ss:$8 sps:$4 sm:$0xff]  }
 0x7cb   : > { %12760 = vmatpush1.bf16.msra.mxu0 %v18508_v52  ;;  %v18563_v52 = vld [vmem:[%s24859_s3 + $0x784] ss:$8 sps:$4 sm:$0xff]  }
 0x7cc   : > { %12761 = vmatprep.subr.bf16.mxu0 %v18513_v43  ;;  %v18561_v43 = vld [vmem:[%s24859_s3 + $0x780] ss:$8 sps:$4 sm:$0xff]  }
 0x7cf   : > { %12762 = vmatpush1.bf16.msra.mxu0 %v18511_v7  ;;  %v18566_v7 = vld [vmem:[%s24859_s3 + $0x794] ss:$8 sps:$4 sm:$0xff]  }
 0x7d0   : > { %12763 = vmatprep.subr.bf16.mxu0 %v18516_v48  ;;  %v18564_v48 = vld [vmem:[%s24859_s3 + $0x790] ss:$8 sps:$4 sm:$0xff]  }
 0x7d3   : > { %12764 = vmatpush1.bf16.msra.mxu0 %v18514_v3  ;;  %v18569_v3 = vld [vmem:[%s24859_s3 + $0x7a4] ss:$8 sps:$4 sm:$0xff]  }
 0x7d4   : > { %12765 = vmatprep.subr.bf16.mxu0 %v18519_v17  ;;  %v18567_v17 = vld [vmem:[%s24859_s3 + $0x7a0] ss:$8 sps:$4 sm:$0xff]  }
 0x7d7   : > { %12766 = vmatpush1.bf16.msra.mxu0 %v18517_v51  ;;  %v18572_v51 = vld [vmem:[%s24859_s3 + $0x7b4] ss:$8 sps:$4 sm:$0xff]  }
 0x7d8   : > { %12767 = vmatprep.subr.bf16.mxu0 %v18522_v29  ;;  %v18570_v29 = vld [vmem:[%s24859_s3 + $0x7b0] ss:$8 sps:$4 sm:$0xff]  }
 0x7db   : > { %12768 = vmatpush1.bf16.msra.mxu0 %v18520_v58  ;;  %v18575_v58 = vld [vmem:[%s24859_s3 + $0x7c4] ss:$8 sps:$4 sm:$0xff]  }
 0x7dc   : > { %12769 = vmatprep.subr.bf16.mxu0 %v18525_v31  ;;  %v18573_v31 = vld [vmem:[%s24859_s3 + $0x7c0] ss:$8 sps:$4 sm:$0xff]  }
 0x7df   : > { %12770 = vmatpush1.bf16.msra.mxu0 %v18523_v55  ;;  %v18578_v55 = vld [vmem:[%s24859_s3 + $0x7d4] ss:$8 sps:$4 sm:$0xff]  }
 0x7e0   : > { %12771 = vmatprep.subr.bf16.mxu0 %v18528_v62  ;;  %v18576_v62 = vld [vmem:[%s24859_s3 + $0x7d0] ss:$8 sps:$4 sm:$0xff]  }
 0x7e3   : > { %12772 = vmatpush1.bf16.msra.mxu0 %v18526_v21  ;;  %v18581_v21 = vld [vmem:[%s24859_s3 + $0x7e4] ss:$8 sps:$4 sm:$0xff]  }
 0x7e4   : > { %12773 = vmatprep.subr.bf16.mxu0 %v18531_v39  ;;  %v10500_v39 = vshrl.u32 %v23418_v60, 16  ;;  %v18582_v60 = vld [vmem:[%s24859_s3 + $0x7f0] ss:$8 sps:$4 sm:$0xff]  }
 0x7e6   : > { %v10502_v40 = vrot.slane %v10500_v39, 1  ;;  %v18618_v39 = vld [vmem:[%s24859_s3 + $0x8a4] ss:$8 sps:$4 sm:$0xff]  }
 0x7e7   : > { %12774 = vmatpush1.bf16.msra.mxu0 %v18529_v19  ;;  %v18584_v19 = vld [vmem:[%s24859_s3 + $0x7f4] ss:$8 sps:$4 sm:$0xff]  }
 0x7e8   : > { %12775 = vmatprep.subr.bf16.mxu0 %v18534_v37  ;;  %v10494_v37 = vrot.slane %v10492_v53, 1  ;;  %v10506_v42 = vor.u32 %v10505_v2, %v10502_v40  ;;  %v18619_v53 = vld [vmem:[%s24859_s3 + $0x8b0] ss:$8 sps:$4 sm:$0xff]   ;;  %v18627_v40 = vld [vmem:[%s24859_s3 + $0x8d4] ss:$8 sps:$4 sm:$0xff]  }
 0x7e9   : > { %v18625_v2 = vld [vmem:[%s24859_s3 + $0x8d0] ss:$8 sps:$4 sm:$0xff]  }
 0x7ea   : > { %v10498_v57 = vor.u32 %v10497_v36, %v10494_v37  ;;  %v18628_v37 = vld [vmem:[%s24859_s3 + $0x8e0] ss:$8 sps:$4 sm:$0xff]   ;;  %v18633_v36 = vld [vmem:[%s24859_s3 + $0x8f4] ss:$8 sps:$4 sm:$0xff]  }
 0x7eb   : > { %12776 = vmatpush1.bf16.msra.mxu0 %v18532_v33  ;;  %v18589_v33 = vld [vmem:[%s24859_s3 + $0x810] ss:$8 sps:$4 sm:$0xff]  }
 0x7ec   : > { %12788 = vmatprep.subr.bf16.mxu0 %v18538_v54  ;;  %v10507_v5 = vsel %vm650_vm2, %v10498_v57, %v10506_v42  ;;  %v13063_v54 = vld [vmem:[%s24861_s5 + $0x88] sm:$0xff] }
 0x7ed   : > { %v15823_v38 = vpack.c.bf16 %v13063_v54, %v13062_v49  ;;  %v18636_v42 = vld [vmem:[%s24859_s3 + $0x904] ss:$8 sps:$4 sm:$0xff]   ;;  %v18634_v57 = vld [vmem:[%s24859_s3 + $0x900] ss:$8 sps:$4 sm:$0xff]   ;;  %v18651_v54 = vld [vmem:[%s24859_s3 + $0x954] ss:$8 sps:$4 sm:$0xff]  }
 0x7ee   : > { %12778 = vmatmul.mubr.bf16.vlgmr.msra.gmra.mrb[4].mxu0 %v10473_v45  ;;  %v13066_v45 = vld [vmem:[%s24861_s5 + $0xa0] sm:$0xff] }
 0x7ef   : > { %12789 = vmatpush1.bf16.msra.mxu0 %v18536_v6  ;;  %12820 = vmatprep.mubr.bf16.mxu0 %v10524_v8  ;;  %v15825_v6 = vpack.c.bf16 %v13047_v28, %v13046_v25  ;;  %v13067_v8 = vld [vmem:[%s24861_s5 + $0xa8] sm:$0xff]  ;;  %v18649_v25 = vld [vmem:[%s24859_s3 + $0x950] ss:$8 sps:$4 sm:$0xff]  }
 0x7f0   : > { %12790 = vmatprep.subr.bf16.mxu0 %v18542_v63  ;;  %v13049_v63 = vld [vmem:[%s24861_s5 + $0x18] sm:$0xff]  ;;  %15824 = vmatprep.subr.bf16.mxu1 %v15823_v38  ;;  %v18646_v49 = vld [vmem:[%s24859_s3 + $0x940] ss:$8 sps:$4 sm:$0xff]   ;;  %v18654_v38 = vld [vmem:[%s24859_s3 + $0x964] ss:$8 sps:$4 sm:$0xff]  }
 0x7f1   : > { %15826 = vmatpush3.bf16.msra.mxu1 %v15825_v6  ;;  %v18652_v28 = vld [vmem:[%s24859_s3 + $0x960] ss:$8 sps:$4 sm:$0xff]   ;;  %v18660_v6 = vld [vmem:[%s24859_s3 + $0x984] ss:$8 sps:$4 sm:$0xff]  }
 0x7f2   : > { %15828 = vmatprep.subr.bf16.mxu1 %v15827_v44  ;;  %v18658_v44 = vld [vmem:[%s24859_s3 + $0x980] ss:$8 sps:$4 sm:$0xff]  }
 0x7f3   : > { %12791 = vmatpush1.bf16.msra.mxu0 %v18540_v12 }
 0x7f4   : > { %12792 = vmatprep.subr.bf16.mxu0 %v18545_v20  ;;  %v18592_v20 = vld [vmem:[%s24859_s3 + $0x820] ss:$8 sps:$4 sm:$0xff]  }
 0x7f7   : > { %12793 = vmatpush1.bf16.msra.mxu0 %v18543_v26  ;;  %v15831_v26 = vpack.c.bf16 %v13067_v8, %v13066_v45  ;;  %v18666_v45 = vld [vmem:[%s24859_s3 + $0x9a4] ss:$8 sps:$4 sm:$0xff]   ;;  %v18664_v8 = vld [vmem:[%s24859_s3 + $0x9a0] ss:$8 sps:$4 sm:$0xff]  }
 0x7f8   : > { %12794 = vmatprep.subr.bf16.mxu0 %v18548_v4  ;;  %v13050_v4 = vld [vmem:[%s24861_s5 + $0x20] sm:$0xff] }
 0x7fb   : > { %12795 = vmatpush1.bf16.msra.mxu0 %v18546_v30  ;;  %v13051_v30 = vld [vmem:[%s24861_s5 + $0x28] sm:$0xff] }
 0x7fc   : > { %12796 = vmatprep.subr.bf16.mxu0 %v18551_v11  ;;  %v18597_v11 = vld [vmem:[%s24859_s3 + $0x834] ss:$8 sps:$4 sm:$0xff]  }
 0x7ff   : > { %12797 = vmatpush1.bf16.msra.mxu0 %v18549_v41  ;;  %v13068_v41 = vld [vmem:[%s24861_s5 + $0xb0] sm:$0xff] }
 0x800   : > { %12798 = vmatprep.subr.bf16.mxu0 %v18554_v50  ;;  %v13069_v50 = vld [vmem:[%s24861_s5 + $0xb8] sm:$0xff] }
 0x803   : > { %12799 = vmatpush1.bf16.msra.mxu0 %v18552_v46  ;;  %v15833_v46 = vpack.c.bf16 %v13051_v30, %v13050_v4  ;;  %v18670_v4 = vld [vmem:[%s24859_s3 + $0x9c0] ss:$8 sps:$4 sm:$0xff]   ;;  %v18675_v30 = vld [vmem:[%s24859_s3 + $0x9d4] ss:$8 sps:$4 sm:$0xff]  }
 0x804   : > { %12800 = vmatprep.subr.bf16.mxu0 %v18557_v0  ;;  %v18595_v0 = vld [vmem:[%s24859_s3 + $0x830] ss:$8 sps:$4 sm:$0xff]  }
 0x807   : > { %12801 = vmatpush1.bf16.msra.mxu0 %v18555_v47  ;;  %v15835_v47 = vpack.c.bf16 %v13069_v50, %v13068_v41  ;;  %v18678_v41 = vld [vmem:[%s24859_s3 + $0x9e4] ss:$8 sps:$4 sm:$0xff]   ;;  %v18676_v50 = vld [vmem:[%s24859_s3 + $0x9e0] ss:$8 sps:$4 sm:$0xff]  }
 0x808   : > { %12802 = vmatprep.subr.bf16.mxu0 %v18560_v9  ;;  %v13052_v9 = vld [vmem:[%s24861_s5 + $0x30] sm:$0xff] }
 0x80b   : > { %12803 = vmatpush1.bf16.msra.mxu0 %v18558_v61  ;;  %v13053_v61 = vld [vmem:[%s24861_s5 + $0x38] sm:$0xff] }
 0x80c   : > { %12804 = vmatprep.subr.bf16.mxu0 %v18563_v52  ;;  %v18600_v52 = vld [vmem:[%s24859_s3 + $0x844] ss:$8 sps:$4 sm:$0xff]  }
 0x80f   : > { %12805 = vmatpush1.bf16.msra.mxu0 %v18561_v43  ;;  %v15837_v43 = vpack.c.bf16 %v13053_v61, %v13052_v9  ;;  %v13071_v9 = vld [vmem:[%s24861_s5 + $0xc8] sm:$0xff] }
 0x810   : > { %12806 = vmatprep.subr.bf16.mxu0 %v18566_v7  ;;  %v18598_v7 = vld [vmem:[%s24859_s3 + $0x840] ss:$8 sps:$4 sm:$0xff]  }
 0x813   : > { %12807 = vmatpush1.bf16.msra.mxu0 %v18564_v48  ;;  %v18603_v48 = vld [vmem:[%s24859_s3 + $0x854] ss:$8 sps:$4 sm:$0xff]  }
 0x814   : > { %12808 = vmatprep.subr.bf16.mxu0 %v18569_v3  ;;  %v18601_v3 = vld [vmem:[%s24859_s3 + $0x850] ss:$8 sps:$4 sm:$0xff]  }
 0x817   : > { %12809 = vmatpush1.bf16.msra.mxu0 %v18567_v17  ;;  %v18606_v17 = vld [vmem:[%s24859_s3 + $0x864] ss:$8 sps:$4 sm:$0xff]  }
 0x818   : > { %12810 = vmatprep.subr.bf16.mxu0 %v18572_v51  ;;  %v18604_v51 = vld [vmem:[%s24859_s3 + $0x860] ss:$8 sps:$4 sm:$0xff]  }
 0x81b   : > { %12811 = vmatpush1.bf16.msra.mxu0 %v18570_v29  ;;  %v18609_v29 = vld [vmem:[%s24859_s3 + $0x874] ss:$8 sps:$4 sm:$0xff]  }
 0x81c   : > { %12812 = vmatprep.subr.bf16.mxu0 %v18575_v58  ;;  %v18607_v58 = vld [vmem:[%s24859_s3 + $0x870] ss:$8 sps:$4 sm:$0xff]  }
 0x81f   : > { %12813 = vmatpush1.bf16.msra.mxu0 %v18573_v31  ;;  %v18612_v31 = vld [vmem:[%s24859_s3 + $0x884] ss:$8 sps:$4 sm:$0xff]  }
 0x820   : > { %12814 = vmatprep.subr.bf16.mxu0 %v18578_v55  ;;  %v18610_v55 = vld [vmem:[%s24859_s3 + $0x880] ss:$8 sps:$4 sm:$0xff]  }
 0x823   : > { %12815 = vmatpush1.bf16.msra.mxu0 %v18576_v62  ;;  %v18615_v62 = vld [vmem:[%s24859_s3 + $0x894] ss:$8 sps:$4 sm:$0xff]  }
 0x824   : > { %12816 = vmatprep.subr.bf16.mxu0 %v18581_v21  ;;  %v18613_v21 = vld [vmem:[%s24859_s3 + $0x890] ss:$8 sps:$4 sm:$0xff]  }
 0x827   : > { %12817 = vmatpush1.bf16.msra.mxu0 %v18579_v24  ;;  %v18621_v24 = vld [vmem:[%s24859_s3 + $0x8b4] ss:$8 sps:$4 sm:$0xff]  }
 0x828   : > { %12818 = vmatprep.subr.bf16.mxu0 %v18584_v19  ;;  %v18622_v19 = vld [vmem:[%s24859_s3 + $0x8c0] ss:$8 sps:$4 sm:$0xff]  }
 0x82b   : > { %12819 = vmatpush1.bf16.msra.mxu0 %v18582_v60  ;;  %v18630_v60 = vld [vmem:[%s24859_s3 + $0x8e4] ss:$8 sps:$4 sm:$0xff]  }
 0x82c   : > { %12831 = vmatprep.subr.bf16.mxu0 %v18588_v22  ;;  %v18631_v22 = vld [vmem:[%s24859_s3 + $0x8f0] ss:$8 sps:$4 sm:$0xff]  }
 0x82e   : > { %12821 = vmatmul.mubr.bf16.vlgmr.msra.gmra.mrb[4].mxu0 %v10507_v5  ;;  %v18642_v5 = vld [vmem:[%s24859_s3 + $0x924] ss:$8 sps:$4 sm:$0xff]  }
 0x82f   : > { %12832 = vmatpush1.bf16.msra.mxu0 %v18586_v35  ;;  %12863 = vmatprep.mubr.bf16.mxu0 %v23057_v59  ;;  %v13048_v59 = vld [vmem:[%s24861_s5 + $0x10] sm:$0xff] }
 0x830   : > { %12833 = vmatprep.subr.bf16.mxu0 %v18591_v18  ;;  %v15829_v12 = vpack.c.bf16 %v13049_v63, %v13048_v59  ;;  %v18639_v35 = vld [vmem:[%s24859_s3 + $0x914] ss:$8 sps:$4 sm:$0xff]   ;;  %v18637_v18 = vld [vmem:[%s24859_s3 + $0x910] ss:$8 sps:$4 sm:$0xff]  }
 0x831   : > { %v18663_v59 = vld [vmem:[%s24859_s3 + $0x994] ss:$8 sps:$4 sm:$0xff]   ;;  %v18661_v63 = vld [vmem:[%s24859_s3 + $0x990] ss:$8 sps:$4 sm:$0xff]  }
 0x832   : > { %15830 = vmatpush3.bf16.msra.mxu1 %v15829_v12  ;;  %v18669_v12 = vld [vmem:[%s24859_s3 + $0x9b4] ss:$8 sps:$4 sm:$0xff]  }
 0x833   : > { %12834 = vmatpush1.bf16.msra.mxu0 %v18589_v33  ;;  %15832 = vmatprep.subr.bf16.mxu1 %v15831_v26  ;;  %v18640_v33 = vld [vmem:[%s24859_s3 + $0x920] ss:$8 sps:$4 sm:$0xff]   ;;  %v18672_v26 = vld [vmem:[%s24859_s3 + $0x9c4] ss:$8 sps:$4 sm:$0xff]  }
 0x834   : > { %12835 = vmatprep.subr.bf16.mxu0 %v18594_v13  ;;  %v18648_v13 = vld [vmem:[%s24859_s3 + $0x944] ss:$8 sps:$4 sm:$0xff]  }
 0x836   : > { %15834 = vmatpush3.bf16.msra.mxu1 %v15833_v46  ;;  %v18681_v46 = vld [vmem:[%s24859_s3 + $0x9f4] ss:$8 sps:$4 sm:$0xff]  }
 0x837   : > { %12836 = vmatpush1.bf16.msra.mxu0 %v18592_v20  ;;  %15836 = vmatprep.subr.bf16.mxu1 %v15835_v47  ;;  %v18667_v20 = vld [vmem:[%s24859_s3 + $0x9b0] ss:$8 sps:$4 sm:$0xff]   ;;  %v13070_v47 = vld [vmem:[%s24861_s5 + $0xc0] sm:$0xff] }
 0x838   : > { %12837 = vmatprep.subr.bf16.mxu0 %v18597_v11  ;;  %v18673_v11 = vld [vmem:[%s24859_s3 + $0x9d0] ss:$8 sps:$4 sm:$0xff]   ;;  %v15839_v61 = vpack.c.bf16 %v13071_v9, %v13070_v47 }
 0x83a   : > { %15838 = vmatpush3.bf16.msra.mxu1 %v15837_v43  ;;  %v13055_v43 = vld [vmem:[%s24861_s5 + $0x48] sm:$0xff] }
 0x83b   : > { %12838 = vmatpush1.bf16.msra.mxu0 %v18595_v0  ;;  %v18679_v0 = vld [vmem:[%s24859_s3 + $0x9f0] ss:$8 sps:$4 sm:$0xff]   ;;  %15840 = vmatprep.subr.bf16.mxu1 %v15839_v61  ;;  %v13082_v61 = vld [vmem:[%s24861_s5 + $0x120] sm:$0xff] }
 0x83c   : > { %12839 = vmatprep.subr.bf16.mxu0 %v18600_v52  ;;  %v13054_v52 = vld [vmem:[%s24861_s5 + $0x40] sm:$0xff] }
 0x83f   : > { %12840 = vmatpush1.bf16.msra.mxu0 %v18598_v7  ;;  %v15841_v7 = vpack.c.bf16 %v13055_v43, %v13054_v52  ;;  %v13083_v52 = vld [vmem:[%s24861_s5 + $0x128] sm:$0xff]  ;;  %v13100_v43 = vld [vmem:[%s24861_s5 + $0x1b0] sm:$0xff] }
 0x840   : > { %12841 = vmatprep.subr.bf16.mxu0 %v18603_v48  ;;  %v13073_v48 = vld [vmem:[%s24861_s5 + $0xd8] sm:$0xff] }
 0x841   : > { %15842 = vmatpush3.bf16.msra.mxu1 %v15841_v7  ;;  %v13101_v7 = vld [vmem:[%s24861_s5 + $0x1b8] sm:$0xff] }
 0x843   : > { %12842 = vmatpush1.bf16.msra.mxu0 %v18601_v3  ;;  %v13056_v3 = vld [vmem:[%s24861_s5 + $0x50] sm:$0xff] }
 0x844   : > { %12843 = vmatprep.subr.bf16.mxu0 %v18606_v17 }
 0x847   : > { %12844 = vmatpush1.bf16.msra.mxu0 %v18604_v51  ;;  %v13057_v51 = vld [vmem:[%s24861_s5 + $0x58] sm:$0xff] }
 0x848   : > { %12845 = vmatprep.subr.bf16.mxu0 %v18609_v29  ;;  %v13074_v29 = vld [vmem:[%s24861_s5 + $0xe0] sm:$0xff] }
 0x84b   : > { %12846 = vmatpush1.bf16.msra.mxu0 %v18607_v58  ;;  %v13075_v58 = vld [vmem:[%s24861_s5 + $0xe8] sm:$0xff] }
 0x84c   : > { %12847 = vmatprep.subr.bf16.mxu0 %v18612_v31  ;;  %v18699_v31 = vmov 0.0  }
 0x84d   : > { %12922 = vst [vmem:[#allocation3 + $0x8] sm:$0x3] %v18699_v31  ;;  %12921 = vst [vmem:[#allocation3] sm:$0x3] %v18699_v31 }
 0x84e   : > { %12923 = vst [vmem:[#allocation3 + $0x20] sm:$0xc] %v18699_v31  ;;  %12924 = vst [vmem:[#allocation3 + $0x28] sm:$0xc] %v18699_v31 }
 0x84f   : > { %12848 = vmatpush1.bf16.msra.mxu0 %v18610_v55  ;;  %v15845_v55 = vpack.c.bf16 %v13057_v51, %v13056_v3  ;;  %v15867_v3 = vpack.c.bf16 %v13101_v7, %v13100_v43  ;;  %v13085_v51 = vld [vmem:[%s24861_s5 + $0x138] sm:$0xff] }
 0x850   : > { %12849 = vmatprep.subr.bf16.mxu0 %v18615_v62  ;;  %v15847_v62 = vpack.c.bf16 %v13075_v58, %v13074_v29  ;;  %v13102_v29 = vld [vmem:[%s24861_s5 + $0x1c0] sm:$0xff]  ;;  %v13103_v58 = vld [vmem:[%s24861_s5 + $0x1c8] sm:$0xff]  ;;  %v13133_v7 = vld [vmem:[%s24861_s5 + $0x2b8] sm:$0xff] }
 0x853   : > { %12850 = vmatpush1.bf16.msra.mxu0 %v18613_v21  ;;  %v13058_v21 = vld [vmem:[%s24861_s5 + $0x60] sm:$0xff] }
 0x854   : > { %12851 = vmatprep.subr.bf16.mxu0 %v18618_v39  ;;  %v13059_v39 = vld [vmem:[%s24861_s5 + $0x68] sm:$0xff] }
 0x857   : > { %12852 = vmatpush1.bf16.msra.mxu0 %v18616_v14  ;;  %v13076_v14 = vld [vmem:[%s24861_s5 + $0xf0] sm:$0xff] }
 0x858   : > { %12853 = vmatprep.subr.bf16.mxu0 %v18621_v24  ;;  %v13077_v24 = vld [vmem:[%s24861_s5 + $0xf8] sm:$0xff] }
 0x85b   : > { %12854 = vmatpush1.bf16.msra.mxu0 %v18619_v53  ;;  %v15849_v53 = vpack.c.bf16 %v13059_v39, %v13058_v21  ;;  %v13087_v21 = vld [vmem:[%s24861_s5 + $0x148] sm:$0xff]  ;;  %v13104_v39 = vld [vmem:[%s24861_s5 + $0x1d0] sm:$0xff] }
 0x85c   : > { %12855 = vmatprep.subr.bf16.mxu0 %v18624_v1  ;;  %v15851_v1 = vpack.c.bf16 %v13077_v24, %v13076_v14  ;;  %v13105_v14 = vld [vmem:[%s24861_s5 + $0x1d8] sm:$0xff] }
 0x85f   : > { %12856 = vmatpush1.bf16.msra.mxu0 %v18622_v19  ;;  %v13060_v19 = vld [vmem:[%s24861_s5 + $0x70] sm:$0xff] }
 0x860   : > { %12857 = vmatprep.subr.bf16.mxu0 %v18627_v40  ;;  %v13061_v40 = vld [vmem:[%s24861_s5 + $0x78] sm:$0xff] }
 0x863   : > { %12858 = vmatpush1.bf16.msra.mxu0 %v18625_v2  ;;  %v13094_v2 = vld [vmem:[%s24861_s5 + $0x180] sm:$0xff] }
 0x864   : > { %12859 = vmatprep.subr.bf16.mxu0 %v18630_v60  ;;  %v13095_v60 = vld [vmem:[%s24861_s5 + $0x188] sm:$0xff] }
 0x867   : > { %12860 = vmatpush1.bf16.msra.mxu0 %v18628_v37  ;;  %v15853_v37 = vpack.c.bf16 %v13061_v40, %v13060_v19  ;;  %v13089_v19 = vld [vmem:[%s24861_s5 + $0x158] sm:$0xff]  ;;  %v13106_v40 = vld [vmem:[%s24861_s5 + $0x1e0] sm:$0xff] }
 0x868   : > { %12861 = vmatprep.subr.bf16.mxu0 %v18633_v36  ;;  %v15855_v36 = vpack.c.bf16 %v13095_v60, %v13094_v2  ;;  %v13107_v2 = vld [vmem:[%s24861_s5 + $0x1e8] sm:$0xff] }
 0x86b   : > { %12862 = vmatpush1.bf16.msra.mxu0 %v18631_v22  ;;  %v10875_v22 = vld [vmem:[%s24860_s4] sm:$0x3] }
 0x86c   : > { %12874 = vmatprep.subr.bf16.mxu0 %v18636_v42  ;;  %v10880_v42 = vrot.slane %v10875_v22, %v2132_v16 }
 0x86e   : > { %12864 = vmatmul.mubr.bf16.vlgmr.msra.gmra.mrb[4].mxu0 %v23060_v34  ;;  %v18645_v34 = vld [vmem:[%s24859_s3 + $0x934] ss:$8 sps:$4 sm:$0xff]  }
 0x86f   : > { %12875 = vmatpush1.bf16.msra.mxu0 %v18634_v57  ;;  %12906 = vmatprep.mubr.bf16.mxu0 %v23432_v27  ;;  %v18643_v27 = vld [vmem:[%s24859_s3 + $0x930] ss:$8 sps:$4 sm:$0xff]   ;;  %v10884_v57 = vrot.slane %v10875_v22, %v2136_v15  ;;  %v13091_v22 = vld [vmem:[%s24861_s5 + $0x168] sm:$0xff] }
 0x870   : > { %12876 = vmatprep.subr.bf16.mxu0 %v18639_v35 }
 0x873   : > { %12877 = vmatpush1.bf16.msra.mxu0 %v18637_v18 }
 0x874   : > { %12878 = vmatprep.subr.bf16.mxu0 %v18642_v5 }
 0x877   : > { %12879 = vmatpush1.bf16.msra.mxu0 %v18640_v33 }
 0x878   : > { %12880 = vmatprep.subr.bf16.mxu0 %v18645_v34 }
 0x87b   : > { %12881 = vmatpush1.bf16.msra.mxu0 %v18643_v27 }
 0x87c   : > { %12882 = vmatprep.subr.bf16.mxu0 %v18648_v13 }
 0x87f   : > { %12883 = vmatpush1.bf16.msra.mxu0 %v18646_v49 }
 0x880   : > { %12884 = vmatprep.subr.bf16.mxu0 %v18651_v54 }
 0x883   : > { %12885 = vmatpush1.bf16.msra.mxu0 %v18649_v25 }
 0x884   : > { %12886 = vmatprep.subr.bf16.mxu0 %v18654_v38 }
 0x887   : > { %12887 = vmatpush1.bf16.msra.mxu0 %v18652_v28 }
 0x888   : > { %12888 = vmatprep.subr.bf16.mxu0 %v18657_v10 }
 0x88b   : > { %12889 = vmatpush1.bf16.msra.mxu0 %v18655_v23 }
 0x88c   : > { %12890 = vmatprep.subr.bf16.mxu0 %v18660_v6 }
 0x88f   : > { %12891 = vmatpush1.bf16.msra.mxu0 %v18658_v44  ;;  %v13078_v44 = vld [vmem:[%s24861_s5 + $0x100] sm:$0xff] }
 0x890   : > { %12892 = vmatprep.subr.bf16.mxu0 %v18663_v59  ;;  %v13079_v59 = vld [vmem:[%s24861_s5 + $0x108] sm:$0xff] }
 0x893   : > { %12893 = vmatpush1.bf16.msra.mxu0 %v18661_v63  ;;  %v13096_v63 = vld [vmem:[%s24861_s5 + $0x190] sm:$0xff] }
 0x894   : > { %12894 = vmatprep.subr.bf16.mxu0 %v18666_v45  ;;  %v13097_v45 = vld [vmem:[%s24861_s5 + $0x198] sm:$0xff] }
 0x897   : > { %12895 = vmatpush1.bf16.msra.mxu0 %v18664_v8  ;;  %v15857_v8 = vpack.c.bf16 %v13079_v59, %v13078_v44 }
 0x898   : > { %12896 = vmatprep.subr.bf16.mxu0 %v18669_v12  ;;  %v13080_v12 = vld [vmem:[%s24861_s5 + $0x110] sm:$0xff] }
 0x89b   : > { %12897 = vmatpush1.bf16.msra.mxu0 %v18667_v20 }
 0x89c   : > { %12898 = vmatprep.subr.bf16.mxu0 %v18672_v26  ;;  %v15859_v26 = vpack.c.bf16 %v13097_v45, %v13096_v63 }
 0x89f   : > { %12899 = vmatpush1.bf16.msra.mxu0 %v18670_v4  ;;  %v13081_v4 = vld [vmem:[%s24861_s5 + $0x118] sm:$0xff] }
 0x8a0   : > { %12900 = vmatprep.subr.bf16.mxu0 %v18675_v30 }
 0x8a3   : > { %12901 = vmatpush1.bf16.msra.mxu0 %v18673_v11 }
 0x8a4   : > { %12902 = vmatprep.subr.bf16.mxu0 %v18678_v41  ;;  %v13098_v41 = vld [vmem:[%s24861_s5 + $0x1a0] sm:$0xff] }
 0x8a7   : > { %12903 = vmatpush1.bf16.msra.mxu0 %v18676_v50  ;;  %v13099_v50 = vld [vmem:[%s24861_s5 + $0x1a8] sm:$0xff] }
 0x8a8   : > { %12904 = vmatprep.subr.bf16.mxu0 %v18681_v46  ;;  %v15863_v9 = vpack.c.bf16 %v13099_v50, %v13098_v41 }
 0x8ab   : > { %12905 = vmatpush1.bf16.msra.mxu0 %v18679_v0  ;;  %v15861_v0 = vpack.c.bf16 %v13081_v4, %v13080_v12  ;;  %v13112_v12 = vld [vmem:[%s24861_s5 + $0x210] sm:$0xff] }
 0x8ae   : > { %12907 = vmatmul.mubr.bf16.vlgmr.msra.gmra.mrb[4].mxu0 %v23435_v32  ;;  %v13072_v32 = vld [vmem:[%s24861_s5 + $0xd0] sm:$0xff] }
 0x8af   : > { %v15843_v17 = vpack.c.bf16 %v13073_v48, %v13072_v32  ;;  %v15865_v48 = vpack.c.bf16 %v13083_v52, %v13082_v61  ;;  %v13114_v61 = vld [vmem:[%s24861_s5 + $0x220] sm:$0xff]  ;;  %v13115_v52 = vld [vmem:[%s24861_s5 + $0x228] sm:$0xff] }
 0x8b1   : > { %15844 = vmatprep.subr.bf16.mxu1 %v15843_v17  ;;  %v13084_v17 = vld [vmem:[%s24861_s5 + $0x130] sm:$0xff] }
 0x8b2   : > { %15846 = vmatpush3.bf16.msra.mxu1 %v15845_v55  ;;  %v15869_v31 = vpack.c.bf16 %v13085_v51, %v13084_v17  ;;  %v15871_v55 = vpack.c.bf16 %v13103_v58, %v13102_v29  ;;  %v13116_v17 = vld [vmem:[%s24861_s5 + $0x230] sm:$0xff]  ;;  %v13117_v51 = vld [vmem:[%s24861_s5 + $0x238] sm:$0xff]  ;;  %v13134_v29 = vld [vmem:[%s24861_s5 + $0x2c0] sm:$0xff] }
 0x8b3   : > { %15848 = vmatprep.subr.bf16.mxu1 %v15847_v62  ;;  %v13086_v62 = vld [vmem:[%s24861_s5 + $0x140] sm:$0xff]  ;;  %v13135_v58 = vld [vmem:[%s24861_s5 + $0x2c8] sm:$0xff] }
 0x8b4   : > { %v15873_v24 = vpack.c.bf16 %v13087_v21, %v13086_v62  ;;  %v13118_v62 = vld [vmem:[%s24861_s5 + $0x240] sm:$0xff]  ;;  %v13119_v21 = vld [vmem:[%s24861_s5 + $0x248] sm:$0xff] }
 0x8b6   : > { %15850 = vmatpush3.bf16.msra.mxu1 %v15849_v53  ;;  %v15875_v53 = vpack.c.bf16 %v13105_v14, %v13104_v39  ;;  %v13136_v39 = vld [vmem:[%s24861_s5 + $0x2d0] sm:$0xff]  ;;  %v13137_v14 = vld [vmem:[%s24861_s5 + $0x2d8] sm:$0xff] }
 0x8b7   : > { %15852 = vmatprep.subr.bf16.mxu1 %v15851_v1  ;;  %v13088_v1 = vld [vmem:[%s24861_s5 + $0x150] sm:$0xff] }
 0x8b8   : > { %v15877_v60 = vpack.c.bf16 %v13089_v19, %v13088_v1  ;;  %v13120_v1 = vld [vmem:[%s24861_s5 + $0x250] sm:$0xff]  ;;  %v13121_v19 = vld [vmem:[%s24861_s5 + $0x258] sm:$0xff] }
 0x8ba   : > { %15854 = vmatpush3.bf16.msra.mxu1 %v15853_v37  ;;  %v15879_v37 = vpack.c.bf16 %v13107_v2, %v13106_v40  ;;  %v13138_v40 = vld [vmem:[%s24861_s5 + $0x2e0] sm:$0xff]  ;;  %v13139_v2 = vld [vmem:[%s24861_s5 + $0x2e8] sm:$0xff] }
 0x8bb   : > { %15856 = vmatprep.subr.bf16.mxu1 %v15855_v36  ;;  %v13090_v36 = vld [vmem:[%s24861_s5 + $0x160] sm:$0xff] }
 0x981   : > { %v12908_v35 = vpop.f32.mrb[4].mxu0 }
 0x982   : > { %v16059_v18 = vadd.f32 %v12908_v35, %v10880_v42  ;;  %v12910_v5 = vpop.f32.mrb[5].mxu0  ;;  %v15881_v35 = vpack.c.bf16 %v13091_v22, %v13090_v36  ;;  %v13122_v36 = vld [vmem:[%s24861_s5 + $0x260] sm:$0xff]  ;;  %v13123_v22 = vld [vmem:[%s24861_s5 + $0x268] sm:$0xff] }
 0x983   : > { %v16060_v33 = vadd.f32 %v12910_v5, %v10884_v57  ;;  %v12912_v34 = vpop.f32.mrb[6].mxu0  ;;  %v13092_v5 = vld [vmem:[%s24861_s5 + $0x170] sm:$0xff] }
 0x984   : > { %v12917_v27 = vmax.f32 %v16059_v18, 0.0  ;;  %v16061_v13 = vadd.f32 %v12912_v34, %v10880_v42  ;;  %v12914_v49 = vpop.f32.mrb[7].mxu0  ;;  %v13108_v42 = vld [vmem:[%s24861_s5 + $0x1f0] sm:$0xff]  ;;  %v13126_v34 = vld [vmem:[%s24861_s5 + $0x280] sm:$0xff] }
 0x985   : > { %v12918_v54 = vmax.f32 %v16060_v33, 0.0  ;;  %v16062_v25 = vadd.f32 %v12914_v49, %v10884_v57  ;;  %v13109_v57 = vld [vmem:[%s24861_s5 + $0x1f8] sm:$0xff] }
 0x986   : > { %v12930_v38 = vrot.slane %v12917_v27, 6  ;;  %v12919_v28 = vmax.f32 %v16061_v13, 0.0  ;;  %v15883_v18 = vpack.c.bf16 %v13109_v57, %v13108_v42  ;;  %v13093_v33 = vld [vmem:[%s24861_s5 + $0x178] sm:$0xff]  ;;  %v13127_v27 = vld [vmem:[%s24861_s5 + $0x288] sm:$0xff]  ;;  %v13140_v42 = vld [vmem:[%s24861_s5 + $0x2f0] sm:$0xff] }
 0x987   : > { %v12931_v10 = vrot.slane %v12918_v54, 6  ;;  %v12920_v23 = vmax.f32 %v16062_v25, 0.0  ;;  %v15885_v49 = vpack.c.bf16 %v13093_v33, %v13092_v5  ;;  %v15887_v25 = vpack.c.bf16 %v13127_v27, %v13126_v34  ;;  %v13141_v57 = vld [vmem:[%s24861_s5 + $0x2f8] sm:$0xff]  ;;  %v13124_v5 = vld [vmem:[%s24861_s5 + $0x270] sm:$0xff]  ;;  %v13158_v34 = vld [vmem:[%s24861_s5 + $0x380] sm:$0xff] }
 0x988   : > { %12942 = vst [vmem:[#allocation3] sm:$0xfc] %v12930_v38  ;;  %v12932_v16 = vrot.slane %v12919_v28, 6  ;;  %v13111_v28 = vld [vmem:[%s24861_s5 + $0x208] sm:$0xff]  ;;  %v13125_v33 = vld [vmem:[%s24861_s5 + $0x278] sm:$0xff] }
 0x989   : > { %12943 = vst [vmem:[#allocation3 + $0x8] sm:$0xfc] %v12931_v10  ;;  %v12934_v56 = vrot.slane %v12920_v23, 6  ;;  %v13128_v23 = vld [vmem:[%s24861_s5 + $0x290] sm:$0xff]  ;;  %v13159_v27 = vld [vmem:[%s24861_s5 + $0x388] sm:$0xff] }
 0x98a   : > { %v24324_v15 = vsel %vm12929_vm7, %v12930_v38, %v12932_v16  ;;  %12946 = vst [vmem:[#allocation3 + $0x20] sm:$0x3] %v12932_v16  ;;  %v13110_v38 = vld [vmem:[%s24861_s5 + $0x200] sm:$0xff]  ;;  %v13129_v16 = vld [vmem:[%s24861_s5 + $0x298] sm:$0xff] }
 0x98b   : > { %v24326_v6 = vsel %vm12929_vm7, %v12931_v10, %v12934_v56  ;;  %12947 = vst [vmem:[#allocation3 + $0x28] sm:$0x3] %v12934_v56  ;;  %v12976_v59 = vrot.slane %v24324_v15, 1  ;;  %v15889_v63 = vpack.c.bf16 %v13111_v28, %v13110_v38  ;;  %v13142_v38 = vld [vmem:[%s24861_s5 + $0x300] sm:$0xff]  ;;  %v13143_v28 = vld [vmem:[%s24861_s5 + $0x308] sm:$0xff] }
 0x98c   : > { %v12979_v47 = vrot.slane %v24326_v6, 1 }
 0x98f   : > { %v12948_v11 = vld [vmem:[#allocation3] sm:$0xff] }
 0x990   : > { %v12949_v20 = vld [vmem:[#allocation3 + $0x8] sm:$0xff]  ;;  %v12952_v13 = vld [vmem:[#allocation3] sm:$0xfe] }
 0x991   : > { %v12953_v30 = vld [vmem:[#allocation3 + $0x8] sm:$0xfe]  ;;  %13277 = vmatprep.mubr.f32.mxu1 %v12949_v20  ;;  %v12975_v10 = vrot.slane %v12952_v13, 1  ;;  %v12954_v44 = vld [vmem:[#allocation3 + $0x20] sm:$0x1] }
 0x992   : > { %13278 = vmatmul.mubr.f32.vlgmr.msra.gmra.mrb[8].mxu1 %v12948_v11  ;;  %v12978_v46 = vrot.slane %v12953_v30, 1  ;;  %v12955_v54 = vld [vmem:[#allocation3 + $0x28] sm:$0x1]  ;;  %v12957_v45 = vld [vmem:[#allocation3 + $0x8] sm:$0xfc]  ;;  %v12981_v4 = vrot.slane %v12954_v44, 1 }
 0x993   : > { %15858 = vmatpush3.bf16.msra.mxu1 %v15857_v8  ;;  %13282 = vmatprep.mubr.f32.mxu1 %v24326_v6  ;;  %v12983_v56 = vrot.slane %v12955_v54, 1  ;;  %v15891_v8 = vpack.c.bf16 %v13129_v16, %v13128_v23  ;;  %v13113_v20 = vld [vmem:[%s24861_s5 + $0x218] sm:$0xff]  ;;  %v13130_v30 = vld [vmem:[%s24861_s5 + $0x2a0] sm:$0xff]  ;;  %v13131_v11 = vld [vmem:[%s24861_s5 + $0x2a8] sm:$0xff]  ;;  %v12997_v50 = vrot.slane %v12957_v45, 2 }
 0x994   : > { %15860 = vmatprep.subr.bf16.mxu1 %v15859_v26  ;;  %v12980_v32 = vsel %vm597_vm1, %v12978_v46, %v12979_v47  ;;  %v12977_v26 = vsel %vm597_vm1, %v12975_v10, %v12976_v59  ;;  %v15893_v46 = vpack.c.bf16 %v13113_v20, %v13112_v12  ;;  %v12982_v43 = vsel %vm597_vm1, %v12976_v59, %v12981_v4  ;;  %v12956_v13 = vld [vmem:[#allocation3] sm:$0xfc]  ;;  %v12959_v54 = vld [vmem:[#allocation3 + $0x28] sm:$0x3]  ;;  %v12958_v44 = vld [vmem:[#allocation3 + $0x20] sm:$0x3] }
 0x995   : > { %v12984_v41 = vsel %vm597_vm1, %v12979_v47, %v12983_v56  ;;  %v13132_v47 = vld [vmem:[%s24861_s5 + $0x2b0] sm:$0xff]  ;;  %v12994_v10 = vrot.slane %v12956_v13, 2  ;;  %v13161_v16 = vld [vmem:[%s24861_s5 + $0x398] sm:$0xff]  ;;  %v13002_v56 = vrot.slane %v12959_v54, 2  ;;  %v12995_v59 = vrot.slane %v24324_v15, 2 }
 0x996   : > { %13283 = vmatmul.mubr.f32.gmra.mrb[10].mxu1 %v24324_v15  ;;  %v13160_v23 = vld [vmem:[%s24861_s5 + $0x390] sm:$0xff]  ;;  %v12961_v45 = vld [vmem:[#allocation3 + $0x8] sm:$0xf8]  ;;  %v13000_v4 = vrot.slane %v12958_v44, 2  ;;  %v12963_v54 = vld [vmem:[#allocation3 + $0x28] sm:$0x7] }
 0x997   : > { %15862 = vmatpush3.bf16.msra.mxu1 %v15861_v0  ;;  %13352 = vmatprep.mubr.f32.mxu1 %v12980_v32  ;;  %v12998_v0 = vrot.slane %v24326_v6, 2  ;;  %v13144_v12 = vld [vmem:[%s24861_s5 + $0x310] sm:$0xff]  ;;  %v13145_v20 = vld [vmem:[%s24861_s5 + $0x318] sm:$0xff] }
 0x998   : > { %15864 = vmatprep.subr.bf16.mxu1 %v15863_v9  ;;  %v15895_v9 = vpack.c.bf16 %v13131_v11, %v13130_v30  ;;  %v13162_v30 = vld [vmem:[%s24861_s5 + $0x3a0] sm:$0xff]  ;;  %v13163_v11 = vld [vmem:[%s24861_s5 + $0x3a8] sm:$0xff]  ;;  %v12960_v13 = vld [vmem:[#allocation3] sm:$0xf8] }
 0x999   : > { %v12999_v32 = vsel %vm815_vm3, %v12997_v50, %v12998_v0  ;;  %v13016_v50 = vrot.slane %v12961_v45, 3  ;;  %v12962_v44 = vld [vmem:[#allocation3 + $0x20] sm:$0x7]  ;;  %v12965_v45 = vld [vmem:[#allocation3 + $0x8] sm:$0xf0] }
 0x99b   : > { %15866 = vmatpush3.bf16.msra.mxu1 %v15865_v48  ;;  %v15897_v48 = vpack.c.bf16 %v13115_v52, %v13114_v61  ;;  %v15927_v61 = vpack.c.bf16 %v13163_v11, %v13162_v30  ;;  %v13146_v52 = vld [vmem:[%s24861_s5 + $0x320] sm:$0xff]  ;;  %v13195_v11 = vld [vmem:[%s24861_s5 + $0x4a8] sm:$0xff] }
 0x99c   : > { %15868 = vmatprep.subr.bf16.mxu1 %v15867_v3  ;;  %v15899_v3 = vpack.c.bf16 %v13133_v7, %v13132_v47  ;;  %v13001_v47 = vsel %vm815_vm3, %v12995_v59, %v13000_v4  ;;  %v13165_v7 = vld [vmem:[%s24861_s5 + $0x3b8] sm:$0xff]  ;;  %v13019_v4 = vrot.slane %v12962_v44, 3  ;;  %v13194_v30 = vld [vmem:[%s24861_s5 + $0x4a0] sm:$0xff] }
 0x99f   : > { %15870 = vmatpush3.bf16.msra.mxu1 %v15869_v31  ;;  %v15901_v31 = vpack.c.bf16 %v13117_v51, %v13116_v17  ;;  %v13148_v17 = vld [vmem:[%s24861_s5 + $0x330] sm:$0xff]  ;;  %v13149_v51 = vld [vmem:[%s24861_s5 + $0x338] sm:$0xff] }
 0x9a0   : > { %15872 = vmatprep.subr.bf16.mxu1 %v15871_v55  ;;  %v15903_v55 = vpack.c.bf16 %v13135_v58, %v13134_v29  ;;  %v13166_v29 = vld [vmem:[%s24861_s5 + $0x3c0] sm:$0xff]  ;;  %v13167_v58 = vld [vmem:[%s24861_s5 + $0x3c8] sm:$0xff] }
 0x9a3   : > { %15874 = vmatpush3.bf16.msra.mxu1 %v15873_v24  ;;  %v15905_v24 = vpack.c.bf16 %v13119_v21, %v13118_v62  ;;  %v13150_v62 = vld [vmem:[%s24861_s5 + $0x340] sm:$0xff]  ;;  %v13151_v21 = vld [vmem:[%s24861_s5 + $0x348] sm:$0xff] }
 0x9a4   : > { %15876 = vmatprep.subr.bf16.mxu1 %v15875_v53  ;;  %v15907_v53 = vpack.c.bf16 %v13137_v14, %v13136_v39  ;;  %v13168_v39 = vld [vmem:[%s24861_s5 + $0x3d0] sm:$0xff]  ;;  %v13169_v14 = vld [vmem:[%s24861_s5 + $0x3d8] sm:$0xff] }
 0x9a7   : > { %15878 = vmatpush3.bf16.msra.mxu1 %v15877_v60  ;;  %v15909_v60 = vpack.c.bf16 %v13121_v19, %v13120_v1  ;;  %v13152_v1 = vld [vmem:[%s24861_s5 + $0x350] sm:$0xff]  ;;  %v13153_v19 = vld [vmem:[%s24861_s5 + $0x358] sm:$0xff] }
 0x9a8   : > { %15880 = vmatprep.subr.bf16.mxu1 %v15879_v37  ;;  %v15911_v37 = vpack.c.bf16 %v13139_v2, %v13138_v40  ;;  %v13170_v40 = vld [vmem:[%s24861_s5 + $0x3e0] sm:$0xff]  ;;  %v13171_v2 = vld [vmem:[%s24861_s5 + $0x3e8] sm:$0xff] }
 0x9ab   : > { %15882 = vmatpush3.bf16.msra.mxu1 %v15881_v35  ;;  %v15913_v35 = vpack.c.bf16 %v13123_v22, %v13122_v36  ;;  %v13154_v36 = vld [vmem:[%s24861_s5 + $0x360] sm:$0xff]  ;;  %v13155_v22 = vld [vmem:[%s24861_s5 + $0x368] sm:$0xff] }
 0x9ac   : > { %15884 = vmatprep.subr.bf16.mxu1 %v15883_v18  ;;  %v15915_v18 = vpack.c.bf16 %v13141_v57, %v13140_v42  ;;  %v13172_v42 = vld [vmem:[%s24861_s5 + $0x3f0] sm:$0xff]  ;;  %v13173_v57 = vld [vmem:[%s24861_s5 + $0x3f8] sm:$0xff] }
 0x9af   : > { %15886 = vmatpush3.bf16.msra.mxu1 %v15885_v49  ;;  %v15917_v49 = vpack.c.bf16 %v13125_v33, %v13124_v5  ;;  %v13156_v5 = vld [vmem:[%s24861_s5 + $0x370] sm:$0xff]  ;;  %v13157_v33 = vld [vmem:[%s24861_s5 + $0x378] sm:$0xff] }
 0x9b0   : > { %15888 = vmatprep.subr.bf16.mxu1 %v15887_v25  ;;  %v15919_v25 = vpack.c.bf16 %v13159_v27, %v13158_v34  ;;  %v13190_v34 = vld [vmem:[%s24861_s5 + $0x480] sm:$0xff]  ;;  %v13191_v27 = vld [vmem:[%s24861_s5 + $0x488] sm:$0xff] }
 0x9b2   : > { %13353 = vmatmul.mubr.f32.vlgmr.msra.gmra.mrb[12].mxu1 %v12977_v26  ;;  %v12996_v26 = vsel %vm815_vm3, %v12994_v10, %v12995_v59  ;;  %v13013_v10 = vrot.slane %v12960_v13, 3  ;;  %v13014_v59 = vrot.slane %v24324_v15, 3 }
 0x9b3   : > { %13357 = vmatprep.mubr.f32.mxu1 %v12984_v41  ;;  %15890 = vmatpush3.bf16.msra.mxu1 %v15889_v63  ;;  %v15921_v63 = vpack.c.bf16 %v13143_v28, %v13142_v38  ;;  %v13003_v41 = vsel %vm815_vm3, %v12998_v0, %v13002_v56  ;;  %v13164_v0 = vld [vmem:[%s24861_s5 + $0x3b0] sm:$0xff]  ;;  %v13174_v38 = vld [vmem:[%s24861_s5 + $0x400] sm:$0xff]  ;;  %v13175_v28 = vld [vmem:[%s24861_s5 + $0x408] sm:$0xff]  ;;  %v13021_v56 = vrot.slane %v12963_v54, 3 }
 0x9b4   : > { %15892 = vmatprep.subr.bf16.mxu1 %v15891_v8  ;;  %v15923_v8 = vpack.c.bf16 %v13161_v16, %v13160_v23  ;;  %v13192_v23 = vld [vmem:[%s24861_s5 + $0x490] sm:$0xff]  ;;  %v13193_v16 = vld [vmem:[%s24861_s5 + $0x498] sm:$0xff] }
 0x9b5   : > { %v12966_v54 = vld [vmem:[#allocation3 + $0x20] sm:$0xf] }
 0x9b6   : > { %13358 = vmatmul.mubr.f32.gmra.mrb[14].mxu1 %v12982_v43  ;;  %v13147_v43 = vld [vmem:[%s24861_s5 + $0x328] sm:$0xff] }
 0x9b7   : > { %15894 = vmatpush3.bf16.msra.mxu1 %v15893_v46  ;;  %13427 = vmatprep.mubr.f32.mxu1 %v12999_v32  ;;  %v15925_v46 = vpack.c.bf16 %v13145_v20, %v13144_v12  ;;  %v13176_v12 = vld [vmem:[%s24861_s5 + $0x410] sm:$0xff]  ;;  %v13177_v20 = vld [vmem:[%s24861_s5 + $0x418] sm:$0xff] }
 0x9b8   : > { %15896 = vmatprep.subr.bf16.mxu1 %v15895_v9  ;;  %v13017_v9 = vrot.slane %v24326_v6, 3 }
 0x9ba   : > { %v13018_v32 = vsel %vm13012_vm8, %v13016_v50, %v13017_v9  ;;  %v13035_v50 = vrot.slane %v12965_v45, 4  ;;  %v13594_v45 = vld [vmem:[%s24863_s7 + $0x20] sm:$0xff] }
 0x9bb   : > { %15898 = vmatpush3.bf16.msra.mxu1 %v15897_v48  ;;  %v15929_v48 = vpack.c.bf16 %v13147_v43, %v13146_v52  ;;  %v15959_v52 = vpack.c.bf16 %v13195_v11, %v13194_v30  ;;  %v13178_v43 = vld [vmem:[%s24861_s5 + $0x420] sm:$0xff]  ;;  %v13599_v11 = vld [vmem:[%s24863_s7 + $0x48] sm:$0xff] }
 0x9bc   : > { %15900 = vmatprep.subr.bf16.mxu1 %v15899_v3  ;;  %v15931_v3 = vpack.c.bf16 %v13165_v7, %v13164_v0  ;;  %v13020_v0 = vsel %vm13012_vm8, %v13014_v59, %v13019_v4  ;;  %v13197_v7 = vld [vmem:[%s24861_s5 + $0x4b8] sm:$0xff]  ;;  %v13598_v30 = vld [vmem:[%s24863_s7 + $0x40] sm:$0xff] }
 0x9bf   : > { %15902 = vmatpush3.bf16.msra.mxu1 %v15901_v31  ;;  %v15933_v31 = vpack.c.bf16 %v13149_v51, %v13148_v17  ;;  %v13181_v17 = vld [vmem:[%s24861_s5 + $0x438] sm:$0xff]  ;;  %v13198_v51 = vld [vmem:[%s24861_s5 + $0x4c0] sm:$0xff] }
 0x9c0   : > { %15904 = vmatprep.subr.bf16.mxu1 %v15903_v55  ;;  %v15935_v55 = vpack.c.bf16 %v13167_v58, %v13166_v29  ;;  %v13199_v29 = vld [vmem:[%s24861_s5 + $0x4c8] sm:$0xff] }
 0x9c3   : > { %15906 = vmatpush3.bf16.msra.mxu1 %v15905_v24  ;;  %v15937_v24 = vpack.c.bf16 %v13151_v21, %v13150_v62  ;;  %v13183_v62 = vld [vmem:[%s24861_s5 + $0x448] sm:$0xff]  ;;  %v13200_v21 = vld [vmem:[%s24861_s5 + $0x4d0] sm:$0xff] }
 0x9c4   : > { %15908 = vmatprep.subr.bf16.mxu1 %v15907_v53  ;;  %v15939_v53 = vpack.c.bf16 %v13169_v14, %v13168_v39  ;;  %v13201_v39 = vld [vmem:[%s24861_s5 + $0x4d8] sm:$0xff] }
 0x9c7   : > { %15910 = vmatpush3.bf16.msra.mxu1 %v15909_v60  ;;  %v15941_v60 = vpack.c.bf16 %v13153_v19, %v13152_v1  ;;  %v13185_v1 = vld [vmem:[%s24861_s5 + $0x458] sm:$0xff]  ;;  %v13202_v19 = vld [vmem:[%s24861_s5 + $0x4e0] sm:$0xff] }
 0x9c8   : > { %15912 = vmatprep.subr.bf16.mxu1 %v15911_v37  ;;  %v15943_v37 = vpack.c.bf16 %v13171_v2, %v13170_v40  ;;  %v13203_v40 = vld [vmem:[%s24861_s5 + $0x4e8] sm:$0xff] }
 0x9cb   : > { %15914 = vmatpush3.bf16.msra.mxu1 %v15913_v35  ;;  %v15945_v35 = vpack.c.bf16 %v13155_v22, %v13154_v36  ;;  %v13187_v36 = vld [vmem:[%s24861_s5 + $0x468] sm:$0xff]  ;;  %v13204_v22 = vld [vmem:[%s24861_s5 + $0x4f0] sm:$0xff] }
 0x9cc   : > { %15916 = vmatprep.subr.bf16.mxu1 %v15915_v18  ;;  %v15947_v18 = vpack.c.bf16 %v13173_v57, %v13172_v42  ;;  %v13205_v42 = vld [vmem:[%s24861_s5 + $0x4f8] sm:$0xff] }
 0x9cf   : > { %15918 = vmatpush3.bf16.msra.mxu1 %v15917_v49  ;;  %v15949_v49 = vpack.c.bf16 %v13157_v33, %v13156_v5  ;;  %v13189_v5 = vld [vmem:[%s24861_s5 + $0x478] sm:$0xff]  ;;  %v12964_v33 = vld [vmem:[#allocation3] sm:$0xf0] }
 0x9d0   : > { %15920 = vmatprep.subr.bf16.mxu1 %v15919_v25  ;;  %v15951_v25 = vpack.c.bf16 %v13191_v27, %v13190_v34  ;;  %v12967_v27 = vld [vmem:[#allocation3 + $0x28] sm:$0xf]  ;;  %v13032_v13 = vrot.slane %v12964_v33, 4 }
 0x9d2   : > { %13428 = vmatmul.mubr.f32.vlgmr.msra.gmra.mrb[16].mxu1 %v12996_v26  ;;  %v13015_v26 = vsel %vm13012_vm8, %v13013_v10, %v13014_v59  ;;  %v13593_v59 = vld [vmem:[%s24863_s7 + $0x18] sm:$0xff] }
 0x9d3   : > { %13432 = vmatprep.mubr.f32.mxu1 %v13003_v41  ;;  %15922 = vmatpush3.bf16.msra.mxu1 %v15921_v63  ;;  %v15953_v63 = vpack.c.bf16 %v13175_v28, %v13174_v38  ;;  %v13022_v41 = vsel %vm13012_vm8, %v13017_v9, %v13021_v56  ;;  %v13196_v9 = vld [vmem:[%s24861_s5 + $0x4b0] sm:$0xff]  ;;  %v13038_v28 = vrot.slane %v12966_v54, 4  ;;  %v13591_v56 = vld [vmem:[%s24863_s7 + $0x8] sm:$0xff] }
 0x9d4   : > { %15924 = vmatprep.subr.bf16.mxu1 %v15923_v8  ;;  %v15955_v8 = vpack.c.bf16 %v13193_v16, %v13192_v23  ;;  %v13590_v16 = vld [vmem:[%s24863_s7] sm:$0xff] }
 0x9d5   : > { %v15983_v44 = vpack.c.bf16 %v13591_v56, %v13590_v16 }
 0x9d6   : > { %13433 = vmatmul.mubr.f32.gmra.mrb[18].mxu1 %v13001_v47  ;;  %v13179_v47 = vld [vmem:[%s24861_s5 + $0x428] sm:$0xff] }
 0x9d7   : > { %15926 = vmatpush3.bf16.msra.mxu1 %v15925_v46  ;;  %13502 = vmatprep.mubr.f32.mxu1 %v13018_v32  ;;  %v15957_v46 = vpack.c.bf16 %v13177_v20, %v13176_v12  ;;  %v15961_v32 = vpack.c.bf16 %v13179_v47, %v13178_v43  ;;  %v13596_v20 = vld [vmem:[%s24863_s7 + $0x30] sm:$0xff] }
 0x9d8   : > { %15928 = vmatprep.subr.bf16.mxu1 %v15927_v61  ;;  %v13036_v61 = vrot.slane %v24326_v6, 4 }
 0x9da   : > { %v13037_v6 = vsel %vm13031_vm9, %v13035_v50, %v13036_v61 }
 0x9db   : > { %15930 = vmatpush3.bf16.msra.mxu1 %v15929_v48  ;;  %v15963_v48 = vpack.c.bf16 %v13197_v7, %v13196_v9 }
 0x9dc   : > { %15932 = vmatprep.subr.bf16.mxu1 %v15931_v3  ;;  %v13180_v3 = vld [vmem:[%s24861_s5 + $0x430] sm:$0xff] }
 0x9dd   : > { %v15965_v58 = vpack.c.bf16 %v13181_v17, %v13180_v3  ;;  %v13604_v3 = vld [vmem:[%s24863_s7 + $0x70] sm:$0xff]  ;;  %v13605_v17 = vld [vmem:[%s24863_s7 + $0x78] sm:$0xff] }
 0x9df   : > { %15934 = vmatpush3.bf16.msra.mxu1 %v15933_v31  ;;  %v15967_v31 = vpack.c.bf16 %v13199_v29, %v13198_v51  ;;  %v16011_v51 = vpack.c.bf16 %v13605_v17, %v13604_v3  ;;  %v13690_v29 = vld [vmem:[%s24865_s9] sm:$0xff] }
 0x9e0   : > { %15936 = vmatprep.subr.bf16.mxu1 %v15935_v55  ;;  %v13182_v55 = vld [vmem:[%s24861_s5 + $0x440] sm:$0xff] }
 0x9e1   : > { %v15969_v14 = vpack.c.bf16 %v13183_v62, %v13182_v55  ;;  %v15517_v55 = vld [vmem:[%s24862_s6] ss:$0 sm:$0xff] }
 0x9e2   : > { %v15518_v3 = vld [vmem:[%s24864_s8] ss:$0 sm:$0xff] }
 0x9e3   : > { %15938 = vmatpush3.bf16.msra.mxu1 %v15937_v24  ;;  %v15971_v24 = vpack.c.bf16 %v13201_v39, %v13200_v21 }
 0x9e4   : > { %15940 = vmatprep.subr.bf16.mxu1 %v15939_v53  ;;  %v13184_v53 = vld [vmem:[%s24861_s5 + $0x450] sm:$0xff] }
 0x9e5   : > { %v15973_v2 = vpack.c.bf16 %v13185_v1, %v13184_v53 }
 0x9e7   : > { %15942 = vmatpush3.bf16.msra.mxu1 %v15941_v60  ;;  %v15975_v60 = vpack.c.bf16 %v13203_v40, %v13202_v19 }
 0x9e8   : > { %15944 = vmatprep.subr.bf16.mxu1 %v15943_v37  ;;  %v13186_v37 = vld [vmem:[%s24861_s5 + $0x460] sm:$0xff] }
 0x9e9   : > { %v15977_v57 = vpack.c.bf16 %v13187_v36, %v13186_v37 }
 0x9eb   : > { %15946 = vmatpush3.bf16.msra.mxu1 %v15945_v35  ;;  %v15979_v35 = vpack.c.bf16 %v13205_v42, %v13204_v22 }
 0x9ec   : > { %15948 = vmatprep.subr.bf16.mxu1 %v15947_v18  ;;  %v13188_v18 = vld [vmem:[%s24861_s5 + $0x470] sm:$0xff] }
 0x9ed   : > { %v15981_v34 = vpack.c.bf16 %v13189_v5, %v13188_v18 }
 0x9ef   : > { %15950 = vmatpush3.bf16.msra.mxu1 %v15949_v49  ;;  %v13040_v49 = vrot.slane %v12967_v27, 4 }
 0x9f0   : > { %15952 = vmatprep.subr.bf16.mxu1 %v15951_v25  ;;  %v13033_v25 = vrot.slane %v24324_v15, 4  ;;  %v13592_v15 = vld [vmem:[%s24863_s7 + $0x10] sm:$0xff] }
 0x9f1   : > { %v13041_v10 = vsel %vm13031_vm9, %v13036_v61, %v13040_v49  ;;  %v13601_v61 = vld [vmem:[%s24863_s7 + $0x58] sm:$0xff] }
 0x9f2   : > { %13503 = vmatmul.mubr.f32.vlgmr.msra.gmra.mrb[20].mxu1 %v13015_v26  ;;  %v13034_v38 = vsel %vm13031_vm9, %v13032_v13, %v13033_v25  ;;  %v13039_v23 = vsel %vm13031_vm9, %v13033_v25, %v13038_v28  ;;  %v13597_v26 = vld [vmem:[%s24863_s7 + $0x38] sm:$0xff] }
 0x9f3   : > { %13507 = vmatprep.mubr.f32.mxu1 %v13022_v41  ;;  %15954 = vmatpush3.bf16.msra.mxu1 %v15953_v63  ;;  %v15987_v63 = vpack.c.bf16 %v13593_v59, %v13592_v15  ;;  %v15995_v4 = vpack.c.bf16 %v13597_v26, %v13596_v20  ;;  %v15999_v41 = vpack.c.bf16 %v13599_v11, %v13598_v30  ;;  %v13692_v59 = vld [vmem:[%s24865_s9 + $0x10] sm:$0xff]  ;;  %v13694_v20 = vld [vmem:[%s24865_s9 + $0x20] sm:$0xff]  ;;  %v13695_v26 = vld [vmem:[%s24865_s9 + $0x28] sm:$0xff] }
 0x9f4   : > { %15956 = vmatprep.subr.bf16.mxu1 %v15955_v8  ;;  %v13595_v8 = vld [vmem:[%s24863_s7 + $0x28] sm:$0xff]  ;;  %v13696_v30 = vld [vmem:[%s24865_s9 + $0x30] sm:$0xff]  ;;  %v13697_v11 = vld [vmem:[%s24865_s9 + $0x38] sm:$0xff] }
 0x9f5   : > { %v15991_v12 = vpack.c.bf16 %v13595_v8, %v13594_v45 }
 0x9f6   : > { %13508 = vmatmul.mubr.f32.gmra.mrb[22].mxu1 %v13020_v0 }
 0x9f7   : > { %15958 = vmatpush3.bf16.msra.mxu1 %v15957_v46  ;;  %13577 = vmatprep.mubr.f32.mxu1 %v13037_v6  ;;  %v13600_v46 = vld [vmem:[%s24863_s7 + $0x50] sm:$0xff]  ;;  %v13602_v6 = vld [vmem:[%s24863_s7 + $0x60] sm:$0xff] }
 0x9f8   : > { %15960 = vmatprep.subr.bf16.mxu1 %v15959_v52  ;;  %v16003_v43 = vpack.c.bf16 %v13601_v61, %v13600_v46  ;;  %v13699_v46 = vld [vmem:[%s24865_s9 + $0x48] sm:$0xff] }
 0x9fb   : > { %15962 = vmatpush3.bf16.msra.mxu1 %v15961_v32  ;;  %v13603_v32 = vld [vmem:[%s24863_s7 + $0x68] sm:$0xff] }
 0x9fc   : > { %15964 = vmatprep.subr.bf16.mxu1 %v15963_v48  ;;  %v16007_v48 = vpack.c.bf16 %v13603_v32, %v13602_v6  ;;  %v13704_v6 = vld [vmem:[%s24865_s9 + $0x70] sm:$0xff]  ;;  %v13705_v32 = vld [vmem:[%s24865_s9 + $0x78] sm:$0xff] }
 0x9ff   : > { %15966 = vmatpush3.bf16.msra.mxu1 %v15965_v58  ;;  %v13691_v58 = vld [vmem:[%s24865_s9 + $0x8] sm:$0xff] }
 0xa00   : > { %15968 = vmatprep.subr.bf16.mxu1 %v15967_v31  ;;  %v16015_v31 = vpack.c.bf16 %v13691_v58, %v13690_v29 }
 0xa03   : > { %15970 = vmatpush3.bf16.msra.mxu1 %v15969_v14 }
 0xa04   : > { %15972 = vmatprep.subr.bf16.mxu1 %v15971_v24 }
 0xa07   : > { %15974 = vmatpush3.bf16.msra.mxu1 %v15973_v2 }
 0xa08   : > { %15976 = vmatprep.subr.bf16.mxu1 %v15975_v60 }
 0xa0b   : > { %15978 = vmatpush3.bf16.msra.mxu1 %v15977_v57 }
 0xa0c   : > { %15980 = vmatprep.subr.bf16.mxu1 %v15979_v35 }
 0xa0f   : > { %15982 = vmatpush3.bf16.msra.mxu1 %v15981_v34 }
 0xa10   : > { %15984 = vmatprep.subr.bf16.mxu1 %v15983_v44 }
 0xa12   : > { %13578 = vmatmul.mubr.f32.vlgmr.msra.gmra.mrb[24].mxu1 %v13034_v38 }
 0xa13   : > { %13582 = vmatprep.mubr.f32.mxu1 %v13041_v10  ;;  %15986 = vmatpush3.bf16.msra.mxu1 %v15983_v44 }
 0xa14   : > { %15988 = vmatprep.subr.bf16.mxu1 %v15987_v63 }
 0xa16   : > { %13583 = vmatmul.mubr.f32.gmra.mrb[26].mxu1 %v13039_v23 }
 0xa17   : > { %15990 = vmatpush3.bf16.msra.mxu1 %v15987_v63  ;;  %v13693_v63 = vld [vmem:[%s24865_s9 + $0x18] sm:$0xff] }
 0xa18   : > { %15992 = vmatprep.subr.bf16.mxu1 %v15991_v12 }
 0xa1b   : > { %15994 = vmatpush3.bf16.msra.mxu1 %v15991_v12  ;;  %v16019_v12 = vpack.c.bf16 %v13693_v63, %v13692_v59 }
 0xa1c   : > { %15996 = vmatprep.subr.bf16.mxu1 %v15995_v4 }
 0xa1f   : > { %15998 = vmatpush3.bf16.msra.mxu1 %v15995_v4  ;;  %v16023_v4 = vpack.c.bf16 %v13695_v26, %v13694_v20 }
 0xa20   : > { %16000 = vmatprep.subr.bf16.mxu1 %v15999_v41 }
 0xa23   : > { %16002 = vmatpush3.bf16.msra.mxu1 %v15999_v41  ;;  %v16027_v41 = vpack.c.bf16 %v13697_v11, %v13696_v30 }
 0xa24   : > { %16004 = vmatprep.subr.bf16.mxu1 %v16003_v43 }
 0xa27   : > { %16006 = vmatpush3.bf16.msra.mxu1 %v16003_v43  ;;  %v13701_v43 = vld [vmem:[%s24865_s9 + $0x58] sm:$0xff] }
 0xa28   : > { %16008 = vmatprep.subr.bf16.mxu1 %v16007_v48 }
 0xa2b   : > { %16010 = vmatpush3.bf16.msra.mxu1 %v16007_v48  ;;  %v16043_v48 = vpack.c.bf16 %v13705_v32, %v13704_v6 }
 0xa2c   : > { %16012 = vmatprep.subr.bf16.mxu1 %v16011_v51 }
 0xa2f   : > { %16014 = vmatpush3.bf16.msra.mxu1 %v16011_v51 }
 0xa30   : > { %16016 = vmatprep.subr.bf16.mxu1 %v16015_v31 }
 0xa65   : > { %v15559_v50 = vpop.f32.mrb[8].mxu1 }
 0xa66   : > { %v15560_v52 = vpop.f32.mrb[9].mxu1 }
 0xa67   : > { %v15561_v47 = vadd.f32 %v15560_v52, %v15559_v50  ;;  %v13698_v50 = vld [vmem:[%s24865_s9 + $0x40] sm:$0xff]  ;;  %v13700_v52 = vld [vmem:[%s24865_s9 + $0x50] sm:$0xff] }
 0xa68   : > { %v16031_v61 = vpack.c.bf16 %v13699_v46, %v13698_v50 }
 0xa69   : > { %v15562_v0 = vpop.f32.mrb[10].mxu1  ;;  %v13280_v39 = vadd.f32 %v15561_v47, %v15517_v55  ;;  %v16035_v47 = vpack.c.bf16 %v13701_v43, %v13700_v52 }
 0xa6a   : > { %v15563_v9 = vpop.f32.mrb[11].mxu1 }
 0xa6b   : > { %v15564_v7 = vadd.f32 %v15563_v9, %v15562_v0  ;;  %v13702_v0 = vld [vmem:[%s24865_s9 + $0x60] sm:$0xff]  ;;  %v13703_v9 = vld [vmem:[%s24865_s9 + $0x68] sm:$0xff] }
 0xa6d   : > { %v13285_v19 = vadd.f32 %v15564_v7, %v15517_v55  ;;  %v16039_v7 = vpack.c.bf16 %v13703_v9, %v13702_v0 }
 0xa85   : > { %v15597_v62 = vpop.f32.mrb[12].mxu1 }
 0xa86   : > { %v15598_v21 = vpop.f32.mrb[13].mxu1 }
 0xa87   : > { %v15599_v14 = vadd.f32 %v15598_v21, %v15597_v62  ;;  %v15519_v62 = vld [vmem:[%s24866_s10] ss:$0 sm:$0xff] }
 0xa89   : > { %v13355_v24 = vadd.f32 %v15599_v14, %v13280_v39  ;;  %v15600_v53 = vpop.f32.mrb[14].mxu1 }
 0xa8a   : > { %v15601_v1 = vpop.f32.mrb[15].mxu1 }
 0xa8b   : > { %v15602_v40 = vadd.f32 %v15601_v1, %v15600_v53 }
 0xa8d   : > { %v13360_v2 = vadd.f32 %v15602_v40, %v13285_v19 }
 0xaa5   : > { %v15635_v60 = vpop.f32.mrb[16].mxu1 }
 0xaa6   : > { %v15636_v37 = vpop.f32.mrb[17].mxu1 }
 0xaa7   : > { %v15637_v36 = vadd.f32 %v15636_v37, %v15635_v60 }
 0xaa9   : > { %v13430_v22 = vadd.f32 %v15637_v36, %v13355_v24  ;;  %v15638_v42 = vpop.f32.mrb[18].mxu1 }
 0xaaa   : > { %v15639_v57 = vpop.f32.mrb[19].mxu1 }
 0xaab   : > { %v15640_v35 = vadd.f32 %v15639_v57, %v15638_v42 }
 0xaad   : > { %v13435_v18 = vadd.f32 %v15640_v35, %v13360_v2 }
 0xac5   : > { %v15673_v5 = vpop.f32.mrb[20].mxu1 }
 0xac6   : > { %v15674_v33 = vpop.f32.mrb[21].mxu1 }
 0xac7   : > { %v15675_v34 = vadd.f32 %v15674_v33, %v15673_v5 }
 0xac9   : > { %v13505_v27 = vadd.f32 %v15675_v34, %v13430_v22  ;;  %v15676_v13 = vpop.f32.mrb[22].mxu1 }
 0xaca   : > { %v15677_v49 = vpop.f32.mrb[23].mxu1 }
 0xacb   : > { %v15678_v54 = vadd.f32 %v15677_v49, %v15676_v13 }
 0xacd   : > { %v13510_v25 = vadd.f32 %v15678_v54, %v13435_v18 }
 0xae5   : > { %v15711_v38 = vpop.f32.mrb[24].mxu1 }
 0xae6   : > { %v15712_v28 = vpop.f32.mrb[25].mxu1 }
 0xae7   : > { %v15713_v10 = vadd.f32 %v15712_v28, %v15711_v38 }
 0xae9   : > { %v13580_v23 = vadd.f32 %v15713_v10, %v13505_v27  ;;  %v15714_v16 = vpop.f32.mrb[26].mxu1 }
 0xaea   : > { %v15715_v56 = vpop.f32.mrb[27].mxu1 }
 0xaeb   : > { %v13588_v15 = vmax.f32 %v13580_v23, 0.0  ;;  %v15716_v44 = vadd.f32 %v15715_v56, %v15714_v16 }
 0xaed   : > { %v13585_v45 = vadd.f32 %v15716_v44, %v13510_v25  ;;  %15785 = vmatprep.mubr.f32.mxu1 %v13588_v15 }
 0xaef   : > { %v13589_v8 = vmax.f32 %v13585_v45, 0.0 }
 0xaf1   : > { %15786 = vmatmul.mubr.f32.vlgmr.msra.gmra.mrb[28].mxu1 %v13589_v8 }
 0xaf2   : > { %16018 = vmatpush3.bf16.msra.mxu1 %v16015_v31 }
 0xaf3   : > { %16020 = vmatprep.subr.bf16.mxu1 %v16019_v12 }
 0xaf6   : > { %16022 = vmatpush3.bf16.msra.mxu1 %v16019_v12 }
 0xaf7   : > { %16024 = vmatprep.subr.bf16.mxu1 %v16023_v4 }
 0xafa   : > { %16026 = vmatpush3.bf16.msra.mxu1 %v16023_v4 }
 0xafb   : > { %16028 = vmatprep.subr.bf16.mxu1 %v16027_v41 }
 0xafe   : > { %16030 = vmatpush3.bf16.msra.mxu1 %v16027_v41 }
 0xaff   : > { %16032 = vmatprep.subr.bf16.mxu1 %v16031_v61 }
 0xb02   : > { %16034 = vmatpush3.bf16.msra.mxu1 %v16031_v61 }
 0xb03   : > { %16036 = vmatprep.subr.bf16.mxu1 %v16035_v47 }
 0xb06   : > { %16038 = vmatpush3.bf16.msra.mxu1 %v16035_v47 }
 0xb07   : > { %16040 = vmatprep.subr.bf16.mxu1 %v16039_v7 }
 0xb0a   : > { %16042 = vmatpush3.bf16.msra.mxu1 %v16039_v7 }
 0xb0b   : > { %16044 = vmatprep.subr.bf16.mxu1 %v16043_v48 }
 0xb0e   : > { %16046 = vmatpush3.bf16.msra.mxu1 %v16043_v48 }
 0xbc4   : > { %v15787_v17 = vpop.f32.mrb[28].mxu1 }
 0xbc5   : > { %v13685_v51 = vadd.f32 %v15787_v17, %v15518_v3  ;;  %v13679_v29 = vpop.f32.mrb[29].mxu1 }
 0xbc6   : > { %v13680_v58 = vadd.f32 %v15518_v3, %v13679_v29 }
 0xbc7   : > { %v13689_v55 = vmax.f32 %v13685_v51, 0.0 }
 0xbc8   : > { %v13688_v31 = vmax.f32 %v13680_v58, 0.0 }
 0xbca   : > { %15820 = vmatprep.mubr.f32.mxu1 %v13688_v31 }
 0xbcb   : > { %15821 = vmatmul.mubr.f32.vlgmr.msra.gmra.mrb[30].mxu1 %v13689_v55 }
 0xc9e   : > { %v15822_v21 = vpop.f32.mrb[30].mxu1 }
 0xc9f   : > { %v13785_v39 = vadd.f32 %v15822_v21, %v15519_v62  ;;  %v13779_v14 = vpop.f32.mrb[31].mxu1 }
 0xca0   : > { %v13780_v24 = vadd.f32 %v15519_v62, %v13779_v14 }
 0xca1   : > { %13789 = vst [vmem:[%s386_s16 + $0x8] sm:$0xff] %v13785_v39 }
 0xca2   : > { %13788 = vst [vmem:[%s386_s16] sm:$0xff] %v13780_v24 }
 0xca3 PF: > { %s21_s17 = sadd.s32 1, %s18696_s17  }
 0xca4   : > { %p18_p4 = scmp.ge.s32.totalorder %s21_s17, 4  }
 0xca6   :  { %20 = sbr.rel (!%p18_p4) target bundleno = 1 (0x1), region = 94 }

</bundles_post_ra>
